<compile_context>
chip_gen: v6e
topology: v6e:2x2x1
jax: 0.10.0
libtpu: 0.0.40
codegen_flags: <defaults>
</compile_context>

<pallas_src>
import functools
import math

import jax
import jax.numpy as jnp
from jax.experimental import pallas as pl
from jax.experimental.pallas import tpu as pltpu

NUM_HEADS = 8


# ----------------------------------------------------------------------------
# Fused forward kernel: one grid step == one batch element.
# ----------------------------------------------------------------------------
def _fused_kernel(
    x_ref,
    fpw_ref, fpb_ref,
    wih0f_ref, whh0f_ref, b0f_ref,
    wih0r_ref, whh0r_ref, b0r_ref,
    wih1f_ref, whh1f_ref, b1f_ref,
    wih1r_ref, whh1r_ref, b1r_ref,
    inw_ref, inb_ref, outw_ref, outb_ref,
    lng_ref, lnb_ref,
    mw1_ref, mb1_ref, mw2_ref, mb2_ref, mw3_ref, mb3_ref,
    o_ref,
    *, T, H, nh,
):
    f32 = jnp.float32
    bf16 = jnp.bfloat16
    E = 2 * H
    hd = E // nh

    # ---- feature_proj: Linear(2, H//2), computed inline ----------------------
    x = x_ref[...]                                                     # (T, 2)
    h0 = jnp.dot(x, fpw_ref[...], preferred_element_type=f32) + fpb_ref[...]

    # ---- one LSTM direction: fully unrolled recurrence, h/c stay in vregs ----
    def lstm_dir(inp, w_ref, u_ref, b_ref, reverse):
        gates = (
            jnp.dot(inp.astype(bf16), w_ref[...], preferred_element_type=f32)
            + b_ref[...]
        )                                                              # (T, 4H)
        u = u_ref[...]                                                 # (H, 4H) bf16
        h = jnp.zeros((1, H), f32)
        c = jnp.zeros((1, H), f32)
        hs = [None] * T
        order = range(T - 1, -1, -1) if reverse else range(T)
        for t in order:
            g = gates[t:t + 1, :] + jnp.dot(
                h.astype(bf16), u, preferred_element_type=f32)         # (1, 4H)
            i = jax.nn.sigmoid(g[:, 0:H])
            f = jax.nn.sigmoid(g[:, H:2 * H])
            gg = jnp.tanh(g[:, 2 * H:3 * H])
            o = jax.nn.sigmoid(g[:, 3 * H:4 * H])
            c = f * c + i * gg
            h = o * jnp.tanh(c)
            hs[t] = h
        return jnp.concatenate(hs, axis=0)                             # (T, H)

    # ---- 2-layer bidirectional LSTM ------------------------------------------
    s0f = lstm_dir(h0, wih0f_ref, whh0f_ref, b0f_ref, reverse=False)
    s0r = lstm_dir(h0, wih0r_ref, whh0r_ref, b0r_ref, reverse=True)
    l0 = jnp.concatenate([s0f, s0r], axis=-1)                          # (T, 2H)

    s1f = lstm_dir(l0, wih1f_ref, whh1f_ref, b1f_ref, reverse=False)
    s1r = lstm_dir(l0, wih1r_ref, whh1r_ref, b1r_ref, reverse=True)
    lo = jnp.concatenate([s1f, s1r], axis=-1)                          # (T, E)

    # ---- multi-head self-attention (eval mode, no dropout) -------------------
    qkv = (
        jnp.dot(lo.astype(bf16), inw_ref[...], preferred_element_type=f32)
        + inb_ref[...]
    )                                                                  # (T, 3E)
    scale = 1.0 / math.sqrt(hd)
    attn = jnp.zeros((T, E), f32)
    for hh in range(nh):
        q = qkv[:, hh * hd:(hh + 1) * hd]                              # (T, hd)
        k = qkv[:, E + hh * hd:E + (hh + 1) * hd]
        v = qkv[:, 2 * E + hh * hd:2 * E + (hh + 1) * hd]
        s = jax.lax.dot_general(
            q, k, (((1,), (1,)), ((), ())), preferred_element_type=f32) * scale
        m = jnp.max(s, axis=-1, keepdims=True)
        p = jnp.exp(s - m)
        p = p * pl.reciprocal(jnp.sum(p, axis=-1, keepdims=True), approx=True)
        ho = jnp.dot(p, v, preferred_element_type=f32)                 # (T, hd)
        # Fold this head straight into the output projection (block matmul).
        attn = attn + jnp.dot(
            ho.astype(bf16), outw_ref[hh * hd:(hh + 1) * hd, :],
            preferred_element_type=f32)
    attn = attn + outb_ref[...]                                        # (T, E)

    # ---- max/mean pool + LayerNorm + MLP classifier ---------------------------
    comb = (jnp.max(attn, axis=0, keepdims=True)
            + jnp.mean(attn, axis=0, keepdims=True))                   # (1, E)
    mu = jnp.mean(comb, axis=-1, keepdims=True)
    var = jnp.mean((comb - mu) ** 2, axis=-1, keepdims=True)
    xn = (comb - mu) * jax.lax.rsqrt(var + 1e-5)
    xn = xn * lng_ref[...] + lnb_ref[...]
    h1 = jnp.maximum(
        jnp.dot(xn, mw1_ref[...], preferred_element_type=f32) + mb1_ref[...], 0.0)
    h2 = jnp.maximum(
        jnp.dot(h1, mw2_ref[...], preferred_element_type=f32) + mb2_ref[...], 0.0)
    out = jnp.dot(h2, mw3_ref[...], preferred_element_type=f32) + mb3_ref[...]
    o_ref[...] = out.astype(o_ref.dtype)                               # (1, 1)


# ----------------------------------------------------------------------------
# Wrapper: one pallas_call for the whole forward pass.
# ----------------------------------------------------------------------------
def forward(params, x, H):
    B, T, _ = x.shape
    bf16 = jnp.bfloat16

    inputs = [x]
    specs = [pl.BlockSpec((None, T, 2), lambda b: (b, 0, 0))]

    def add(arr, cast_bf16=False):
        arr = arr.astype(bf16) if cast_bf16 else arr
        inputs.append(arr)
        specs.append(pl.BlockSpec(arr.shape, lambda b, _nd=arr.ndim: (0,) * _nd))

    add(params["fp_w"])
    add(params["fp_b"].reshape(1, -1))
    for layer in range(2):
        for d in range(2):
            w_ih, w_hh, b = params["lstm"][layer][d]
            add(w_ih, cast_bf16=True)
            add(w_hh, cast_bf16=True)
            add(b.reshape(1, -1))
    add(params["attn_in_w"], cast_bf16=True)
    add(params["attn_in_b"].reshape(1, -1))
    add(params["attn_out_w"], cast_bf16=True)
    add(params["attn_out_b"].reshape(1, -1))
    add(params["ln_g"].reshape(1, -1))
    add(params["ln_b"].reshape(1, -1))
    add(params["w1"])
    add(params["b1"].reshape(1, -1))
    add(params["w2"])
    add(params["b2"].reshape(1, -1))
    add(params["w3"])
    add(params["b3"].reshape(1, -1))

    out = pl.pallas_call(
        functools.partial(_fused_kernel, T=T, H=H, nh=NUM_HEADS),
        out_shape=jax.ShapeDtypeStruct((B, 1, 1), jnp.float32),
        grid=(B,),
        in_specs=specs,
        out_specs=pl.BlockSpec((None, 1, 1), lambda b: (b, 0, 0)),
        compiler_params=pltpu.CompilerParams(
            dimension_semantics=("parallel",),   # v7x: shard batch over 2 TCs
            vmem_limit_bytes=32 * 1024 * 1024,
        ),
    )(*inputs)
    return out[:, 0, 0]  # squeeze to (B,)


# ----------------------------------------------------------------------------
# Pure-JAX reference (f32) for numerical sanity check.
# ----------------------------------------------------------------------------
def forward_ref(p, x, H):
    B, T, _ = x.shape
    E = 2 * H
    nh = NUM_HEADS
    hd = E // nh

    h = x @ p["fp_w"] + p["fp_b"]
    inp = h
    for layer in range(2):
        outs = []
        for d in range(2):
            w_ih, w_hh, b = p["lstm"][layer][d]
            xin = inp if d == 0 else jnp.flip(inp, 1)
            gates_all = xin @ w_ih + b  # (B, T, 4H)

            def step(carry, g_t):
                h_prev, c_prev = carry
                g = g_t + h_prev @ w_hh
                i = jax.nn.sigmoid(g[:, :H])
                f = jax.nn.sigmoid(g[:, H:2 * H])
                gg = jnp.tanh(g[:, 2 * H:3 * H])
                o = jax.nn.sigmoid(g[:, 3 * H:])
                c = f * c_prev + i * gg
                hh = o * jnp.tanh(c)
                return (hh, c), hh

            init = (jnp.zeros((B, H), jnp.float32), jnp.zeros((B, H), jnp.float32))
            _, hs = jax.lax.scan(step, init, jnp.transpose(gates_all, (1, 0, 2)))
            hs = jnp.transpose(hs, (1, 0, 2))
            if d == 1:
                hs = jnp.flip(hs, 1)
            outs.append(hs)
        inp = jnp.concatenate(outs, -1)
    lstm_out = inp

    qkv = lstm_out @ p["attn_in_w"] + p["attn_in_b"]
    q, k, v = jnp.split(qkv, 3, axis=-1)

    def heads(z):
        return z.reshape(B, T, nh, hd).transpose(0, 2, 1, 3)

    q, k, v = heads(q), heads(k), heads(v)
    s = jnp.einsum("bhqd,bhkd->bhqk", q, k) / math.sqrt(hd)
    a = jax.nn.softmax(s, -1)
    ao = jnp.einsum("bhqk,bhkd->bhqd", a, v).transpose(0, 2, 1, 3).reshape(B, T, E)
    attn = ao @ p["attn_out_w"] + p["attn_out_b"]

    comb = jnp.max(attn, 1) + jnp.mean(attn, 1)
    mu = jnp.mean(comb, -1, keepdims=True)
    var = jnp.mean((comb - mu) ** 2, -1, keepdims=True)
    xn = (comb - mu) / jnp.sqrt(var + 1e-5) * p["ln_g"] + p["ln_b"]
    h1 = jax.nn.relu(xn @ p["w1"] + p["b1"])
    h2 = jax.nn.relu(h1 @ p["w2"] + p["b2"])
    out = h2 @ p["w3"] + p["b3"]
    return out[:, 0]


# ----------------------------------------------------------------------------
# Deterministic synthetic parameters (weights stored as (in, out) matrices,
# i.e. transposed relative to PyTorch's (out, in); b_ih + b_hh folded per dir).
# ----------------------------------------------------------------------------
def init_params(key, H, mlp=32):
    keys = iter(jax.random.split(key, 40))

    def rnd(shape, scale=0.05):
        return jax.random.normal(next(keys), shape, jnp.float32) * scale

    E = 2 * H
    p = {
        "fp_w": rnd((2, H // 2)),
        "fp_b": rnd((H // 2,)),
        "attn_in_w": rnd((E, 3 * E)),
        "attn_in_b": rnd((3 * E,)),
        "attn_out_w": rnd((E, E)),
        "attn_out_b": rnd((E,)),
        "ln_g": jnp.ones((E,), jnp.float32),
        "ln_b": jnp.zeros((E,), jnp.float32),
        "w1": rnd((E, mlp)),
        "b1": rnd((mlp,)),
        "w2": rnd((mlp, mlp // 2)),
        "b2": rnd((mlp // 2,)),
        "w3": rnd((mlp // 2, 1)),
        "b3": rnd((1,)),
    }
    lstm = []
    in_dim = H // 2
    for _ in range(2):
        dirs = []
        for _ in range(2):
            dirs.append((rnd((in_dim, 4 * H)), rnd((H, 4 * H)), rnd((4 * H,))))
        lstm.append(dirs)
        in_dim = 2 * H
    p["lstm"] = lstm
    return p


if __name__ == "__main__":
    # small-but-consistent shapes: lstm_hidden_dim=128, batch=2, seq=8, feature=2
    H = 128
    B, T = 2, 8

    key = jax.random.PRNGKey(0)
    pkey, xkey = jax.random.split(key)
    params = init_params(pkey, H=H)
    x = jax.random.normal(xkey, (B, T, 2), jnp.float32)

    fwd = jax.jit(forward, static_argnums=(2,))
    out = jax.block_until_ready(fwd(params, x, H))
    assert out.shape == (B,)

    ref = forward_ref(params, x, H)
    max_err = float(jnp.max(jnp.abs(out - ref)))
    assert max_err < 5e-2, f"mismatch vs reference: {max_err}"

    print("KERNEL_OK")
</pallas_src>

<mosaic_0001>
module attributes {stable_mosaic.version = 11 : i64} {
  func.func @_fused_kernel(%arg0: i32, %arg1: memref<1x8x2xf32, #tpu.memory_space<vmem>>, %arg2: memref<2x64xf32, #tpu.memory_space<vmem>>, %arg3: memref<1x64xf32, #tpu.memory_space<vmem>>, %arg4: memref<64x512xbf16, #tpu.memory_space<vmem>>, %arg5: memref<128x512xbf16, #tpu.memory_space<vmem>>, %arg6: memref<1x512xf32, #tpu.memory_space<vmem>>, %arg7: memref<64x512xbf16, #tpu.memory_space<vmem>>, %arg8: memref<128x512xbf16, #tpu.memory_space<vmem>>, %arg9: memref<1x512xf32, #tpu.memory_space<vmem>>, %arg10: memref<256x512xbf16, #tpu.memory_space<vmem>>, %arg11: memref<128x512xbf16, #tpu.memory_space<vmem>>, %arg12: memref<1x512xf32, #tpu.memory_space<vmem>>, %arg13: memref<256x512xbf16, #tpu.memory_space<vmem>>, %arg14: memref<128x512xbf16, #tpu.memory_space<vmem>>, %arg15: memref<1x512xf32, #tpu.memory_space<vmem>>, %arg16: memref<256x768xbf16, #tpu.memory_space<vmem>>, %arg17: memref<1x768xf32, #tpu.memory_space<vmem>>, %arg18: memref<256x256xbf16, #tpu.memory_space<vmem>>, %arg19: memref<1x256xf32, #tpu.memory_space<vmem>>, %arg20: memref<1x256xf32, #tpu.memory_space<vmem>>, %arg21: memref<1x256xf32, #tpu.memory_space<vmem>>, %arg22: memref<256x32xf32, #tpu.memory_space<vmem>>, %arg23: memref<1x32xf32, #tpu.memory_space<vmem>>, %arg24: memref<32x16xf32, #tpu.memory_space<vmem>>, %arg25: memref<1x16xf32, #tpu.memory_space<vmem>>, %arg26: memref<16x1xf32, #tpu.memory_space<vmem>>, %arg27: memref<1x1xf32, #tpu.memory_space<vmem>>, %arg28: memref<1x1x1xf32, #tpu.memory_space<vmem>>) attributes {dimension_semantics = [#tpu.dimension_semantics<parallel>], iteration_bounds = array<i64: 2>, scalar_prefetch = 0 : i64, scratch_operands = 0 : i64, tpu.core_type = #tpu.core_type<tc>, window_params = [{transform_indices = @transform_0, window_bounds = array<i64: 1, 8, 2>}, {pipeline_mode = #tpu.pipeline_mode<synchronous>, transform_indices = @transform_1, window_bounds = array<i64: 2, 64>}, {pipeline_mode = #tpu.pipeline_mode<synchronous>, transform_indices = @transform_2, window_bounds = array<i64: 1, 64>}, {pipeline_mode = #tpu.pipeline_mode<synchronous>, transform_indices = @transform_3, window_bounds = array<i64: 64, 512>}, {pipeline_mode = #tpu.pipeline_mode<synchronous>, transform_indices = @transform_4, window_bounds = array<i64: 128, 512>}, {pipeline_mode = #tpu.pipeline_mode<synchronous>, transform_indices = @transform_5, window_bounds = array<i64: 1, 512>}, {pipeline_mode = #tpu.pipeline_mode<synchronous>, transform_indices = @transform_6, window_bounds = array<i64: 64, 512>}, {pipeline_mode = #tpu.pipeline_mode<synchronous>, transform_indices = @transform_7, window_bounds = array<i64: 128, 512>}, {pipeline_mode = #tpu.pipeline_mode<synchronous>, transform_indices = @transform_8, window_bounds = array<i64: 1, 512>}, {pipeline_mode = #tpu.pipeline_mode<synchronous>, transform_indices = @transform_9, window_bounds = array<i64: 256, 512>}, {pipeline_mode = #tpu.pipeline_mode<synchronous>, transform_indices = @transform_10, window_bounds = array<i64: 128, 512>}, {pipeline_mode = #tpu.pipeline_mode<synchronous>, transform_indices = @transform_11, window_bounds = array<i64: 1, 512>}, {pipeline_mode = #tpu.pipeline_mode<synchronous>, transform_indices = @transform_12, window_bounds = array<i64: 256, 512>}, {pipeline_mode = #tpu.pipeline_mode<synchronous>, transform_indices = @transform_13, window_bounds = array<i64: 128, 512>}, {pipeline_mode = #tpu.pipeline_mode<synchronous>, transform_indices = @transform_14, window_bounds = array<i64: 1, 512>}, {pipeline_mode = #tpu.pipeline_mode<synchronous>, transform_indices = @transform_15, window_bounds = array<i64: 256, 768>}, {pipeline_mode = #tpu.pipeline_mode<synchronous>, transform_indices = @transform_16, window_bounds = array<i64: 1, 768>}, {pipeline_mode = #tpu.pipeline_mode<synchronous>, transform_indices = @transform_17, window_bounds = array<i64: 256, 256>}, {pipeline_mode = #tpu.pipeline_mode<synchronous>, transform_indices = @transform_18, window_bounds = array<i64: 1, 256>}, {pipeline_mode = #tpu.pipeline_mode<synchronous>, transform_indices = @transform_19, window_bounds = array<i64: 1, 256>}, {pipeline_mode = #tpu.pipeline_mode<synchronous>, transform_indices = @transform_20, window_bounds = array<i64: 1, 256>}, {pipeline_mode = #tpu.pipeline_mode<synchronous>, transform_indices = @transform_21, window_bounds = array<i64: 256, 32>}, {pipeline_mode = #tpu.pipeline_mode<synchronous>, transform_indices = @transform_22, window_bounds = array<i64: 1, 32>}, {pipeline_mode = #tpu.pipeline_mode<synchronous>, transform_indices = @transform_23, window_bounds = array<i64: 32, 16>}, {pipeline_mode = #tpu.pipeline_mode<synchronous>, transform_indices = @transform_24, window_bounds = array<i64: 1, 16>}, {pipeline_mode = #tpu.pipeline_mode<synchronous>, transform_indices = @transform_25, window_bounds = array<i64: 16, 1>}, {pipeline_mode = #tpu.pipeline_mode<synchronous>, transform_indices = @transform_26, window_bounds = array<i64: 1, 1>}, {transform_indices = @transform_27, window_bounds = array<i64: 1, 1, 1>}]} {
    %c0 = arith.constant 0 : index
    %c0_0 = arith.constant 0 : index
    %c0_1 = arith.constant 0 : index
    %0 = vector.load %arg1[%c0, %c0_0, %c0_1] : memref<1x8x2xf32, #tpu.memory_space<vmem>>, vector<1x8x2xf32>
    %1 = vector.shape_cast %0 : vector<1x8x2xf32> to vector<8x2xf32>
    %c0_2 = arith.constant 0 : index
    %c0_3 = arith.constant 0 : index
    %2 = vector.load %arg2[%c0_2, %c0_3] : memref<2x64xf32, #tpu.memory_space<vmem>>, vector<2x64xf32>
    %cst = arith.constant dense<0.000000e+00> : vector<8x64xf32>
    %3 = tpu.matmul %1, %2, %cst {dimension_numbers = #tpu.dot_dimension_numbers<[1], [0], [0], [1], [0, 0, 1, 1], [], []>} : vector<8x2xf32>, vector<2x64xf32>, vector<8x64xf32> -> vector<8x64xf32>
    %c0_4 = arith.constant 0 : index
    %c0_5 = arith.constant 0 : index
    %4 = vector.load %arg3[%c0_4, %c0_5] : memref<1x64xf32, #tpu.memory_space<vmem>>, vector<1x64xf32>
    %5 = vector.broadcast %4 : vector<1x64xf32> to vector<8x64xf32>
    %6 = arith.addf %3, %5 : vector<8x64xf32>
    %7 = arith.truncf %6 : vector<8x64xf32> to vector<8x64xbf16>
    %c0_6 = arith.constant 0 : index
    %c0_7 = arith.constant 0 : index
    %8 = vector.load %arg4[%c0_6, %c0_7] : memref<64x512xbf16, #tpu.memory_space<vmem>>, vector<64x512xbf16>
    %cst_8 = arith.constant dense<0.000000e+00> : vector<8x512xf32>
    %9 = tpu.matmul %7, %8, %cst_8 {dimension_numbers = #tpu.dot_dimension_numbers<[1], [0], [0], [1], [0, 0, 1, 1], [], []>} : vector<8x64xbf16>, vector<64x512xbf16>, vector<8x512xf32> -> vector<8x512xf32>
    %c0_9 = arith.constant 0 : index
    %c0_10 = arith.constant 0 : index
    %10 = vector.load %arg6[%c0_9, %c0_10] : memref<1x512xf32, #tpu.memory_space<vmem>>, vector<1x512xf32>
    %11 = vector.broadcast %10 : vector<1x512xf32> to vector<8x512xf32>
    %12 = arith.addf %9, %11 : vector<8x512xf32>
    %c0_11 = arith.constant 0 : index
    %c0_12 = arith.constant 0 : index
    %13 = vector.load %arg5[%c0_11, %c0_12] : memref<128x512xbf16, #tpu.memory_space<vmem>>, vector<128x512xbf16>
    %cst_13 = arith.constant 0.000000e+00 : f32
    %14 = vector.broadcast %cst_13 : f32 to vector<1x128xf32>
    %cst_14 = arith.constant 0.000000e+00 : f32
    %15 = vector.broadcast %cst_14 : f32 to vector<1x128xf32>
    %16 = vector.extract_strided_slice %12 {offsets = [0, 0], sizes = [1, 512], strides = [1, 1]} : vector<8x512xf32> to vector<1x512xf32>
    %17 = arith.truncf %14 : vector<1x128xf32> to vector<1x128xbf16>
    %cst_15 = arith.constant dense<0.000000e+00> : vector<1x512xf32>
    %18 = tpu.matmul %17, %13, %cst_15 {dimension_numbers = #tpu.dot_dimension_numbers<[1], [0], [0], [1], [0, 0, 1, 1], [], []>} : vector<1x128xbf16>, vector<128x512xbf16>, vector<1x512xf32> -> vector<1x512xf32>
    %19 = arith.addf %16, %18 : vector<1x512xf32>
    %20 = vector.extract_strided_slice %19 {offsets = [0, 0], sizes = [1, 128], strides = [1, 1]} : vector<1x512xf32> to vector<1x128xf32>
    %21 = arith.negf %20 : vector<1x128xf32>
    %22 = math.exp %21 : vector<1x128xf32>
    %cst_16 = arith.constant 1.000000e+00 : f32
    %23 = vector.broadcast %cst_16 : f32 to vector<1x128xf32>
    %24 = arith.addf %23, %22 : vector<1x128xf32>
    %25 = arith.divf %23, %24 : vector<1x128xf32>
    %26 = vector.extract_strided_slice %19 {offsets = [0, 128], sizes = [1, 128], strides = [1, 1]} : vector<1x512xf32> to vector<1x128xf32>
    %27 = arith.negf %26 : vector<1x128xf32>
    %28 = math.exp %27 : vector<1x128xf32>
    %cst_17 = arith.constant 1.000000e+00 : f32
    %29 = vector.broadcast %cst_17 : f32 to vector<1x128xf32>
    %30 = arith.addf %29, %28 : vector<1x128xf32>
    %31 = arith.divf %29, %30 : vector<1x128xf32>
    %32 = vector.extract_strided_slice %19 {offsets = [0, 256], sizes = [1, 128], strides = [1, 1]} : vector<1x512xf32> to vector<1x128xf32>
    %33 = math.tanh %32 : vector<1x128xf32>
    %34 = vector.extract_strided_slice %19 {offsets = [0, 384], sizes = [1, 128], strides = [1, 1]} : vector<1x512xf32> to vector<1x128xf32>
    %35 = arith.negf %34 : vector<1x128xf32>
    %36 = math.exp %35 : vector<1x128xf32>
    %cst_18 = arith.constant 1.000000e+00 : f32
    %37 = vector.broadcast %cst_18 : f32 to vector<1x128xf32>
    %38 = arith.addf %37, %36 : vector<1x128xf32>
    %39 = arith.divf %37, %38 : vector<1x128xf32>
    %40 = arith.mulf %31, %15 : vector<1x128xf32>
    %41 = arith.mulf %25, %33 : vector<1x128xf32>
    %42 = arith.addf %40, %41 : vector<1x128xf32>
    %43 = math.tanh %42 : vector<1x128xf32>
    %44 = arith.mulf %39, %43 : vector<1x128xf32>
    %45 = vector.extract_strided_slice %12 {offsets = [1, 0], sizes = [1, 512], strides = [1, 1]} : vector<8x512xf32> to vector<1x512xf32>
    %46 = arith.truncf %44 : vector<1x128xf32> to vector<1x128xbf16>
    %cst_19 = arith.constant dense<0.000000e+00> : vector<1x512xf32>
    %47 = tpu.matmul %46, %13, %cst_19 {dimension_numbers = #tpu.dot_dimension_numbers<[1], [0], [0], [1], [0, 0, 1, 1], [], []>} : vector<1x128xbf16>, vector<128x512xbf16>, vector<1x512xf32> -> vector<1x512xf32>
    %48 = arith.addf %45, %47 : vector<1x512xf32>
    %49 = vector.extract_strided_slice %48 {offsets = [0, 0], sizes = [1, 128], strides = [1, 1]} : vector<1x512xf32> to vector<1x128xf32>
    %50 = arith.negf %49 : vector<1x128xf32>
    %51 = math.exp %50 : vector<1x128xf32>
    %cst_20 = arith.constant 1.000000e+00 : f32
    %52 = vector.broadcast %cst_20 : f32 to vector<1x128xf32>
    %53 = arith.addf %52, %51 : vector<1x128xf32>
    %54 = arith.divf %52, %53 : vector<1x128xf32>
    %55 = vector.extract_strided_slice %48 {offsets = [0, 128], sizes = [1, 128], strides = [1, 1]} : vector<1x512xf32> to vector<1x128xf32>
    %56 = arith.negf %55 : vector<1x128xf32>
    %57 = math.exp %56 : vector<1x128xf32>
    %cst_21 = arith.constant 1.000000e+00 : f32
    %58 = vector.broadcast %cst_21 : f32 to vector<1x128xf32>
    %59 = arith.addf %58, %57 : vector<1x128xf32>
    %60 = arith.divf %58, %59 : vector<1x128xf32>
    %61 = vector.extract_strided_slice %48 {offsets = [0, 256], sizes = [1, 128], strides = [1, 1]} : vector<1x512xf32> to vector<1x128xf32>
    %62 = math.tanh %61 : vector<1x128xf32>
    %63 = vector.extract_strided_slice %48 {offsets = [0, 384], sizes = [1, 128], strides = [1, 1]} : vector<1x512xf32> to vector<1x128xf32>
    %64 = arith.negf %63 : vector<1x128xf32>
    %65 = math.exp %64 : vector<1x128xf32>
    %cst_22 = arith.constant 1.000000e+00 : f32
    %66 = vector.broadcast %cst_22 : f32 to vector<1x128xf32>
    %67 = arith.addf %66, %65 : vector<1x128xf32>
    %68 = arith.divf %66, %67 : vector<1x128xf32>
    %69 = arith.mulf %60, %42 : vector<1x128xf32>
    %70 = arith.mulf %54, %62 : vector<1x128xf32>
    %71 = arith.addf %69, %70 : vector<1x128xf32>
    %72 = math.tanh %71 : vector<1x128xf32>
    %73 = arith.mulf %68, %72 : vector<1x128xf32>
    %74 = vector.extract_strided_slice %12 {offsets = [2, 0], sizes = [1, 512], strides = [1, 1]} : vector<8x512xf32> to vector<1x512xf32>
    %75 = arith.truncf %73 : vector<1x128xf32> to vector<1x128xbf16>
    %cst_23 = arith.constant dense<0.000000e+00> : vector<1x512xf32>
    %76 = tpu.matmul %75, %13, %cst_23 {dimension_numbers = #tpu.dot_dimension_numbers<[1], [0], [0], [1], [0, 0, 1, 1], [], []>} : vector<1x128xbf16>, vector<128x512xbf16>, vector<1x512xf32> -> vector<1x512xf32>
    %77 = arith.addf %74, %76 : vector<1x512xf32>
    %78 = vector.extract_strided_slice %77 {offsets = [0, 0], sizes = [1, 128], strides = [1, 1]} : vector<1x512xf32> to vector<1x128xf32>
    %79 = arith.negf %78 : vector<1x128xf32>
    %80 = math.exp %79 : vector<1x128xf32>
    %cst_24 = arith.constant 1.000000e+00 : f32
    %81 = vector.broadcast %cst_24 : f32 to vector<1x128xf32>
    %82 = arith.addf %81, %80 : vector<1x128xf32>
    %83 = arith.divf %81, %82 : vector<1x128xf32>
    %84 = vector.extract_strided_slice %77 {offsets = [0, 128], sizes = [1, 128], strides = [1, 1]} : vector<1x512xf32> to vector<1x128xf32>
    %85 = arith.negf %84 : vector<1x128xf32>
    %86 = math.exp %85 : vector<1x128xf32>
    %cst_25 = arith.constant 1.000000e+00 : f32
    %87 = vector.broadcast %cst_25 : f32 to vector<1x128xf32>
    %88 = arith.addf %87, %86 : vector<1x128xf32>
    %89 = arith.divf %87, %88 : vector<1x128xf32>
    %90 = vector.extract_strided_slice %77 {offsets = [0, 256], sizes = [1, 128], strides = [1, 1]} : vector<1x512xf32> to vector<1x128xf32>
    %91 = math.tanh %90 : vector<1x128xf32>
    %92 = vector.extract_strided_slice %77 {offsets = [0, 384], sizes = [1, 128], strides = [1, 1]} : vector<1x512xf32> to vector<1x128xf32>
    %93 = arith.negf %92 : vector<1x128xf32>
    %94 = math.exp %93 : vector<1x128xf32>
    %cst_26 = arith.constant 1.000000e+00 : f32
    %95 = vector.broadcast %cst_26 : f32 to vector<1x128xf32>
    %96 = arith.addf %95, %94 : vector<1x128xf32>
    %97 = arith.divf %95, %96 : vector<1x128xf32>
    %98 = arith.mulf %89, %71 : vector<1x128xf32>
    %99 = arith.mulf %83, %91 : vector<1x128xf32>
    %100 = arith.addf %98, %99 : vector<1x128xf32>
    %101 = math.tanh %100 : vector<1x128xf32>
    %102 = arith.mulf %97, %101 : vector<1x128xf32>
    %103 = vector.extract_strided_slice %12 {offsets = [3, 0], sizes = [1, 512], strides = [1, 1]} : vector<8x512xf32> to vector<1x512xf32>
    %104 = arith.truncf %102 : vector<1x128xf32> to vector<1x128xbf16>
    %cst_27 = arith.constant dense<0.000000e+00> : vector<1x512xf32>
    %105 = tpu.matmul %104, %13, %cst_27 {dimension_numbers = #tpu.dot_dimension_numbers<[1], [0], [0], [1], [0, 0, 1, 1], [], []>} : vector<1x128xbf16>, vector<128x512xbf16>, vector<1x512xf32> -> vector<1x512xf32>
    %106 = arith.addf %103, %105 : vector<1x512xf32>
    %107 = vector.extract_strided_slice %106 {offsets = [0, 0], sizes = [1, 128], strides = [1, 1]} : vector<1x512xf32> to vector<1x128xf32>
    %108 = arith.negf %107 : vector<1x128xf32>
    %109 = math.exp %108 : vector<1x128xf32>
    %cst_28 = arith.constant 1.000000e+00 : f32
    %110 = vector.broadcast %cst_28 : f32 to vector<1x128xf32>
    %111 = arith.addf %110, %109 : vector<1x128xf32>
    %112 = arith.divf %110, %111 : vector<1x128xf32>
    %113 = vector.extract_strided_slice %106 {offsets = [0, 128], sizes = [1, 128], strides = [1, 1]} : vector<1x512xf32> to vector<1x128xf32>
    %114 = arith.negf %113 : vector<1x128xf32>
    %115 = math.exp %114 : vector<1x128xf32>
    %cst_29 = arith.constant 1.000000e+00 : f32
    %116 = vector.broadcast %cst_29 : f32 to vector<1x128xf32>
    %117 = arith.addf %116, %115 : vector<1x128xf32>
    %118 = arith.divf %116, %117 : vector<1x128xf32>
    %119 = vector.extract_strided_slice %106 {offsets = [0, 256], sizes = [1, 128], strides = [1, 1]} : vector<1x512xf32> to vector<1x128xf32>
    %120 = math.tanh %119 : vector<1x128xf32>
    %121 = vector.extract_strided_slice %106 {offsets = [0, 384], sizes = [1, 128], strides = [1, 1]} : vector<1x512xf32> to vector<1x128xf32>
    %122 = arith.negf %121 : vector<1x128xf32>
    %123 = math.exp %122 : vector<1x128xf32>
    %cst_30 = arith.constant 1.000000e+00 : f32
    %124 = vector.broadcast %cst_30 : f32 to vector<1x128xf32>
    %125 = arith.addf %124, %123 : vector<1x128xf32>
    %126 = arith.divf %124, %125 : vector<1x128xf32>
    %127 = arith.mulf %118, %100 : vector<1x128xf32>
    %128 = arith.mulf %112, %120 : vector<1x128xf32>
    %129 = arith.addf %127, %128 : vector<1x128xf32>
    %130 = math.tanh %129 : vector<1x128xf32>
    %131 = arith.mulf %126, %130 : vector<1x128xf32>
    %132 = vector.extract_strided_slice %12 {offsets = [4, 0], sizes = [1, 512], strides = [1, 1]} : vector<8x512xf32> to vector<1x512xf32>
    %133 = arith.truncf %131 : vector<1x128xf32> to vector<1x128xbf16>
    %cst_31 = arith.constant dense<0.000000e+00> : vector<1x512xf32>
    %134 = tpu.matmul %133, %13, %cst_31 {dimension_numbers = #tpu.dot_dimension_numbers<[1], [0], [0], [1], [0, 0, 1, 1], [], []>} : vector<1x128xbf16>, vector<128x512xbf16>, vector<1x512xf32> -> vector<1x512xf32>
    %135 = arith.addf %132, %134 : vector<1x512xf32>
    %136 = vector.extract_strided_slice %135 {offsets = [0, 0], sizes = [1, 128], strides = [1, 1]} : vector<1x512xf32> to vector<1x128xf32>
    %137 = arith.negf %136 : vector<1x128xf32>
    %138 = math.exp %137 : vector<1x128xf32>
    %cst_32 = arith.constant 1.000000e+00 : f32
    %139 = vector.broadcast %cst_32 : f32 to vector<1x128xf32>
    %140 = arith.addf %139, %138 : vector<1x128xf32>
    %141 = arith.divf %139, %140 : vector<1x128xf32>
    %142 = vector.extract_strided_slice %135 {offsets = [0, 128], sizes = [1, 128], strides = [1, 1]} : vector<1x512xf32> to vector<1x128xf32>
    %143 = arith.negf %142 : vector<1x128xf32>
    %144 = math.exp %143 : vector<1x128xf32>
    %cst_33 = arith.constant 1.000000e+00 : f32
    %145 = vector.broadcast %cst_33 : f32 to vector<1x128xf32>
    %146 = arith.addf %145, %144 : vector<1x128xf32>
    %147 = arith.divf %145, %146 : vector<1x128xf32>
    %148 = vector.extract_strided_slice %135 {offsets = [0, 256], sizes = [1, 128], strides = [1, 1]} : vector<1x512xf32> to vector<1x128xf32>
    %149 = math.tanh %148 : vector<1x128xf32>
    %150 = vector.extract_strided_slice %135 {offsets = [0, 384], sizes = [1, 128], strides = [1, 1]} : vector<1x512xf32> to vector<1x128xf32>
    %151 = arith.negf %150 : vector<1x128xf32>
    %152 = math.exp %151 : vector<1x128xf32>
    %cst_34 = arith.constant 1.000000e+00 : f32
    %153 = vector.broadcast %cst_34 : f32 to vector<1x128xf32>
    %154 = arith.addf %153, %152 : vector<1x128xf32>
    %155 = arith.divf %153, %154 : vector<1x128xf32>
    %156 = arith.mulf %147, %129 : vector<1x128xf32>
    %157 = arith.mulf %141, %149 : vector<1x128xf32>
    %158 = arith.addf %156, %157 : vector<1x128xf32>
    %159 = math.tanh %158 : vector<1x128xf32>
    %160 = arith.mulf %155, %159 : vector<1x128xf32>
    %161 = vector.extract_strided_slice %12 {offsets = [5, 0], sizes = [1, 512], strides = [1, 1]} : vector<8x512xf32> to vector<1x512xf32>
    %162 = arith.truncf %160 : vector<1x128xf32> to vector<1x128xbf16>
    %cst_35 = arith.constant dense<0.000000e+00> : vector<1x512xf32>
    %163 = tpu.matmul %162, %13, %cst_35 {dimension_numbers = #tpu.dot_dimension_numbers<[1], [0], [0], [1], [0, 0, 1, 1], [], []>} : vector<1x128xbf16>, vector<128x512xbf16>, vector<1x512xf32> -> vector<1x512xf32>
    %164 = arith.addf %161, %163 : vector<1x512xf32>
    %165 = vector.extract_strided_slice %164 {offsets = [0, 0], sizes = [1, 128], strides = [1, 1]} : vector<1x512xf32> to vector<1x128xf32>
    %166 = arith.negf %165 : vector<1x128xf32>
    %167 = math.exp %166 : vector<1x128xf32>
    %cst_36 = arith.constant 1.000000e+00 : f32
    %168 = vector.broadcast %cst_36 : f32 to vector<1x128xf32>
    %169 = arith.addf %168, %167 : vector<1x128xf32>
    %170 = arith.divf %168, %169 : vector<1x128xf32>
    %171 = vector.extract_strided_slice %164 {offsets = [0, 128], sizes = [1, 128], strides = [1, 1]} : vector<1x512xf32> to vector<1x128xf32>
    %172 = arith.negf %171 : vector<1x128xf32>
    %173 = math.exp %172 : vector<1x128xf32>
    %cst_37 = arith.constant 1.000000e+00 : f32
    %174 = vector.broadcast %cst_37 : f32 to vector<1x128xf32>
    %175 = arith.addf %174, %173 : vector<1x128xf32>
    %176 = arith.divf %174, %175 : vector<1x128xf32>
    %177 = vector.extract_strided_slice %164 {offsets = [0, 256], sizes = [1, 128], strides = [1, 1]} : vector<1x512xf32> to vector<1x128xf32>
    %178 = math.tanh %177 : vector<1x128xf32>
    %179 = vector.extract_strided_slice %164 {offsets = [0, 384], sizes = [1, 128], strides = [1, 1]} : vector<1x512xf32> to vector<1x128xf32>
    %180 = arith.negf %179 : vector<1x128xf32>
    %181 = math.exp %180 : vector<1x128xf32>
    %cst_38 = arith.constant 1.000000e+00 : f32
    %182 = vector.broadcast %cst_38 : f32 to vector<1x128xf32>
    %183 = arith.addf %182, %181 : vector<1x128xf32>
    %184 = arith.divf %182, %183 : vector<1x128xf32>
    %185 = arith.mulf %176, %158 : vector<1x128xf32>
    %186 = arith.mulf %170, %178 : vector<1x128xf32>
    %187 = arith.addf %185, %186 : vector<1x128xf32>
    %188 = math.tanh %187 : vector<1x128xf32>
    %189 = arith.mulf %184, %188 : vector<1x128xf32>
    %190 = vector.extract_strided_slice %12 {offsets = [6, 0], sizes = [1, 512], strides = [1, 1]} : vector<8x512xf32> to vector<1x512xf32>
    %191 = arith.truncf %189 : vector<1x128xf32> to vector<1x128xbf16>
    %cst_39 = arith.constant dense<0.000000e+00> : vector<1x512xf32>
    %192 = tpu.matmul %191, %13, %cst_39 {dimension_numbers = #tpu.dot_dimension_numbers<[1], [0], [0], [1], [0, 0, 1, 1], [], []>} : vector<1x128xbf16>, vector<128x512xbf16>, vector<1x512xf32> -> vector<1x512xf32>
    %193 = arith.addf %190, %192 : vector<1x512xf32>
    %194 = vector.extract_strided_slice %193 {offsets = [0, 0], sizes = [1, 128], strides = [1, 1]} : vector<1x512xf32> to vector<1x128xf32>
    %195 = arith.negf %194 : vector<1x128xf32>
    %196 = math.exp %195 : vector<1x128xf32>
    %cst_40 = arith.constant 1.000000e+00 : f32
    %197 = vector.broadcast %cst_40 : f32 to vector<1x128xf32>
    %198 = arith.addf %197, %196 : vector<1x128xf32>
    %199 = arith.divf %197, %198 : vector<1x128xf32>
    %200 = vector.extract_strided_slice %193 {offsets = [0, 128], sizes = [1, 128], strides = [1, 1]} : vector<1x512xf32> to vector<1x128xf32>
    %201 = arith.negf %200 : vector<1x128xf32>
    %202 = math.exp %201 : vector<1x128xf32>
    %cst_41 = arith.constant 1.000000e+00 : f32
    %203 = vector.broadcast %cst_41 : f32 to vector<1x128xf32>
    %204 = arith.addf %203, %202 : vector<1x128xf32>
    %205 = arith.divf %203, %204 : vector<1x128xf32>
    %206 = vector.extract_strided_slice %193 {offsets = [0, 256], sizes = [1, 128], strides = [1, 1]} : vector<1x512xf32> to vector<1x128xf32>
    %207 = math.tanh %206 : vector<1x128xf32>
    %208 = vector.extract_strided_slice %193 {offsets = [0, 384], sizes = [1, 128], strides = [1, 1]} : vector<1x512xf32> to vector<1x128xf32>
    %209 = arith.negf %208 : vector<1x128xf32>
    %210 = math.exp %209 : vector<1x128xf32>
    %cst_42 = arith.constant 1.000000e+00 : f32
    %211 = vector.broadcast %cst_42 : f32 to vector<1x128xf32>
    %212 = arith.addf %211, %210 : vector<1x128xf32>
    %213 = arith.divf %211, %212 : vector<1x128xf32>
    %214 = arith.mulf %205, %187 : vector<1x128xf32>
    %215 = arith.mulf %199, %207 : vector<1x128xf32>
    %216 = arith.addf %214, %215 : vector<1x128xf32>
    %217 = math.tanh %216 : vector<1x128xf32>
    %218 = arith.mulf %213, %217 : vector<1x128xf32>
    %219 = vector.extract_strided_slice %12 {offsets = [7, 0], sizes = [1, 512], strides = [1, 1]} : vector<8x512xf32> to vector<1x512xf32>
    %220 = arith.truncf %218 : vector<1x128xf32> to vector<1x128xbf16>
    %cst_43 = arith.constant dense<0.000000e+00> : vector<1x512xf32>
    %221 = tpu.matmul %220, %13, %cst_43 {dimension_numbers = #tpu.dot_dimension_numbers<[1], [0], [0], [1], [0, 0, 1, 1], [], []>} : vector<1x128xbf16>, vector<128x512xbf16>, vector<1x512xf32> -> vector<1x512xf32>
    %222 = arith.addf %219, %221 : vector<1x512xf32>
    %223 = vector.extract_strided_slice %222 {offsets = [0, 0], sizes = [1, 128], strides = [1, 1]} : vector<1x512xf32> to vector<1x128xf32>
    %224 = arith.negf %223 : vector<1x128xf32>
    %225 = math.exp %224 : vector<1x128xf32>
    %cst_44 = arith.constant 1.000000e+00 : f32
    %226 = vector.broadcast %cst_44 : f32 to vector<1x128xf32>
    %227 = arith.addf %226, %225 : vector<1x128xf32>
    %228 = arith.divf %226, %227 : vector<1x128xf32>
    %229 = vector.extract_strided_slice %222 {offsets = [0, 128], sizes = [1, 128], strides = [1, 1]} : vector<1x512xf32> to vector<1x128xf32>
    %230 = arith.negf %229 : vector<1x128xf32>
    %231 = math.exp %230 : vector<1x128xf32>
    %cst_45 = arith.constant 1.000000e+00 : f32
    %232 = vector.broadcast %cst_45 : f32 to vector<1x128xf32>
    %233 = arith.addf %232, %231 : vector<1x128xf32>
    %234 = arith.divf %232, %233 : vector<1x128xf32>
    %235 = vector.extract_strided_slice %222 {offsets = [0, 256], sizes = [1, 128], strides = [1, 1]} : vector<1x512xf32> to vector<1x128xf32>
    %236 = math.tanh %235 : vector<1x128xf32>
    %237 = vector.extract_strided_slice %222 {offsets = [0, 384], sizes = [1, 128], strides = [1, 1]} : vector<1x512xf32> to vector<1x128xf32>
    %238 = arith.negf %237 : vector<1x128xf32>
    %239 = math.exp %238 : vector<1x128xf32>
    %cst_46 = arith.constant 1.000000e+00 : f32
    %240 = vector.broadcast %cst_46 : f32 to vector<1x128xf32>
    %241 = arith.addf %240, %239 : vector<1x128xf32>
    %242 = arith.divf %240, %241 : vector<1x128xf32>
    %243 = arith.mulf %234, %216 : vector<1x128xf32>
    %244 = arith.mulf %228, %236 : vector<1x128xf32>
    %245 = arith.addf %243, %244 : vector<1x128xf32>
    %246 = math.tanh %245 : vector<1x128xf32>
    %247 = arith.mulf %242, %246 : vector<1x128xf32>
    %248 = tpu.concatenate %44, %73, %102, %131, %160, %189, %218, %247 in 0 : vector<1x128xf32>, vector<1x128xf32>, vector<1x128xf32>, vector<1x128xf32>, vector<1x128xf32>, vector<1x128xf32>, vector<1x128xf32>, vector<1x128xf32> -> vector<8x128xf32>
    %249 = arith.truncf %6 : vector<8x64xf32> to vector<8x64xbf16>
    %c0_47 = arith.constant 0 : index
    %c0_48 = arith.constant 0 : index
    %250 = vector.load %arg7[%c0_47, %c0_48] : memref<64x512xbf16, #tpu.memory_space<vmem>>, vector<64x512xbf16>
    %cst_49 = arith.constant dense<0.000000e+00> : vector<8x512xf32>
    %251 = tpu.matmul %249, %250, %cst_49 {dimension_numbers = #tpu.dot_dimension_numbers<[1], [0], [0], [1], [0, 0, 1, 1], [], []>} : vector<8x64xbf16>, vector<64x512xbf16>, vector<8x512xf32> -> vector<8x512xf32>
    %c0_50 = arith.constant 0 : index
    %c0_51 = arith.constant 0 : index
    %252 = vector.load %arg9[%c0_50, %c0_51] : memref<1x512xf32, #tpu.memory_space<vmem>>, vector<1x512xf32>
    %253 = vector.broadcast %252 : vector<1x512xf32> to vector<8x512xf32>
    %254 = arith.addf %251, %253 : vector<8x512xf32>
    %c0_52 = arith.constant 0 : index
    %c0_53 = arith.constant 0 : index
    %255 = vector.load %arg8[%c0_52, %c0_53] : memref<128x512xbf16, #tpu.memory_space<vmem>>, vector<128x512xbf16>
    %cst_54 = arith.constant 0.000000e+00 : f32
    %256 = vector.broadcast %cst_54 : f32 to vector<1x128xf32>
    %cst_55 = arith.constant 0.000000e+00 : f32
    %257 = vector.broadcast %cst_55 : f32 to vector<1x128xf32>
    %258 = vector.extract_strided_slice %254 {offsets = [7, 0], sizes = [1, 512], strides = [1, 1]} : vector<8x512xf32> to vector<1x512xf32>
    %259 = arith.truncf %256 : vector<1x128xf32> to vector<1x128xbf16>
    %cst_56 = arith.constant dense<0.000000e+00> : vector<1x512xf32>
    %260 = tpu.matmul %259, %255, %cst_56 {dimension_numbers = #tpu.dot_dimension_numbers<[1], [0], [0], [1], [0, 0, 1, 1], [], []>} : vector<1x128xbf16>, vector<128x512xbf16>, vector<1x512xf32> -> vector<1x512xf32>
    %261 = arith.addf %258, %260 : vector<1x512xf32>
    %262 = vector.extract_strided_slice %261 {offsets = [0, 0], sizes = [1, 128], strides = [1, 1]} : vector<1x512xf32> to vector<1x128xf32>
    %263 = arith.negf %262 : vector<1x128xf32>
    %264 = math.exp %263 : vector<1x128xf32>
    %cst_57 = arith.constant 1.000000e+00 : f32
    %265 = vector.broadcast %cst_57 : f32 to vector<1x128xf32>
    %266 = arith.addf %265, %264 : vector<1x128xf32>
    %267 = arith.divf %265, %266 : vector<1x128xf32>
    %268 = vector.extract_strided_slice %261 {offsets = [0, 128], sizes = [1, 128], strides = [1, 1]} : vector<1x512xf32> to vector<1x128xf32>
    %269 = arith.negf %268 : vector<1x128xf32>
    %270 = math.exp %269 : vector<1x128xf32>
    %cst_58 = arith.constant 1.000000e+00 : f32
    %271 = vector.broadcast %cst_58 : f32 to vector<1x128xf32>
    %272 = arith.addf %271, %270 : vector<1x128xf32>
    %273 = arith.divf %271, %272 : vector<1x128xf32>
    %274 = vector.extract_strided_slice %261 {offsets = [0, 256], sizes = [1, 128], strides = [1, 1]} : vector<1x512xf32> to vector<1x128xf32>
    %275 = math.tanh %274 : vector<1x128xf32>
    %276 = vector.extract_strided_slice %261 {offsets = [0, 384], sizes = [1, 128], strides = [1, 1]} : vector<1x512xf32> to vector<1x128xf32>
    %277 = arith.negf %276 : vector<1x128xf32>
    %278 = math.exp %277 : vector<1x128xf32>
    %cst_59 = arith.constant 1.000000e+00 : f32
    %279 = vector.broadcast %cst_59 : f32 to vector<1x128xf32>
    %280 = arith.addf %279, %278 : vector<1x128xf32>
    %281 = arith.divf %279, %280 : vector<1x128xf32>
    %282 = arith.mulf %273, %257 : vector<1x128xf32>
    %283 = arith.mulf %267, %275 : vector<1x128xf32>
    %284 = arith.addf %282, %283 : vector<1x128xf32>
    %285 = math.tanh %284 : vector<1x128xf32>
    %286 = arith.mulf %281, %285 : vector<1x128xf32>
    %287 = vector.extract_strided_slice %254 {offsets = [6, 0], sizes = [1, 512], strides = [1, 1]} : vector<8x512xf32> to vector<1x512xf32>
    %288 = arith.truncf %286 : vector<1x128xf32> to vector<1x128xbf16>
    %cst_60 = arith.constant dense<0.000000e+00> : vector<1x512xf32>
    %289 = tpu.matmul %288, %255, %cst_60 {dimension_numbers = #tpu.dot_dimension_numbers<[1], [0], [0], [1], [0, 0, 1, 1], [], []>} : vector<1x128xbf16>, vector<128x512xbf16>, vector<1x512xf32> -> vector<1x512xf32>
    %290 = arith.addf %287, %289 : vector<1x512xf32>
    %291 = vector.extract_strided_slice %290 {offsets = [0, 0], sizes = [1, 128], strides = [1, 1]} : vector<1x512xf32> to vector<1x128xf32>
    %292 = arith.negf %291 : vector<1x128xf32>
    %293 = math.exp %292 : vector<1x128xf32>
    %cst_61 = arith.constant 1.000000e+00 : f32
    %294 = vector.broadcast %cst_61 : f32 to vector<1x128xf32>
    %295 = arith.addf %294, %293 : vector<1x128xf32>
    %296 = arith.divf %294, %295 : vector<1x128xf32>
    %297 = vector.extract_strided_slice %290 {offsets = [0, 128], sizes = [1, 128], strides = [1, 1]} : vector<1x512xf32> to vector<1x128xf32>
    %298 = arith.negf %297 : vector<1x128xf32>
    %299 = math.exp %298 : vector<1x128xf32>
    %cst_62 = arith.constant 1.000000e+00 : f32
    %300 = vector.broadcast %cst_62 : f32 to vector<1x128xf32>
    %301 = arith.addf %300, %299 : vector<1x128xf32>
    %302 = arith.divf %300, %301 : vector<1x128xf32>
    %303 = vector.extract_strided_slice %290 {offsets = [0, 256], sizes = [1, 128], strides = [1, 1]} : vector<1x512xf32> to vector<1x128xf32>
    %304 = math.tanh %303 : vector<1x128xf32>
    %305 = vector.extract_strided_slice %290 {offsets = [0, 384], sizes = [1, 128], strides = [1, 1]} : vector<1x512xf32> to vector<1x128xf32>
    %306 = arith.negf %305 : vector<1x128xf32>
    %307 = math.exp %306 : vector<1x128xf32>
    %cst_63 = arith.constant 1.000000e+00 : f32
    %308 = vector.broadcast %cst_63 : f32 to vector<1x128xf32>
    %309 = arith.addf %308, %307 : vector<1x128xf32>
    %310 = arith.divf %308, %309 : vector<1x128xf32>
    %311 = arith.mulf %302, %284 : vector<1x128xf32>
    %312 = arith.mulf %296, %304 : vector<1x128xf32>
    %313 = arith.addf %311, %312 : vector<1x128xf32>
    %314 = math.tanh %313 : vector<1x128xf32>
    %315 = arith.mulf %310, %314 : vector<1x128xf32>
    %316 = vector.extract_strided_slice %254 {offsets = [5, 0], sizes = [1, 512], strides = [1, 1]} : vector<8x512xf32> to vector<1x512xf32>
    %317 = arith.truncf %315 : vector<1x128xf32> to vector<1x128xbf16>
    %cst_64 = arith.constant dense<0.000000e+00> : vector<1x512xf32>
    %318 = tpu.matmul %317, %255, %cst_64 {dimension_numbers = #tpu.dot_dimension_numbers<[1], [0], [0], [1], [0, 0, 1, 1], [], []>} : vector<1x128xbf16>, vector<128x512xbf16>, vector<1x512xf32> -> vector<1x512xf32>
    %319 = arith.addf %316, %318 : vector<1x512xf32>
    %320 = vector.extract_strided_slice %319 {offsets = [0, 0], sizes = [1, 128], strides = [1, 1]} : vector<1x512xf32> to vector<1x128xf32>
    %321 = arith.negf %320 : vector<1x128xf32>
    %322 = math.exp %321 : vector<1x128xf32>
    %cst_65 = arith.constant 1.000000e+00 : f32
    %323 = vector.broadcast %cst_65 : f32 to vector<1x128xf32>
    %324 = arith.addf %323, %322 : vector<1x128xf32>
    %325 = arith.divf %323, %324 : vector<1x128xf32>
    %326 = vector.extract_strided_slice %319 {offsets = [0, 128], sizes = [1, 128], strides = [1, 1]} : vector<1x512xf32> to vector<1x128xf32>
    %327 = arith.negf %326 : vector<1x128xf32>
    %328 = math.exp %327 : vector<1x128xf32>
    %cst_66 = arith.constant 1.000000e+00 : f32
    %329 = vector.broadcast %cst_66 : f32 to vector<1x128xf32>
    %330 = arith.addf %329, %328 : vector<1x128xf32>
    %331 = arith.divf %329, %330 : vector<1x128xf32>
    %332 = vector.extract_strided_slice %319 {offsets = [0, 256], sizes = [1, 128], strides = [1, 1]} : vector<1x512xf32> to vector<1x128xf32>
    %333 = math.tanh %332 : vector<1x128xf32>
    %334 = vector.extract_strided_slice %319 {offsets = [0, 384], sizes = [1, 128], strides = [1, 1]} : vector<1x512xf32> to vector<1x128xf32>
    %335 = arith.negf %334 : vector<1x128xf32>
    %336 = math.exp %335 : vector<1x128xf32>
    %cst_67 = arith.constant 1.000000e+00 : f32
    %337 = vector.broadcast %cst_67 : f32 to vector<1x128xf32>
    %338 = arith.addf %337, %336 : vector<1x128xf32>
    %339 = arith.divf %337, %338 : vector<1x128xf32>
    %340 = arith.mulf %331, %313 : vector<1x128xf32>
    %341 = arith.mulf %325, %333 : vector<1x128xf32>
    %342 = arith.addf %340, %341 : vector<1x128xf32>
    %343 = math.tanh %342 : vector<1x128xf32>
    %344 = arith.mulf %339, %343 : vector<1x128xf32>
    %345 = vector.extract_strided_slice %254 {offsets = [4, 0], sizes = [1, 512], strides = [1, 1]} : vector<8x512xf32> to vector<1x512xf32>
    %346 = arith.truncf %344 : vector<1x128xf32> to vector<1x128xbf16>
    %cst_68 = arith.constant dense<0.000000e+00> : vector<1x512xf32>
    %347 = tpu.matmul %346, %255, %cst_68 {dimension_numbers = #tpu.dot_dimension_numbers<[1], [0], [0], [1], [0, 0, 1, 1], [], []>} : vector<1x128xbf16>, vector<128x512xbf16>, vector<1x512xf32> -> vector<1x512xf32>
    %348 = arith.addf %345, %347 : vector<1x512xf32>
    %349 = vector.extract_strided_slice %348 {offsets = [0, 0], sizes = [1, 128], strides = [1, 1]} : vector<1x512xf32> to vector<1x128xf32>
    %350 = arith.negf %349 : vector<1x128xf32>
    %351 = math.exp %350 : vector<1x128xf32>
    %cst_69 = arith.constant 1.000000e+00 : f32
    %352 = vector.broadcast %cst_69 : f32 to vector<1x128xf32>
    %353 = arith.addf %352, %351 : vector<1x128xf32>
    %354 = arith.divf %352, %353 : vector<1x128xf32>
    %355 = vector.extract_strided_slice %348 {offsets = [0, 128], sizes = [1, 128], strides = [1, 1]} : vector<1x512xf32> to vector<1x128xf32>
    %356 = arith.negf %355 : vector<1x128xf32>
    %357 = math.exp %356 : vector<1x128xf32>
    %cst_70 = arith.constant 1.000000e+00 : f32
    %358 = vector.broadcast %cst_70 : f32 to vector<1x128xf32>
    %359 = arith.addf %358, %357 : vector<1x128xf32>
    %360 = arith.divf %358, %359 : vector<1x128xf32>
    %361 = vector.extract_strided_slice %348 {offsets = [0, 256], sizes = [1, 128], strides = [1, 1]} : vector<1x512xf32> to vector<1x128xf32>
    %362 = math.tanh %361 : vector<1x128xf32>
    %363 = vector.extract_strided_slice %348 {offsets = [0, 384], sizes = [1, 128], strides = [1, 1]} : vector<1x512xf32> to vector<1x128xf32>
    %364 = arith.negf %363 : vector<1x128xf32>
    %365 = math.exp %364 : vector<1x128xf32>
    %cst_71 = arith.constant 1.000000e+00 : f32
    %366 = vector.broadcast %cst_71 : f32 to vector<1x128xf32>
    %367 = arith.addf %366, %365 : vector<1x128xf32>
    %368 = arith.divf %366, %367 : vector<1x128xf32>
    %369 = arith.mulf %360, %342 : vector<1x128xf32>
    %370 = arith.mulf %354, %362 : vector<1x128xf32>
    %371 = arith.addf %369, %370 : vector<1x128xf32>
    %372 = math.tanh %371 : vector<1x128xf32>
    %373 = arith.mulf %368, %372 : vector<1x128xf32>
    %374 = vector.extract_strided_slice %254 {offsets = [3, 0], sizes = [1, 512], strides = [1, 1]} : vector<8x512xf32> to vector<1x512xf32>
    %375 = arith.truncf %373 : vector<1x128xf32> to vector<1x128xbf16>
    %cst_72 = arith.constant dense<0.000000e+00> : vector<1x512xf32>
    %376 = tpu.matmul %375, %255, %cst_72 {dimension_numbers = #tpu.dot_dimension_numbers<[1], [0], [0], [1], [0, 0, 1, 1], [], []>} : vector<1x128xbf16>, vector<128x512xbf16>, vector<1x512xf32> -> vector<1x512xf32>
    %377 = arith.addf %374, %376 : vector<1x512xf32>
    %378 = vector.extract_strided_slice %377 {offsets = [0, 0], sizes = [1, 128], strides = [1, 1]} : vector<1x512xf32> to vector<1x128xf32>
    %379 = arith.negf %378 : vector<1x128xf32>
    %380 = math.exp %379 : vector<1x128xf32>
    %cst_73 = arith.constant 1.000000e+00 : f32
    %381 = vector.broadcast %cst_73 : f32 to vector<1x128xf32>
    %382 = arith.addf %381, %380 : vector<1x128xf32>
    %383 = arith.divf %381, %382 : vector<1x128xf32>
    %384 = vector.extract_strided_slice %377 {offsets = [0, 128], sizes = [1, 128], strides = [1, 1]} : vector<1x512xf32> to vector<1x128xf32>
    %385 = arith.negf %384 : vector<1x128xf32>
    %386 = math.exp %385 : vector<1x128xf32>
    %cst_74 = arith.constant 1.000000e+00 : f32
    %387 = vector.broadcast %cst_74 : f32 to vector<1x128xf32>
    %388 = arith.addf %387, %386 : vector<1x128xf32>
    %389 = arith.divf %387, %388 : vector<1x128xf32>
    %390 = vector.extract_strided_slice %377 {offsets = [0, 256], sizes = [1, 128], strides = [1, 1]} : vector<1x512xf32> to vector<1x128xf32>
    %391 = math.tanh %390 : vector<1x128xf32>
    %392 = vector.extract_strided_slice %377 {offsets = [0, 384], sizes = [1, 128], strides = [1, 1]} : vector<1x512xf32> to vector<1x128xf32>
    %393 = arith.negf %392 : vector<1x128xf32>
    %394 = math.exp %393 : vector<1x128xf32>
    %cst_75 = arith.constant 1.000000e+00 : f32
    %395 = vector.broadcast %cst_75 : f32 to vector<1x128xf32>
    %396 = arith.addf %395, %394 : vector<1x128xf32>
    %397 = arith.divf %395, %396 : vector<1x128xf32>
    %398 = arith.mulf %389, %371 : vector<1x128xf32>
    %399 = arith.mulf %383, %391 : vector<1x128xf32>
    %400 = arith.addf %398, %399 : vector<1x128xf32>
    %401 = math.tanh %400 : vector<1x128xf32>
    %402 = arith.mulf %397, %401 : vector<1x128xf32>
    %403 = vector.extract_strided_slice %254 {offsets = [2, 0], sizes = [1, 512], strides = [1, 1]} : vector<8x512xf32> to vector<1x512xf32>
    %404 = arith.truncf %402 : vector<1x128xf32> to vector<1x128xbf16>
    %cst_76 = arith.constant dense<0.000000e+00> : vector<1x512xf32>
    %405 = tpu.matmul %404, %255, %cst_76 {dimension_numbers = #tpu.dot_dimension_numbers<[1], [0], [0], [1], [0, 0, 1, 1], [], []>} : vector<1x128xbf16>, vector<128x512xbf16>, vector<1x512xf32> -> vector<1x512xf32>
    %406 = arith.addf %403, %405 : vector<1x512xf32>
    %407 = vector.extract_strided_slice %406 {offsets = [0, 0], sizes = [1, 128], strides = [1, 1]} : vector<1x512xf32> to vector<1x128xf32>
    %408 = arith.negf %407 : vector<1x128xf32>
    %409 = math.exp %408 : vector<1x128xf32>
    %cst_77 = arith.constant 1.000000e+00 : f32
    %410 = vector.broadcast %cst_77 : f32 to vector<1x128xf32>
    %411 = arith.addf %410, %409 : vector<1x128xf32>
    %412 = arith.divf %410, %411 : vector<1x128xf32>
    %413 = vector.extract_strided_slice %406 {offsets = [0, 128], sizes = [1, 128], strides = [1, 1]} : vector<1x512xf32> to vector<1x128xf32>
    %414 = arith.negf %413 : vector<1x128xf32>
    %415 = math.exp %414 : vector<1x128xf32>
    %cst_78 = arith.constant 1.000000e+00 : f32
    %416 = vector.broadcast %cst_78 : f32 to vector<1x128xf32>
    %417 = arith.addf %416, %415 : vector<1x128xf32>
    %418 = arith.divf %416, %417 : vector<1x128xf32>
    %419 = vector.extract_strided_slice %406 {offsets = [0, 256], sizes = [1, 128], strides = [1, 1]} : vector<1x512xf32> to vector<1x128xf32>
    %420 = math.tanh %419 : vector<1x128xf32>
    %421 = vector.extract_strided_slice %406 {offsets = [0, 384], sizes = [1, 128], strides = [1, 1]} : vector<1x512xf32> to vector<1x128xf32>
    %422 = arith.negf %421 : vector<1x128xf32>
    %423 = math.exp %422 : vector<1x128xf32>
    %cst_79 = arith.constant 1.000000e+00 : f32
    %424 = vector.broadcast %cst_79 : f32 to vector<1x128xf32>
    %425 = arith.addf %424, %423 : vector<1x128xf32>
    %426 = arith.divf %424, %425 : vector<1x128xf32>
    %427 = arith.mulf %418, %400 : vector<1x128xf32>
    %428 = arith.mulf %412, %420 : vector<1x128xf32>
    %429 = arith.addf %427, %428 : vector<1x128xf32>
    %430 = math.tanh %429 : vector<1x128xf32>
    %431 = arith.mulf %426, %430 : vector<1x128xf32>
    %432 = vector.extract_strided_slice %254 {offsets = [1, 0], sizes = [1, 512], strides = [1, 1]} : vector<8x512xf32> to vector<1x512xf32>
    %433 = arith.truncf %431 : vector<1x128xf32> to vector<1x128xbf16>
    %cst_80 = arith.constant dense<0.000000e+00> : vector<1x512xf32>
    %434 = tpu.matmul %433, %255, %cst_80 {dimension_numbers = #tpu.dot_dimension_numbers<[1], [0], [0], [1], [0, 0, 1, 1], [], []>} : vector<1x128xbf16>, vector<128x512xbf16>, vector<1x512xf32> -> vector<1x512xf32>
    %435 = arith.addf %432, %434 : vector<1x512xf32>
    %436 = vector.extract_strided_slice %435 {offsets = [0, 0], sizes = [1, 128], strides = [1, 1]} : vector<1x512xf32> to vector<1x128xf32>
    %437 = arith.negf %436 : vector<1x128xf32>
    %438 = math.exp %437 : vector<1x128xf32>
    %cst_81 = arith.constant 1.000000e+00 : f32
    %439 = vector.broadcast %cst_81 : f32 to vector<1x128xf32>
    %440 = arith.addf %439, %438 : vector<1x128xf32>
    %441 = arith.divf %439, %440 : vector<1x128xf32>
    %442 = vector.extract_strided_slice %435 {offsets = [0, 128], sizes = [1, 128], strides = [1, 1]} : vector<1x512xf32> to vector<1x128xf32>
    %443 = arith.negf %442 : vector<1x128xf32>
    %444 = math.exp %443 : vector<1x128xf32>
    %cst_82 = arith.constant 1.000000e+00 : f32
    %445 = vector.broadcast %cst_82 : f32 to vector<1x128xf32>
    %446 = arith.addf %445, %444 : vector<1x128xf32>
    %447 = arith.divf %445, %446 : vector<1x128xf32>
    %448 = vector.extract_strided_slice %435 {offsets = [0, 256], sizes = [1, 128], strides = [1, 1]} : vector<1x512xf32> to vector<1x128xf32>
    %449 = math.tanh %448 : vector<1x128xf32>
    %450 = vector.extract_strided_slice %435 {offsets = [0, 384], sizes = [1, 128], strides = [1, 1]} : vector<1x512xf32> to vector<1x128xf32>
    %451 = arith.negf %450 : vector<1x128xf32>
    %452 = math.exp %451 : vector<1x128xf32>
    %cst_83 = arith.constant 1.000000e+00 : f32
    %453 = vector.broadcast %cst_83 : f32 to vector<1x128xf32>
    %454 = arith.addf %453, %452 : vector<1x128xf32>
    %455 = arith.divf %453, %454 : vector<1x128xf32>
    %456 = arith.mulf %447, %429 : vector<1x128xf32>
    %457 = arith.mulf %441, %449 : vector<1x128xf32>
    %458 = arith.addf %456, %457 : vector<1x128xf32>
    %459 = math.tanh %458 : vector<1x128xf32>
    %460 = arith.mulf %455, %459 : vector<1x128xf32>
    %461 = vector.extract_strided_slice %254 {offsets = [0, 0], sizes = [1, 512], strides = [1, 1]} : vector<8x512xf32> to vector<1x512xf32>
    %462 = arith.truncf %460 : vector<1x128xf32> to vector<1x128xbf16>
    %cst_84 = arith.constant dense<0.000000e+00> : vector<1x512xf32>
    %463 = tpu.matmul %462, %255, %cst_84 {dimension_numbers = #tpu.dot_dimension_numbers<[1], [0], [0], [1], [0, 0, 1, 1], [], []>} : vector<1x128xbf16>, vector<128x512xbf16>, vector<1x512xf32> -> vector<1x512xf32>
    %464 = arith.addf %461, %463 : vector<1x512xf32>
    %465 = vector.extract_strided_slice %464 {offsets = [0, 0], sizes = [1, 128], strides = [1, 1]} : vector<1x512xf32> to vector<1x128xf32>
    %466 = arith.negf %465 : vector<1x128xf32>
    %467 = math.exp %466 : vector<1x128xf32>
    %cst_85 = arith.constant 1.000000e+00 : f32
    %468 = vector.broadcast %cst_85 : f32 to vector<1x128xf32>
    %469 = arith.addf %468, %467 : vector<1x128xf32>
    %470 = arith.divf %468, %469 : vector<1x128xf32>
    %471 = vector.extract_strided_slice %464 {offsets = [0, 128], sizes = [1, 128], strides = [1, 1]} : vector<1x512xf32> to vector<1x128xf32>
    %472 = arith.negf %471 : vector<1x128xf32>
    %473 = math.exp %472 : vector<1x128xf32>
    %cst_86 = arith.constant 1.000000e+00 : f32
    %474 = vector.broadcast %cst_86 : f32 to vector<1x128xf32>
    %475 = arith.addf %474, %473 : vector<1x128xf32>
    %476 = arith.divf %474, %475 : vector<1x128xf32>
    %477 = vector.extract_strided_slice %464 {offsets = [0, 256], sizes = [1, 128], strides = [1, 1]} : vector<1x512xf32> to vector<1x128xf32>
    %478 = math.tanh %477 : vector<1x128xf32>
    %479 = vector.extract_strided_slice %464 {offsets = [0, 384], sizes = [1, 128], strides = [1, 1]} : vector<1x512xf32> to vector<1x128xf32>
    %480 = arith.negf %479 : vector<1x128xf32>
    %481 = math.exp %480 : vector<1x128xf32>
    %cst_87 = arith.constant 1.000000e+00 : f32
    %482 = vector.broadcast %cst_87 : f32 to vector<1x128xf32>
    %483 = arith.addf %482, %481 : vector<1x128xf32>
    %484 = arith.divf %482, %483 : vector<1x128xf32>
    %485 = arith.mulf %476, %458 : vector<1x128xf32>
    %486 = arith.mulf %470, %478 : vector<1x128xf32>
    %487 = arith.addf %485, %486 : vector<1x128xf32>
    %488 = math.tanh %487 : vector<1x128xf32>
    %489 = arith.mulf %484, %488 : vector<1x128xf32>
    %490 = tpu.concatenate %489, %460, %431, %402, %373, %344, %315, %286 in 0 : vector<1x128xf32>, vector<1x128xf32>, vector<1x128xf32>, vector<1x128xf32>, vector<1x128xf32>, vector<1x128xf32>, vector<1x128xf32>, vector<1x128xf32> -> vector<8x128xf32>
    %491 = tpu.concatenate %248, %490 in 1 : vector<8x128xf32>, vector<8x128xf32> -> vector<8x256xf32>
    %492 = arith.truncf %491 : vector<8x256xf32> to vector<8x256xbf16>
    %c0_88 = arith.constant 0 : index
    %c0_89 = arith.constant 0 : index
    %493 = vector.load %arg10[%c0_88, %c0_89] : memref<256x512xbf16, #tpu.memory_space<vmem>>, vector<256x512xbf16>
    %cst_90 = arith.constant dense<0.000000e+00> : vector<8x512xf32>
    %494 = tpu.matmul %492, %493, %cst_90 {dimension_numbers = #tpu.dot_dimension_numbers<[1], [0], [0], [1], [0, 0, 1, 1], [], []>} : vector<8x256xbf16>, vector<256x512xbf16>, vector<8x512xf32> -> vector<8x512xf32>
    %c0_91 = arith.constant 0 : index
    %c0_92 = arith.constant 0 : index
    %495 = vector.load %arg12[%c0_91, %c0_92] : memref<1x512xf32, #tpu.memory_space<vmem>>, vector<1x512xf32>
    %496 = vector.broadcast %495 : vector<1x512xf32> to vector<8x512xf32>
    %497 = arith.addf %494, %496 : vector<8x512xf32>
    %c0_93 = arith.constant 0 : index
    %c0_94 = arith.constant 0 : index
    %498 = vector.load %arg11[%c0_93, %c0_94] : memref<128x512xbf16, #tpu.memory_space<vmem>>, vector<128x512xbf16>
    %cst_95 = arith.constant 0.000000e+00 : f32
    %499 = vector.broadcast %cst_95 : f32 to vector<1x128xf32>
    %cst_96 = arith.constant 0.000000e+00 : f32
    %500 = vector.broadcast %cst_96 : f32 to vector<1x128xf32>
    %501 = vector.extract_strided_slice %497 {offsets = [0, 0], sizes = [1, 512], strides = [1, 1]} : vector<8x512xf32> to vector<1x512xf32>
    %502 = arith.truncf %499 : vector<1x128xf32> to vector<1x128xbf16>
    %cst_97 = arith.constant dense<0.000000e+00> : vector<1x512xf32>
    %503 = tpu.matmul %502, %498, %cst_97 {dimension_numbers = #tpu.dot_dimension_numbers<[1], [0], [0], [1], [0, 0, 1, 1], [], []>} : vector<1x128xbf16>, vector<128x512xbf16>, vector<1x512xf32> -> vector<1x512xf32>
    %504 = arith.addf %501, %503 : vector<1x512xf32>
    %505 = vector.extract_strided_slice %504 {offsets = [0, 0], sizes = [1, 128], strides = [1, 1]} : vector<1x512xf32> to vector<1x128xf32>
    %506 = arith.negf %505 : vector<1x128xf32>
    %507 = math.exp %506 : vector<1x128xf32>
    %cst_98 = arith.constant 1.000000e+00 : f32
    %508 = vector.broadcast %cst_98 : f32 to vector<1x128xf32>
    %509 = arith.addf %508, %507 : vector<1x128xf32>
    %510 = arith.divf %508, %509 : vector<1x128xf32>
    %511 = vector.extract_strided_slice %504 {offsets = [0, 128], sizes = [1, 128], strides = [1, 1]} : vector<1x512xf32> to vector<1x128xf32>
    %512 = arith.negf %511 : vector<1x128xf32>
    %513 = math.exp %512 : vector<1x128xf32>
    %cst_99 = arith.constant 1.000000e+00 : f32
    %514 = vector.broadcast %cst_99 : f32 to vector<1x128xf32>
    %515 = arith.addf %514, %513 : vector<1x128xf32>
    %516 = arith.divf %514, %515 : vector<1x128xf32>
    %517 = vector.extract_strided_slice %504 {offsets = [0, 256], sizes = [1, 128], strides = [1, 1]} : vector<1x512xf32> to vector<1x128xf32>
    %518 = math.tanh %517 : vector<1x128xf32>
    %519 = vector.extract_strided_slice %504 {offsets = [0, 384], sizes = [1, 128], strides = [1, 1]} : vector<1x512xf32> to vector<1x128xf32>
    %520 = arith.negf %519 : vector<1x128xf32>
    %521 = math.exp %520 : vector<1x128xf32>
    %cst_100 = arith.constant 1.000000e+00 : f32
    %522 = vector.broadcast %cst_100 : f32 to vector<1x128xf32>
    %523 = arith.addf %522, %521 : vector<1x128xf32>
    %524 = arith.divf %522, %523 : vector<1x128xf32>
    %525 = arith.mulf %516, %500 : vector<1x128xf32>
    %526 = arith.mulf %510, %518 : vector<1x128xf32>
    %527 = arith.addf %525, %526 : vector<1x128xf32>
    %528 = math.tanh %527 : vector<1x128xf32>
    %529 = arith.mulf %524, %528 : vector<1x128xf32>
    %530 = vector.extract_strided_slice %497 {offsets = [1, 0], sizes = [1, 512], strides = [1, 1]} : vector<8x512xf32> to vector<1x512xf32>
    %531 = arith.truncf %529 : vector<1x128xf32> to vector<1x128xbf16>
    %cst_101 = arith.constant dense<0.000000e+00> : vector<1x512xf32>
    %532 = tpu.matmul %531, %498, %cst_101 {dimension_numbers = #tpu.dot_dimension_numbers<[1], [0], [0], [1], [0, 0, 1, 1], [], []>} : vector<1x128xbf16>, vector<128x512xbf16>, vector<1x512xf32> -> vector<1x512xf32>
    %533 = arith.addf %530, %532 : vector<1x512xf32>
    %534 = vector.extract_strided_slice %533 {offsets = [0, 0], sizes = [1, 128], strides = [1, 1]} : vector<1x512xf32> to vector<1x128xf32>
    %535 = arith.negf %534 : vector<1x128xf32>
    %536 = math.exp %535 : vector<1x128xf32>
    %cst_102 = arith.constant 1.000000e+00 : f32
    %537 = vector.broadcast %cst_102 : f32 to vector<1x128xf32>
    %538 = arith.addf %537, %536 : vector<1x128xf32>
    %539 = arith.divf %537, %538 : vector<1x128xf32>
    %540 = vector.extract_strided_slice %533 {offsets = [0, 128], sizes = [1, 128], strides = [1, 1]} : vector<1x512xf32> to vector<1x128xf32>
    %541 = arith.negf %540 : vector<1x128xf32>
    %542 = math.exp %541 : vector<1x128xf32>
    %cst_103 = arith.constant 1.000000e+00 : f32
    %543 = vector.broadcast %cst_103 : f32 to vector<1x128xf32>
    %544 = arith.addf %543, %542 : vector<1x128xf32>
    %545 = arith.divf %543, %544 : vector<1x128xf32>
    %546 = vector.extract_strided_slice %533 {offsets = [0, 256], sizes = [1, 128], strides = [1, 1]} : vector<1x512xf32> to vector<1x128xf32>
    %547 = math.tanh %546 : vector<1x128xf32>
    %548 = vector.extract_strided_slice %533 {offsets = [0, 384], sizes = [1, 128], strides = [1, 1]} : vector<1x512xf32> to vector<1x128xf32>
    %549 = arith.negf %548 : vector<1x128xf32>
    %550 = math.exp %549 : vector<1x128xf32>
    %cst_104 = arith.constant 1.000000e+00 : f32
    %551 = vector.broadcast %cst_104 : f32 to vector<1x128xf32>
    %552 = arith.addf %551, %550 : vector<1x128xf32>
    %553 = arith.divf %551, %552 : vector<1x128xf32>
    %554 = arith.mulf %545, %527 : vector<1x128xf32>
    %555 = arith.mulf %539, %547 : vector<1x128xf32>
    %556 = arith.addf %554, %555 : vector<1x128xf32>
    %557 = math.tanh %556 : vector<1x128xf32>
    %558 = arith.mulf %553, %557 : vector<1x128xf32>
    %559 = vector.extract_strided_slice %497 {offsets = [2, 0], sizes = [1, 512], strides = [1, 1]} : vector<8x512xf32> to vector<1x512xf32>
    %560 = arith.truncf %558 : vector<1x128xf32> to vector<1x128xbf16>
    %cst_105 = arith.constant dense<0.000000e+00> : vector<1x512xf32>
    %561 = tpu.matmul %560, %498, %cst_105 {dimension_numbers = #tpu.dot_dimension_numbers<[1], [0], [0], [1], [0, 0, 1, 1], [], []>} : vector<1x128xbf16>, vector<128x512xbf16>, vector<1x512xf32> -> vector<1x512xf32>
    %562 = arith.addf %559, %561 : vector<1x512xf32>
    %563 = vector.extract_strided_slice %562 {offsets = [0, 0], sizes = [1, 128], strides = [1, 1]} : vector<1x512xf32> to vector<1x128xf32>
    %564 = arith.negf %563 : vector<1x128xf32>
    %565 = math.exp %564 : vector<1x128xf32>
    %cst_106 = arith.constant 1.000000e+00 : f32
    %566 = vector.broadcast %cst_106 : f32 to vector<1x128xf32>
    %567 = arith.addf %566, %565 : vector<1x128xf32>
    %568 = arith.divf %566, %567 : vector<1x128xf32>
    %569 = vector.extract_strided_slice %562 {offsets = [0, 128], sizes = [1, 128], strides = [1, 1]} : vector<1x512xf32> to vector<1x128xf32>
    %570 = arith.negf %569 : vector<1x128xf32>
    %571 = math.exp %570 : vector<1x128xf32>
    %cst_107 = arith.constant 1.000000e+00 : f32
    %572 = vector.broadcast %cst_107 : f32 to vector<1x128xf32>
    %573 = arith.addf %572, %571 : vector<1x128xf32>
    %574 = arith.divf %572, %573 : vector<1x128xf32>
    %575 = vector.extract_strided_slice %562 {offsets = [0, 256], sizes = [1, 128], strides = [1, 1]} : vector<1x512xf32> to vector<1x128xf32>
    %576 = math.tanh %575 : vector<1x128xf32>
    %577 = vector.extract_strided_slice %562 {offsets = [0, 384], sizes = [1, 128], strides = [1, 1]} : vector<1x512xf32> to vector<1x128xf32>
    %578 = arith.negf %577 : vector<1x128xf32>
    %579 = math.exp %578 : vector<1x128xf32>
    %cst_108 = arith.constant 1.000000e+00 : f32
    %580 = vector.broadcast %cst_108 : f32 to vector<1x128xf32>
    %581 = arith.addf %580, %579 : vector<1x128xf32>
    %582 = arith.divf %580, %581 : vector<1x128xf32>
    %583 = arith.mulf %574, %556 : vector<1x128xf32>
    %584 = arith.mulf %568, %576 : vector<1x128xf32>
    %585 = arith.addf %583, %584 : vector<1x128xf32>
    %586 = math.tanh %585 : vector<1x128xf32>
    %587 = arith.mulf %582, %586 : vector<1x128xf32>
    %588 = vector.extract_strided_slice %497 {offsets = [3, 0], sizes = [1, 512], strides = [1, 1]} : vector<8x512xf32> to vector<1x512xf32>
    %589 = arith.truncf %587 : vector<1x128xf32> to vector<1x128xbf16>
    %cst_109 = arith.constant dense<0.000000e+00> : vector<1x512xf32>
    %590 = tpu.matmul %589, %498, %cst_109 {dimension_numbers = #tpu.dot_dimension_numbers<[1], [0], [0], [1], [0, 0, 1, 1], [], []>} : vector<1x128xbf16>, vector<128x512xbf16>, vector<1x512xf32> -> vector<1x512xf32>
    %591 = arith.addf %588, %590 : vector<1x512xf32>
    %592 = vector.extract_strided_slice %591 {offsets = [0, 0], sizes = [1, 128], strides = [1, 1]} : vector<1x512xf32> to vector<1x128xf32>
    %593 = arith.negf %592 : vector<1x128xf32>
    %594 = math.exp %593 : vector<1x128xf32>
    %cst_110 = arith.constant 1.000000e+00 : f32
    %595 = vector.broadcast %cst_110 : f32 to vector<1x128xf32>
    %596 = arith.addf %595, %594 : vector<1x128xf32>
    %597 = arith.divf %595, %596 : vector<1x128xf32>
    %598 = vector.extract_strided_slice %591 {offsets = [0, 128], sizes = [1, 128], strides = [1, 1]} : vector<1x512xf32> to vector<1x128xf32>
    %599 = arith.negf %598 : vector<1x128xf32>
    %600 = math.exp %599 : vector<1x128xf32>
    %cst_111 = arith.constant 1.000000e+00 : f32
    %601 = vector.broadcast %cst_111 : f32 to vector<1x128xf32>
    %602 = arith.addf %601, %600 : vector<1x128xf32>
    %603 = arith.divf %601, %602 : vector<1x128xf32>
    %604 = vector.extract_strided_slice %591 {offsets = [0, 256], sizes = [1, 128], strides = [1, 1]} : vector<1x512xf32> to vector<1x128xf32>
    %605 = math.tanh %604 : vector<1x128xf32>
    %606 = vector.extract_strided_slice %591 {offsets = [0, 384], sizes = [1, 128], strides = [1, 1]} : vector<1x512xf32> to vector<1x128xf32>
    %607 = arith.negf %606 : vector<1x128xf32>
    %608 = math.exp %607 : vector<1x128xf32>
    %cst_112 = arith.constant 1.000000e+00 : f32
    %609 = vector.broadcast %cst_112 : f32 to vector<1x128xf32>
    %610 = arith.addf %609, %608 : vector<1x128xf32>
    %611 = arith.divf %609, %610 : vector<1x128xf32>
    %612 = arith.mulf %603, %585 : vector<1x128xf32>
    %613 = arith.mulf %597, %605 : vector<1x128xf32>
    %614 = arith.addf %612, %613 : vector<1x128xf32>
    %615 = math.tanh %614 : vector<1x128xf32>
    %616 = arith.mulf %611, %615 : vector<1x128xf32>
    %617 = vector.extract_strided_slice %497 {offsets = [4, 0], sizes = [1, 512], strides = [1, 1]} : vector<8x512xf32> to vector<1x512xf32>
    %618 = arith.truncf %616 : vector<1x128xf32> to vector<1x128xbf16>
    %cst_113 = arith.constant dense<0.000000e+00> : vector<1x512xf32>
    %619 = tpu.matmul %618, %498, %cst_113 {dimension_numbers = #tpu.dot_dimension_numbers<[1], [0], [0], [1], [0, 0, 1, 1], [], []>} : vector<1x128xbf16>, vector<128x512xbf16>, vector<1x512xf32> -> vector<1x512xf32>
    %620 = arith.addf %617, %619 : vector<1x512xf32>
    %621 = vector.extract_strided_slice %620 {offsets = [0, 0], sizes = [1, 128], strides = [1, 1]} : vector<1x512xf32> to vector<1x128xf32>
    %622 = arith.negf %621 : vector<1x128xf32>
    %623 = math.exp %622 : vector<1x128xf32>
    %cst_114 = arith.constant 1.000000e+00 : f32
    %624 = vector.broadcast %cst_114 : f32 to vector<1x128xf32>
    %625 = arith.addf %624, %623 : vector<1x128xf32>
    %626 = arith.divf %624, %625 : vector<1x128xf32>
    %627 = vector.extract_strided_slice %620 {offsets = [0, 128], sizes = [1, 128], strides = [1, 1]} : vector<1x512xf32> to vector<1x128xf32>
    %628 = arith.negf %627 : vector<1x128xf32>
    %629 = math.exp %628 : vector<1x128xf32>
    %cst_115 = arith.constant 1.000000e+00 : f32
    %630 = vector.broadcast %cst_115 : f32 to vector<1x128xf32>
    %631 = arith.addf %630, %629 : vector<1x128xf32>
    %632 = arith.divf %630, %631 : vector<1x128xf32>
    %633 = vector.extract_strided_slice %620 {offsets = [0, 256], sizes = [1, 128], strides = [1, 1]} : vector<1x512xf32> to vector<1x128xf32>
    %634 = math.tanh %633 : vector<1x128xf32>
    %635 = vector.extract_strided_slice %620 {offsets = [0, 384], sizes = [1, 128], strides = [1, 1]} : vector<1x512xf32> to vector<1x128xf32>
    %636 = arith.negf %635 : vector<1x128xf32>
    %637 = math.exp %636 : vector<1x128xf32>
    %cst_116 = arith.constant 1.000000e+00 : f32
    %638 = vector.broadcast %cst_116 : f32 to vector<1x128xf32>
    %639 = arith.addf %638, %637 : vector<1x128xf32>
    %640 = arith.divf %638, %639 : vector<1x128xf32>
    %641 = arith.mulf %632, %614 : vector<1x128xf32>
    %642 = arith.mulf %626, %634 : vector<1x128xf32>
    %643 = arith.addf %641, %642 : vector<1x128xf32>
    %644 = math.tanh %643 : vector<1x128xf32>
    %645 = arith.mulf %640, %644 : vector<1x128xf32>
    %646 = vector.extract_strided_slice %497 {offsets = [5, 0], sizes = [1, 512], strides = [1, 1]} : vector<8x512xf32> to vector<1x512xf32>
    %647 = arith.truncf %645 : vector<1x128xf32> to vector<1x128xbf16>
    %cst_117 = arith.constant dense<0.000000e+00> : vector<1x512xf32>
    %648 = tpu.matmul %647, %498, %cst_117 {dimension_numbers = #tpu.dot_dimension_numbers<[1], [0], [0], [1], [0, 0, 1, 1], [], []>} : vector<1x128xbf16>, vector<128x512xbf16>, vector<1x512xf32> -> vector<1x512xf32>
    %649 = arith.addf %646, %648 : vector<1x512xf32>
    %650 = vector.extract_strided_slice %649 {offsets = [0, 0], sizes = [1, 128], strides = [1, 1]} : vector<1x512xf32> to vector<1x128xf32>
    %651 = arith.negf %650 : vector<1x128xf32>
    %652 = math.exp %651 : vector<1x128xf32>
    %cst_118 = arith.constant 1.000000e+00 : f32
    %653 = vector.broadcast %cst_118 : f32 to vector<1x128xf32>
    %654 = arith.addf %653, %652 : vector<1x128xf32>
    %655 = arith.divf %653, %654 : vector<1x128xf32>
    %656 = vector.extract_strided_slice %649 {offsets = [0, 128], sizes = [1, 128], strides = [1, 1]} : vector<1x512xf32> to vector<1x128xf32>
    %657 = arith.negf %656 : vector<1x128xf32>
    %658 = math.exp %657 : vector<1x128xf32>
    %cst_119 = arith.constant 1.000000e+00 : f32
    %659 = vector.broadcast %cst_119 : f32 to vector<1x128xf32>
    %660 = arith.addf %659, %658 : vector<1x128xf32>
    %661 = arith.divf %659, %660 : vector<1x128xf32>
    %662 = vector.extract_strided_slice %649 {offsets = [0, 256], sizes = [1, 128], strides = [1, 1]} : vector<1x512xf32> to vector<1x128xf32>
    %663 = math.tanh %662 : vector<1x128xf32>
    %664 = vector.extract_strided_slice %649 {offsets = [0, 384], sizes = [1, 128], strides = [1, 1]} : vector<1x512xf32> to vector<1x128xf32>
    %665 = arith.negf %664 : vector<1x128xf32>
    %666 = math.exp %665 : vector<1x128xf32>
    %cst_120 = arith.constant 1.000000e+00 : f32
    %667 = vector.broadcast %cst_120 : f32 to vector<1x128xf32>
    %668 = arith.addf %667, %666 : vector<1x128xf32>
    %669 = arith.divf %667, %668 : vector<1x128xf32>
    %670 = arith.mulf %661, %643 : vector<1x128xf32>
    %671 = arith.mulf %655, %663 : vector<1x128xf32>
    %672 = arith.addf %670, %671 : vector<1x128xf32>
    %673 = math.tanh %672 : vector<1x128xf32>
    %674 = arith.mulf %669, %673 : vector<1x128xf32>
    %675 = vector.extract_strided_slice %497 {offsets = [6, 0], sizes = [1, 512], strides = [1, 1]} : vector<8x512xf32> to vector<1x512xf32>
    %676 = arith.truncf %674 : vector<1x128xf32> to vector<1x128xbf16>
    %cst_121 = arith.constant dense<0.000000e+00> : vector<1x512xf32>
    %677 = tpu.matmul %676, %498, %cst_121 {dimension_numbers = #tpu.dot_dimension_numbers<[1], [0], [0], [1], [0, 0, 1, 1], [], []>} : vector<1x128xbf16>, vector<128x512xbf16>, vector<1x512xf32> -> vector<1x512xf32>
    %678 = arith.addf %675, %677 : vector<1x512xf32>
    %679 = vector.extract_strided_slice %678 {offsets = [0, 0], sizes = [1, 128], strides = [1, 1]} : vector<1x512xf32> to vector<1x128xf32>
    %680 = arith.negf %679 : vector<1x128xf32>
    %681 = math.exp %680 : vector<1x128xf32>
    %cst_122 = arith.constant 1.000000e+00 : f32
    %682 = vector.broadcast %cst_122 : f32 to vector<1x128xf32>
    %683 = arith.addf %682, %681 : vector<1x128xf32>
    %684 = arith.divf %682, %683 : vector<1x128xf32>
    %685 = vector.extract_strided_slice %678 {offsets = [0, 128], sizes = [1, 128], strides = [1, 1]} : vector<1x512xf32> to vector<1x128xf32>
    %686 = arith.negf %685 : vector<1x128xf32>
    %687 = math.exp %686 : vector<1x128xf32>
    %cst_123 = arith.constant 1.000000e+00 : f32
    %688 = vector.broadcast %cst_123 : f32 to vector<1x128xf32>
    %689 = arith.addf %688, %687 : vector<1x128xf32>
    %690 = arith.divf %688, %689 : vector<1x128xf32>
    %691 = vector.extract_strided_slice %678 {offsets = [0, 256], sizes = [1, 128], strides = [1, 1]} : vector<1x512xf32> to vector<1x128xf32>
    %692 = math.tanh %691 : vector<1x128xf32>
    %693 = vector.extract_strided_slice %678 {offsets = [0, 384], sizes = [1, 128], strides = [1, 1]} : vector<1x512xf32> to vector<1x128xf32>
    %694 = arith.negf %693 : vector<1x128xf32>
    %695 = math.exp %694 : vector<1x128xf32>
    %cst_124 = arith.constant 1.000000e+00 : f32
    %696 = vector.broadcast %cst_124 : f32 to vector<1x128xf32>
    %697 = arith.addf %696, %695 : vector<1x128xf32>
    %698 = arith.divf %696, %697 : vector<1x128xf32>
    %699 = arith.mulf %690, %672 : vector<1x128xf32>
    %700 = arith.mulf %684, %692 : vector<1x128xf32>
    %701 = arith.addf %699, %700 : vector<1x128xf32>
    %702 = math.tanh %701 : vector<1x128xf32>
    %703 = arith.mulf %698, %702 : vector<1x128xf32>
    %704 = vector.extract_strided_slice %497 {offsets = [7, 0], sizes = [1, 512], strides = [1, 1]} : vector<8x512xf32> to vector<1x512xf32>
    %705 = arith.truncf %703 : vector<1x128xf32> to vector<1x128xbf16>
    %cst_125 = arith.constant dense<0.000000e+00> : vector<1x512xf32>
    %706 = tpu.matmul %705, %498, %cst_125 {dimension_numbers = #tpu.dot_dimension_numbers<[1], [0], [0], [1], [0, 0, 1, 1], [], []>} : vector<1x128xbf16>, vector<128x512xbf16>, vector<1x512xf32> -> vector<1x512xf32>
    %707 = arith.addf %704, %706 : vector<1x512xf32>
    %708 = vector.extract_strided_slice %707 {offsets = [0, 0], sizes = [1, 128], strides = [1, 1]} : vector<1x512xf32> to vector<1x128xf32>
    %709 = arith.negf %708 : vector<1x128xf32>
    %710 = math.exp %709 : vector<1x128xf32>
    %cst_126 = arith.constant 1.000000e+00 : f32
    %711 = vector.broadcast %cst_126 : f32 to vector<1x128xf32>
    %712 = arith.addf %711, %710 : vector<1x128xf32>
    %713 = arith.divf %711, %712 : vector<1x128xf32>
    %714 = vector.extract_strided_slice %707 {offsets = [0, 128], sizes = [1, 128], strides = [1, 1]} : vector<1x512xf32> to vector<1x128xf32>
    %715 = arith.negf %714 : vector<1x128xf32>
    %716 = math.exp %715 : vector<1x128xf32>
    %cst_127 = arith.constant 1.000000e+00 : f32
    %717 = vector.broadcast %cst_127 : f32 to vector<1x128xf32>
    %718 = arith.addf %717, %716 : vector<1x128xf32>
    %719 = arith.divf %717, %718 : vector<1x128xf32>
    %720 = vector.extract_strided_slice %707 {offsets = [0, 256], sizes = [1, 128], strides = [1, 1]} : vector<1x512xf32> to vector<1x128xf32>
    %721 = math.tanh %720 : vector<1x128xf32>
    %722 = vector.extract_strided_slice %707 {offsets = [0, 384], sizes = [1, 128], strides = [1, 1]} : vector<1x512xf32> to vector<1x128xf32>
    %723 = arith.negf %722 : vector<1x128xf32>
    %724 = math.exp %723 : vector<1x128xf32>
    %cst_128 = arith.constant 1.000000e+00 : f32
    %725 = vector.broadcast %cst_128 : f32 to vector<1x128xf32>
    %726 = arith.addf %725, %724 : vector<1x128xf32>
    %727 = arith.divf %725, %726 : vector<1x128xf32>
    %728 = arith.mulf %719, %701 : vector<1x128xf32>
    %729 = arith.mulf %713, %721 : vector<1x128xf32>
    %730 = arith.addf %728, %729 : vector<1x128xf32>
    %731 = math.tanh %730 : vector<1x128xf32>
    %732 = arith.mulf %727, %731 : vector<1x128xf32>
    %733 = tpu.concatenate %529, %558, %587, %616, %645, %674, %703, %732 in 0 : vector<1x128xf32>, vector<1x128xf32>, vector<1x128xf32>, vector<1x128xf32>, vector<1x128xf32>, vector<1x128xf32>, vector<1x128xf32>, vector<1x128xf32> -> vector<8x128xf32>
    %734 = arith.truncf %491 : vector<8x256xf32> to vector<8x256xbf16>
    %c0_129 = arith.constant 0 : index
    %c0_130 = arith.constant 0 : index
    %735 = vector.load %arg13[%c0_129, %c0_130] : memref<256x512xbf16, #tpu.memory_space<vmem>>, vector<256x512xbf16>
    %cst_131 = arith.constant dense<0.000000e+00> : vector<8x512xf32>
    %736 = tpu.matmul %734, %735, %cst_131 {dimension_numbers = #tpu.dot_dimension_numbers<[1], [0], [0], [1], [0, 0, 1, 1], [], []>} : vector<8x256xbf16>, vector<256x512xbf16>, vector<8x512xf32> -> vector<8x512xf32>
    %c0_132 = arith.constant 0 : index
    %c0_133 = arith.constant 0 : index
    %737 = vector.load %arg15[%c0_132, %c0_133] : memref<1x512xf32, #tpu.memory_space<vmem>>, vector<1x512xf32>
    %738 = vector.broadcast %737 : vector<1x512xf32> to vector<8x512xf32>
    %739 = arith.addf %736, %738 : vector<8x512xf32>
    %c0_134 = arith.constant 0 : index
    %c0_135 = arith.constant 0 : index
    %740 = vector.load %arg14[%c0_134, %c0_135] : memref<128x512xbf16, #tpu.memory_space<vmem>>, vector<128x512xbf16>
    %cst_136 = arith.constant 0.000000e+00 : f32
    %741 = vector.broadcast %cst_136 : f32 to vector<1x128xf32>
    %cst_137 = arith.constant 0.000000e+00 : f32
    %742 = vector.broadcast %cst_137 : f32 to vector<1x128xf32>
    %743 = vector.extract_strided_slice %739 {offsets = [7, 0], sizes = [1, 512], strides = [1, 1]} : vector<8x512xf32> to vector<1x512xf32>
    %744 = arith.truncf %741 : vector<1x128xf32> to vector<1x128xbf16>
    %cst_138 = arith.constant dense<0.000000e+00> : vector<1x512xf32>
    %745 = tpu.matmul %744, %740, %cst_138 {dimension_numbers = #tpu.dot_dimension_numbers<[1], [0], [0], [1], [0, 0, 1, 1], [], []>} : vector<1x128xbf16>, vector<128x512xbf16>, vector<1x512xf32> -> vector<1x512xf32>
    %746 = arith.addf %743, %745 : vector<1x512xf32>
    %747 = vector.extract_strided_slice %746 {offsets = [0, 0], sizes = [1, 128], strides = [1, 1]} : vector<1x512xf32> to vector<1x128xf32>
    %748 = arith.negf %747 : vector<1x128xf32>
    %749 = math.exp %748 : vector<1x128xf32>
    %cst_139 = arith.constant 1.000000e+00 : f32
    %750 = vector.broadcast %cst_139 : f32 to vector<1x128xf32>
    %751 = arith.addf %750, %749 : vector<1x128xf32>
    %752 = arith.divf %750, %751 : vector<1x128xf32>
    %753 = vector.extract_strided_slice %746 {offsets = [0, 128], sizes = [1, 128], strides = [1, 1]} : vector<1x512xf32> to vector<1x128xf32>
    %754 = arith.negf %753 : vector<1x128xf32>
    %755 = math.exp %754 : vector<1x128xf32>
    %cst_140 = arith.constant 1.000000e+00 : f32
    %756 = vector.broadcast %cst_140 : f32 to vector<1x128xf32>
    %757 = arith.addf %756, %755 : vector<1x128xf32>
    %758 = arith.divf %756, %757 : vector<1x128xf32>
    %759 = vector.extract_strided_slice %746 {offsets = [0, 256], sizes = [1, 128], strides = [1, 1]} : vector<1x512xf32> to vector<1x128xf32>
    %760 = math.tanh %759 : vector<1x128xf32>
    %761 = vector.extract_strided_slice %746 {offsets = [0, 384], sizes = [1, 128], strides = [1, 1]} : vector<1x512xf32> to vector<1x128xf32>
    %762 = arith.negf %761 : vector<1x128xf32>
    %763 = math.exp %762 : vector<1x128xf32>
    %cst_141 = arith.constant 1.000000e+00 : f32
    %764 = vector.broadcast %cst_141 : f32 to vector<1x128xf32>
    %765 = arith.addf %764, %763 : vector<1x128xf32>
    %766 = arith.divf %764, %765 : vector<1x128xf32>
    %767 = arith.mulf %758, %742 : vector<1x128xf32>
    %768 = arith.mulf %752, %760 : vector<1x128xf32>
    %769 = arith.addf %767, %768 : vector<1x128xf32>
    %770 = math.tanh %769 : vector<1x128xf32>
    %771 = arith.mulf %766, %770 : vector<1x128xf32>
    %772 = vector.extract_strided_slice %739 {offsets = [6, 0], sizes = [1, 512], strides = [1, 1]} : vector<8x512xf32> to vector<1x512xf32>
    %773 = arith.truncf %771 : vector<1x128xf32> to vector<1x128xbf16>
    %cst_142 = arith.constant dense<0.000000e+00> : vector<1x512xf32>
    %774 = tpu.matmul %773, %740, %cst_142 {dimension_numbers = #tpu.dot_dimension_numbers<[1], [0], [0], [1], [0, 0, 1, 1], [], []>} : vector<1x128xbf16>, vector<128x512xbf16>, vector<1x512xf32> -> vector<1x512xf32>
    %775 = arith.addf %772, %774 : vector<1x512xf32>
    %776 = vector.extract_strided_slice %775 {offsets = [0, 0], sizes = [1, 128], strides = [1, 1]} : vector<1x512xf32> to vector<1x128xf32>
    %777 = arith.negf %776 : vector<1x128xf32>
    %778 = math.exp %777 : vector<1x128xf32>
    %cst_143 = arith.constant 1.000000e+00 : f32
    %779 = vector.broadcast %cst_143 : f32 to vector<1x128xf32>
    %780 = arith.addf %779, %778 : vector<1x128xf32>
    %781 = arith.divf %779, %780 : vector<1x128xf32>
    %782 = vector.extract_strided_slice %775 {offsets = [0, 128], sizes = [1, 128], strides = [1, 1]} : vector<1x512xf32> to vector<1x128xf32>
    %783 = arith.negf %782 : vector<1x128xf32>
    %784 = math.exp %783 : vector<1x128xf32>
    %cst_144 = arith.constant 1.000000e+00 : f32
    %785 = vector.broadcast %cst_144 : f32 to vector<1x128xf32>
    %786 = arith.addf %785, %784 : vector<1x128xf32>
    %787 = arith.divf %785, %786 : vector<1x128xf32>
    %788 = vector.extract_strided_slice %775 {offsets = [0, 256], sizes = [1, 128], strides = [1, 1]} : vector<1x512xf32> to vector<1x128xf32>
    %789 = math.tanh %788 : vector<1x128xf32>
    %790 = vector.extract_strided_slice %775 {offsets = [0, 384], sizes = [1, 128], strides = [1, 1]} : vector<1x512xf32> to vector<1x128xf32>
    %791 = arith.negf %790 : vector<1x128xf32>
    %792 = math.exp %791 : vector<1x128xf32>
    %cst_145 = arith.constant 1.000000e+00 : f32
    %793 = vector.broadcast %cst_145 : f32 to vector<1x128xf32>
    %794 = arith.addf %793, %792 : vector<1x128xf32>
    %795 = arith.divf %793, %794 : vector<1x128xf32>
    %796 = arith.mulf %787, %769 : vector<1x128xf32>
    %797 = arith.mulf %781, %789 : vector<1x128xf32>
    %798 = arith.addf %796, %797 : vector<1x128xf32>
    %799 = math.tanh %798 : vector<1x128xf32>
    %800 = arith.mulf %795, %799 : vector<1x128xf32>
    %801 = vector.extract_strided_slice %739 {offsets = [5, 0], sizes = [1, 512], strides = [1, 1]} : vector<8x512xf32> to vector<1x512xf32>
    %802 = arith.truncf %800 : vector<1x128xf32> to vector<1x128xbf16>
    %cst_146 = arith.constant dense<0.000000e+00> : vector<1x512xf32>
    %803 = tpu.matmul %802, %740, %cst_146 {dimension_numbers = #tpu.dot_dimension_numbers<[1], [0], [0], [1], [0, 0, 1, 1], [], []>} : vector<1x128xbf16>, vector<128x512xbf16>, vector<1x512xf32> -> vector<1x512xf32>
    %804 = arith.addf %801, %803 : vector<1x512xf32>
    %805 = vector.extract_strided_slice %804 {offsets = [0, 0], sizes = [1, 128], strides = [1, 1]} : vector<1x512xf32> to vector<1x128xf32>
    %806 = arith.negf %805 : vector<1x128xf32>
    %807 = math.exp %806 : vector<1x128xf32>
    %cst_147 = arith.constant 1.000000e+00 : f32
    %808 = vector.broadcast %cst_147 : f32 to vector<1x128xf32>
    %809 = arith.addf %808, %807 : vector<1x128xf32>
    %810 = arith.divf %808, %809 : vector<1x128xf32>
    %811 = vector.extract_strided_slice %804 {offsets = [0, 128], sizes = [1, 128], strides = [1, 1]} : vector<1x512xf32> to vector<1x128xf32>
    %812 = arith.negf %811 : vector<1x128xf32>
    %813 = math.exp %812 : vector<1x128xf32>
    %cst_148 = arith.constant 1.000000e+00 : f32
    %814 = vector.broadcast %cst_148 : f32 to vector<1x128xf32>
    %815 = arith.addf %814, %813 : vector<1x128xf32>
    %816 = arith.divf %814, %815 : vector<1x128xf32>
    %817 = vector.extract_strided_slice %804 {offsets = [0, 256], sizes = [1, 128], strides = [1, 1]} : vector<1x512xf32> to vector<1x128xf32>
    %818 = math.tanh %817 : vector<1x128xf32>
    %819 = vector.extract_strided_slice %804 {offsets = [0, 384], sizes = [1, 128], strides = [1, 1]} : vector<1x512xf32> to vector<1x128xf32>
    %820 = arith.negf %819 : vector<1x128xf32>
    %821 = math.exp %820 : vector<1x128xf32>
    %cst_149 = arith.constant 1.000000e+00 : f32
    %822 = vector.broadcast %cst_149 : f32 to vector<1x128xf32>
    %823 = arith.addf %822, %821 : vector<1x128xf32>
    %824 = arith.divf %822, %823 : vector<1x128xf32>
    %825 = arith.mulf %816, %798 : vector<1x128xf32>
    %826 = arith.mulf %810, %818 : vector<1x128xf32>
    %827 = arith.addf %825, %826 : vector<1x128xf32>
    %828 = math.tanh %827 : vector<1x128xf32>
    %829 = arith.mulf %824, %828 : vector<1x128xf32>
    %830 = vector.extract_strided_slice %739 {offsets = [4, 0], sizes = [1, 512], strides = [1, 1]} : vector<8x512xf32> to vector<1x512xf32>
    %831 = arith.truncf %829 : vector<1x128xf32> to vector<1x128xbf16>
    %cst_150 = arith.constant dense<0.000000e+00> : vector<1x512xf32>
    %832 = tpu.matmul %831, %740, %cst_150 {dimension_numbers = #tpu.dot_dimension_numbers<[1], [0], [0], [1], [0, 0, 1, 1], [], []>} : vector<1x128xbf16>, vector<128x512xbf16>, vector<1x512xf32> -> vector<1x512xf32>
    %833 = arith.addf %830, %832 : vector<1x512xf32>
    %834 = vector.extract_strided_slice %833 {offsets = [0, 0], sizes = [1, 128], strides = [1, 1]} : vector<1x512xf32> to vector<1x128xf32>
    %835 = arith.negf %834 : vector<1x128xf32>
    %836 = math.exp %835 : vector<1x128xf32>
    %cst_151 = arith.constant 1.000000e+00 : f32
    %837 = vector.broadcast %cst_151 : f32 to vector<1x128xf32>
    %838 = arith.addf %837, %836 : vector<1x128xf32>
    %839 = arith.divf %837, %838 : vector<1x128xf32>
    %840 = vector.extract_strided_slice %833 {offsets = [0, 128], sizes = [1, 128], strides = [1, 1]} : vector<1x512xf32> to vector<1x128xf32>
    %841 = arith.negf %840 : vector<1x128xf32>
    %842 = math.exp %841 : vector<1x128xf32>
    %cst_152 = arith.constant 1.000000e+00 : f32
    %843 = vector.broadcast %cst_152 : f32 to vector<1x128xf32>
    %844 = arith.addf %843, %842 : vector<1x128xf32>
    %845 = arith.divf %843, %844 : vector<1x128xf32>
    %846 = vector.extract_strided_slice %833 {offsets = [0, 256], sizes = [1, 128], strides = [1, 1]} : vector<1x512xf32> to vector<1x128xf32>
    %847 = math.tanh %846 : vector<1x128xf32>
    %848 = vector.extract_strided_slice %833 {offsets = [0, 384], sizes = [1, 128], strides = [1, 1]} : vector<1x512xf32> to vector<1x128xf32>
    %849 = arith.negf %848 : vector<1x128xf32>
    %850 = math.exp %849 : vector<1x128xf32>
    %cst_153 = arith.constant 1.000000e+00 : f32
    %851 = vector.broadcast %cst_153 : f32 to vector<1x128xf32>
    %852 = arith.addf %851, %850 : vector<1x128xf32>
    %853 = arith.divf %851, %852 : vector<1x128xf32>
    %854 = arith.mulf %845, %827 : vector<1x128xf32>
    %855 = arith.mulf %839, %847 : vector<1x128xf32>
    %856 = arith.addf %854, %855 : vector<1x128xf32>
    %857 = math.tanh %856 : vector<1x128xf32>
    %858 = arith.mulf %853, %857 : vector<1x128xf32>
    %859 = vector.extract_strided_slice %739 {offsets = [3, 0], sizes = [1, 512], strides = [1, 1]} : vector<8x512xf32> to vector<1x512xf32>
    %860 = arith.truncf %858 : vector<1x128xf32> to vector<1x128xbf16>
    %cst_154 = arith.constant dense<0.000000e+00> : vector<1x512xf32>
    %861 = tpu.matmul %860, %740, %cst_154 {dimension_numbers = #tpu.dot_dimension_numbers<[1], [0], [0], [1], [0, 0, 1, 1], [], []>} : vector<1x128xbf16>, vector<128x512xbf16>, vector<1x512xf32> -> vector<1x512xf32>
    %862 = arith.addf %859, %861 : vector<1x512xf32>
    %863 = vector.extract_strided_slice %862 {offsets = [0, 0], sizes = [1, 128], strides = [1, 1]} : vector<1x512xf32> to vector<1x128xf32>
    %864 = arith.negf %863 : vector<1x128xf32>
    %865 = math.exp %864 : vector<1x128xf32>
    %cst_155 = arith.constant 1.000000e+00 : f32
    %866 = vector.broadcast %cst_155 : f32 to vector<1x128xf32>
    %867 = arith.addf %866, %865 : vector<1x128xf32>
    %868 = arith.divf %866, %867 : vector<1x128xf32>
    %869 = vector.extract_strided_slice %862 {offsets = [0, 128], sizes = [1, 128], strides = [1, 1]} : vector<1x512xf32> to vector<1x128xf32>
    %870 = arith.negf %869 : vector<1x128xf32>
    %871 = math.exp %870 : vector<1x128xf32>
    %cst_156 = arith.constant 1.000000e+00 : f32
    %872 = vector.broadcast %cst_156 : f32 to vector<1x128xf32>
    %873 = arith.addf %872, %871 : vector<1x128xf32>
    %874 = arith.divf %872, %873 : vector<1x128xf32>
    %875 = vector.extract_strided_slice %862 {offsets = [0, 256], sizes = [1, 128], strides = [1, 1]} : vector<1x512xf32> to vector<1x128xf32>
    %876 = math.tanh %875 : vector<1x128xf32>
    %877 = vector.extract_strided_slice %862 {offsets = [0, 384], sizes = [1, 128], strides = [1, 1]} : vector<1x512xf32> to vector<1x128xf32>
    %878 = arith.negf %877 : vector<1x128xf32>
    %879 = math.exp %878 : vector<1x128xf32>
    %cst_157 = arith.constant 1.000000e+00 : f32
    %880 = vector.broadcast %cst_157 : f32 to vector<1x128xf32>
    %881 = arith.addf %880, %879 : vector<1x128xf32>
    %882 = arith.divf %880, %881 : vector<1x128xf32>
    %883 = arith.mulf %874, %856 : vector<1x128xf32>
    %884 = arith.mulf %868, %876 : vector<1x128xf32>
    %885 = arith.addf %883, %884 : vector<1x128xf32>
    %886 = math.tanh %885 : vector<1x128xf32>
    %887 = arith.mulf %882, %886 : vector<1x128xf32>
    %888 = vector.extract_strided_slice %739 {offsets = [2, 0], sizes = [1, 512], strides = [1, 1]} : vector<8x512xf32> to vector<1x512xf32>
    %889 = arith.truncf %887 : vector<1x128xf32> to vector<1x128xbf16>
    %cst_158 = arith.constant dense<0.000000e+00> : vector<1x512xf32>
    %890 = tpu.matmul %889, %740, %cst_158 {dimension_numbers = #tpu.dot_dimension_numbers<[1], [0], [0], [1], [0, 0, 1, 1], [], []>} : vector<1x128xbf16>, vector<128x512xbf16>, vector<1x512xf32> -> vector<1x512xf32>
    %891 = arith.addf %888, %890 : vector<1x512xf32>
    %892 = vector.extract_strided_slice %891 {offsets = [0, 0], sizes = [1, 128], strides = [1, 1]} : vector<1x512xf32> to vector<1x128xf32>
    %893 = arith.negf %892 : vector<1x128xf32>
    %894 = math.exp %893 : vector<1x128xf32>
    %cst_159 = arith.constant 1.000000e+00 : f32
    %895 = vector.broadcast %cst_159 : f32 to vector<1x128xf32>
    %896 = arith.addf %895, %894 : vector<1x128xf32>
    %897 = arith.divf %895, %896 : vector<1x128xf32>
    %898 = vector.extract_strided_slice %891 {offsets = [0, 128], sizes = [1, 128], strides = [1, 1]} : vector<1x512xf32> to vector<1x128xf32>
    %899 = arith.negf %898 : vector<1x128xf32>
    %900 = math.exp %899 : vector<1x128xf32>
    %cst_160 = arith.constant 1.000000e+00 : f32
    %901 = vector.broadcast %cst_160 : f32 to vector<1x128xf32>
    %902 = arith.addf %901, %900 : vector<1x128xf32>
    %903 = arith.divf %901, %902 : vector<1x128xf32>
    %904 = vector.extract_strided_slice %891 {offsets = [0, 256], sizes = [1, 128], strides = [1, 1]} : vector<1x512xf32> to vector<1x128xf32>
    %905 = math.tanh %904 : vector<1x128xf32>
    %906 = vector.extract_strided_slice %891 {offsets = [0, 384], sizes = [1, 128], strides = [1, 1]} : vector<1x512xf32> to vector<1x128xf32>
    %907 = arith.negf %906 : vector<1x128xf32>
    %908 = math.exp %907 : vector<1x128xf32>
    %cst_161 = arith.constant 1.000000e+00 : f32
    %909 = vector.broadcast %cst_161 : f32 to vector<1x128xf32>
    %910 = arith.addf %909, %908 : vector<1x128xf32>
    %911 = arith.divf %909, %910 : vector<1x128xf32>
    %912 = arith.mulf %903, %885 : vector<1x128xf32>
    %913 = arith.mulf %897, %905 : vector<1x128xf32>
    %914 = arith.addf %912, %913 : vector<1x128xf32>
    %915 = math.tanh %914 : vector<1x128xf32>
    %916 = arith.mulf %911, %915 : vector<1x128xf32>
    %917 = vector.extract_strided_slice %739 {offsets = [1, 0], sizes = [1, 512], strides = [1, 1]} : vector<8x512xf32> to vector<1x512xf32>
    %918 = arith.truncf %916 : vector<1x128xf32> to vector<1x128xbf16>
    %cst_162 = arith.constant dense<0.000000e+00> : vector<1x512xf32>
    %919 = tpu.matmul %918, %740, %cst_162 {dimension_numbers = #tpu.dot_dimension_numbers<[1], [0], [0], [1], [0, 0, 1, 1], [], []>} : vector<1x128xbf16>, vector<128x512xbf16>, vector<1x512xf32> -> vector<1x512xf32>
    %920 = arith.addf %917, %919 : vector<1x512xf32>
    %921 = vector.extract_strided_slice %920 {offsets = [0, 0], sizes = [1, 128], strides = [1, 1]} : vector<1x512xf32> to vector<1x128xf32>
    %922 = arith.negf %921 : vector<1x128xf32>
    %923 = math.exp %922 : vector<1x128xf32>
    %cst_163 = arith.constant 1.000000e+00 : f32
    %924 = vector.broadcast %cst_163 : f32 to vector<1x128xf32>
    %925 = arith.addf %924, %923 : vector<1x128xf32>
    %926 = arith.divf %924, %925 : vector<1x128xf32>
    %927 = vector.extract_strided_slice %920 {offsets = [0, 128], sizes = [1, 128], strides = [1, 1]} : vector<1x512xf32> to vector<1x128xf32>
    %928 = arith.negf %927 : vector<1x128xf32>
    %929 = math.exp %928 : vector<1x128xf32>
    %cst_164 = arith.constant 1.000000e+00 : f32
    %930 = vector.broadcast %cst_164 : f32 to vector<1x128xf32>
    %931 = arith.addf %930, %929 : vector<1x128xf32>
    %932 = arith.divf %930, %931 : vector<1x128xf32>
    %933 = vector.extract_strided_slice %920 {offsets = [0, 256], sizes = [1, 128], strides = [1, 1]} : vector<1x512xf32> to vector<1x128xf32>
    %934 = math.tanh %933 : vector<1x128xf32>
    %935 = vector.extract_strided_slice %920 {offsets = [0, 384], sizes = [1, 128], strides = [1, 1]} : vector<1x512xf32> to vector<1x128xf32>
    %936 = arith.negf %935 : vector<1x128xf32>
    %937 = math.exp %936 : vector<1x128xf32>
    %cst_165 = arith.constant 1.000000e+00 : f32
    %938 = vector.broadcast %cst_165 : f32 to vector<1x128xf32>
    %939 = arith.addf %938, %937 : vector<1x128xf32>
    %940 = arith.divf %938, %939 : vector<1x128xf32>
    %941 = arith.mulf %932, %914 : vector<1x128xf32>
    %942 = arith.mulf %926, %934 : vector<1x128xf32>
    %943 = arith.addf %941, %942 : vector<1x128xf32>
    %944 = math.tanh %943 : vector<1x128xf32>
    %945 = arith.mulf %940, %944 : vector<1x128xf32>
    %946 = vector.extract_strided_slice %739 {offsets = [0, 0], sizes = [1, 512], strides = [1, 1]} : vector<8x512xf32> to vector<1x512xf32>
    %947 = arith.truncf %945 : vector<1x128xf32> to vector<1x128xbf16>
    %cst_166 = arith.constant dense<0.000000e+00> : vector<1x512xf32>
    %948 = tpu.matmul %947, %740, %cst_166 {dimension_numbers = #tpu.dot_dimension_numbers<[1], [0], [0], [1], [0, 0, 1, 1], [], []>} : vector<1x128xbf16>, vector<128x512xbf16>, vector<1x512xf32> -> vector<1x512xf32>
    %949 = arith.addf %946, %948 : vector<1x512xf32>
    %950 = vector.extract_strided_slice %949 {offsets = [0, 0], sizes = [1, 128], strides = [1, 1]} : vector<1x512xf32> to vector<1x128xf32>
    %951 = arith.negf %950 : vector<1x128xf32>
    %952 = math.exp %951 : vector<1x128xf32>
    %cst_167 = arith.constant 1.000000e+00 : f32
    %953 = vector.broadcast %cst_167 : f32 to vector<1x128xf32>
    %954 = arith.addf %953, %952 : vector<1x128xf32>
    %955 = arith.divf %953, %954 : vector<1x128xf32>
    %956 = vector.extract_strided_slice %949 {offsets = [0, 128], sizes = [1, 128], strides = [1, 1]} : vector<1x512xf32> to vector<1x128xf32>
    %957 = arith.negf %956 : vector<1x128xf32>
    %958 = math.exp %957 : vector<1x128xf32>
    %cst_168 = arith.constant 1.000000e+00 : f32
    %959 = vector.broadcast %cst_168 : f32 to vector<1x128xf32>
    %960 = arith.addf %959, %958 : vector<1x128xf32>
    %961 = arith.divf %959, %960 : vector<1x128xf32>
    %962 = vector.extract_strided_slice %949 {offsets = [0, 256], sizes = [1, 128], strides = [1, 1]} : vector<1x512xf32> to vector<1x128xf32>
    %963 = math.tanh %962 : vector<1x128xf32>
    %964 = vector.extract_strided_slice %949 {offsets = [0, 384], sizes = [1, 128], strides = [1, 1]} : vector<1x512xf32> to vector<1x128xf32>
    %965 = arith.negf %964 : vector<1x128xf32>
    %966 = math.exp %965 : vector<1x128xf32>
    %cst_169 = arith.constant 1.000000e+00 : f32
    %967 = vector.broadcast %cst_169 : f32 to vector<1x128xf32>
    %968 = arith.addf %967, %966 : vector<1x128xf32>
    %969 = arith.divf %967, %968 : vector<1x128xf32>
    %970 = arith.mulf %961, %943 : vector<1x128xf32>
    %971 = arith.mulf %955, %963 : vector<1x128xf32>
    %972 = arith.addf %970, %971 : vector<1x128xf32>
    %973 = math.tanh %972 : vector<1x128xf32>
    %974 = arith.mulf %969, %973 : vector<1x128xf32>
    %975 = tpu.concatenate %974, %945, %916, %887, %858, %829, %800, %771 in 0 : vector<1x128xf32>, vector<1x128xf32>, vector<1x128xf32>, vector<1x128xf32>, vector<1x128xf32>, vector<1x128xf32>, vector<1x128xf32>, vector<1x128xf32> -> vector<8x128xf32>
    %976 = tpu.concatenate %733, %975 in 1 : vector<8x128xf32>, vector<8x128xf32> -> vector<8x256xf32>
    %977 = arith.truncf %976 : vector<8x256xf32> to vector<8x256xbf16>
    %c0_170 = arith.constant 0 : index
    %c0_171 = arith.constant 0 : index
    %978 = vector.load %arg16[%c0_170, %c0_171] : memref<256x768xbf16, #tpu.memory_space<vmem>>, vector<256x768xbf16>
    %cst_172 = arith.constant dense<0.000000e+00> : vector<8x768xf32>
    %979 = tpu.matmul %977, %978, %cst_172 {dimension_numbers = #tpu.dot_dimension_numbers<[1], [0], [0], [1], [0, 0, 1, 1], [], []>} : vector<8x256xbf16>, vector<256x768xbf16>, vector<8x768xf32> -> vector<8x768xf32>
    %c0_173 = arith.constant 0 : index
    %c0_174 = arith.constant 0 : index
    %980 = vector.load %arg17[%c0_173, %c0_174] : memref<1x768xf32, #tpu.memory_space<vmem>>, vector<1x768xf32>
    %981 = vector.broadcast %980 : vector<1x768xf32> to vector<8x768xf32>
    %982 = arith.addf %979, %981 : vector<8x768xf32>
    %cst_175 = arith.constant 0.000000e+00 : f32
    %983 = vector.broadcast %cst_175 : f32 to vector<8x256xf32>
    %984 = vector.extract_strided_slice %982 {offsets = [0, 0], sizes = [8, 32], strides = [1, 1]} : vector<8x768xf32> to vector<8x32xf32>
    %985 = vector.extract_strided_slice %982 {offsets = [0, 256], sizes = [8, 32], strides = [1, 1]} : vector<8x768xf32> to vector<8x32xf32>
    %986 = vector.extract_strided_slice %982 {offsets = [0, 512], sizes = [8, 32], strides = [1, 1]} : vector<8x768xf32> to vector<8x32xf32>
    %cst_176 = arith.constant dense<0.000000e+00> : vector<8x8xf32>
    %987 = tpu.matmul %984, %985, %cst_176 {dimension_numbers = #tpu.dot_dimension_numbers<[1], [1], [0], [0], [0, 0, 1, 0], [], []>} : vector<8x32xf32>, vector<8x32xf32>, vector<8x8xf32> -> vector<8x8xf32>
    %cst_177 = arith.constant 0.176776692 : f32
    %988 = vector.broadcast %cst_177 : f32 to vector<8x8xf32>
    %989 = arith.mulf %987, %988 : vector<8x8xf32>
    %cst_178 = arith.constant dense<0xFF800000> : vector<8xf32>
    %990 = vector.multi_reduction <maximumf>, %989, %cst_178 [1] : vector<8x8xf32> to vector<8xf32>
    %991 = vector.shape_cast %990 : vector<8xf32> to vector<8x1xf32>
    %992 = vector.broadcast %991 : vector<8x1xf32> to vector<8x8xf32>
    %993 = arith.subf %989, %992 : vector<8x8xf32>
    %994 = math.exp %993 : vector<8x8xf32>
    %cst_179 = arith.constant dense<0.000000e+00> : vector<8xf32>
    %995 = vector.multi_reduction <add>, %994, %cst_179 [1] : vector<8x8xf32> to vector<8xf32>
    %996 = vector.shape_cast %995 : vector<8xf32> to vector<8x1xf32>
    %997 = tpu.reciprocal %996 {approx = true} : vector<8x1xf32> -> vector<8x1xf32>
    %998 = vector.broadcast %997 : vector<8x1xf32> to vector<8x8xf32>
    %999 = arith.mulf %994, %998 : vector<8x8xf32>
    %cst_180 = arith.constant dense<0.000000e+00> : vector<8x32xf32>
    %1000 = tpu.matmul %999, %986, %cst_180 {dimension_numbers = #tpu.dot_dimension_numbers<[1], [0], [0], [1], [0, 0, 1, 1], [], []>} : vector<8x8xf32>, vector<8x32xf32>, vector<8x32xf32> -> vector<8x32xf32>
    %1001 = arith.truncf %1000 : vector<8x32xf32> to vector<8x32xbf16>
    %c0_181 = arith.constant 0 : index
    %c0_182 = arith.constant 0 : index
    %1002 = vector.load %arg18[%c0_181, %c0_182] : memref<256x256xbf16, #tpu.memory_space<vmem>>, vector<32x256xbf16>
    %cst_183 = arith.constant dense<0.000000e+00> : vector<8x256xf32>
    %1003 = tpu.matmul %1001, %1002, %cst_183 {dimension_numbers = #tpu.dot_dimension_numbers<[1], [0], [0], [1], [0, 0, 1, 1], [], []>} : vector<8x32xbf16>, vector<32x256xbf16>, vector<8x256xf32> -> vector<8x256xf32>
    %1004 = arith.addf %983, %1003 : vector<8x256xf32>
    %1005 = vector.extract_strided_slice %982 {offsets = [0, 32], sizes = [8, 32], strides = [1, 1]} : vector<8x768xf32> to vector<8x32xf32>
    %1006 = vector.extract_strided_slice %982 {offsets = [0, 288], sizes = [8, 32], strides = [1, 1]} : vector<8x768xf32> to vector<8x32xf32>
    %1007 = vector.extract_strided_slice %982 {offsets = [0, 544], sizes = [8, 32], strides = [1, 1]} : vector<8x768xf32> to vector<8x32xf32>
    %cst_184 = arith.constant dense<0.000000e+00> : vector<8x8xf32>
    %1008 = tpu.matmul %1005, %1006, %cst_184 {dimension_numbers = #tpu.dot_dimension_numbers<[1], [1], [0], [0], [0, 0, 1, 0], [], []>} : vector<8x32xf32>, vector<8x32xf32>, vector<8x8xf32> -> vector<8x8xf32>
    %cst_185 = arith.constant 0.176776692 : f32
    %1009 = vector.broadcast %cst_185 : f32 to vector<8x8xf32>
    %1010 = arith.mulf %1008, %1009 : vector<8x8xf32>
    %cst_186 = arith.constant dense<0xFF800000> : vector<8xf32>
    %1011 = vector.multi_reduction <maximumf>, %1010, %cst_186 [1] : vector<8x8xf32> to vector<8xf32>
    %1012 = vector.shape_cast %1011 : vector<8xf32> to vector<8x1xf32>
    %1013 = vector.broadcast %1012 : vector<8x1xf32> to vector<8x8xf32>
    %1014 = arith.subf %1010, %1013 : vector<8x8xf32>
    %1015 = math.exp %1014 : vector<8x8xf32>
    %cst_187 = arith.constant dense<0.000000e+00> : vector<8xf32>
    %1016 = vector.multi_reduction <add>, %1015, %cst_187 [1] : vector<8x8xf32> to vector<8xf32>
    %1017 = vector.shape_cast %1016 : vector<8xf32> to vector<8x1xf32>
    %1018 = tpu.reciprocal %1017 {approx = true} : vector<8x1xf32> -> vector<8x1xf32>
    %1019 = vector.broadcast %1018 : vector<8x1xf32> to vector<8x8xf32>
    %1020 = arith.mulf %1015, %1019 : vector<8x8xf32>
    %cst_188 = arith.constant dense<0.000000e+00> : vector<8x32xf32>
    %1021 = tpu.matmul %1020, %1007, %cst_188 {dimension_numbers = #tpu.dot_dimension_numbers<[1], [0], [0], [1], [0, 0, 1, 1], [], []>} : vector<8x8xf32>, vector<8x32xf32>, vector<8x32xf32> -> vector<8x32xf32>
    %1022 = arith.truncf %1021 : vector<8x32xf32> to vector<8x32xbf16>
    %c32 = arith.constant 32 : index
    %c0_189 = arith.constant 0 : index
    %1023 = vector.load %arg18[%c32, %c0_189] : memref<256x256xbf16, #tpu.memory_space<vmem>>, vector<32x256xbf16>
    %cst_190 = arith.constant dense<0.000000e+00> : vector<8x256xf32>
    %1024 = tpu.matmul %1022, %1023, %cst_190 {dimension_numbers = #tpu.dot_dimension_numbers<[1], [0], [0], [1], [0, 0, 1, 1], [], []>} : vector<8x32xbf16>, vector<32x256xbf16>, vector<8x256xf32> -> vector<8x256xf32>
    %1025 = arith.addf %1004, %1024 : vector<8x256xf32>
    %1026 = vector.extract_strided_slice %982 {offsets = [0, 64], sizes = [8, 32], strides = [1, 1]} : vector<8x768xf32> to vector<8x32xf32>
    %1027 = vector.extract_strided_slice %982 {offsets = [0, 320], sizes = [8, 32], strides = [1, 1]} : vector<8x768xf32> to vector<8x32xf32>
    %1028 = vector.extract_strided_slice %982 {offsets = [0, 576], sizes = [8, 32], strides = [1, 1]} : vector<8x768xf32> to vector<8x32xf32>
    %cst_191 = arith.constant dense<0.000000e+00> : vector<8x8xf32>
    %1029 = tpu.matmul %1026, %1027, %cst_191 {dimension_numbers = #tpu.dot_dimension_numbers<[1], [1], [0], [0], [0, 0, 1, 0], [], []>} : vector<8x32xf32>, vector<8x32xf32>, vector<8x8xf32> -> vector<8x8xf32>
    %cst_192 = arith.constant 0.176776692 : f32
    %1030 = vector.broadcast %cst_192 : f32 to vector<8x8xf32>
    %1031 = arith.mulf %1029, %1030 : vector<8x8xf32>
    %cst_193 = arith.constant dense<0xFF800000> : vector<8xf32>
    %1032 = vector.multi_reduction <maximumf>, %1031, %cst_193 [1] : vector<8x8xf32> to vector<8xf32>
    %1033 = vector.shape_cast %1032 : vector<8xf32> to vector<8x1xf32>
    %1034 = vector.broadcast %1033 : vector<8x1xf32> to vector<8x8xf32>
    %1035 = arith.subf %1031, %1034 : vector<8x8xf32>
    %1036 = math.exp %1035 : vector<8x8xf32>
    %cst_194 = arith.constant dense<0.000000e+00> : vector<8xf32>
    %1037 = vector.multi_reduction <add>, %1036, %cst_194 [1] : vector<8x8xf32> to vector<8xf32>
    %1038 = vector.shape_cast %1037 : vector<8xf32> to vector<8x1xf32>
    %1039 = tpu.reciprocal %1038 {approx = true} : vector<8x1xf32> -> vector<8x1xf32>
    %1040 = vector.broadcast %1039 : vector<8x1xf32> to vector<8x8xf32>
    %1041 = arith.mulf %1036, %1040 : vector<8x8xf32>
    %cst_195 = arith.constant dense<0.000000e+00> : vector<8x32xf32>
    %1042 = tpu.matmul %1041, %1028, %cst_195 {dimension_numbers = #tpu.dot_dimension_numbers<[1], [0], [0], [1], [0, 0, 1, 1], [], []>} : vector<8x8xf32>, vector<8x32xf32>, vector<8x32xf32> -> vector<8x32xf32>
    %1043 = arith.truncf %1042 : vector<8x32xf32> to vector<8x32xbf16>
    %c64 = arith.constant 64 : index
    %c0_196 = arith.constant 0 : index
    %1044 = vector.load %arg18[%c64, %c0_196] : memref<256x256xbf16, #tpu.memory_space<vmem>>, vector<32x256xbf16>
    %cst_197 = arith.constant dense<0.000000e+00> : vector<8x256xf32>
    %1045 = tpu.matmul %1043, %1044, %cst_197 {dimension_numbers = #tpu.dot_dimension_numbers<[1], [0], [0], [1], [0, 0, 1, 1], [], []>} : vector<8x32xbf16>, vector<32x256xbf16>, vector<8x256xf32> -> vector<8x256xf32>
    %1046 = arith.addf %1025, %1045 : vector<8x256xf32>
    %1047 = vector.extract_strided_slice %982 {offsets = [0, 96], sizes = [8, 32], strides = [1, 1]} : vector<8x768xf32> to vector<8x32xf32>
    %1048 = vector.extract_strided_slice %982 {offsets = [0, 352], sizes = [8, 32], strides = [1, 1]} : vector<8x768xf32> to vector<8x32xf32>
    %1049 = vector.extract_strided_slice %982 {offsets = [0, 608], sizes = [8, 32], strides = [1, 1]} : vector<8x768xf32> to vector<8x32xf32>
    %cst_198 = arith.constant dense<0.000000e+00> : vector<8x8xf32>
    %1050 = tpu.matmul %1047, %1048, %cst_198 {dimension_numbers = #tpu.dot_dimension_numbers<[1], [1], [0], [0], [0, 0, 1, 0], [], []>} : vector<8x32xf32>, vector<8x32xf32>, vector<8x8xf32> -> vector<8x8xf32>
    %cst_199 = arith.constant 0.176776692 : f32
    %1051 = vector.broadcast %cst_199 : f32 to vector<8x8xf32>
    %1052 = arith.mulf %1050, %1051 : vector<8x8xf32>
    %cst_200 = arith.constant dense<0xFF800000> : vector<8xf32>
    %1053 = vector.multi_reduction <maximumf>, %1052, %cst_200 [1] : vector<8x8xf32> to vector<8xf32>
    %1054 = vector.shape_cast %1053 : vector<8xf32> to vector<8x1xf32>
    %1055 = vector.broadcast %1054 : vector<8x1xf32> to vector<8x8xf32>
    %1056 = arith.subf %1052, %1055 : vector<8x8xf32>
    %1057 = math.exp %1056 : vector<8x8xf32>
    %cst_201 = arith.constant dense<0.000000e+00> : vector<8xf32>
    %1058 = vector.multi_reduction <add>, %1057, %cst_201 [1] : vector<8x8xf32> to vector<8xf32>
    %1059 = vector.shape_cast %1058 : vector<8xf32> to vector<8x1xf32>
    %1060 = tpu.reciprocal %1059 {approx = true} : vector<8x1xf32> -> vector<8x1xf32>
    %1061 = vector.broadcast %1060 : vector<8x1xf32> to vector<8x8xf32>
    %1062 = arith.mulf %1057, %1061 : vector<8x8xf32>
    %cst_202 = arith.constant dense<0.000000e+00> : vector<8x32xf32>
    %1063 = tpu.matmul %1062, %1049, %cst_202 {dimension_numbers = #tpu.dot_dimension_numbers<[1], [0], [0], [1], [0, 0, 1, 1], [], []>} : vector<8x8xf32>, vector<8x32xf32>, vector<8x32xf32> -> vector<8x32xf32>
    %1064 = arith.truncf %1063 : vector<8x32xf32> to vector<8x32xbf16>
    %c96 = arith.constant 96 : index
    %c0_203 = arith.constant 0 : index
    %1065 = vector.load %arg18[%c96, %c0_203] : memref<256x256xbf16, #tpu.memory_space<vmem>>, vector<32x256xbf16>
    %cst_204 = arith.constant dense<0.000000e+00> : vector<8x256xf32>
    %1066 = tpu.matmul %1064, %1065, %cst_204 {dimension_numbers = #tpu.dot_dimension_numbers<[1], [0], [0], [1], [0, 0, 1, 1], [], []>} : vector<8x32xbf16>, vector<32x256xbf16>, vector<8x256xf32> -> vector<8x256xf32>
    %1067 = arith.addf %1046, %1066 : vector<8x256xf32>
    %1068 = vector.extract_strided_slice %982 {offsets = [0, 128], sizes = [8, 32], strides = [1, 1]} : vector<8x768xf32> to vector<8x32xf32>
    %1069 = vector.extract_strided_slice %982 {offsets = [0, 384], sizes = [8, 32], strides = [1, 1]} : vector<8x768xf32> to vector<8x32xf32>
    %1070 = vector.extract_strided_slice %982 {offsets = [0, 640], sizes = [8, 32], strides = [1, 1]} : vector<8x768xf32> to vector<8x32xf32>
    %cst_205 = arith.constant dense<0.000000e+00> : vector<8x8xf32>
    %1071 = tpu.matmul %1068, %1069, %cst_205 {dimension_numbers = #tpu.dot_dimension_numbers<[1], [1], [0], [0], [0, 0, 1, 0], [], []>} : vector<8x32xf32>, vector<8x32xf32>, vector<8x8xf32> -> vector<8x8xf32>
    %cst_206 = arith.constant 0.176776692 : f32
    %1072 = vector.broadcast %cst_206 : f32 to vector<8x8xf32>
    %1073 = arith.mulf %1071, %1072 : vector<8x8xf32>
    %cst_207 = arith.constant dense<0xFF800000> : vector<8xf32>
    %1074 = vector.multi_reduction <maximumf>, %1073, %cst_207 [1] : vector<8x8xf32> to vector<8xf32>
    %1075 = vector.shape_cast %1074 : vector<8xf32> to vector<8x1xf32>
    %1076 = vector.broadcast %1075 : vector<8x1xf32> to vector<8x8xf32>
    %1077 = arith.subf %1073, %1076 : vector<8x8xf32>
    %1078 = math.exp %1077 : vector<8x8xf32>
    %cst_208 = arith.constant dense<0.000000e+00> : vector<8xf32>
    %1079 = vector.multi_reduction <add>, %1078, %cst_208 [1] : vector<8x8xf32> to vector<8xf32>
    %1080 = vector.shape_cast %1079 : vector<8xf32> to vector<8x1xf32>
    %1081 = tpu.reciprocal %1080 {approx = true} : vector<8x1xf32> -> vector<8x1xf32>
    %1082 = vector.broadcast %1081 : vector<8x1xf32> to vector<8x8xf32>
    %1083 = arith.mulf %1078, %1082 : vector<8x8xf32>
    %cst_209 = arith.constant dense<0.000000e+00> : vector<8x32xf32>
    %1084 = tpu.matmul %1083, %1070, %cst_209 {dimension_numbers = #tpu.dot_dimension_numbers<[1], [0], [0], [1], [0, 0, 1, 1], [], []>} : vector<8x8xf32>, vector<8x32xf32>, vector<8x32xf32> -> vector<8x32xf32>
    %1085 = arith.truncf %1084 : vector<8x32xf32> to vector<8x32xbf16>
    %c128 = arith.constant 128 : index
    %c0_210 = arith.constant 0 : index
    %1086 = vector.load %arg18[%c128, %c0_210] : memref<256x256xbf16, #tpu.memory_space<vmem>>, vector<32x256xbf16>
    %cst_211 = arith.constant dense<0.000000e+00> : vector<8x256xf32>
    %1087 = tpu.matmul %1085, %1086, %cst_211 {dimension_numbers = #tpu.dot_dimension_numbers<[1], [0], [0], [1], [0, 0, 1, 1], [], []>} : vector<8x32xbf16>, vector<32x256xbf16>, vector<8x256xf32> -> vector<8x256xf32>
    %1088 = arith.addf %1067, %1087 : vector<8x256xf32>
    %1089 = vector.extract_strided_slice %982 {offsets = [0, 160], sizes = [8, 32], strides = [1, 1]} : vector<8x768xf32> to vector<8x32xf32>
    %1090 = vector.extract_strided_slice %982 {offsets = [0, 416], sizes = [8, 32], strides = [1, 1]} : vector<8x768xf32> to vector<8x32xf32>
    %1091 = vector.extract_strided_slice %982 {offsets = [0, 672], sizes = [8, 32], strides = [1, 1]} : vector<8x768xf32> to vector<8x32xf32>
    %cst_212 = arith.constant dense<0.000000e+00> : vector<8x8xf32>
    %1092 = tpu.matmul %1089, %1090, %cst_212 {dimension_numbers = #tpu.dot_dimension_numbers<[1], [1], [0], [0], [0, 0, 1, 0], [], []>} : vector<8x32xf32>, vector<8x32xf32>, vector<8x8xf32> -> vector<8x8xf32>
    %cst_213 = arith.constant 0.176776692 : f32
    %1093 = vector.broadcast %cst_213 : f32 to vector<8x8xf32>
    %1094 = arith.mulf %1092, %1093 : vector<8x8xf32>
    %cst_214 = arith.constant dense<0xFF800000> : vector<8xf32>
    %1095 = vector.multi_reduction <maximumf>, %1094, %cst_214 [1] : vector<8x8xf32> to vector<8xf32>
    %1096 = vector.shape_cast %1095 : vector<8xf32> to vector<8x1xf32>
    %1097 = vector.broadcast %1096 : vector<8x1xf32> to vector<8x8xf32>
    %1098 = arith.subf %1094, %1097 : vector<8x8xf32>
    %1099 = math.exp %1098 : vector<8x8xf32>
    %cst_215 = arith.constant dense<0.000000e+00> : vector<8xf32>
    %1100 = vector.multi_reduction <add>, %1099, %cst_215 [1] : vector<8x8xf32> to vector<8xf32>
    %1101 = vector.shape_cast %1100 : vector<8xf32> to vector<8x1xf32>
    %1102 = tpu.reciprocal %1101 {approx = true} : vector<8x1xf32> -> vector<8x1xf32>
    %1103 = vector.broadcast %1102 : vector<8x1xf32> to vector<8x8xf32>
    %1104 = arith.mulf %1099, %1103 : vector<8x8xf32>
    %cst_216 = arith.constant dense<0.000000e+00> : vector<8x32xf32>
    %1105 = tpu.matmul %1104, %1091, %cst_216 {dimension_numbers = #tpu.dot_dimension_numbers<[1], [0], [0], [1], [0, 0, 1, 1], [], []>} : vector<8x8xf32>, vector<8x32xf32>, vector<8x32xf32> -> vector<8x32xf32>
    %1106 = arith.truncf %1105 : vector<8x32xf32> to vector<8x32xbf16>
    %c160 = arith.constant 160 : index
    %c0_217 = arith.constant 0 : index
    %1107 = vector.load %arg18[%c160, %c0_217] : memref<256x256xbf16, #tpu.memory_space<vmem>>, vector<32x256xbf16>
    %cst_218 = arith.constant dense<0.000000e+00> : vector<8x256xf32>
    %1108 = tpu.matmul %1106, %1107, %cst_218 {dimension_numbers = #tpu.dot_dimension_numbers<[1], [0], [0], [1], [0, 0, 1, 1], [], []>} : vector<8x32xbf16>, vector<32x256xbf16>, vector<8x256xf32> -> vector<8x256xf32>
    %1109 = arith.addf %1088, %1108 : vector<8x256xf32>
    %1110 = vector.extract_strided_slice %982 {offsets = [0, 192], sizes = [8, 32], strides = [1, 1]} : vector<8x768xf32> to vector<8x32xf32>
    %1111 = vector.extract_strided_slice %982 {offsets = [0, 448], sizes = [8, 32], strides = [1, 1]} : vector<8x768xf32> to vector<8x32xf32>
    %1112 = vector.extract_strided_slice %982 {offsets = [0, 704], sizes = [8, 32], strides = [1, 1]} : vector<8x768xf32> to vector<8x32xf32>
    %cst_219 = arith.constant dense<0.000000e+00> : vector<8x8xf32>
    %1113 = tpu.matmul %1110, %1111, %cst_219 {dimension_numbers = #tpu.dot_dimension_numbers<[1], [1], [0], [0], [0, 0, 1, 0], [], []>} : vector<8x32xf32>, vector<8x32xf32>, vector<8x8xf32> -> vector<8x8xf32>
    %cst_220 = arith.constant 0.176776692 : f32
    %1114 = vector.broadcast %cst_220 : f32 to vector<8x8xf32>
    %1115 = arith.mulf %1113, %1114 : vector<8x8xf32>
    %cst_221 = arith.constant dense<0xFF800000> : vector<8xf32>
    %1116 = vector.multi_reduction <maximumf>, %1115, %cst_221 [1] : vector<8x8xf32> to vector<8xf32>
    %1117 = vector.shape_cast %1116 : vector<8xf32> to vector<8x1xf32>
    %1118 = vector.broadcast %1117 : vector<8x1xf32> to vector<8x8xf32>
    %1119 = arith.subf %1115, %1118 : vector<8x8xf32>
    %1120 = math.exp %1119 : vector<8x8xf32>
    %cst_222 = arith.constant dense<0.000000e+00> : vector<8xf32>
    %1121 = vector.multi_reduction <add>, %1120, %cst_222 [1] : vector<8x8xf32> to vector<8xf32>
    %1122 = vector.shape_cast %1121 : vector<8xf32> to vector<8x1xf32>
    %1123 = tpu.reciprocal %1122 {approx = true} : vector<8x1xf32> -> vector<8x1xf32>
    %1124 = vector.broadcast %1123 : vector<8x1xf32> to vector<8x8xf32>
    %1125 = arith.mulf %1120, %1124 : vector<8x8xf32>
    %cst_223 = arith.constant dense<0.000000e+00> : vector<8x32xf32>
    %1126 = tpu.matmul %1125, %1112, %cst_223 {dimension_numbers = #tpu.dot_dimension_numbers<[1], [0], [0], [1], [0, 0, 1, 1], [], []>} : vector<8x8xf32>, vector<8x32xf32>, vector<8x32xf32> -> vector<8x32xf32>
    %1127 = arith.truncf %1126 : vector<8x32xf32> to vector<8x32xbf16>
    %c192 = arith.constant 192 : index
    %c0_224 = arith.constant 0 : index
    %1128 = vector.load %arg18[%c192, %c0_224] : memref<256x256xbf16, #tpu.memory_space<vmem>>, vector<32x256xbf16>
    %cst_225 = arith.constant dense<0.000000e+00> : vector<8x256xf32>
    %1129 = tpu.matmul %1127, %1128, %cst_225 {dimension_numbers = #tpu.dot_dimension_numbers<[1], [0], [0], [1], [0, 0, 1, 1], [], []>} : vector<8x32xbf16>, vector<32x256xbf16>, vector<8x256xf32> -> vector<8x256xf32>
    %1130 = arith.addf %1109, %1129 : vector<8x256xf32>
    %1131 = vector.extract_strided_slice %982 {offsets = [0, 224], sizes = [8, 32], strides = [1, 1]} : vector<8x768xf32> to vector<8x32xf32>
    %1132 = vector.extract_strided_slice %982 {offsets = [0, 480], sizes = [8, 32], strides = [1, 1]} : vector<8x768xf32> to vector<8x32xf32>
    %1133 = vector.extract_strided_slice %982 {offsets = [0, 736], sizes = [8, 32], strides = [1, 1]} : vector<8x768xf32> to vector<8x32xf32>
    %cst_226 = arith.constant dense<0.000000e+00> : vector<8x8xf32>
    %1134 = tpu.matmul %1131, %1132, %cst_226 {dimension_numbers = #tpu.dot_dimension_numbers<[1], [1], [0], [0], [0, 0, 1, 0], [], []>} : vector<8x32xf32>, vector<8x32xf32>, vector<8x8xf32> -> vector<8x8xf32>
    %cst_227 = arith.constant 0.176776692 : f32
    %1135 = vector.broadcast %cst_227 : f32 to vector<8x8xf32>
    %1136 = arith.mulf %1134, %1135 : vector<8x8xf32>
    %cst_228 = arith.constant dense<0xFF800000> : vector<8xf32>
    %1137 = vector.multi_reduction <maximumf>, %1136, %cst_228 [1] : vector<8x8xf32> to vector<8xf32>
    %1138 = vector.shape_cast %1137 : vector<8xf32> to vector<8x1xf32>
    %1139 = vector.broadcast %1138 : vector<8x1xf32> to vector<8x8xf32>
    %1140 = arith.subf %1136, %1139 : vector<8x8xf32>
    %1141 = math.exp %1140 : vector<8x8xf32>
    %cst_229 = arith.constant dense<0.000000e+00> : vector<8xf32>
    %1142 = vector.multi_reduction <add>, %1141, %cst_229 [1] : vector<8x8xf32> to vector<8xf32>
    %1143 = vector.shape_cast %1142 : vector<8xf32> to vector<8x1xf32>
    %1144 = tpu.reciprocal %1143 {approx = true} : vector<8x1xf32> -> vector<8x1xf32>
    %1145 = vector.broadcast %1144 : vector<8x1xf32> to vector<8x8xf32>
    %1146 = arith.mulf %1141, %1145 : vector<8x8xf32>
    %cst_230 = arith.constant dense<0.000000e+00> : vector<8x32xf32>
    %1147 = tpu.matmul %1146, %1133, %cst_230 {dimension_numbers = #tpu.dot_dimension_numbers<[1], [0], [0], [1], [0, 0, 1, 1], [], []>} : vector<8x8xf32>, vector<8x32xf32>, vector<8x32xf32> -> vector<8x32xf32>
    %1148 = arith.truncf %1147 : vector<8x32xf32> to vector<8x32xbf16>
    %c224 = arith.constant 224 : index
    %c0_231 = arith.constant 0 : index
    %1149 = vector.load %arg18[%c224, %c0_231] : memref<256x256xbf16, #tpu.memory_space<vmem>>, vector<32x256xbf16>
    %cst_232 = arith.constant dense<0.000000e+00> : vector<8x256xf32>
    %1150 = tpu.matmul %1148, %1149, %cst_232 {dimension_numbers = #tpu.dot_dimension_numbers<[1], [0], [0], [1], [0, 0, 1, 1], [], []>} : vector<8x32xbf16>, vector<32x256xbf16>, vector<8x256xf32> -> vector<8x256xf32>
    %1151 = arith.addf %1130, %1150 : vector<8x256xf32>
    %c0_233 = arith.constant 0 : index
    %c0_234 = arith.constant 0 : index
    %1152 = vector.load %arg19[%c0_233, %c0_234] : memref<1x256xf32, #tpu.memory_space<vmem>>, vector<1x256xf32>
    %1153 = vector.broadcast %1152 : vector<1x256xf32> to vector<8x256xf32>
    %1154 = arith.addf %1151, %1153 : vector<8x256xf32>
    %cst_235 = arith.constant dense<0xFF800000> : vector<256xf32>
    %1155 = vector.multi_reduction <maximumf>, %1154, %cst_235 [0] : vector<8x256xf32> to vector<256xf32>
    %1156 = vector.shape_cast %1155 : vector<256xf32> to vector<1x256xf32>
    %cst_236 = arith.constant dense<0.000000e+00> : vector<256xf32>
    %1157 = vector.multi_reduction <add>, %1154, %cst_236 [0] : vector<8x256xf32> to vector<256xf32>
    %1158 = vector.shape_cast %1157 : vector<256xf32> to vector<1x256xf32>
    %cst_237 = arith.constant 8.000000e+00 : f32
    %1159 = vector.broadcast %cst_237 : f32 to vector<1x256xf32>
    %1160 = arith.divf %1158, %1159 : vector<1x256xf32>
    %1161 = arith.addf %1156, %1160 : vector<1x256xf32>
    %cst_238 = arith.constant dense<0.000000e+00> : vector<1xf32>
    %1162 = vector.multi_reduction <add>, %1161, %cst_238 [1] : vector<1x256xf32> to vector<1xf32>
    %1163 = vector.shape_cast %1162 : vector<1xf32> to vector<1x1xf32>
    %cst_239 = arith.constant 2.560000e+02 : f32
    %1164 = vector.broadcast %cst_239 : f32 to vector<1x1xf32>
    %1165 = arith.divf %1163, %1164 : vector<1x1xf32>
    %1166 = vector.broadcast %1165 : vector<1x1xf32> to vector<1x256xf32>
    %1167 = arith.subf %1161, %1166 : vector<1x256xf32>
    %1168 = arith.mulf %1167, %1167 : vector<1x256xf32>
    %cst_240 = arith.constant dense<0.000000e+00> : vector<1xf32>
    %1169 = vector.multi_reduction <add>, %1168, %cst_240 [1] : vector<1x256xf32> to vector<1xf32>
    %1170 = vector.shape_cast %1169 : vector<1xf32> to vector<1x1xf32>
    %cst_241 = arith.constant 2.560000e+02 : f32
    %1171 = vector.broadcast %cst_241 : f32 to vector<1x1xf32>
    %1172 = arith.divf %1170, %1171 : vector<1x1xf32>
    %1173 = vector.broadcast %1165 : vector<1x1xf32> to vector<1x256xf32>
    %1174 = arith.subf %1161, %1173 : vector<1x256xf32>
    %cst_242 = arith.constant 9.99999974E-6 : f32
    %1175 = vector.broadcast %cst_242 : f32 to vector<1x1xf32>
    %1176 = arith.addf %1172, %1175 : vector<1x1xf32>
    %1177 = math.rsqrt %1176 : vector<1x1xf32>
    %1178 = vector.broadcast %1177 : vector<1x1xf32> to vector<1x256xf32>
    %1179 = arith.mulf %1174, %1178 : vector<1x256xf32>
    %c0_243 = arith.constant 0 : index
    %c0_244 = arith.constant 0 : index
    %1180 = vector.load %arg20[%c0_243, %c0_244] : memref<1x256xf32, #tpu.memory_space<vmem>>, vector<1x256xf32>
    %1181 = arith.mulf %1179, %1180 : vector<1x256xf32>
    %c0_245 = arith.constant 0 : index
    %c0_246 = arith.constant 0 : index
    %1182 = vector.load %arg21[%c0_245, %c0_246] : memref<1x256xf32, #tpu.memory_space<vmem>>, vector<1x256xf32>
    %1183 = arith.addf %1181, %1182 : vector<1x256xf32>
    %c0_247 = arith.constant 0 : index
    %c0_248 = arith.constant 0 : index
    %1184 = vector.load %arg22[%c0_247, %c0_248] : memref<256x32xf32, #tpu.memory_space<vmem>>, vector<256x32xf32>
    %cst_249 = arith.constant dense<0.000000e+00> : vector<1x32xf32>
    %1185 = tpu.matmul %1183, %1184, %cst_249 {dimension_numbers = #tpu.dot_dimension_numbers<[1], [0], [0], [1], [0, 0, 1, 1], [], []>} : vector<1x256xf32>, vector<256x32xf32>, vector<1x32xf32> -> vector<1x32xf32>
    %c0_250 = arith.constant 0 : index
    %c0_251 = arith.constant 0 : index
    %1186 = vector.load %arg23[%c0_250, %c0_251] : memref<1x32xf32, #tpu.memory_space<vmem>>, vector<1x32xf32>
    %1187 = arith.addf %1185, %1186 : vector<1x32xf32>
    %cst_252 = arith.constant 0.000000e+00 : f32
    %1188 = vector.broadcast %cst_252 : f32 to vector<1x32xf32>
    %1189 = arith.maximumf %1187, %1188 : vector<1x32xf32>
    %c0_253 = arith.constant 0 : index
    %c0_254 = arith.constant 0 : index
    %1190 = vector.load %arg24[%c0_253, %c0_254] : memref<32x16xf32, #tpu.memory_space<vmem>>, vector<32x16xf32>
    %cst_255 = arith.constant dense<0.000000e+00> : vector<1x16xf32>
    %1191 = tpu.matmul %1189, %1190, %cst_255 {dimension_numbers = #tpu.dot_dimension_numbers<[1], [0], [0], [1], [0, 0, 1, 1], [], []>} : vector<1x32xf32>, vector<32x16xf32>, vector<1x16xf32> -> vector<1x16xf32>
    %c0_256 = arith.constant 0 : index
    %c0_257 = arith.constant 0 : index
    %1192 = vector.load %arg25[%c0_256, %c0_257] : memref<1x16xf32, #tpu.memory_space<vmem>>, vector<1x16xf32>
    %1193 = arith.addf %1191, %1192 : vector<1x16xf32>
    %cst_258 = arith.constant 0.000000e+00 : f32
    %1194 = vector.broadcast %cst_258 : f32 to vector<1x16xf32>
    %1195 = arith.maximumf %1193, %1194 : vector<1x16xf32>
    %c0_259 = arith.constant 0 : index
    %c0_260 = arith.constant 0 : index
    %1196 = vector.load %arg26[%c0_259, %c0_260] : memref<16x1xf32, #tpu.memory_space<vmem>>, vector<16x1xf32>
    %cst_261 = arith.constant dense<0.000000e+00> : vector<1x1xf32>
    %1197 = tpu.matmul %1195, %1196, %cst_261 {dimension_numbers = #tpu.dot_dimension_numbers<[1], [0], [0], [1], [0, 0, 1, 1], [], []>} : vector<1x16xf32>, vector<16x1xf32>, vector<1x1xf32> -> vector<1x1xf32>
    %c0_262 = arith.constant 0 : index
    %c0_263 = arith.constant 0 : index
    %1198 = vector.load %arg27[%c0_262, %c0_263] : memref<1x1xf32, #tpu.memory_space<vmem>>, vector<1x1xf32>
    %1199 = arith.addf %1197, %1198 : vector<1x1xf32>
    %c0_264 = arith.constant 0 : index
    %c0_265 = arith.constant 0 : index
    %c0_266 = arith.constant 0 : index
    %1200 = vector.load %arg28[%c0_264, %c0_265, %c0_266] : memref<1x1x1xf32, #tpu.memory_space<vmem>>, vector<1x1x1xf32>
    %1201 = vector.shape_cast %1200 : vector<1x1x1xf32> to vector<1x1xf32>
    %1202 = vector.shape_cast %1199 : vector<1x1xf32> to vector<1x1x1xf32>
    tpu.vector_store %arg28[%c0_264, %c0_265, %c0_266], %1202 {strides = array<i32>} : memref<1x1x1xf32, #tpu.memory_space<vmem>>, vector<1x1x1xf32>,
    return
  }
  func.func @transform_0(%arg0: i32) -> (i32, i32, i32) {
    %c0_i32 = arith.constant 0 : i32
    %c0_i32_0 = arith.constant 0 : i32
    %c0_i32_1 = arith.constant 0 : i32
    return %arg0, %c0_i32, %c0_i32_0 : i32, i32, i32
  }
  func.func @transform_1(%arg0: i32) -> (i32, i32) {
    %c0_i32 = arith.constant 0 : i32
    %c0_i32_0 = arith.constant 0 : i32
    %c0_i32_1 = arith.constant 0 : i32
    return %c0_i32, %c0_i32_0 : i32, i32
  }
  func.func @transform_2(%arg0: i32) -> (i32, i32) {
    %c0_i32 = arith.constant 0 : i32
    %c0_i32_0 = arith.constant 0 : i32
    %c0_i32_1 = arith.constant 0 : i32
    return %c0_i32, %c0_i32_0 : i32, i32
  }
  func.func @transform_3(%arg0: i32) -> (i32, i32) {
    %c0_i32 = arith.constant 0 : i32
    %c0_i32_0 = arith.constant 0 : i32
    %c0_i32_1 = arith.constant 0 : i32
    return %c0_i32, %c0_i32_0 : i32, i32
  }
  func.func @transform_4(%arg0: i32) -> (i32, i32) {
    %c0_i32 = arith.constant 0 : i32
    %c0_i32_0 = arith.constant 0 : i32
    %c0_i32_1 = arith.constant 0 : i32
    return %c0_i32, %c0_i32_0 : i32, i32
  }
  func.func @transform_5(%arg0: i32) -> (i32, i32) {
    %c0_i32 = arith.constant 0 : i32
    %c0_i32_0 = arith.constant 0 : i32
    %c0_i32_1 = arith.constant 0 : i32
    return %c0_i32, %c0_i32_0 : i32, i32
  }
  func.func @transform_6(%arg0: i32) -> (i32, i32) {
    %c0_i32 = arith.constant 0 : i32
    %c0_i32_0 = arith.constant 0 : i32
    %c0_i32_1 = arith.constant 0 : i32
    return %c0_i32, %c0_i32_0 : i32, i32
  }
  func.func @transform_7(%arg0: i32) -> (i32, i32) {
    %c0_i32 = arith.constant 0 : i32
    %c0_i32_0 = arith.constant 0 : i32
    %c0_i32_1 = arith.constant 0 : i32
    return %c0_i32, %c0_i32_0 : i32, i32
  }
  func.func @transform_8(%arg0: i32) -> (i32, i32) {
    %c0_i32 = arith.constant 0 : i32
    %c0_i32_0 = arith.constant 0 : i32
    %c0_i32_1 = arith.constant 0 : i32
    return %c0_i32, %c0_i32_0 : i32, i32
  }
  func.func @transform_9(%arg0: i32) -> (i32, i32) {
    %c0_i32 = arith.constant 0 : i32
    %c0_i32_0 = arith.constant 0 : i32
    %c0_i32_1 = arith.constant 0 : i32
    return %c0_i32, %c0_i32_0 : i32, i32
  }
  func.func @transform_10(%arg0: i32) -> (i32, i32) {
    %c0_i32 = arith.constant 0 : i32
    %c0_i32_0 = arith.constant 0 : i32
    %c0_i32_1 = arith.constant 0 : i32
    return %c0_i32, %c0_i32_0 : i32, i32
  }
  func.func @transform_11(%arg0: i32) -> (i32, i32) {
    %c0_i32 = arith.constant 0 : i32
    %c0_i32_0 = arith.constant 0 : i32
    %c0_i32_1 = arith.constant 0 : i32
    return %c0_i32, %c0_i32_0 : i32, i32
  }
  func.func @transform_12(%arg0: i32) -> (i32, i32) {
    %c0_i32 = arith.constant 0 : i32
    %c0_i32_0 = arith.constant 0 : i32
    %c0_i32_1 = arith.constant 0 : i32
    return %c0_i32, %c0_i32_0 : i32, i32
  }
  func.func @transform_13(%arg0: i32) -> (i32, i32) {
    %c0_i32 = arith.constant 0 : i32
    %c0_i32_0 = arith.constant 0 : i32
    %c0_i32_1 = arith.constant 0 : i32
    return %c0_i32, %c0_i32_0 : i32, i32
  }
  func.func @transform_14(%arg0: i32) -> (i32, i32) {
    %c0_i32 = arith.constant 0 : i32
    %c0_i32_0 = arith.constant 0 : i32
    %c0_i32_1 = arith.constant 0 : i32
    return %c0_i32, %c0_i32_0 : i32, i32
  }
  func.func @transform_15(%arg0: i32) -> (i32, i32) {
    %c0_i32 = arith.constant 0 : i32
    %c0_i32_0 = arith.constant 0 : i32
    %c0_i32_1 = arith.constant 0 : i32
    return %c0_i32, %c0_i32_0 : i32, i32
  }
  func.func @transform_16(%arg0: i32) -> (i32, i32) {
    %c0_i32 = arith.constant 0 : i32
    %c0_i32_0 = arith.constant 0 : i32
    %c0_i32_1 = arith.constant 0 : i32
    return %c0_i32, %c0_i32_0 : i32, i32
  }
  func.func @transform_17(%arg0: i32) -> (i32, i32) {
    %c0_i32 = arith.constant 0 : i32
    %c0_i32_0 = arith.constant 0 : i32
    %c0_i32_1 = arith.constant 0 : i32
    return %c0_i32, %c0_i32_0 : i32, i32
  }
  func.func @transform_18(%arg0: i32) -> (i32, i32) {
    %c0_i32 = arith.constant 0 : i32
    %c0_i32_0 = arith.constant 0 : i32
    %c0_i32_1 = arith.constant 0 : i32
    return %c0_i32, %c0_i32_0 : i32, i32
  }
  func.func @transform_19(%arg0: i32) -> (i32, i32) {
    %c0_i32 = arith.constant 0 : i32
    %c0_i32_0 = arith.constant 0 : i32
    %c0_i32_1 = arith.constant 0 : i32
    return %c0_i32, %c0_i32_0 : i32, i32
  }
  func.func @transform_20(%arg0: i32) -> (i32, i32) {
    %c0_i32 = arith.constant 0 : i32
    %c0_i32_0 = arith.constant 0 : i32
    %c0_i32_1 = arith.constant 0 : i32
    return %c0_i32, %c0_i32_0 : i32, i32
  }
  func.func @transform_21(%arg0: i32) -> (i32, i32) {
    %c0_i32 = arith.constant 0 : i32
    %c0_i32_0 = arith.constant 0 : i32
    %c0_i32_1 = arith.constant 0 : i32
    return %c0_i32, %c0_i32_0 : i32, i32
  }
  func.func @transform_22(%arg0: i32) -> (i32, i32) {
    %c0_i32 = arith.constant 0 : i32
    %c0_i32_0 = arith.constant 0 : i32
    %c0_i32_1 = arith.constant 0 : i32
    return %c0_i32, %c0_i32_0 : i32, i32
  }
  func.func @transform_23(%arg0: i32) -> (i32, i32) {
    %c0_i32 = arith.constant 0 : i32
    %c0_i32_0 = arith.constant 0 : i32
    %c0_i32_1 = arith.constant 0 : i32
    return %c0_i32, %c0_i32_0 : i32, i32
  }
  func.func @transform_24(%arg0: i32) -> (i32, i32) {
    %c0_i32 = arith.constant 0 : i32
    %c0_i32_0 = arith.constant 0 : i32
    %c0_i32_1 = arith.constant 0 : i32
    return %c0_i32, %c0_i32_0 : i32, i32
  }
  func.func @transform_25(%arg0: i32) -> (i32, i32) {
    %c0_i32 = arith.constant 0 : i32
    %c0_i32_0 = arith.constant 0 : i32
    %c0_i32_1 = arith.constant 0 : i32
    return %c0_i32, %c0_i32_0 : i32, i32
  }
  func.func @transform_26(%arg0: i32) -> (i32, i32) {
    %c0_i32 = arith.constant 0 : i32
    %c0_i32_0 = arith.constant 0 : i32
    %c0_i32_1 = arith.constant 0 : i32
    return %c0_i32, %c0_i32_0 : i32, i32
  }
  func.func @transform_27(%arg0: i32) -> (i32, i32, i32) {
    %c0_i32 = arith.constant 0 : i32
    %c0_i32_0 = arith.constant 0 : i32
    %c0_i32_1 = arith.constant 0 : i32
    return %arg0, %c0_i32, %c0_i32_0 : i32, i32, i32
  }
}

</mosaic_0001>

<bundles_post_ra>
// kernel: forward.1
= control target key start
LH: loop header
LB: loop body
LE: loop exit
PB: predicated region body
PF: predicated region fallthrough
CT: control target
= control target key end

     0   :  { %s16276_s0 = inlined_call_operand.vmem [shape: f32[2,8,2], index: 0, kind: input, shape index: {}]   ;;  %s16277_s1 = inlined_call_operand.vmem [shape: f32[2,64], index: 1, kind: input, shape index: {}]   ;;  %s16278_s2 = inlined_call_operand.vmem [shape: f32[1,64], index: 2, kind: input, shape index: {}]   ;;  %s16279_s3 = inlined_call_operand.vmem [shape: bf16[64,512], index: 3, kind: input, shape index: {}]   ;;  %s16280_s4 = inlined_call_operand.vmem [shape: bf16[128,512], index: 4, kind: input, shape index: {}]   ;;  %s16281_s5 = inlined_call_operand.vmem [shape: f32[1,512], index: 5, kind: input, shape index: {}]   ;;  %s16282_s6 = inlined_call_operand.vmem [shape: bf16[64,512], index: 6, kind: input, shape index: {}]   ;;  %s16283_s7 = inlined_call_operand.vmem [shape: bf16[128,512], index: 7, kind: input, shape index: {}]   ;;  %s16284_s8 = inlined_call_operand.vmem [shape: f32[1,512], index: 8, kind: input, shape index: {}]   ;;  %s16285_s9 = inlined_call_operand.vmem [shape: bf16[256,512], index: 9, kind: input, shape index: {}]   ;;  %s16286_s10 = inlined_call_operand.vmem [shape: bf16[128,512], index: 10, kind: input, shape index: {}]   ;;  %s16287_s11 = inlined_call_operand.vmem [shape: f32[1,512], index: 11, kind: input, shape index: {}]   ;;  %s16288_s12 = inlined_call_operand.vmem [shape: bf16[256,512], index: 12, kind: input, shape index: {}]   ;;  %s16289_s13 = inlined_call_operand.vmem [shape: bf16[128,512], index: 13, kind: input, shape index: {}]   ;;  %s16290_s14 = inlined_call_operand.vmem [shape: f32[1,512], index: 14, kind: input, shape index: {}]   ;;  %s16291_s15 = inlined_call_operand.vmem [shape: bf16[256,768], index: 15, kind: input, shape index: {}]   ;;  %s16292_s16 = inlined_call_operand.vmem [shape: f32[1,768], index: 16, kind: input, shape index: {}]   ;;  %s16293_s17 = inlined_call_operand.vmem [shape: bf16[256,256], index: 17, kind: input, shape index: {}]   ;;  %s16294_s18 = inlined_call_operand.vmem [shape: f32[1,256], index: 18, kind: input, shape index: {}]   ;;  %s16295_s19 = inlined_call_operand.vmem [shape: f32[1,256], index: 19, kind: input, shape index: {}]   ;;  %s16296_s20 = inlined_call_operand.vmem [shape: f32[1,256], index: 20, kind: input, shape index: {}]   ;;  %s16297_s21 = inlined_call_operand.vmem [shape: f32[256,32], index: 21, kind: input, shape index: {}]   ;;  %s16298_s22 = inlined_call_operand.vmem [shape: f32[1,32], index: 22, kind: input, shape index: {}]   ;;  %s16299_s23 = inlined_call_operand.vmem [shape: f32[32,16], index: 23, kind: input, shape index: {}]   ;;  %s16300_s24 = inlined_call_operand.vmem [shape: f32[1,16], index: 24, kind: input, shape index: {}]   ;;  %s16301_s25 = inlined_call_operand.vmem [shape: f32[16,1], index: 25, kind: input, shape index: {}]   ;;  %s16302_s26 = inlined_call_operand.<no memory space> [shape: f32[1,1], index: 26, kind: input, shape index: {}]   ;;  %s16303_s27 = inlined_call_operand.vmem [shape: f32[2,1,1], index: 27, kind: output, shape index: {}]  }
   0x1   :  { %16324 = sst [smem:[#allocation6_spill]] %s16276_s0  ;;  %v32_v0 = vstv %s16302_s26 }
   0x2   :  { %16325 = sst [smem:[#allocation7_spill]] %s16277_s1  ;;  %33 = vst [vmem:[#allocation2] sm:$0x1] %v32_v0 }
   0x3   :  { %16326 = sst [smem:[#allocation8_spill]] %s16278_s2 }
   0x4   :  { %16327 = sst [smem:[#allocation9_spill]] %s16279_s3 }
   0x5   :  { %16328 = sst [smem:[#allocation10_spill]] %s16280_s4 }
   0x6   :  { %16329 = sst [smem:[#allocation11_spill]] %s16281_s5 }
   0x7   :  { %16330 = sst [smem:[#allocation12_spill]] %s16282_s6 }
   0x8   :  { %16331 = sst [smem:[#allocation13_spill]] %s16283_s7 }
   0x9   :  { %16332 = sst [smem:[#allocation14_spill]] %s16284_s8  ;;  %s12383_s8 = smov 0  }
   0xa   :  { %16333 = sst [smem:[#allocation15_spill]] %s16285_s9 }
   0xb   :  { %16334 = sst [smem:[#allocation16_spill]] %s16286_s10 }
   0xc   :  { %16335 = sst [smem:[#allocation17_spill]] %s16287_s11 }
   0xd LB: > { %s10173_s30 = sadd.s32 4294967295, %s12232_s8   ;;  %p10177_p0 = scmp.ge.s32.totalorder %s12232_s8, 1  ;;  %s12232_s8 = sphi %s12383_s8, %s39_s8  }
   0xe   : > { %p738_p1 = scmp.lt.s32.totalorder %s12232_s8, 3 }
  0x10   : > { %p739_p2 = pnand %p10177_p0, %p738_p1 }
  0x12   : > { %742 = sbr.rel (%p739_p2) target bundleno = 13912 (0x3658), region = 128 }
  0x17   : > { %s16336_s28 = sld [smem:[#allocation7_spill]]  ;;  %vm828_vm0 = vcmask 1041408   ;;  %p807_p3 = scmp.lt.s32.totalorder %s10173_s30, 1  ;;  %v16310_v2 = vmov 0.0   ;;  %vm12235_vm1 = vmmov 0   ;;  %vm824_vm2 = vcmask 15360  }
  0x18   : > { %10811 = vmatprep.subr.mxu0 %v16310_v2  ;;  %10813 = vmatprep.mubr.msk.f32.mxu0 %vm12235_vm1, %v16310_v2  ;;  %s16337_s10 = sld [smem:[#allocation9_spill]]  ;;  %v16312_v22 = vmov 0   ;;  %vm1021_vm3 = vcmask 523264   ;;  %vm2314_vm4 = vcmask 1040384   ;;  %vm2317_vm5 = vcmask 1042432   ;;  %s12237_s6 = smov 96  }
  0x19   : > { %s16359_s30 = smov (!%p807_p3, %s10173_s30), 1  ;;  %s16338_s26 = sld [smem:[#allocation6_spill]]  ;;  %1057 = vmatprep.mubr.bf16.mxu1 %v16312_v22  ;;  %vm2319_vm6 = vcmask 1043456   ;;  %vm2321_vm7 = vcmask 1044480   ;;  %vm2323_vm8 = vcmask 1045504   ;;  %vm2325_vm9 = vcmask 1046528  }
  0x1a   : > { %s10178_s7 = sshll.u32 %s16359_s30, 3  ;;  %s16340_s11 = sld [smem:[#allocation8_spill]]  ;;  %vm7890_vm10 = vcmask 261120   ;;  %vm7968_vm11 = vcmask 64512   ;;  %vm10050_vm12 = vcmask 130048   ;;  %vm10124_vm13 = vcmask 0  }
  0x1b   : > { %s16342_s4 = sld [smem:[#allocation11_spill]]  ;;  %s12239_s3 = smov 32  }
  0x1c   : > { %s16345_s1 = sld [smem:[#allocation12_spill]]  ;;  %s813_s9 = scalar_lea.vmem %s16303_s27, %s16359_s30 }
  0x1d   : > { %v816_v1 = vld [vmem:[%s16336_s28] sm:$0x3]  ;;  %s16346_s29 = sld [smem:[#allocation13_spill]] }
  0x1e   : > { %v10928_v3 = vld [vmem:[%s16337_s10 + $0x64] ss:$16 sps:$4 sm:$0xff]   ;;  %10812 = vmatpush3.msk.msra.mxu0 %vm828_vm0, %v816_v1  ;;  %v10930_v4 = vld [vmem:[%s16337_s10 + $0x68] ss:$16 sps:$4 sm:$0xff]   ;;  %v10932_v5 = vld [vmem:[%s16337_s10 + $0x6c] ss:$16 sps:$4 sm:$0xff]  }
  0x1f   : > { %1033 = vmatprep.subr.bf16.mxu1 %v10928_v3  ;;  %v10933_v6 = vld [vmem:[%s16337_s10 + $0x60] ss:$16 sps:$4 sm:$0xff]   ;;  %v10934_v7 = vld [vmem:[%s16337_s10 + $0x44] ss:$16 sps:$4 sm:$0xff]   ;;  %s810_s0 = scalar_lea.vmem %s16338_s26, %s10178_s7  ;;  %1074 = vmatprep.subr.bf16.mxu0 %v10932_v5  ;;  %v10938_v8 = vld [vmem:[%s16337_s10 + $0x4c] ss:$16 sps:$4 sm:$0xff]   ;;  %v921_v3 = vlaneseq }
  0x20   : > { %1034 = vmatpush1.bf16.msra.mxu1 %v10933_v6  ;;  %v815_v9 = vld [vmem:[%s810_s0] sm:$0xff]  ;;  %v10936_v12 = vld [vmem:[%s16337_s10 + $0x48] ss:$16 sps:$4 sm:$0xff]   ;;  %v10944_v13 = vld [vmem:[%s16337_s10 + $0x2c] ss:$16 sps:$4 sm:$0xff]   ;;  %s16339_s26 = sld [smem:[#allocation10_spill]] }
  0x21   : > { %1035 = vmatprep.subr.bf16.mxu1 %v10934_v7  ;;  %v10939_v10 = vld [vmem:[%s16337_s10 + $0x40] ss:$16 sps:$4 sm:$0xff]   ;;  %10814 = vmatmul.mubr.msk.f32.vlgmr.msra.gmra.mxu0 %vm824_vm2, %v815_v9  ;;  %v10940_v11 = vld [vmem:[%s16337_s10 + $0x24] ss:$16 sps:$4 sm:$0xff]   ;;  %v10942_v15 = vld [vmem:[%s16337_s10 + $0x28] ss:$16 sps:$4 sm:$0xff]  }
  0x22   : > { %1075 = vmatpush1.bf16.msra.mxu0 %v10930_v4  ;;  %v10945_v14 = vld [vmem:[%s16337_s10 + $0x20] ss:$16 sps:$4 sm:$0xff]   ;;  %v10946_v16 = vld [vmem:[%s16337_s10 + $0x4] ss:$16 sps:$4 sm:$0xff]   ;;  %v10950_v17 = vld [vmem:[%s16337_s10 + $0xc] ss:$16 sps:$4 sm:$0xff]   ;;  %1098 = vmatprep.mubr.bf16.mxu0 %v16312_v22 }
  0x23   : > { %1076 = vmatprep.subr.bf16.mxu0 %v10938_v8  ;;  %v10948_v18 = vld [vmem:[%s16337_s10 + $0x8] ss:$16 sps:$4 sm:$0xff]   ;;  %v10951_v19 = vld [vmem:[%s16337_s10] ss:$16 sps:$4 sm:$0xff]   ;;  %v12695_v4 = vshrl.u32 %v921_v3, 7  ;;  %s16350_s0 = sld [smem:[#allocation16_spill]] }
  0x24   : > { %1036 = vmatpush1.bf16.msra.mxu1 %v10939_v10  ;;  %v10179_v23 = vld [vmem:[%s16340_s11] ss:$0 sm:$0xff]  ;;  %s16349_s11 = sld [smem:[#allocation15_spill]] }
  0x25   : > { %1037 = vmatprep.subr.bf16.mxu1 %v10940_v11  ;;  %16341 = vst [vmem:[#allocation3_spill] sm:$0xff] %v12695_v4  ;;  %v12698_v5 = vsub.s32 0, %v12695_v4  ;;  %v919_v6 = vld [vmem:[%s16342_s4] sm:$0xf]  ;;  %v12704_v7 = vsub.s32 1, %v12695_v4  ;;  %s16347_s4 = sld [smem:[#allocation14_spill]] }
  0x26   : > { %1077 = vmatpush1.bf16.msra.mxu0 %v10936_v12  ;;  %v12455_v20 = vld [vmem:[%s16339_s26 + $0xe4] ss:$16 sps:$4 sm:$0xff]   ;;  %v12460_v21 = vld [vmem:[%s16339_s26 + $0xec] ss:$16 sps:$4 sm:$0xff]   ;;  %v12472_v27 = vld [vmem:[%s16339_s26 + $0xe0] ss:$16 sps:$4 sm:$0xff]  }
  0x27   : > { %1078 = vmatprep.subr.bf16.mxu0 %v10944_v13  ;;  %v12477_v28 = vld [vmem:[%s16339_s26 + $0xe8] ss:$16 sps:$4 sm:$0xff]   ;;  %v12484_v30 = vld [vmem:[%s16339_s26 + $0xc4] ss:$16 sps:$4 sm:$0xff]   ;;  %v12489_v31 = vld [vmem:[%s16339_s26 + $0xcc] ss:$16 sps:$4 sm:$0xff]   ;;  %v924_v8 = vrot.slane %v919_v6, %v12698_v5  ;;  %v928_v9 = vrot.slane %v919_v6, %v12704_v7 }
  0x28   : > { %1038 = vmatpush1.bf16.msra.mxu1 %v10945_v14  ;;  %v12500_v32 = vld [vmem:[%s16339_s26 + $0xc0] ss:$16 sps:$4 sm:$0xff]   ;;  %v12505_v33 = vld [vmem:[%s16339_s26 + $0xc8] ss:$16 sps:$4 sm:$0xff]   ;;  %v12512_v34 = vld [vmem:[%s16339_s26 + $0xa4] ss:$16 sps:$4 sm:$0xff]  }
  0x29   : > { %1039 = vmatprep.subr.bf16.mxu1 %v10946_v16  ;;  %v12517_v35 = vld [vmem:[%s16339_s26 + $0xac] ss:$16 sps:$4 sm:$0xff]   ;;  %v12526_v36 = vld [vmem:[%s16339_s26 + $0xa0] ss:$16 sps:$4 sm:$0xff]   ;;  %v12531_v37 = vld [vmem:[%s16339_s26 + $0xa8] ss:$16 sps:$4 sm:$0xff]  }
  0x2a   : > { %1079 = vmatpush1.bf16.msra.mxu0 %v10942_v15  ;;  %v12538_v38 = vld [vmem:[%s16339_s26 + $0x84] ss:$16 sps:$4 sm:$0xff]   ;;  %v12543_v39 = vld [vmem:[%s16339_s26 + $0x8c] ss:$16 sps:$4 sm:$0xff]   ;;  %v12550_v40 = vld [vmem:[%s16339_s26 + $0x80] ss:$16 sps:$4 sm:$0xff]  }
  0x2b   : > { %1080 = vmatprep.subr.bf16.mxu0 %v10950_v17  ;;  %v12555_v41 = vld [vmem:[%s16339_s26 + $0x88] ss:$16 sps:$4 sm:$0xff]   ;;  %v12562_v42 = vld [vmem:[%s16339_s26 + $0x64] ss:$16 sps:$4 sm:$0xff]   ;;  %v12567_v43 = vld [vmem:[%s16339_s26 + $0x6c] ss:$16 sps:$4 sm:$0xff]  }
  0x2c   : > { %1040 = vmatpush1.bf16.msra.mxu1 %v10951_v19  ;;  %v12574_v44 = vld [vmem:[%s16339_s26 + $0x60] ss:$16 sps:$4 sm:$0xff]   ;;  %v12579_v45 = vld [vmem:[%s16339_s26 + $0x68] ss:$16 sps:$4 sm:$0xff]   ;;  %v12586_v46 = vld [vmem:[%s16339_s26 + $0x44] ss:$16 sps:$4 sm:$0xff]  }
  0x2d   : > { %1299 = vmatprep.subr.bf16.mxu1 %v12455_v20  ;;  %v12591_v47 = vld [vmem:[%s16339_s26 + $0x4c] ss:$16 sps:$4 sm:$0xff]   ;;  %v12598_v48 = vld [vmem:[%s16339_s26 + $0x40] ss:$16 sps:$4 sm:$0xff]   ;;  %v12603_v49 = vld [vmem:[%s16339_s26 + $0x48] ss:$16 sps:$4 sm:$0xff]  }
  0x2e   : > { %1081 = vmatpush1.bf16.msra.mxu0 %v10948_v18  ;;  %v12610_v50 = vld [vmem:[%s16339_s26 + $0x24] ss:$16 sps:$4 sm:$0xff]   ;;  %v12615_v51 = vld [vmem:[%s16339_s26 + $0x2c] ss:$16 sps:$4 sm:$0xff]   ;;  %v12622_v52 = vld [vmem:[%s16339_s26 + $0x20] ss:$16 sps:$4 sm:$0xff]  }
  0x2f   : > { %1340 = vmatprep.subr.bf16.mxu0 %v12460_v21  ;;  %v12627_v53 = vld [vmem:[%s16339_s26 + $0x28] ss:$16 sps:$4 sm:$0xff]   ;;  %v12634_v54 = vld [vmem:[%s16339_s26 + $0x4] ss:$16 sps:$4 sm:$0xff]   ;;  %v12639_v55 = vld [vmem:[%s16339_s26 + $0xc] ss:$16 sps:$4 sm:$0xff]  }
  0x30   : > { %v12646_v56 = vld [vmem:[%s16339_s26] ss:$16 sps:$4 sm:$0xff]   ;;  %v12651_v57 = vld [vmem:[%s16339_s26 + $0x8] ss:$16 sps:$4 sm:$0xff]   ;;  %16343 = vst [vmem:[#allocation4_spill] sm:$0xff] %v12704_v7  ;;  %v12714_v15 = vsub.s32 3, %v12695_v4 }
  0x31   : > { %s16351_s2 = sld [smem:[#allocation17_spill]] }
  0xe1   : > { %v898_v24 = vpop.f32.mrf.mxu0 }
  0xe2   : > { %v899_v25 = vadd.f32 %v10179_v23, %v898_v24 }
  0xe3   : > { %v10815_v26 = vpop.f32.mrf.mxu0 }
  0xe4   : > { %v12479_v29 = vpack.c.bf16 %v899_v25, %v899_v25  ;;  %v936_v26 = vrot.slane %v919_v6, %v12714_v15 }
  0xe6   : > { %10198 = vmatmul.mubr.msk.bf16.vlgmr.msra.gmra.mxu1 %vm1021_vm3, %v12479_v29  ;;  %10199 = vmatmul.mubr.msk.bf16.vlgmr.msra.gmra.mxu0 %vm1021_vm3, %v12479_v29 }
  0xe7   : > { %1300 = vmatpush1.bf16.msra.mxu1 %v12472_v27  ;;  %1341 = vmatpush1.bf16.msra.mxu0 %v12477_v28 }
  0xe8   : > { %1301 = vmatprep.subr.bf16.mxu1 %v12484_v30  ;;  %1342 = vmatprep.subr.bf16.mxu0 %v12489_v31 }
  0xe9   : > { %1331 = vmatprep.mubr.bf16.mxu1 %v16312_v22  ;;  %1372 = vmatprep.mubr.bf16.mxu0 %v16312_v22 }
  0xeb   : > { %1302 = vmatpush1.bf16.msra.mxu1 %v12500_v32  ;;  %1343 = vmatpush1.bf16.msra.mxu0 %v12505_v33 }
  0xec   : > { %1303 = vmatprep.subr.bf16.mxu1 %v12512_v34  ;;  %1344 = vmatprep.subr.bf16.mxu0 %v12517_v35 }
  0xef   : > { %1304 = vmatpush1.bf16.msra.mxu1 %v12526_v36  ;;  %1345 = vmatpush1.bf16.msra.mxu0 %v12531_v37 }
  0xf0   : > { %1305 = vmatprep.subr.bf16.mxu1 %v12538_v38  ;;  %1346 = vmatprep.subr.bf16.mxu0 %v12543_v39 }
  0xf3   : > { %1306 = vmatpush1.bf16.msra.mxu1 %v12550_v40  ;;  %1347 = vmatpush1.bf16.msra.mxu0 %v12555_v41 }
  0xf4   : > { %1307 = vmatprep.subr.bf16.mxu1 %v12562_v42  ;;  %1348 = vmatprep.subr.bf16.mxu0 %v12567_v43 }
  0xf7   : > { %1308 = vmatpush1.bf16.msra.mxu1 %v12574_v44  ;;  %1349 = vmatpush1.bf16.msra.mxu0 %v12579_v45 }
  0xf8   : > { %1309 = vmatprep.subr.bf16.mxu1 %v12586_v46  ;;  %1350 = vmatprep.subr.bf16.mxu0 %v12591_v47 }
  0xfb   : > { %1310 = vmatpush1.bf16.msra.mxu1 %v12598_v48  ;;  %1351 = vmatpush1.bf16.msra.mxu0 %v12603_v49 }
  0xfc   : > { %1311 = vmatprep.subr.bf16.mxu1 %v12610_v50  ;;  %1352 = vmatprep.subr.bf16.mxu0 %v12615_v51 }
  0xff   : > { %1312 = vmatpush1.bf16.msra.mxu1 %v12622_v52  ;;  %1353 = vmatpush1.bf16.msra.mxu0 %v12627_v53 }
 0x100   : > { %1313 = vmatprep.subr.bf16.mxu1 %v12634_v54  ;;  %1354 = vmatprep.subr.bf16.mxu0 %v12639_v55 }
 0x103   : > { %1314 = vmatpush1.bf16.msra.mxu1 %v12646_v56  ;;  %1355 = vmatpush1.bf16.msra.mxu0 %v12651_v57 }
 0x104   : > { %1410 = vmatprep.subr.bf16.mxu1 %v12455_v20  ;;  %1451 = vmatprep.subr.bf16.mxu0 %v12460_v21 }
 0x106   : > { %1332 = vmatmul.mubr.bf16.vlgmr.msra.gmra.mxu1 %v16312_v22  ;;  %1373 = vmatmul.mubr.bf16.vlgmr.msra.gmra.mxu0 %v16312_v22 }
 0x107   : > { %1411 = vmatpush1.bf16.msra.mxu1 %v12472_v27  ;;  %1452 = vmatpush1.bf16.msra.mxu0 %v12477_v28 }
 0x108   : > { %1412 = vmatprep.subr.bf16.mxu1 %v12484_v30  ;;  %1453 = vmatprep.subr.bf16.mxu0 %v12489_v31 }
 0x109   : > { %1442 = vmatprep.mubr.bf16.mxu1 %v16312_v22  ;;  %1483 = vmatprep.mubr.bf16.mxu0 %v16312_v22 }
 0x10b   : > { %1413 = vmatpush1.bf16.msra.mxu1 %v12500_v32  ;;  %1454 = vmatpush1.bf16.msra.mxu0 %v12505_v33 }
 0x10c   : > { %1414 = vmatprep.subr.bf16.mxu1 %v12512_v34  ;;  %1455 = vmatprep.subr.bf16.mxu0 %v12517_v35 }
 0x10f   : > { %1415 = vmatpush1.bf16.msra.mxu1 %v12526_v36  ;;  %1456 = vmatpush1.bf16.msra.mxu0 %v12531_v37 }
 0x110   : > { %1416 = vmatprep.subr.bf16.mxu1 %v12538_v38  ;;  %1457 = vmatprep.subr.bf16.mxu0 %v12543_v39 }
 0x113   : > { %1417 = vmatpush1.bf16.msra.mxu1 %v12550_v40  ;;  %1458 = vmatpush1.bf16.msra.mxu0 %v12555_v41 }
 0x114   : > { %1418 = vmatprep.subr.bf16.mxu1 %v12562_v42  ;;  %1459 = vmatprep.subr.bf16.mxu0 %v12567_v43 }
 0x117   : > { %1419 = vmatpush1.bf16.msra.mxu1 %v12574_v44  ;;  %1460 = vmatpush1.bf16.msra.mxu0 %v12579_v45 }
 0x118   : > { %1420 = vmatprep.subr.bf16.mxu1 %v12586_v46  ;;  %1461 = vmatprep.subr.bf16.mxu0 %v12591_v47 }
 0x11b   : > { %1421 = vmatpush1.bf16.msra.mxu1 %v12598_v48  ;;  %1462 = vmatpush1.bf16.msra.mxu0 %v12603_v49 }
 0x11c   : > { %1422 = vmatprep.subr.bf16.mxu1 %v12610_v50  ;;  %1463 = vmatprep.subr.bf16.mxu0 %v12615_v51 }
 0x11f   : > { %1423 = vmatpush1.bf16.msra.mxu1 %v12622_v52  ;;  %1464 = vmatpush1.bf16.msra.mxu0 %v12627_v53 }
 0x120   : > { %1424 = vmatprep.subr.bf16.mxu1 %v12634_v54  ;;  %1465 = vmatprep.subr.bf16.mxu0 %v12639_v55 }
 0x123   : > { %1425 = vmatpush1.bf16.msra.mxu1 %v12646_v56  ;;  %1466 = vmatpush1.bf16.msra.mxu0 %v12651_v57 }
 0x124   : > { %1540 = vmatprep.subr.bf16.mxu1 %v12455_v20  ;;  %1581 = vmatprep.subr.bf16.mxu0 %v12460_v21 }
 0x1a6   : > { %v1059_v58 = vpop.f32.mrf.mxu1  ;;  %v1100_v59 = vpop.f32.mrf.mxu0 }
 0x1a7   : > { %v12708_v10 = vadd.f32 %v1059_v58, %v924_v8 }
 0x1a8   : > { %v1061_v60 = vpop.f32.mrf.mxu1  ;;  %v1102_v61 = vpop.f32.mrf.mxu0 }
 0x1a9   : > { %v12710_v13 = vadd.f32 %v1061_v60, %v928_v9  ;;  %v12719_v60 = vsub.s32 2, %v12695_v4 }
 0x1aa   : > { %v1063_v62 = vpop.f32.mrf.mxu1  ;;  %v1104_v63 = vpop.f32.mrf.mxu0 }
 0x1ab   : > { %16344 = vst [vmem:[#allocation5_spill] sm:$0xff] %v12719_v60  ;;  %v12721_v63 = vadd.f32 %v1102_v61, %v936_v26 }
 0x1ac   : > { %v1064_v0 = vpop.f32.mrf.mxu1  ;;  %v1105_v1 = vpop.f32.mrf.mxu0 }
 0x1ad   : > { %v932_v0 = vrot.slane %v919_v6, %v12719_v60 }
 0x1af   : > { %v12725_v3 = vadd.f32 %v1100_v59, %v932_v0 }
 0x1c6   : > { %v1333_v11 = vpop.f32.mrf.mxu1  ;;  %v1374_v12 = vpop.f32.mrf.mxu0 }
 0x1c7   : > { %v1381_v14 = vadd.f32 %v1333_v11, %v12708_v10  ;;  %v1383_v11 = vadd.f32 %v1374_v12, %v12725_v3 }
 0x1c8   : > { %v1335_v16 = vpop.f32.mrf.mxu1  ;;  %v1376_v17 = vpop.f32.mrf.mxu0 }
 0x1c9   : > { %v10232_v18 = vmul.f32 -1.442695, %v1381_v14  ;;  %v1382_v19 = vadd.f32 %v1335_v16, %v12710_v13  ;;  %v1384_v1 = vadd.f32 %v1376_v17, %v12721_v63 }
 0x1ca   : > { %v1337_v23 = vpop.f32.mrf.mxu1  ;;  %v1378_v24 = vpop.f32.mrf.mxu0 }
 0x1cb   : > { %11552 = vpow2.f32 %v10232_v18  ;;  %v10233_v25 = vmul.f32 -1.442695, %v1382_v19  ;;  %v10234_v8 = vmul.f32 -1.442695, %v1384_v1 }
 0x1cc   : > { %v1338_v58 = vpop.f32.mrf.mxu1  ;;  %v1379_v62 = vpop.f32.mrf.mxu0 }
 0x1cd   : > { %11554 = vpow2.f32 %v10233_v25 }
 0x1ce   : > { %11556 = vpow2.f32 %v10234_v8 }
 0x1d8   : > { %v11553_v9 = vpop.eup %11552 }
 0x1d9   : > { %v1388_v14 = vadd.f32 1.0, %v11553_v9 }
 0x1da   : > { %v11555_v16 = vpop.eup %11554 }
 0x1db   : > { %11558 = vrcp.f32 %v1388_v14  ;;  %v1394_v18 = vadd.f32 1.0, %v11555_v16  ;;  %v11557_v19 = vpop.eup %11556 }
 0x1dc   : > { %11560 = vtanh.f32 %v1383_v11  ;;  %v1401_v6 = vadd.f32 1.0, %v11557_v19 }
 0x1dd   : > { %11562 = vrcp.f32 %v1394_v18 }
 0x1de   : > { %11564 = vrcp.f32 %v1401_v6 }
 0x1e8   : > { %v11559_v61 = vpop.eup %11558 }
 0x1e9   : > { %v11561_v23 = vpop.eup %11560 }
 0x1ea   : > { %v11563_v24 = vpop.eup %11562  ;;  %v1405_v17 = vmul.f32 %v11561_v23, %v11559_v61 }
 0x1eb   : > { %v1404_v25 = vmul.f32 0.0, %v11563_v24  ;;  %v11565_v12 = vpop.eup %11564 }
 0x1ed   : > { %v12728_v59 = vadd.f32 %v1405_v17, %v1404_v25 }
 0x1ef   : > { %11566 = vtanh.f32 %v12728_v59 }
 0x1fc   : > { %v11567_v26 = vpop.eup %11566 }
 0x1fd   : > { %v12731_v58 = vmul.f32 %v11567_v26, %v11565_v12 }
 0x1ff   : > { %v1409_v62 = vpack.c.bf16 %v12731_v58, %v12731_v58 }
 0x201   : > { %1443 = vmatmul.mubr.bf16.vlgmr.msra.gmra.mxu1 %v1409_v62  ;;  %1484 = vmatmul.mubr.bf16.vlgmr.msra.gmra.mxu0 %v1409_v62 }
 0x202   : > { %1541 = vmatpush1.bf16.msra.mxu1 %v12472_v27  ;;  %1582 = vmatpush1.bf16.msra.mxu0 %v12477_v28 }
 0x203   : > { %1542 = vmatprep.subr.bf16.mxu1 %v12484_v30  ;;  %1583 = vmatprep.subr.bf16.mxu0 %v12489_v31 }
 0x204   : > { %1572 = vmatprep.mubr.bf16.mxu1 %v16312_v22  ;;  %1613 = vmatprep.mubr.bf16.mxu0 %v16312_v22 }
 0x206   : > { %1543 = vmatpush1.bf16.msra.mxu1 %v12500_v32  ;;  %1584 = vmatpush1.bf16.msra.mxu0 %v12505_v33 }
 0x207   : > { %1544 = vmatprep.subr.bf16.mxu1 %v12512_v34  ;;  %1585 = vmatprep.subr.bf16.mxu0 %v12517_v35 }
 0x20a   : > { %1545 = vmatpush1.bf16.msra.mxu1 %v12526_v36  ;;  %1586 = vmatpush1.bf16.msra.mxu0 %v12531_v37 }
 0x20b   : > { %1546 = vmatprep.subr.bf16.mxu1 %v12538_v38  ;;  %1587 = vmatprep.subr.bf16.mxu0 %v12543_v39 }
 0x20e   : > { %1547 = vmatpush1.bf16.msra.mxu1 %v12550_v40  ;;  %1588 = vmatpush1.bf16.msra.mxu0 %v12555_v41 }
 0x20f   : > { %1548 = vmatprep.subr.bf16.mxu1 %v12562_v42  ;;  %1589 = vmatprep.subr.bf16.mxu0 %v12567_v43 }
 0x212   : > { %1549 = vmatpush1.bf16.msra.mxu1 %v12574_v44  ;;  %1590 = vmatpush1.bf16.msra.mxu0 %v12579_v45 }
 0x213   : > { %1550 = vmatprep.subr.bf16.mxu1 %v12586_v46  ;;  %1591 = vmatprep.subr.bf16.mxu0 %v12591_v47 }
 0x216   : > { %1551 = vmatpush1.bf16.msra.mxu1 %v12598_v48  ;;  %1592 = vmatpush1.bf16.msra.mxu0 %v12603_v49 }
 0x217   : > { %1552 = vmatprep.subr.bf16.mxu1 %v12610_v50  ;;  %1593 = vmatprep.subr.bf16.mxu0 %v12615_v51 }
 0x21a   : > { %1553 = vmatpush1.bf16.msra.mxu1 %v12622_v52  ;;  %1594 = vmatpush1.bf16.msra.mxu0 %v12627_v53 }
 0x21b   : > { %1554 = vmatprep.subr.bf16.mxu1 %v12634_v54  ;;  %1595 = vmatprep.subr.bf16.mxu0 %v12639_v55 }
 0x21e   : > { %1555 = vmatpush1.bf16.msra.mxu1 %v12646_v56  ;;  %1596 = vmatpush1.bf16.msra.mxu0 %v12651_v57 }
 0x21f   : > { %1669 = vmatprep.subr.bf16.mxu1 %v12455_v20  ;;  %1710 = vmatprep.subr.bf16.mxu0 %v12460_v21 }
 0x2c1   : > { %v1444_v0 = vpop.f32.mrf.mxu1  ;;  %v1485_v1 = vpop.f32.mrf.mxu0 }
 0x2c2   : > { %v1496_v8 = vrot.slane %v1444_v0, 7  ;;  %v1498_v26 = vrot.slane %v1485_v1, 7 }
 0x2c3   : > { %v1446_v9 = vpop.f32.mrf.mxu1  ;;  %v1487_v11 = vpop.f32.mrf.mxu0 }
 0x2c4   : > { %v1504_v14 = vadd.f32 %v1496_v8, %v12708_v10  ;;  %v1497_v16 = vrot.slane %v1446_v9, 7  ;;  %v1499_v17 = vrot.slane %v1487_v11, 7  ;;  %v1506_v2 = vadd.f32 %v1498_v26, %v12725_v3 }
 0x2c5   : > { %v1448_v18 = vpop.f32.mrf.mxu1  ;;  %v1489_v19 = vpop.f32.mrf.mxu0 }
 0x2c6   : > { %v10235_v61 = vmul.f32 -1.442695, %v1504_v14  ;;  %v1505_v23 = vadd.f32 %v1497_v16, %v12710_v13  ;;  %v1507_v12 = vadd.f32 %v1499_v17, %v12721_v63 }
 0x2c7   : > { %v1449_v24 = vpop.f32.mrf.mxu1  ;;  %v1490_v6 = vpop.f32.mrf.mxu0 }
 0x2c8   : > { %11568 = vpow2.f32 %v10235_v61  ;;  %v10236_v25 = vmul.f32 -1.442695, %v1505_v23  ;;  %v10237_v62 = vmul.f32 -1.442695, %v1507_v12  ;;  %v1528_v61 = vrot.slane %v12728_v59, 7 }
 0x2ca   : > { %11570 = vpow2.f32 %v10236_v25 }
 0x2cb   : > { %11572 = vpow2.f32 %v10237_v62 }
 0x2d5   : > { %v11569_v0 = vpop.eup %11568 }
 0x2d6   : > { %v1511_v8 = vadd.f32 1.0, %v11569_v0 }
 0x2d7   : > { %v11571_v9 = vpop.eup %11570 }
 0x2d8   : > { %11574 = vrcp.f32 %v1511_v8  ;;  %v1517_v14 = vadd.f32 1.0, %v11571_v9  ;;  %v11573_v16 = vpop.eup %11572 }
 0x2d9   : > { %11576 = vtanh.f32 %v1506_v2  ;;  %v1524_v23 = vadd.f32 1.0, %v11573_v16 }
 0x2da   : > { %11578 = vrcp.f32 %v1517_v14 }
 0x2db   : > { %11580 = vrcp.f32 %v1524_v23 }
 0x2e5   : > { %v11575_v18 = vpop.eup %11574 }
 0x2e6   : > { %v11577_v19 = vpop.eup %11576 }
 0x2e7   : > { %v11579_v11 = vpop.eup %11578  ;;  %v1531_v24 = vmul.f32 %v11577_v19, %v11575_v18 }
 0x2e8   : > { %v1530_v1 = vmul.f32 %v11579_v11, %v1528_v61  ;;  %v11581_v25 = vpop.eup %11580 }
 0x2ea   : > { %v12774_v6 = vadd.f32 %v1531_v24, %v1530_v1 }
 0x2ec   : > { %11582 = vtanh.f32 %v12774_v6 }
 0x2f9   : > { %v11583_v17 = vpop.eup %11582 }
 0x2fa   : > { %v12777_v12 = vmul.f32 %v11583_v17, %v11581_v25 }
 0x2fc   : > { %v1535_v2 = vpack.c.bf16 %v12777_v12, %v12777_v12 }
 0x2fe   : > { %v1537_v26 = vshrl.u32 %v1535_v2, 16 }
 0x300   : > { %1573 = vmatmul.mubr.bf16.vlgmr.msra.gmra.mxu1 %v1537_v26  ;;  %1614 = vmatmul.mubr.bf16.vlgmr.msra.gmra.mxu0 %v1537_v26 }
 0x301   : > { %1670 = vmatpush1.bf16.msra.mxu1 %v12472_v27  ;;  %1711 = vmatpush1.bf16.msra.mxu0 %v12477_v28 }
 0x302   : > { %1671 = vmatprep.subr.bf16.mxu1 %v12484_v30  ;;  %1712 = vmatprep.subr.bf16.mxu0 %v12489_v31 }
 0x303   : > { %1701 = vmatprep.mubr.bf16.mxu1 %v16312_v22  ;;  %1742 = vmatprep.mubr.bf16.mxu0 %v16312_v22 }
 0x305   : > { %1672 = vmatpush1.bf16.msra.mxu1 %v12500_v32  ;;  %1713 = vmatpush1.bf16.msra.mxu0 %v12505_v33 }
 0x306   : > { %1673 = vmatprep.subr.bf16.mxu1 %v12512_v34  ;;  %1714 = vmatprep.subr.bf16.mxu0 %v12517_v35 }
 0x309   : > { %1674 = vmatpush1.bf16.msra.mxu1 %v12526_v36  ;;  %1715 = vmatpush1.bf16.msra.mxu0 %v12531_v37 }
 0x30a   : > { %1675 = vmatprep.subr.bf16.mxu1 %v12538_v38  ;;  %1716 = vmatprep.subr.bf16.mxu0 %v12543_v39 }
 0x30d   : > { %1676 = vmatpush1.bf16.msra.mxu1 %v12550_v40  ;;  %1717 = vmatpush1.bf16.msra.mxu0 %v12555_v41 }
 0x30e   : > { %1677 = vmatprep.subr.bf16.mxu1 %v12562_v42  ;;  %1718 = vmatprep.subr.bf16.mxu0 %v12567_v43 }
 0x311   : > { %1678 = vmatpush1.bf16.msra.mxu1 %v12574_v44  ;;  %1719 = vmatpush1.bf16.msra.mxu0 %v12579_v45 }
 0x312   : > { %1679 = vmatprep.subr.bf16.mxu1 %v12586_v46  ;;  %1720 = vmatprep.subr.bf16.mxu0 %v12591_v47 }
 0x315   : > { %1680 = vmatpush1.bf16.msra.mxu1 %v12598_v48  ;;  %1721 = vmatpush1.bf16.msra.mxu0 %v12603_v49 }
 0x316   : > { %1681 = vmatprep.subr.bf16.mxu1 %v12610_v50  ;;  %1722 = vmatprep.subr.bf16.mxu0 %v12615_v51 }
 0x319   : > { %1682 = vmatpush1.bf16.msra.mxu1 %v12622_v52  ;;  %1723 = vmatpush1.bf16.msra.mxu0 %v12627_v53 }
 0x31a   : > { %1683 = vmatprep.subr.bf16.mxu1 %v12634_v54  ;;  %1724 = vmatprep.subr.bf16.mxu0 %v12639_v55 }
 0x31d   : > { %1684 = vmatpush1.bf16.msra.mxu1 %v12646_v56  ;;  %1725 = vmatpush1.bf16.msra.mxu0 %v12651_v57 }
 0x31e   : > { %1800 = vmatprep.subr.bf16.mxu1 %v12455_v20  ;;  %1841 = vmatprep.subr.bf16.mxu0 %v12460_v21 }
 0x3c0   : > { %v1574_v59 = vpop.f32.mrf.mxu1  ;;  %v1615_v62 = vpop.f32.mrf.mxu0 }
 0x3c1   : > { %v1626_v0 = vrot.slane %v1574_v59, 6  ;;  %v1628_v25 = vrot.slane %v1615_v62, 6 }
 0x3c2   : > { %v1576_v8 = vpop.f32.mrf.mxu1  ;;  %v1617_v9 = vpop.f32.mrf.mxu0 }
 0x3c3   : > { %v1634_v14 = vadd.f32 %v1626_v0, %v12708_v10  ;;  %v1627_v16 = vrot.slane %v1576_v8, 6  ;;  %v1629_v20 = vrot.slane %v1617_v9, 6  ;;  %v1636_v26 = vadd.f32 %v1628_v25, %v12725_v3 }
 0x3c4   : > { %v1578_v18 = vpop.f32.mrf.mxu1  ;;  %v1619_v19 = vpop.f32.mrf.mxu0 }
 0x3c5   : > { %v10238_v61 = vmul.f32 -1.442695, %v1634_v14  ;;  %v1635_v11 = vadd.f32 %v1627_v16, %v12710_v13  ;;  %v1637_v21 = vadd.f32 %v1629_v20, %v12721_v63  ;;  %v1658_v19 = vrot.slane %v12774_v6, 7 }
 0x3c6   : > { %v1579_v23 = vpop.f32.mrf.mxu1  ;;  %v1620_v24 = vpop.f32.mrf.mxu0 }
 0x3c7   : > { %11584 = vpow2.f32 %v10238_v61  ;;  %v10239_v1 = vmul.f32 -1.442695, %v1635_v11  ;;  %v10240_v17 = vmul.f32 -1.442695, %v1637_v21  ;;  %v2315_v21 = vsel %vm2314_vm4, %v12731_v58, %v12777_v12  ;;  %v12864_v58 = vld [vmem:[%s16339_s26 + $0xe4] ss:$16 sps:$4 sm:$0xff]  }
 0x3c8   : > { %v12870_v12 = vld [vmem:[%s16339_s26 + $0xec] ss:$16 sps:$4 sm:$0xff]  }
 0x3c9   : > { %11586 = vpow2.f32 %v10239_v1 }
 0x3ca   : > { %11588 = vpow2.f32 %v10240_v17 }
 0x3d4   : > { %v11585_v2 = vpop.eup %11584 }
 0x3d5   : > { %v1641_v59 = vadd.f32 1.0, %v11585_v2 }
 0x3d6   : > { %v11587_v0 = vpop.eup %11586 }
 0x3d7   : > { %11590 = vrcp.f32 %v1641_v59  ;;  %v1647_v8 = vadd.f32 1.0, %v11587_v0  ;;  %v11589_v14 = vpop.eup %11588 }
 0x3d8   : > { %11592 = vtanh.f32 %v1636_v26  ;;  %v1654_v61 = vadd.f32 1.0, %v11589_v14 }
 0x3d9   : > { %11594 = vrcp.f32 %v1647_v8 }
 0x3da   : > { %11596 = vrcp.f32 %v1654_v61 }
 0x3e4   : > { %v11591_v16 = vpop.eup %11590 }
 0x3e5   : > { %v11593_v18 = vpop.eup %11592 }
 0x3e6   : > { %v11595_v9 = vpop.eup %11594  ;;  %v1661_v11 = vmul.f32 %v11593_v18, %v11591_v16 }
 0x3e7   : > { %v1660_v62 = vmul.f32 %v11595_v9, %v1658_v19  ;;  %v11597_v24 = vpop.eup %11596 }
 0x3e9   : > { %v12820_v23 = vadd.f32 %v1661_v11, %v1660_v62 }
 0x3eb   : > { %11598 = vtanh.f32 %v12820_v23 }
 0x3f8   : > { %v11599_v1 = vpop.eup %11598 }
 0x3f9   : > { %v1664_v20 = vmul.f32 %v11599_v1, %v11597_v24 }
 0x3fb   : > { %v1665_v25 = vpack.c.bf16 %v1664_v20, %v1664_v20  ;;  %v12827_v6 = vsel %vm828_vm0, %v2315_v21, %v1664_v20 }
 0x3fd   : > { %v1667_v17 = vrot.slane %v1665_v25, 1 }
 0x3ff   : > { %1702 = vmatmul.mubr.bf16.vlgmr.msra.gmra.mxu1 %v1667_v17  ;;  %1743 = vmatmul.mubr.bf16.vlgmr.msra.gmra.mxu0 %v1667_v17 }
 0x400   : > { %1801 = vmatpush1.bf16.msra.mxu1 %v12472_v27  ;;  %1842 = vmatpush1.bf16.msra.mxu0 %v12477_v28 }
 0x401   : > { %1802 = vmatprep.subr.bf16.mxu1 %v12484_v30  ;;  %1843 = vmatprep.subr.bf16.mxu0 %v12489_v31 }
 0x402   : > { %1832 = vmatprep.mubr.bf16.mxu1 %v16312_v22  ;;  %1873 = vmatprep.mubr.bf16.mxu0 %v16312_v22 }
 0x404   : > { %1803 = vmatpush1.bf16.msra.mxu1 %v12500_v32  ;;  %1844 = vmatpush1.bf16.msra.mxu0 %v12505_v33 }
 0x405   : > { %1804 = vmatprep.subr.bf16.mxu1 %v12512_v34  ;;  %1845 = vmatprep.subr.bf16.mxu0 %v12517_v35 }
 0x408   : > { %1805 = vmatpush1.bf16.msra.mxu1 %v12526_v36  ;;  %1846 = vmatpush1.bf16.msra.mxu0 %v12531_v37 }
 0x409   : > { %1806 = vmatprep.subr.bf16.mxu1 %v12538_v38  ;;  %1847 = vmatprep.subr.bf16.mxu0 %v12543_v39 }
 0x40c   : > { %1807 = vmatpush1.bf16.msra.mxu1 %v12550_v40  ;;  %1848 = vmatpush1.bf16.msra.mxu0 %v12555_v41 }
 0x40d   : > { %1808 = vmatprep.subr.bf16.mxu1 %v12562_v42  ;;  %1849 = vmatprep.subr.bf16.mxu0 %v12567_v43 }
 0x410   : > { %1809 = vmatpush1.bf16.msra.mxu1 %v12574_v44  ;;  %1850 = vmatpush1.bf16.msra.mxu0 %v12579_v45 }
 0x411   : > { %1810 = vmatprep.subr.bf16.mxu1 %v12586_v46  ;;  %1851 = vmatprep.subr.bf16.mxu0 %v12591_v47 }
 0x414   : > { %1811 = vmatpush1.bf16.msra.mxu1 %v12598_v48  ;;  %1852 = vmatpush1.bf16.msra.mxu0 %v12603_v49 }
 0x415   : > { %1812 = vmatprep.subr.bf16.mxu1 %v12610_v50  ;;  %1853 = vmatprep.subr.bf16.mxu0 %v12615_v51 }
 0x418   : > { %1813 = vmatpush1.bf16.msra.mxu1 %v12622_v52  ;;  %1854 = vmatpush1.bf16.msra.mxu0 %v12627_v53 }
 0x419   : > { %1814 = vmatprep.subr.bf16.mxu1 %v12634_v54  ;;  %1855 = vmatprep.subr.bf16.mxu0 %v12639_v55 }
 0x41c   : > { %1815 = vmatpush1.bf16.msra.mxu1 %v12646_v56  ;;  %1856 = vmatpush1.bf16.msra.mxu0 %v12651_v57 }
 0x41d   : > { %1929 = vmatprep.subr.bf16.mxu1 %v12864_v58  ;;  %1970 = vmatprep.subr.bf16.mxu0 %v12870_v12 }
 0x4bf   : > { %v1703_v2 = vpop.f32.mrf.mxu1  ;;  %v1744_v26 = vpop.f32.mrf.mxu0 }
 0x4c0   : > { %v1755_v59 = vrot.slane %v1703_v2, 5  ;;  %v1757_v21 = vrot.slane %v1744_v26, 5 }
 0x4c1   : > { %v1705_v0 = vpop.f32.mrf.mxu1  ;;  %v1746_v8 = vpop.f32.mrf.mxu0 }
 0x4c2   : > { %v1763_v14 = vadd.f32 %v1755_v59, %v12708_v10  ;;  %v1756_v16 = vrot.slane %v1705_v0, 5  ;;  %v1758_v1 = vrot.slane %v1746_v8, 5  ;;  %v1765_v2 = vadd.f32 %v1757_v21, %v12725_v3 }
 0x4c3   : > { %v1707_v18 = vpop.f32.mrf.mxu1  ;;  %v1748_v19 = vpop.f32.mrf.mxu0 }
 0x4c4   : > { %v10241_v9 = vmul.f32 -1.442695, %v1763_v14  ;;  %v1764_v61 = vadd.f32 %v1756_v16, %v12710_v13  ;;  %v1766_v20 = vadd.f32 %v1758_v1, %v12721_v63 }
 0x4c5   : > { %v1708_v11 = vpop.f32.mrf.mxu1  ;;  %v1749_v62 = vpop.f32.mrf.mxu0 }
 0x4c6   : > { %11600 = vpow2.f32 %v10241_v9  ;;  %v10242_v24 = vmul.f32 -1.442695, %v1764_v61  ;;  %v10243_v25 = vmul.f32 -1.442695, %v1766_v20  ;;  %v1787_v9 = vrot.slane %v12820_v23, 7 }
 0x4c8   : > { %11602 = vpow2.f32 %v10242_v24 }
 0x4c9   : > { %11604 = vpow2.f32 %v10243_v25 }
 0x4d3   : > { %v11601_v17 = vpop.eup %11600 }
 0x4d4   : > { %v1770_v59 = vadd.f32 1.0, %v11601_v17 }
 0x4d5   : > { %v11603_v0 = vpop.eup %11602 }
 0x4d6   : > { %11606 = vrcp.f32 %v1770_v59  ;;  %v1776_v14 = vadd.f32 1.0, %v11603_v0  ;;  %v11605_v16 = vpop.eup %11604 }
 0x4d7   : > { %11608 = vtanh.f32 %v1765_v2  ;;  %v1783_v61 = vadd.f32 1.0, %v11605_v16 }
 0x4d8   : > { %11610 = vrcp.f32 %v1776_v14 }
 0x4d9   : > { %11612 = vrcp.f32 %v1783_v61 }
 0x4e3   : > { %v11607_v18 = vpop.eup %11606 }
 0x4e4   : > { %v11609_v19 = vpop.eup %11608 }
 0x4e5   : > { %v11611_v8 = vpop.eup %11610  ;;  %v1790_v11 = vmul.f32 %v11609_v19, %v11607_v18 }
 0x4e6   : > { %v1789_v26 = vmul.f32 %v11611_v8, %v1787_v9  ;;  %v11613_v24 = vpop.eup %11612 }
 0x4e8   : > { %v12878_v62 = vadd.f32 %v1790_v11, %v1789_v26 }
 0x4ea   : > { %11614 = vtanh.f32 %v12878_v62 }
 0x4f7   : > { %v11615_v1 = vpop.eup %11614 }
 0x4f8   : > { %v1793_v20 = vmul.f32 %v11615_v1, %v11613_v24 }
 0x4fa   : > { %v1794_v21 = vpack.c.bf16 %v1793_v20, %v1793_v20  ;;  %v12883_v25 = vsel %vm2317_vm5, %v12827_v6, %v1793_v20 }
 0x4fc   : > { %v1796_v17 = vshrl.u32 %v1794_v21, 16 }
 0x4fe   : > { %v1798_v23 = vrot.slane %v1796_v17, 1 }
 0x500   : > { %1833 = vmatmul.mubr.bf16.vlgmr.msra.gmra.mxu1 %v1798_v23  ;;  %1874 = vmatmul.mubr.bf16.vlgmr.msra.gmra.mxu0 %v1798_v23 }
 0x501   : > { %1930 = vmatpush1.bf16.msra.mxu1 %v12472_v27  ;;  %1971 = vmatpush1.bf16.msra.mxu0 %v12477_v28 }
 0x502   : > { %1931 = vmatprep.subr.bf16.mxu1 %v12484_v30  ;;  %1972 = vmatprep.subr.bf16.mxu0 %v12489_v31 }
 0x503   : > { %1961 = vmatprep.mubr.bf16.mxu1 %v16312_v22  ;;  %2002 = vmatprep.mubr.bf16.mxu0 %v16312_v22 }
 0x505   : > { %1932 = vmatpush1.bf16.msra.mxu1 %v12500_v32  ;;  %1973 = vmatpush1.bf16.msra.mxu0 %v12505_v33 }
 0x506   : > { %1933 = vmatprep.subr.bf16.mxu1 %v12512_v34  ;;  %1974 = vmatprep.subr.bf16.mxu0 %v12517_v35 }
 0x509   : > { %1934 = vmatpush1.bf16.msra.mxu1 %v12526_v36  ;;  %1975 = vmatpush1.bf16.msra.mxu0 %v12531_v37 }
 0x50a   : > { %1935 = vmatprep.subr.bf16.mxu1 %v12538_v38  ;;  %1976 = vmatprep.subr.bf16.mxu0 %v12543_v39 }
 0x50d   : > { %1936 = vmatpush1.bf16.msra.mxu1 %v12550_v40  ;;  %1977 = vmatpush1.bf16.msra.mxu0 %v12555_v41 }
 0x50e   : > { %1937 = vmatprep.subr.bf16.mxu1 %v12562_v42  ;;  %1978 = vmatprep.subr.bf16.mxu0 %v12567_v43 }
 0x511   : > { %1938 = vmatpush1.bf16.msra.mxu1 %v12574_v44  ;;  %1979 = vmatpush1.bf16.msra.mxu0 %v12579_v45 }
 0x512   : > { %1939 = vmatprep.subr.bf16.mxu1 %v12586_v46  ;;  %1980 = vmatprep.subr.bf16.mxu0 %v12591_v47 }
 0x515   : > { %1940 = vmatpush1.bf16.msra.mxu1 %v12598_v48  ;;  %1981 = vmatpush1.bf16.msra.mxu0 %v12603_v49 }
 0x516   : > { %1941 = vmatprep.subr.bf16.mxu1 %v12610_v50  ;;  %1982 = vmatprep.subr.bf16.mxu0 %v12615_v51 }
 0x519   : > { %1942 = vmatpush1.bf16.msra.mxu1 %v12622_v52  ;;  %1983 = vmatpush1.bf16.msra.mxu0 %v12627_v53 }
 0x51a   : > { %1943 = vmatprep.subr.bf16.mxu1 %v12634_v54  ;;  %1984 = vmatprep.subr.bf16.mxu0 %v12639_v55 }
 0x51d   : > { %1944 = vmatpush1.bf16.msra.mxu1 %v12646_v56  ;;  %1985 = vmatpush1.bf16.msra.mxu0 %v12651_v57 }
 0x51e   : > { %2060 = vmatprep.subr.bf16.mxu1 %v12864_v58  ;;  %2101 = vmatprep.subr.bf16.mxu0 %v12870_v12 }
 0x5c0   : > { %v1834_v6 = vpop.f32.mrf.mxu1  ;;  %v1875_v2 = vpop.f32.mrf.mxu0 }
 0x5c1   : > { %v1886_v59 = vrot.slane %v1834_v6, 4  ;;  %v1888_v21 = vrot.slane %v1875_v2, 4 }
 0x5c2   : > { %v1836_v0 = vpop.f32.mrf.mxu1  ;;  %v1877_v14 = vpop.f32.mrf.mxu0 }
 0x5c3   : > { %v1894_v16 = vadd.f32 %v1886_v59, %v12708_v10  ;;  %v1887_v18 = vrot.slane %v1836_v0, 4  ;;  %v1889_v1 = vrot.slane %v1877_v14, 4  ;;  %v1896_v6 = vadd.f32 %v1888_v21, %v12725_v3 }
 0x5c4   : > { %v1838_v19 = vpop.f32.mrf.mxu1  ;;  %v1879_v9 = vpop.f32.mrf.mxu0 }
 0x5c5   : > { %v10244_v8 = vmul.f32 -1.442695, %v1894_v16  ;;  %v1895_v61 = vadd.f32 %v1887_v18, %v12710_v13  ;;  %v1897_v20 = vadd.f32 %v1889_v1, %v12721_v63 }
 0x5c6   : > { %v1839_v11 = vpop.f32.mrf.mxu1  ;;  %v1880_v26 = vpop.f32.mrf.mxu0 }
 0x5c7   : > { %11616 = vpow2.f32 %v10244_v8  ;;  %v10245_v24 = vmul.f32 -1.442695, %v1895_v61  ;;  %v10246_v17 = vmul.f32 -1.442695, %v1897_v20  ;;  %v1918_v8 = vrot.slane %v12878_v62, 7 }
 0x5c9   : > { %11618 = vpow2.f32 %v10245_v24 }
 0x5ca   : > { %11620 = vpow2.f32 %v10246_v17 }
 0x5d4   : > { %v11617_v23 = vpop.eup %11616 }
 0x5d5   : > { %v1901_v59 = vadd.f32 1.0, %v11617_v23 }
 0x5d6   : > { %v11619_v0 = vpop.eup %11618 }
 0x5d7   : > { %11622 = vrcp.f32 %v1901_v59  ;;  %v1907_v16 = vadd.f32 1.0, %v11619_v0  ;;  %v11621_v18 = vpop.eup %11620 }
 0x5d8   : > { %11624 = vtanh.f32 %v1896_v6  ;;  %v1914_v61 = vadd.f32 1.0, %v11621_v18 }
 0x5d9   : > { %11626 = vrcp.f32 %v1907_v16 }
 0x5da   : > { %11628 = vrcp.f32 %v1914_v61  ;;  %v12104_v61 = vld [vmem:[%s16339_s26 + $0xc0] ss:$16 sps:$4 sm:$0xff]  }
 0x5e4   : > { %v11623_v19 = vpop.eup %11622 }
 0x5e5   : > { %v11625_v9 = vpop.eup %11624 }
 0x5e6   : > { %v11627_v14 = vpop.eup %11626  ;;  %v1921_v11 = vmul.f32 %v11625_v9, %v11623_v19  ;;  %v12100_v19 = vld [vmem:[%s16339_s26 + $0xe0] ss:$16 sps:$4 sm:$0xff]   ;;  %v12101_v9 = vld [vmem:[%s16339_s26 + $0xe8] ss:$16 sps:$4 sm:$0xff]  }
 0x5e7   : > { %v1920_v2 = vmul.f32 %v11627_v14, %v1918_v8  ;;  %v11629_v24 = vpop.eup %11628  ;;  %v12102_v8 = vld [vmem:[%s16339_s26 + $0xc4] ss:$16 sps:$4 sm:$0xff]   ;;  %v12103_v14 = vld [vmem:[%s16339_s26 + $0xcc] ss:$16 sps:$4 sm:$0xff]  }
 0x5e9   : > { %v12924_v26 = vadd.f32 %v1921_v11, %v1920_v2  ;;  %v12105_v11 = vld [vmem:[%s16339_s26 + $0xc8] ss:$16 sps:$4 sm:$0xff]   ;;  %v12106_v2 = vld [vmem:[%s16339_s26 + $0xa4] ss:$16 sps:$4 sm:$0xff]  }
 0x5eb   : > { %11630 = vtanh.f32 %v12924_v26 }
 0x5f8   : > { %v11631_v1 = vpop.eup %11630 }
 0x5f9   : > { %v1924_v20 = vmul.f32 %v11631_v1, %v11629_v24  ;;  %v12108_v24 = vld [vmem:[%s16339_s26 + $0xa0] ss:$16 sps:$4 sm:$0xff]   ;;  %v12109_v1 = vld [vmem:[%s16339_s26 + $0xa8] ss:$16 sps:$4 sm:$0xff]  }
 0x5fb   : > { %v1925_v21 = vpack.c.bf16 %v1924_v20, %v1924_v20  ;;  %v12929_v17 = vsel %vm2319_vm6, %v12883_v25, %v1924_v20  ;;  %v12110_v20 = vld [vmem:[%s16339_s26 + $0x84] ss:$16 sps:$4 sm:$0xff]  }
 0x5fd   : > { %v1927_v23 = vrot.slane %v1925_v21, 2  ;;  %v12111_v21 = vld [vmem:[%s16339_s26 + $0x8c] ss:$16 sps:$4 sm:$0xff]  }
 0x5ff   : > { %1962 = vmatmul.mubr.bf16.vlgmr.msra.gmra.mxu1 %v1927_v23  ;;  %2003 = vmatmul.mubr.bf16.vlgmr.msra.gmra.mxu0 %v1927_v23  ;;  %v12113_v23 = vld [vmem:[%s16339_s26 + $0x88] ss:$16 sps:$4 sm:$0xff]  }
 0x600   : > { %2061 = vmatpush1.bf16.msra.mxu1 %v12472_v27  ;;  %2102 = vmatpush1.bf16.msra.mxu0 %v12477_v28 }
 0x601   : > { %2062 = vmatprep.subr.bf16.mxu1 %v12484_v30  ;;  %2103 = vmatprep.subr.bf16.mxu0 %v12489_v31 }
 0x602   : > { %2092 = vmatprep.mubr.bf16.mxu1 %v16312_v22  ;;  %2133 = vmatprep.mubr.bf16.mxu0 %v16312_v22 }
 0x604   : > { %2063 = vmatpush1.bf16.msra.mxu1 %v12500_v32  ;;  %2104 = vmatpush1.bf16.msra.mxu0 %v12505_v33 }
 0x605   : > { %2064 = vmatprep.subr.bf16.mxu1 %v12512_v34  ;;  %2105 = vmatprep.subr.bf16.mxu0 %v12517_v35 }
 0x608   : > { %2065 = vmatpush1.bf16.msra.mxu1 %v12526_v36  ;;  %2106 = vmatpush1.bf16.msra.mxu0 %v12531_v37 }
 0x609   : > { %2066 = vmatprep.subr.bf16.mxu1 %v12538_v38  ;;  %2107 = vmatprep.subr.bf16.mxu0 %v12543_v39 }
 0x60c   : > { %2067 = vmatpush1.bf16.msra.mxu1 %v12550_v40  ;;  %2108 = vmatpush1.bf16.msra.mxu0 %v12555_v41 }
 0x60d   : > { %2068 = vmatprep.subr.bf16.mxu1 %v12562_v42  ;;  %2109 = vmatprep.subr.bf16.mxu0 %v12567_v43 }
 0x610   : > { %2069 = vmatpush1.bf16.msra.mxu1 %v12574_v44  ;;  %2110 = vmatpush1.bf16.msra.mxu0 %v12579_v45 }
 0x611   : > { %2070 = vmatprep.subr.bf16.mxu1 %v12586_v46  ;;  %2111 = vmatprep.subr.bf16.mxu0 %v12591_v47 }
 0x614   : > { %2071 = vmatpush1.bf16.msra.mxu1 %v12598_v48  ;;  %2112 = vmatpush1.bf16.msra.mxu0 %v12603_v49 }
 0x615   : > { %2072 = vmatprep.subr.bf16.mxu1 %v12610_v50  ;;  %2113 = vmatprep.subr.bf16.mxu0 %v12615_v51 }
 0x618   : > { %2073 = vmatpush1.bf16.msra.mxu1 %v12622_v52  ;;  %2114 = vmatpush1.bf16.msra.mxu0 %v12627_v53 }
 0x619   : > { %2074 = vmatprep.subr.bf16.mxu1 %v12634_v54  ;;  %2115 = vmatprep.subr.bf16.mxu0 %v12639_v55  ;;  %v2047_v54 = vrot.slane %v12924_v26, 7  ;;  %v12107_v26 = vld [vmem:[%s16339_s26 + $0xac] ss:$16 sps:$4 sm:$0xff]  }
 0x61c   : > { %2075 = vmatpush1.bf16.msra.mxu1 %v12646_v56  ;;  %2116 = vmatpush1.bf16.msra.mxu0 %v12651_v57 }
 0x61d   : > { %2189 = vmatprep.subr.bf16.mxu1 %v12864_v58  ;;  %2230 = vmatprep.subr.bf16.mxu0 %v12870_v12 }
 0x6bf   : > { %v1963_v27 = vpop.f32.mrf.mxu1  ;;  %v2004_v28 = vpop.f32.mrf.mxu0 }
 0x6c0   : > { %v2015_v30 = vrot.slane %v1963_v27, 3  ;;  %v2017_v44 = vrot.slane %v2004_v28, 3  ;;  %v12114_v27 = vld [vmem:[%s16339_s26 + $0x64] ss:$16 sps:$4 sm:$0xff]   ;;  %v12115_v28 = vld [vmem:[%s16339_s26 + $0x6c] ss:$16 sps:$4 sm:$0xff]  }
 0x6c1   : > { %v1965_v31 = vpop.f32.mrf.mxu1  ;;  %v2006_v32 = vpop.f32.mrf.mxu0 }
 0x6c2   : > { %v2023_v33 = vadd.f32 %v2015_v30, %v12708_v10  ;;  %v2016_v34 = vrot.slane %v1965_v31, 3  ;;  %v2018_v42 = vrot.slane %v2006_v32, 3  ;;  %v2025_v47 = vadd.f32 %v2017_v44, %v12725_v3  ;;  %v12116_v30 = vld [vmem:[%s16339_s26 + $0x60] ss:$16 sps:$4 sm:$0xff]   ;;  %v12117_v31 = vld [vmem:[%s16339_s26 + $0x68] ss:$16 sps:$4 sm:$0xff]  }
 0x6c3   : > { %v1967_v35 = vpop.f32.mrf.mxu1  ;;  %v2008_v36 = vpop.f32.mrf.mxu0  ;;  %v12118_v32 = vld [vmem:[%s16339_s26 + $0x44] ss:$16 sps:$4 sm:$0xff]  }
 0x6c4   : > { %v10247_v37 = vmul.f32 -1.442695, %v2023_v33  ;;  %v2024_v38 = vadd.f32 %v2016_v34, %v12710_v13  ;;  %v2026_v43 = vadd.f32 %v2018_v42, %v12721_v63  ;;  %v12119_v33 = vld [vmem:[%s16339_s26 + $0x4c] ss:$16 sps:$4 sm:$0xff]   ;;  %v12120_v34 = vld [vmem:[%s16339_s26 + $0x40] ss:$16 sps:$4 sm:$0xff]  }
 0x6c5   : > { %v1968_v39 = vpop.f32.mrf.mxu1  ;;  %v2009_v40 = vpop.f32.mrf.mxu0  ;;  %v12121_v35 = vld [vmem:[%s16339_s26 + $0x48] ss:$16 sps:$4 sm:$0xff]   ;;  %v12122_v36 = vld [vmem:[%s16339_s26 + $0x24] ss:$16 sps:$4 sm:$0xff]   ;;  %v12128_v42 = vld [vmem:[%s16339_s26] ss:$16 sps:$4 sm:$0xff]  }
 0x6c6   : > { %11632 = vpow2.f32 %v10247_v37  ;;  %v10248_v41 = vmul.f32 -1.442695, %v2024_v38  ;;  %v10249_v45 = vmul.f32 -1.442695, %v2026_v43  ;;  %v12123_v37 = vld [vmem:[%s16339_s26 + $0x2c] ss:$16 sps:$4 sm:$0xff]  }
 0x6c7   : > { %v12124_v38 = vld [vmem:[%s16339_s26 + $0x20] ss:$16 sps:$4 sm:$0xff]   ;;  %v12125_v39 = vld [vmem:[%s16339_s26 + $0x28] ss:$16 sps:$4 sm:$0xff]   ;;  %v12126_v40 = vld [vmem:[%s16339_s26 + $0x4] ss:$16 sps:$4 sm:$0xff]  }
 0x6c8   : > { %11634 = vpow2.f32 %v10248_v41  ;;  %v12127_v41 = vld [vmem:[%s16339_s26 + $0xc] ss:$16 sps:$4 sm:$0xff]   ;;  %v12129_v43 = vld [vmem:[%s16339_s26 + $0x8] ss:$16 sps:$4 sm:$0xff]   ;;  %v11002_v44 = vld [vmem:[%s16345_s1 + $0x64] ss:$16 sps:$4 sm:$0xff]  }
 0x6c9   : > { %11636 = vpow2.f32 %v10249_v45  ;;  %v11005_v45 = vld [vmem:[%s16345_s1 + $0x6c] ss:$16 sps:$4 sm:$0xff]  }
 0x6d3   : > { %v11633_v46 = vpop.eup %11632 }
 0x6d4   : > { %v2030_v48 = vadd.f32 1.0, %v11633_v46 }
 0x6d5   : > { %v11635_v49 = vpop.eup %11634 }
 0x6d6   : > { %11638 = vrcp.f32 %v2030_v48  ;;  %v2036_v50 = vadd.f32 1.0, %v11635_v49  ;;  %v11637_v51 = vpop.eup %11636 }
 0x6d7   : > { %11640 = vtanh.f32 %v2025_v47  ;;  %v2043_v56 = vadd.f32 1.0, %v11637_v51 }
 0x6d8   : > { %11642 = vrcp.f32 %v2036_v50 }
 0x6d9   : > { %11644 = vrcp.f32 %v2043_v56 }
 0x6e3   : > { %v11639_v52 = vpop.eup %11638 }
 0x6e4   : > { %v11641_v53 = vpop.eup %11640 }
 0x6e5   : > { %v11643_v55 = vpop.eup %11642  ;;  %v2050_v57 = vmul.f32 %v11641_v53, %v11639_v52 }
 0x6e6   : > { %v2049_v58 = vmul.f32 %v11643_v55, %v2047_v54  ;;  %v11645_v62 = vpop.eup %11644 }
 0x6e8   : > { %v12970_v12 = vadd.f32 %v2050_v57, %v2049_v58 }
 0x6ea   : > { %11646 = vtanh.f32 %v12970_v12 }
 0x6f7   : > { %v11647_v25 = vpop.eup %11646 }
 0x6f8   : > { %v2053_v6 = vmul.f32 %v11647_v25, %v11645_v62 }
 0x6fa   : > { %v2054_v59 = vpack.c.bf16 %v2053_v6, %v2053_v6  ;;  %v12975_v0 = vsel %vm2321_vm7, %v12929_v17, %v2053_v6  ;;  %v12112_v17 = vld [vmem:[%s16339_s26 + $0x80] ss:$16 sps:$4 sm:$0xff]  }
 0x6fc   : > { %v2056_v16 = vshrl.u32 %v2054_v59, 16 }
 0x6fe   : > { %v2058_v18 = vrot.slane %v2056_v16, 2 }
 0x700   : > { %2093 = vmatmul.mubr.bf16.vlgmr.msra.gmra.mxu1 %v2058_v18  ;;  %2134 = vmatmul.mubr.bf16.vlgmr.msra.gmra.mxu0 %v2058_v18 }
 0x701   : > { %2190 = vmatpush1.bf16.msra.mxu1 %v12100_v19  ;;  %2231 = vmatpush1.bf16.msra.mxu0 %v12101_v9 }
 0x702   : > { %2191 = vmatprep.subr.bf16.mxu1 %v12102_v8  ;;  %2232 = vmatprep.subr.bf16.mxu0 %v12103_v14 }
 0x703   : > { %2221 = vmatprep.mubr.bf16.mxu1 %v16312_v22  ;;  %2262 = vmatprep.mubr.bf16.mxu0 %v16312_v22 }
 0x705   : > { %2192 = vmatpush1.bf16.msra.mxu1 %v12104_v61  ;;  %2233 = vmatpush1.bf16.msra.mxu0 %v12105_v11 }
 0x706   : > { %2193 = vmatprep.subr.bf16.mxu1 %v12106_v2  ;;  %2234 = vmatprep.subr.bf16.mxu0 %v12107_v26  ;;  %v2178_v26 = vrot.slane %v12970_v12, 7  ;;  %v11000_v12 = vld [vmem:[%s16345_s1 + $0x60] ss:$16 sps:$4 sm:$0xff]  }
 0x709   : > { %2194 = vmatpush1.bf16.msra.mxu1 %v12108_v24  ;;  %2235 = vmatpush1.bf16.msra.mxu0 %v12109_v1 }
 0x70a   : > { %2195 = vmatprep.subr.bf16.mxu1 %v12110_v20  ;;  %2236 = vmatprep.subr.bf16.mxu0 %v12111_v21 }
 0x70d   : > { %2196 = vmatpush1.bf16.msra.mxu1 %v12112_v17  ;;  %2237 = vmatpush1.bf16.msra.mxu0 %v12113_v23 }
 0x70e   : > { %2197 = vmatprep.subr.bf16.mxu1 %v12114_v27  ;;  %2238 = vmatprep.subr.bf16.mxu0 %v12115_v28 }
 0x711   : > { %2198 = vmatpush1.bf16.msra.mxu1 %v12116_v30  ;;  %2239 = vmatpush1.bf16.msra.mxu0 %v12117_v31 }
 0x712   : > { %2199 = vmatprep.subr.bf16.mxu1 %v12118_v32  ;;  %2240 = vmatprep.subr.bf16.mxu0 %v12119_v33  ;;  %v11003_v32 = vld [vmem:[%s16345_s1 + $0x68] ss:$16 sps:$4 sm:$0xff]  }
 0x715   : > { %2200 = vmatpush1.bf16.msra.mxu1 %v12120_v34  ;;  %2241 = vmatpush1.bf16.msra.mxu0 %v12121_v35  ;;  %v11008_v34 = vld [vmem:[%s16345_s1 + $0x44] ss:$16 sps:$4 sm:$0xff]   ;;  %v11011_v35 = vld [vmem:[%s16345_s1 + $0x4c] ss:$16 sps:$4 sm:$0xff]  }
 0x716   : > { %2201 = vmatprep.subr.bf16.mxu1 %v12122_v36  ;;  %2242 = vmatprep.subr.bf16.mxu0 %v12123_v37  ;;  %v11009_v36 = vld [vmem:[%s16345_s1 + $0x48] ss:$16 sps:$4 sm:$0xff]   ;;  %v11014_v37 = vld [vmem:[%s16345_s1 + $0x24] ss:$16 sps:$4 sm:$0xff]  }
 0x719   : > { %2202 = vmatpush1.bf16.msra.mxu1 %v12124_v38  ;;  %2243 = vmatpush1.bf16.msra.mxu0 %v12125_v39  ;;  %v11017_v38 = vld [vmem:[%s16345_s1 + $0x2c] ss:$16 sps:$4 sm:$0xff]   ;;  %v11012_v39 = vld [vmem:[%s16345_s1 + $0x20] ss:$16 sps:$4 sm:$0xff]  }
 0x71a   : > { %2203 = vmatprep.subr.bf16.mxu1 %v12126_v40  ;;  %2244 = vmatprep.subr.bf16.mxu0 %v12127_v41  ;;  %v11015_v40 = vld [vmem:[%s16345_s1 + $0x28] ss:$16 sps:$4 sm:$0xff]   ;;  %v11020_v41 = vld [vmem:[%s16345_s1 + $0x4] ss:$16 sps:$4 sm:$0xff]  }
 0x71d   : > { %2204 = vmatpush1.bf16.msra.mxu1 %v12128_v42  ;;  %2245 = vmatpush1.bf16.msra.mxu0 %v12129_v43  ;;  %v11023_v42 = vld [vmem:[%s16345_s1 + $0xc] ss:$16 sps:$4 sm:$0xff]   ;;  %v11018_v43 = vld [vmem:[%s16345_s1] ss:$16 sps:$4 sm:$0xff]  }
 0x71e   : > { %2453 = vmatprep.subr.bf16.mxu1 %v11002_v44  ;;  %2494 = vmatprep.subr.bf16.mxu0 %v11005_v45  ;;  %v11021_v44 = vld [vmem:[%s16345_s1 + $0x8] ss:$16 sps:$4 sm:$0xff]   ;;  %v13134_v45 = vld [vmem:[%s16346_s29 + $0xe4] ss:$16 sps:$4 sm:$0xff]  }
 0x7c0   : > { %v2094_v46 = vpop.f32.mrf.mxu1  ;;  %v2135_v47 = vpop.f32.mrf.mxu0 }
 0x7c1   : > { %v2146_v48 = vrot.slane %v2094_v46, 2  ;;  %v2148_v59 = vrot.slane %v2135_v47, 2  ;;  %v13139_v46 = vld [vmem:[%s16346_s29 + $0xec] ss:$16 sps:$4 sm:$0xff]   ;;  %v13144_v47 = vld [vmem:[%s16346_s29 + $0xe0] ss:$16 sps:$4 sm:$0xff]  }
 0x7c2   : > { %v2096_v49 = vpop.f32.mrf.mxu1  ;;  %v2137_v50 = vpop.f32.mrf.mxu0 }
 0x7c3   : > { %v2154_v51 = vadd.f32 %v2146_v48, %v12708_v10  ;;  %v2147_v52 = vrot.slane %v2096_v49, 2  ;;  %v2149_v25 = vrot.slane %v2137_v50, 2  ;;  %v2156_v19 = vadd.f32 %v2148_v59, %v12725_v3  ;;  %v13149_v48 = vld [vmem:[%s16346_s29 + $0xe8] ss:$16 sps:$4 sm:$0xff]   ;;  %v13156_v49 = vld [vmem:[%s16346_s29 + $0xc4] ss:$16 sps:$4 sm:$0xff]  }
 0x7c4   : > { %v2098_v53 = vpop.f32.mrf.mxu1  ;;  %v2139_v54 = vpop.f32.mrf.mxu0  ;;  %v13161_v50 = vld [vmem:[%s16346_s29 + $0xcc] ss:$16 sps:$4 sm:$0xff]   ;;  %v13246_v59 = vld [vmem:[%s16346_s29 + $0x60] ss:$16 sps:$4 sm:$0xff]  }
 0x7c5   : > { %v10250_v55 = vmul.f32 -1.442695, %v2154_v51  ;;  %v2155_v56 = vadd.f32 %v2147_v52, %v12710_v13  ;;  %v2157_v6 = vadd.f32 %v2149_v25, %v12721_v63  ;;  %v13172_v51 = vld [vmem:[%s16346_s29 + $0xc0] ss:$16 sps:$4 sm:$0xff]   ;;  %v13177_v52 = vld [vmem:[%s16346_s29 + $0xc8] ss:$16 sps:$4 sm:$0xff]  }
 0x7c6   : > { %v2099_v57 = vpop.f32.mrf.mxu1  ;;  %v2140_v58 = vpop.f32.mrf.mxu0  ;;  %v13189_v53 = vld [vmem:[%s16346_s29 + $0xac] ss:$16 sps:$4 sm:$0xff]   ;;  %v13198_v54 = vld [vmem:[%s16346_s29 + $0xa0] ss:$16 sps:$4 sm:$0xff]   ;;  %v13234_v25 = vld [vmem:[%s16346_s29 + $0x64] ss:$16 sps:$4 sm:$0xff]  }
 0x7c7   : > { %11648 = vpow2.f32 %v10250_v55  ;;  %v10251_v62 = vmul.f32 -1.442695, %v2155_v56  ;;  %v10252_v16 = vmul.f32 -1.442695, %v2157_v6  ;;  %v13203_v55 = vld [vmem:[%s16346_s29 + $0xa8] ss:$16 sps:$4 sm:$0xff]  }
 0x7c8   : > { %v13210_v56 = vld [vmem:[%s16346_s29 + $0x84] ss:$16 sps:$4 sm:$0xff]   ;;  %v13215_v57 = vld [vmem:[%s16346_s29 + $0x8c] ss:$16 sps:$4 sm:$0xff]   ;;  %v13222_v58 = vld [vmem:[%s16346_s29 + $0x80] ss:$16 sps:$4 sm:$0xff]  }
 0x7c9   : > { %11650 = vpow2.f32 %v10251_v62  ;;  %v13227_v62 = vld [vmem:[%s16346_s29 + $0x88] ss:$16 sps:$4 sm:$0xff]   ;;  %v13239_v6 = vld [vmem:[%s16346_s29 + $0x6c] ss:$16 sps:$4 sm:$0xff]  }
 0x7ca   : > { %11652 = vpow2.f32 %v10252_v16  ;;  %v13251_v16 = vld [vmem:[%s16346_s29 + $0x68] ss:$16 sps:$4 sm:$0xff]  }
 0x7d4   : > { %v11649_v18 = vpop.eup %11648 }
 0x7d5   : > { %v2161_v9 = vadd.f32 1.0, %v11649_v18  ;;  %v13258_v18 = vld [vmem:[%s16346_s29 + $0x44] ss:$16 sps:$4 sm:$0xff]  }
 0x7d6   : > { %v11651_v8 = vpop.eup %11650 }
 0x7d7   : > { %11654 = vrcp.f32 %v2161_v9  ;;  %v2167_v14 = vadd.f32 1.0, %v11651_v8  ;;  %v11653_v61 = vpop.eup %11652  ;;  %v13270_v9 = vld [vmem:[%s16346_s29 + $0x40] ss:$16 sps:$4 sm:$0xff]   ;;  %v13275_v8 = vld [vmem:[%s16346_s29 + $0x48] ss:$16 sps:$4 sm:$0xff]  }
 0x7d8   : > { %11656 = vtanh.f32 %v2156_v19  ;;  %v2174_v1 = vadd.f32 1.0, %v11653_v61  ;;  %v13263_v19 = vld [vmem:[%s16346_s29 + $0x4c] ss:$16 sps:$4 sm:$0xff]  }
 0x7d9   : > { %11658 = vrcp.f32 %v2167_v14  ;;  %v13282_v14 = vld [vmem:[%s16346_s29 + $0x24] ss:$16 sps:$4 sm:$0xff]   ;;  %v13287_v61 = vld [vmem:[%s16346_s29 + $0x2c] ss:$16 sps:$4 sm:$0xff]  }
 0x7da   : > { %11660 = vrcp.f32 %v2174_v1  ;;  %v13318_v1 = vld [vmem:[%s16346_s29] ss:$16 sps:$4 sm:$0xff]  }
 0x7e4   : > { %v11655_v11 = vpop.eup %11654 }
 0x7e5   : > { %v11657_v2 = vpop.eup %11656 }
 0x7e6   : > { %v11659_v24 = vpop.eup %11658  ;;  %v2181_v20 = vmul.f32 %v11657_v2, %v11655_v11  ;;  %v13294_v11 = vld [vmem:[%s16346_s29 + $0x20] ss:$16 sps:$4 sm:$0xff]   ;;  %v13299_v2 = vld [vmem:[%s16346_s29 + $0x28] ss:$16 sps:$4 sm:$0xff]  }
 0x7e7   : > { %v2180_v21 = vmul.f32 %v11659_v24, %v2178_v26  ;;  %v11661_v23 = vpop.eup %11660  ;;  %v13306_v26 = vld [vmem:[%s16346_s29 + $0x4] ss:$16 sps:$4 sm:$0xff]   ;;  %v13311_v24 = vld [vmem:[%s16346_s29 + $0xc] ss:$16 sps:$4 sm:$0xff]  }
 0x7e9   : > { %v13080_v17 = vadd.f32 %v2181_v20, %v2180_v21  ;;  %v13323_v20 = vld [vmem:[%s16346_s29 + $0x8] ss:$16 sps:$4 sm:$0xff]  }
 0x7eb   : > { %11662 = vtanh.f32 %v13080_v17 }
 0x7f8   : > { %v11663_v27 = vpop.eup %11662 }
 0x7f9   : > { %v2184_v28 = vmul.f32 %v11663_v27, %v11661_v23 }
 0x7fb   : > { %v2185_v30 = vpack.c.bf16 %v2184_v28, %v2184_v28  ;;  %v13085_v31 = vsel %vm2323_vm8, %v12975_v0, %v2184_v28  ;;  %v11006_v0 = vld [vmem:[%s16345_s1 + $0x40] ss:$16 sps:$4 sm:$0xff]  }
 0x7fd   : > { %v2187_v33 = vrot.slane %v2185_v30, 3 }
 0x7ff   : > { %2222 = vmatmul.mubr.bf16.vlgmr.msra.gmra.mxu1 %v2187_v33  ;;  %2263 = vmatmul.mubr.bf16.vlgmr.msra.gmra.mxu0 %v2187_v33 }
 0x800   : > { %2454 = vmatpush1.bf16.msra.mxu1 %v11000_v12  ;;  %2495 = vmatpush1.bf16.msra.mxu0 %v11003_v32 }
 0x801   : > { %2455 = vmatprep.subr.bf16.mxu1 %v11008_v34  ;;  %2496 = vmatprep.subr.bf16.mxu0 %v11011_v35 }
 0x802   : > { %2477 = vmatprep.mubr.bf16.mxu1 %v16312_v22  ;;  %2518 = vmatprep.mubr.bf16.mxu0 %v16312_v22 }
 0x804   : > { %2456 = vmatpush1.bf16.msra.mxu1 %v11006_v0  ;;  %2497 = vmatpush1.bf16.msra.mxu0 %v11009_v36 }
 0x805   : > { %2457 = vmatprep.subr.bf16.mxu1 %v11014_v37  ;;  %2498 = vmatprep.subr.bf16.mxu0 %v11017_v38 }
 0x808   : > { %2458 = vmatpush1.bf16.msra.mxu1 %v11012_v39  ;;  %2499 = vmatpush1.bf16.msra.mxu0 %v11015_v40 }
 0x809   : > { %2459 = vmatprep.subr.bf16.mxu1 %v11020_v41  ;;  %2500 = vmatprep.subr.bf16.mxu0 %v11023_v42 }
 0x80c   : > { %2460 = vmatpush1.bf16.msra.mxu1 %v11018_v43  ;;  %2501 = vmatpush1.bf16.msra.mxu0 %v11021_v44 }
 0x80d   : > { %2719 = vmatprep.subr.bf16.mxu1 %v13134_v45  ;;  %2760 = vmatprep.subr.bf16.mxu0 %v13139_v46 }
 0x80f   : > { %10272 = vmatmul.mubr.msk.bf16.vlgmr.msra.gmra.mxu1 %vm1021_vm3, %v12479_v29  ;;  %10273 = vmatmul.mubr.msk.bf16.vlgmr.msra.gmra.mxu0 %vm1021_vm3, %v12479_v29  ;;  %v13184_v29 = vld [vmem:[%s16346_s29 + $0xa4] ss:$16 sps:$4 sm:$0xff]  }
 0x810   : > { %2720 = vmatpush1.bf16.msra.mxu1 %v13144_v47  ;;  %2761 = vmatpush1.bf16.msra.mxu0 %v13149_v48 }
 0x811   : > { %2721 = vmatprep.subr.bf16.mxu1 %v13156_v49  ;;  %2762 = vmatprep.subr.bf16.mxu0 %v13161_v50 }
 0x812   : > { %2751 = vmatprep.mubr.bf16.mxu1 %v16312_v22  ;;  %2792 = vmatprep.mubr.bf16.mxu0 %v16312_v22 }
 0x814   : > { %2722 = vmatpush1.bf16.msra.mxu1 %v13172_v51  ;;  %2763 = vmatpush1.bf16.msra.mxu0 %v13177_v52 }
 0x815   : > { %2723 = vmatprep.subr.bf16.mxu1 %v13184_v29  ;;  %2764 = vmatprep.subr.bf16.mxu0 %v13189_v53 }
 0x818   : > { %2724 = vmatpush1.bf16.msra.mxu1 %v13198_v54  ;;  %2765 = vmatpush1.bf16.msra.mxu0 %v13203_v55 }
 0x819   : > { %2725 = vmatprep.subr.bf16.mxu1 %v13210_v56  ;;  %2766 = vmatprep.subr.bf16.mxu0 %v13215_v57 }
 0x81c   : > { %2726 = vmatpush1.bf16.msra.mxu1 %v13222_v58  ;;  %2767 = vmatpush1.bf16.msra.mxu0 %v13227_v62 }
 0x81d   : > { %2727 = vmatprep.subr.bf16.mxu1 %v13234_v25  ;;  %2768 = vmatprep.subr.bf16.mxu0 %v13239_v6 }
 0x820   : > { %2728 = vmatpush1.bf16.msra.mxu1 %v13246_v59  ;;  %2769 = vmatpush1.bf16.msra.mxu0 %v13251_v16 }
 0x821   : > { %2729 = vmatprep.subr.bf16.mxu1 %v13258_v18  ;;  %2770 = vmatprep.subr.bf16.mxu0 %v13263_v19 }
 0x824   : > { %2730 = vmatpush1.bf16.msra.mxu1 %v13270_v9  ;;  %2771 = vmatpush1.bf16.msra.mxu0 %v13275_v8 }
 0x825   : > { %2731 = vmatprep.subr.bf16.mxu1 %v13282_v14  ;;  %2772 = vmatprep.subr.bf16.mxu0 %v13287_v61 }
 0x828   : > { %2732 = vmatpush1.bf16.msra.mxu1 %v13294_v11  ;;  %2773 = vmatpush1.bf16.msra.mxu0 %v13299_v2 }
 0x829   : > { %2733 = vmatprep.subr.bf16.mxu1 %v13306_v26  ;;  %2774 = vmatprep.subr.bf16.mxu0 %v13311_v24 }
 0x82c   : > { %2734 = vmatpush1.bf16.msra.mxu1 %v13318_v1  ;;  %2775 = vmatpush1.bf16.msra.mxu0 %v13323_v20 }
 0x82d   : > { %2847 = vmatprep.subr.bf16.mxu1 %v13134_v45  ;;  %2888 = vmatprep.subr.bf16.mxu0 %v13139_v46 }
 0x82f   : > { %2752 = vmatmul.mubr.bf16.vlgmr.msra.gmra.mxu1 %v16312_v22  ;;  %2793 = vmatmul.mubr.bf16.vlgmr.msra.gmra.mxu0 %v16312_v22 }
 0x830   : > { %2848 = vmatpush1.bf16.msra.mxu1 %v13144_v47  ;;  %2889 = vmatpush1.bf16.msra.mxu0 %v13149_v48 }
 0x831   : > { %2849 = vmatprep.subr.bf16.mxu1 %v13156_v49  ;;  %2890 = vmatprep.subr.bf16.mxu0 %v13161_v50 }
 0x832   : > { %2879 = vmatprep.mubr.bf16.mxu1 %v16312_v22  ;;  %2920 = vmatprep.mubr.bf16.mxu0 %v16312_v22 }
 0x834   : > { %2850 = vmatpush1.bf16.msra.mxu1 %v13172_v51  ;;  %2891 = vmatpush1.bf16.msra.mxu0 %v13177_v52 }
 0x835   : > { %2851 = vmatprep.subr.bf16.mxu1 %v13184_v29  ;;  %2892 = vmatprep.subr.bf16.mxu0 %v13189_v53 }
 0x838   : > { %2852 = vmatpush1.bf16.msra.mxu1 %v13198_v54  ;;  %2893 = vmatpush1.bf16.msra.mxu0 %v13203_v55 }
 0x839   : > { %2853 = vmatprep.subr.bf16.mxu1 %v13210_v56  ;;  %2894 = vmatprep.subr.bf16.mxu0 %v13215_v57 }
 0x83c   : > { %2854 = vmatpush1.bf16.msra.mxu1 %v13222_v58  ;;  %2895 = vmatpush1.bf16.msra.mxu0 %v13227_v62 }
 0x83d   : > { %2855 = vmatprep.subr.bf16.mxu1 %v13234_v25  ;;  %2896 = vmatprep.subr.bf16.mxu0 %v13239_v6 }
 0x840   : > { %2856 = vmatpush1.bf16.msra.mxu1 %v13246_v59  ;;  %2897 = vmatpush1.bf16.msra.mxu0 %v13251_v16 }
 0x841   : > { %2857 = vmatprep.subr.bf16.mxu1 %v13258_v18  ;;  %2898 = vmatprep.subr.bf16.mxu0 %v13263_v19 }
 0x844   : > { %2858 = vmatpush1.bf16.msra.mxu1 %v13270_v9  ;;  %2899 = vmatpush1.bf16.msra.mxu0 %v13275_v8 }
 0x845   : > { %2859 = vmatprep.subr.bf16.mxu1 %v13282_v14  ;;  %2900 = vmatprep.subr.bf16.mxu0 %v13287_v61 }
 0x848   : > { %2860 = vmatpush1.bf16.msra.mxu1 %v13294_v11  ;;  %2901 = vmatpush1.bf16.msra.mxu0 %v13299_v2 }
 0x849   : > { %2861 = vmatprep.subr.bf16.mxu1 %v13306_v26  ;;  %2902 = vmatprep.subr.bf16.mxu0 %v13311_v24 }
 0x84c   : > { %2862 = vmatpush1.bf16.msra.mxu1 %v13318_v1  ;;  %2903 = vmatpush1.bf16.msra.mxu0 %v13323_v20 }
 0x84d   : > { %2976 = vmatprep.subr.bf16.mxu1 %v13134_v45  ;;  %3017 = vmatprep.subr.bf16.mxu0 %v13139_v46 }
 0x8bf   : > { %v2223_v21 = vpop.f32.mrf.mxu1  ;;  %v2264_v23 = vpop.f32.mrf.mxu0 }
 0x8c0   : > { %v2275_v27 = vrot.slane %v2223_v21, 1  ;;  %v2277_v40 = vrot.slane %v2264_v23, 1 }
 0x8c1   : > { %v2225_v28 = vpop.f32.mrf.mxu1  ;;  %v2266_v30 = vpop.f32.mrf.mxu0 }
 0x8c2   : > { %v2283_v12 = vadd.f32 %v2275_v27, %v12708_v10  ;;  %v2276_v32 = vrot.slane %v2225_v28, 1  ;;  %v2278_v39 = vrot.slane %v2266_v30, 1  ;;  %v2285_v44 = vadd.f32 %v2277_v40, %v12725_v3 }
 0x8c3   : > { %v2227_v33 = vpop.f32.mrf.mxu1  ;;  %v2268_v34 = vpop.f32.mrf.mxu0  ;;  %v2307_v3 = vrot.slane %v13080_v17, 7 }
 0x8c4   : > { %v10253_v35 = vmul.f32 -1.442695, %v2283_v12  ;;  %v2284_v0 = vadd.f32 %v2276_v32, %v12710_v13  ;;  %v2286_v41 = vadd.f32 %v2278_v39, %v12721_v63 }
 0x8c5   : > { %v2228_v36 = vpop.f32.mrf.mxu1  ;;  %v2269_v37 = vpop.f32.mrf.mxu0 }
 0x8c6   : > { %11664 = vpow2.f32 %v10253_v35  ;;  %v10254_v38 = vmul.f32 -1.442695, %v2284_v0  ;;  %v10255_v10 = vmul.f32 -1.442695, %v2286_v41  ;;  %v2343_v41 = vld [vmem:[%s16347_s4] sm:$0xf] }
 0x8c7   : > { %s16357_s4 = smov 64  }
 0x8c8   : > { %11666 = vpow2.f32 %v10254_v38 }
 0x8c9   : > { %11668 = vtanh.f32 %v2285_v44  ;;  %v2348_v44 = vrot.slane %v2343_v41, %v12698_v5 }
 0x8ca   : > { %11670 = vpow2.f32 %v10255_v10  ;;  %v2352_v10 = vrot.slane %v2343_v41, %v12704_v7 }
 0x8cf   : > { %v2479_v42 = vpop.f32.mrf.mxu1  ;;  %v2520_v43 = vpop.f32.mrf.mxu0 }
 0x8d1   : > { %v2481_v21 = vpop.f32.mrf.mxu1  ;;  %v2522_v27 = vpop.f32.mrf.mxu0 }
 0x8d3   : > { %v11665_v28 = vpop.eup %11664  ;;  %v2483_v12 = vpop.f32.mrf.mxu1 }
 0x8d4   : > { %v2524_v33 = vpop.f32.mrf.mxu0  ;;  %v2290_v13 = vadd.f32 1.0, %v11665_v28 }
 0x8d5   : > { %v11667_v32 = vpop.eup %11666  ;;  %v2484_v34 = vpop.f32.mrf.mxu1  ;;  %v13377_v33 = vadd.f32 %v2479_v42, %v2348_v44 }
 0x8d6   : > { %v2525_v35 = vpop.f32.mrf.mxu0  ;;  %11672 = vrcp.f32 %v2290_v13  ;;  %v2296_v23 = vadd.f32 1.0, %v11667_v32  ;;  %v11669_v63 = vpop.eup %11668  ;;  %v13379_v34 = vadd.f32 %v2481_v21, %v2352_v10 }
 0x8d7   : > { %v11671_v30 = vpop.eup %11670 }
 0x8d8   : > { %11674 = vrcp.f32 %v2296_v23  ;;  %v2303_v38 = vadd.f32 1.0, %v11671_v30 }
 0x8da   : > { %11676 = vrcp.f32 %v2303_v38 }
 0x8e3   : > { %v11673_v0 = vpop.eup %11672 }
 0x8e4   : > { %v2310_v36 = vmul.f32 %v11673_v0, %v11669_v63 }
 0x8e5   : > { %v11675_v37 = vpop.eup %11674 }
 0x8e6   : > { %v2309_v39 = vmul.f32 %v11675_v37, %v2307_v3 }
 0x8e7   : > { %v11677_v38 = vpop.eup %11676 }
 0x8e8   : > { %v2311_v40 = vadd.f32 %v2310_v36, %v2309_v39 }
 0x8ea   : > { %11678 = vtanh.f32 %v2311_v40  ;;  %v2360_v40 = vrot.slane %v2343_v41, %v12714_v15 }
 0x8ef   : > { %v2753_v28 = vpop.f32.mrf.mxu1  ;;  %v2794_v12 = vpop.f32.mrf.mxu0 }
 0x8f0   : > { %v2805_v13 = vrot.slane %v2753_v28, 1  ;;  %v13388_v28 = vadd.f32 %v2522_v27, %v2360_v40 }
 0x8f1   : > { %v2755_v17 = vpop.f32.mrf.mxu1  ;;  %v2796_v32 = vpop.f32.mrf.mxu0 }
 0x8f2   : > { %v2813_v35 = vadd.f32 %v2805_v13, %v13377_v33  ;;  %v2806_v23 = vrot.slane %v2755_v17, 1  ;;  %v2808_v44 = vrot.slane %v2796_v32, 1  ;;  %v2356_v13 = vrot.slane %v2343_v41, %v12719_v60 }
 0x8f3   : > { %v2757_v63 = vpop.f32.mrf.mxu1  ;;  %v2798_v30 = vpop.f32.mrf.mxu0 }
 0x8f4   : > { %v10306_v0 = vmul.f32 -1.442695, %v2813_v35  ;;  %v2814_v36 = vadd.f32 %v2806_v23, %v13379_v34  ;;  %v2816_v17 = vadd.f32 %v2808_v44, %v13388_v28  ;;  %v2807_v35 = vrot.slane %v2794_v12, 1 }
 0x8f5   : > { %v2758_v3 = vpop.f32.mrf.mxu1  ;;  %v2799_v37 = vpop.f32.mrf.mxu0  ;;  %v13392_v23 = vadd.f32 %v2520_v43, %v2356_v13 }
 0x8f6   : > { %11680 = vpow2.f32 %v10306_v0  ;;  %v10307_v39 = vmul.f32 -1.442695, %v2814_v36  ;;  %v10308_v63 = vmul.f32 -1.442695, %v2816_v17 }
 0x8f7   : > { %v11679_v42 = vpop.eup %11678  ;;  %v2815_v0 = vadd.f32 %v2807_v35, %v13392_v23 }
 0x8f8   : > { %11682 = vpow2.f32 %v10307_v39  ;;  %v2313_v21 = vmul.f32 %v11679_v42, %v11677_v38 }
 0x8f9   : > { %11684 = vpow2.f32 %v10308_v63 }
 0x8fa   : > { %v13386_v10 = vsel %vm2325_vm9, %v13085_v31, %v2313_v21 }
 0x903   : > { %v11681_v30 = vpop.eup %11680 }
 0x904   : > { %v2820_v36 = vadd.f32 1.0, %v11681_v30 }
 0x905   : > { %v11683_v3 = vpop.eup %11682 }
 0x906   : > { %11686 = vrcp.f32 %v2820_v36  ;;  %v2826_v32 = vadd.f32 1.0, %v11683_v3  ;;  %v11685_v31 = vpop.eup %11684 }
 0x907   : > { %11688 = vtanh.f32 %v2815_v0  ;;  %v2833_v38 = vadd.f32 1.0, %v11685_v31 }
 0x908   : > { %11690 = vrcp.f32 %v2826_v32 }
 0x909   : > { %11692 = vrcp.f32 %v2833_v38 }
 0x913   : > { %v11687_v27 = vpop.eup %11686 }
 0x914   : > { %v11689_v37 = vpop.eup %11688 }
 0x915   : > { %v11691_v41 = vpop.eup %11690  ;;  %v2837_v12 = vmul.f32 %v11689_v37, %v11687_v27 }
 0x916   : > { %v2836_v39 = vmul.f32 0.0, %v11691_v41  ;;  %v11693_v42 = vpop.eup %11692 }
 0x918   : > { %v13395_v43 = vadd.f32 %v2837_v12, %v2836_v39 }
 0x91a   : > { %11694 = vtanh.f32 %v13395_v43 }
 0x927   : > { %v11695_v40 = vpop.eup %11694 }
 0x928   : > { %v13398_v21 = vmul.f32 %v11695_v40, %v11693_v42 }
 0x92a   : > { %v2841_v44 = vpack.c.bf16 %v13398_v21, %v13398_v21 }
 0x92c   : > { %v2843_v13 = vshrl.u32 %v2841_v44, 16 }
 0x92e   : > { %v2845_v17 = vrot.slane %v2843_v13, 3 }
 0x930   : > { %2880 = vmatmul.mubr.bf16.vlgmr.msra.gmra.mxu1 %v2845_v17  ;;  %2921 = vmatmul.mubr.bf16.vlgmr.msra.gmra.mxu0 %v2845_v17 }
 0x931   : > { %2977 = vmatpush1.bf16.msra.mxu1 %v13144_v47  ;;  %3018 = vmatpush1.bf16.msra.mxu0 %v13149_v48 }
 0x932   : > { %2978 = vmatprep.subr.bf16.mxu1 %v13156_v49  ;;  %3019 = vmatprep.subr.bf16.mxu0 %v13161_v50 }
 0x933   : > { %3008 = vmatprep.mubr.bf16.mxu1 %v16312_v22  ;;  %3049 = vmatprep.mubr.bf16.mxu0 %v16312_v22 }
 0x935   : > { %2979 = vmatpush1.bf16.msra.mxu1 %v13172_v51  ;;  %3020 = vmatpush1.bf16.msra.mxu0 %v13177_v52 }
 0x936   : > { %2980 = vmatprep.subr.bf16.mxu1 %v13184_v29  ;;  %3021 = vmatprep.subr.bf16.mxu0 %v13189_v53 }
 0x939   : > { %2981 = vmatpush1.bf16.msra.mxu1 %v13198_v54  ;;  %3022 = vmatpush1.bf16.msra.mxu0 %v13203_v55 }
 0x93a   : > { %2982 = vmatprep.subr.bf16.mxu1 %v13210_v56  ;;  %3023 = vmatprep.subr.bf16.mxu0 %v13215_v57 }
 0x93d   : > { %2983 = vmatpush1.bf16.msra.mxu1 %v13222_v58  ;;  %3024 = vmatpush1.bf16.msra.mxu0 %v13227_v62 }
 0x93e   : > { %2984 = vmatprep.subr.bf16.mxu1 %v13234_v25  ;;  %3025 = vmatprep.subr.bf16.mxu0 %v13239_v6 }
 0x941   : > { %2985 = vmatpush1.bf16.msra.mxu1 %v13246_v59  ;;  %3026 = vmatpush1.bf16.msra.mxu0 %v13251_v16 }
 0x942   : > { %2986 = vmatprep.subr.bf16.mxu1 %v13258_v18  ;;  %3027 = vmatprep.subr.bf16.mxu0 %v13263_v19 }
 0x945   : > { %2987 = vmatpush1.bf16.msra.mxu1 %v13270_v9  ;;  %3028 = vmatpush1.bf16.msra.mxu0 %v13275_v8 }
 0x946   : > { %2988 = vmatprep.subr.bf16.mxu1 %v13282_v14  ;;  %3029 = vmatprep.subr.bf16.mxu0 %v13287_v61 }
 0x949   : > { %2989 = vmatpush1.bf16.msra.mxu1 %v13294_v11  ;;  %3030 = vmatpush1.bf16.msra.mxu0 %v13299_v2 }
 0x94a   : > { %2990 = vmatprep.subr.bf16.mxu1 %v13306_v26  ;;  %3031 = vmatprep.subr.bf16.mxu0 %v13311_v24 }
 0x94d   : > { %2991 = vmatpush1.bf16.msra.mxu1 %v13318_v1  ;;  %3032 = vmatpush1.bf16.msra.mxu0 %v13323_v20 }
 0x94e   : > { %3107 = vmatprep.subr.bf16.mxu1 %v13134_v45  ;;  %3148 = vmatprep.subr.bf16.mxu0 %v13139_v46 }
 0x9f0   : > { %v2881_v35 = vpop.f32.mrf.mxu1  ;;  %v2922_v63 = vpop.f32.mrf.mxu0 }
 0x9f1   : > { %v2933_v30 = vrot.slane %v2881_v35, 2  ;;  %v2935_v44 = vrot.slane %v2922_v63, 2 }
 0x9f2   : > { %v2883_v0 = vpop.f32.mrf.mxu1  ;;  %v2924_v36 = vpop.f32.mrf.mxu0 }
 0x9f3   : > { %v2941_v3 = vadd.f32 %v2933_v30, %v13377_v33  ;;  %v2934_v32 = vrot.slane %v2883_v0, 2  ;;  %v2936_v42 = vrot.slane %v2924_v36, 2  ;;  %v2943_v35 = vadd.f32 %v2935_v44, %v13392_v23 }
 0x9f4   : > { %v2885_v31 = vpop.f32.mrf.mxu1  ;;  %v2926_v27 = vpop.f32.mrf.mxu0 }
 0x9f5   : > { %v10309_v37 = vmul.f32 -1.442695, %v2941_v3  ;;  %v2942_v41 = vadd.f32 %v2934_v32, %v13379_v34  ;;  %v2944_v40 = vadd.f32 %v2936_v42, %v13388_v28 }
 0x9f6   : > { %v2886_v38 = vpop.f32.mrf.mxu1  ;;  %v2927_v39 = vpop.f32.mrf.mxu0 }
 0x9f7   : > { %11696 = vpow2.f32 %v10309_v37  ;;  %v10310_v12 = vmul.f32 -1.442695, %v2942_v41  ;;  %v10311_v13 = vmul.f32 -1.442695, %v2944_v40  ;;  %v2965_v37 = vrot.slane %v13395_v43, 1 }
 0x9f9   : > { %11698 = vpow2.f32 %v10310_v12 }
 0x9fa   : > { %11700 = vpow2.f32 %v10311_v13 }
 0xa04   : > { %v11697_v17 = vpop.eup %11696 }
 0xa05   : > { %v2948_v30 = vadd.f32 1.0, %v11697_v17 }
 0xa06   : > { %v11699_v0 = vpop.eup %11698 }
 0xa07   : > { %11702 = vrcp.f32 %v2948_v30  ;;  %v2954_v3 = vadd.f32 1.0, %v11699_v0  ;;  %v11701_v32 = vpop.eup %11700 }
 0xa08   : > { %11704 = vtanh.f32 %v2943_v35  ;;  %v2961_v41 = vadd.f32 1.0, %v11701_v32 }
 0xa09   : > { %11706 = vrcp.f32 %v2954_v3 }
 0xa0a   : > { %11708 = vrcp.f32 %v2961_v41 }
 0xa14   : > { %v11703_v31 = vpop.eup %11702 }
 0xa15   : > { %v11705_v27 = vpop.eup %11704 }
 0xa16   : > { %v11707_v36 = vpop.eup %11706  ;;  %v2968_v38 = vmul.f32 %v11705_v27, %v11703_v31 }
 0xa17   : > { %v2967_v63 = vmul.f32 %v11707_v36, %v2965_v37  ;;  %v11709_v12 = vpop.eup %11708 }
 0xa19   : > { %v13441_v39 = vadd.f32 %v2968_v38, %v2967_v63 }
 0xa1b   : > { %11710 = vtanh.f32 %v13441_v39 }
 0xa28   : > { %v11711_v42 = vpop.eup %11710 }
 0xa29   : > { %v13444_v40 = vmul.f32 %v11711_v42, %v11709_v12 }
 0xa2b   : > { %v2972_v44 = vpack.c.bf16 %v13444_v40, %v13444_v40 }
 0xa2d   : > { %v2974_v13 = vrot.slane %v2972_v44, 3 }
 0xa2f   : > { %3009 = vmatmul.mubr.bf16.vlgmr.msra.gmra.mxu1 %v2974_v13  ;;  %3050 = vmatmul.mubr.bf16.vlgmr.msra.gmra.mxu0 %v2974_v13 }
 0xa30   : > { %3108 = vmatpush1.bf16.msra.mxu1 %v13144_v47  ;;  %3149 = vmatpush1.bf16.msra.mxu0 %v13149_v48 }
 0xa31   : > { %3109 = vmatprep.subr.bf16.mxu1 %v13156_v49  ;;  %3150 = vmatprep.subr.bf16.mxu0 %v13161_v50 }
 0xa32   : > { %3139 = vmatprep.mubr.bf16.mxu1 %v16312_v22  ;;  %3180 = vmatprep.mubr.bf16.mxu0 %v16312_v22 }
 0xa34   : > { %3110 = vmatpush1.bf16.msra.mxu1 %v13172_v51  ;;  %3151 = vmatpush1.bf16.msra.mxu0 %v13177_v52 }
 0xa35   : > { %3111 = vmatprep.subr.bf16.mxu1 %v13184_v29  ;;  %3152 = vmatprep.subr.bf16.mxu0 %v13189_v53 }
 0xa38   : > { %3112 = vmatpush1.bf16.msra.mxu1 %v13198_v54  ;;  %3153 = vmatpush1.bf16.msra.mxu0 %v13203_v55 }
 0xa39   : > { %3113 = vmatprep.subr.bf16.mxu1 %v13210_v56  ;;  %3154 = vmatprep.subr.bf16.mxu0 %v13215_v57 }
 0xa3c   : > { %3114 = vmatpush1.bf16.msra.mxu1 %v13222_v58  ;;  %3155 = vmatpush1.bf16.msra.mxu0 %v13227_v62 }
 0xa3d   : > { %3115 = vmatprep.subr.bf16.mxu1 %v13234_v25  ;;  %3156 = vmatprep.subr.bf16.mxu0 %v13239_v6 }
 0xa40   : > { %3116 = vmatpush1.bf16.msra.mxu1 %v13246_v59  ;;  %3157 = vmatpush1.bf16.msra.mxu0 %v13251_v16 }
 0xa41   : > { %3117 = vmatprep.subr.bf16.mxu1 %v13258_v18  ;;  %3158 = vmatprep.subr.bf16.mxu0 %v13263_v19 }
 0xa44   : > { %3118 = vmatpush1.bf16.msra.mxu1 %v13270_v9  ;;  %3159 = vmatpush1.bf16.msra.mxu0 %v13275_v8 }
 0xa45   : > { %3119 = vmatprep.subr.bf16.mxu1 %v13282_v14  ;;  %3160 = vmatprep.subr.bf16.mxu0 %v13287_v61 }
 0xa48   : > { %3120 = vmatpush1.bf16.msra.mxu1 %v13294_v11  ;;  %3161 = vmatpush1.bf16.msra.mxu0 %v13299_v2 }
 0xa49   : > { %3121 = vmatprep.subr.bf16.mxu1 %v13306_v26  ;;  %3162 = vmatprep.subr.bf16.mxu0 %v13311_v24 }
 0xa4c   : > { %3122 = vmatpush1.bf16.msra.mxu1 %v13318_v1  ;;  %3163 = vmatpush1.bf16.msra.mxu0 %v13323_v20 }
 0xa4d   : > { %3236 = vmatprep.subr.bf16.mxu1 %v13134_v45  ;;  %3277 = vmatprep.subr.bf16.mxu0 %v13139_v46 }
 0xaef   : > { %v3010_v43 = vpop.f32.mrf.mxu1  ;;  %v3051_v17 = vpop.f32.mrf.mxu0 }
 0xaf0   : > { %v3062_v35 = vrot.slane %v3010_v43, 3  ;;  %v3064_v44 = vrot.slane %v3051_v17, 3 }
 0xaf1   : > { %v3012_v30 = vpop.f32.mrf.mxu1  ;;  %v3053_v0 = vpop.f32.mrf.mxu0 }
 0xaf2   : > { %v3070_v3 = vadd.f32 %v3062_v35, %v13377_v33  ;;  %v3063_v32 = vrot.slane %v3012_v30, 3  ;;  %v3065_v12 = vrot.slane %v3053_v0, 3  ;;  %v3072_v22 = vadd.f32 %v3064_v44, %v13392_v23 }
 0xaf3   : > { %v3014_v31 = vpop.f32.mrf.mxu1  ;;  %v3055_v27 = vpop.f32.mrf.mxu0 }
 0xaf4   : > { %v10312_v37 = vmul.f32 -1.442695, %v3070_v3  ;;  %v3071_v36 = vadd.f32 %v3063_v32, %v13379_v34  ;;  %v3073_v42 = vadd.f32 %v3065_v12, %v13388_v28 }
 0xaf5   : > { %v3015_v41 = vpop.f32.mrf.mxu1  ;;  %v3056_v38 = vpop.f32.mrf.mxu0 }
 0xaf6   : > { %11712 = vpow2.f32 %v10312_v37  ;;  %v10313_v63 = vmul.f32 -1.442695, %v3071_v36  ;;  %v10314_v13 = vmul.f32 -1.442695, %v3073_v42  ;;  %v3094_v37 = vrot.slane %v13441_v39, 1 }
 0xaf7   : > { %v16348_v39 = vmov 0  }
 0xaf8   : > { %11714 = vpow2.f32 %v10313_v63 }
 0xaf9   : > { %11716 = vpow2.f32 %v10314_v13 }
 0xb03   : > { %v11713_v43 = vpop.eup %11712 }
 0xb04   : > { %v3077_v35 = vadd.f32 1.0, %v11713_v43 }
 0xb05   : > { %v11715_v30 = vpop.eup %11714 }
 0xb06   : > { %11718 = vrcp.f32 %v3077_v35  ;;  %v3083_v3 = vadd.f32 1.0, %v11715_v30  ;;  %v11717_v32 = vpop.eup %11716 }
 0xb07   : > { %11720 = vtanh.f32 %v3072_v22  ;;  %v3090_v36 = vadd.f32 1.0, %v11717_v32 }
 0xb08   : > { %11722 = vrcp.f32 %v3083_v3 }
 0xb09   : > { %11724 = vrcp.f32 %v3090_v36 }
 0xb13   : > { %v11719_v31 = vpop.eup %11718 }
 0xb14   : > { %v11721_v27 = vpop.eup %11720 }
 0xb15   : > { %v11723_v0 = vpop.eup %11722  ;;  %v3097_v41 = vmul.f32 %v11721_v27, %v11719_v31 }
 0xb16   : > { %v3096_v17 = vmul.f32 %v11723_v0, %v3094_v37  ;;  %v11725_v63 = vpop.eup %11724 }
 0xb18   : > { %v13487_v38 = vadd.f32 %v3097_v41, %v3096_v17 }
 0xb1a   : > { %11726 = vtanh.f32 %v13487_v38 }
 0xb27   : > { %v11727_v12 = vpop.eup %11726 }
 0xb28   : > { %v13490_v42 = vmul.f32 %v11727_v12, %v11725_v63 }
 0xb2a   : > { %v3101_v22 = vpack.c.bf16 %v13490_v42, %v13490_v42 }
 0xb2c   : > { %v3103_v44 = vshrl.u32 %v3101_v22, 16 }
 0xb2e   : > { %v3105_v13 = vrot.slane %v3103_v44, 2 }
 0xb30   : > { %3140 = vmatmul.mubr.bf16.vlgmr.msra.gmra.mxu1 %v3105_v13  ;;  %3181 = vmatmul.mubr.bf16.vlgmr.msra.gmra.mxu0 %v3105_v13 }
 0xb31   : > { %3237 = vmatpush1.bf16.msra.mxu1 %v13144_v47  ;;  %3278 = vmatpush1.bf16.msra.mxu0 %v13149_v48 }
 0xb32   : > { %3238 = vmatprep.subr.bf16.mxu1 %v13156_v49  ;;  %3279 = vmatprep.subr.bf16.mxu0 %v13161_v50 }
 0xb33   : > { %3268 = vmatprep.mubr.bf16.mxu1 %v16348_v39  ;;  %3309 = vmatprep.mubr.bf16.mxu0 %v16348_v39 }
 0xb35   : > { %3239 = vmatpush1.bf16.msra.mxu1 %v13172_v51  ;;  %3280 = vmatpush1.bf16.msra.mxu0 %v13177_v52 }
 0xb36   : > { %3240 = vmatprep.subr.bf16.mxu1 %v13184_v29  ;;  %3281 = vmatprep.subr.bf16.mxu0 %v13189_v53 }
 0xb39   : > { %3241 = vmatpush1.bf16.msra.mxu1 %v13198_v54  ;;  %3282 = vmatpush1.bf16.msra.mxu0 %v13203_v55 }
 0xb3a   : > { %3242 = vmatprep.subr.bf16.mxu1 %v13210_v56  ;;  %3283 = vmatprep.subr.bf16.mxu0 %v13215_v57 }
 0xb3d   : > { %3243 = vmatpush1.bf16.msra.mxu1 %v13222_v58  ;;  %3284 = vmatpush1.bf16.msra.mxu0 %v13227_v62 }
 0xb3e   : > { %3244 = vmatprep.subr.bf16.mxu1 %v13234_v25  ;;  %3285 = vmatprep.subr.bf16.mxu0 %v13239_v6 }
 0xb41   : > { %3245 = vmatpush1.bf16.msra.mxu1 %v13246_v59  ;;  %3286 = vmatpush1.bf16.msra.mxu0 %v13251_v16 }
 0xb42   : > { %3246 = vmatprep.subr.bf16.mxu1 %v13258_v18  ;;  %3287 = vmatprep.subr.bf16.mxu0 %v13263_v19 }
 0xb45   : > { %3247 = vmatpush1.bf16.msra.mxu1 %v13270_v9  ;;  %3288 = vmatpush1.bf16.msra.mxu0 %v13275_v8 }
 0xb46   : > { %3248 = vmatprep.subr.bf16.mxu1 %v13282_v14  ;;  %3289 = vmatprep.subr.bf16.mxu0 %v13287_v61 }
 0xb49   : > { %3249 = vmatpush1.bf16.msra.mxu1 %v13294_v11  ;;  %3290 = vmatpush1.bf16.msra.mxu0 %v13299_v2 }
 0xb4a   : > { %3250 = vmatprep.subr.bf16.mxu1 %v13306_v26  ;;  %3291 = vmatprep.subr.bf16.mxu0 %v13311_v24 }
 0xb4d   : > { %3251 = vmatpush1.bf16.msra.mxu1 %v13318_v1  ;;  %3292 = vmatpush1.bf16.msra.mxu0 %v13323_v20 }
 0xb4e   : > { %3367 = vmatprep.subr.bf16.mxu1 %v13134_v45  ;;  %3408 = vmatprep.subr.bf16.mxu0 %v13139_v46 }
 0xbf0   : > { %v3141_v43 = vpop.f32.mrf.mxu1  ;;  %v3182_v35 = vpop.f32.mrf.mxu0 }
 0xbf1   : > { %v3193_v30 = vrot.slane %v3141_v43, 4  ;;  %v3195_v13 = vrot.slane %v3182_v35, 4 }
 0xbf2   : > { %v3143_v3 = vpop.f32.mrf.mxu1  ;;  %v3184_v32 = vpop.f32.mrf.mxu0 }
 0xbf3   : > { %v3201_v31 = vadd.f32 %v3193_v30, %v13377_v33  ;;  %v3194_v27 = vrot.slane %v3143_v3, 4  ;;  %v3196_v22 = vrot.slane %v3184_v32, 4  ;;  %v3203_v60 = vadd.f32 %v3195_v13, %v13392_v23 }
 0xbf4   : > { %v3145_v37 = vpop.f32.mrf.mxu1  ;;  %v3186_v0 = vpop.f32.mrf.mxu0 }
 0xbf5   : > { %v10315_v36 = vmul.f32 -1.442695, %v3201_v31  ;;  %v3202_v41 = vadd.f32 %v3194_v27, %v13379_v34  ;;  %v3204_v44 = vadd.f32 %v3196_v22, %v13388_v28 }
 0xbf6   : > { %v3146_v17 = vpop.f32.mrf.mxu1  ;;  %v3187_v63 = vpop.f32.mrf.mxu0 }
 0xbf7   : > { %11728 = vpow2.f32 %v10315_v36  ;;  %v10316_v12 = vmul.f32 -1.442695, %v3202_v41  ;;  %v10317_v43 = vmul.f32 -1.442695, %v3204_v44  ;;  %v3225_v36 = vrot.slane %v13487_v38, 1 }
 0xbf9   : > { %11730 = vpow2.f32 %v10316_v12 }
 0xbfa   : > { %11732 = vpow2.f32 %v10317_v43 }
 0xc04   : > { %v11729_v4 = vpop.eup %11728 }
 0xc05   : > { %v3208_v30 = vadd.f32 1.0, %v11729_v4 }
 0xc06   : > { %v11731_v3 = vpop.eup %11730 }
 0xc07   : > { %11734 = vrcp.f32 %v3208_v30  ;;  %v3214_v31 = vadd.f32 1.0, %v11731_v3  ;;  %v11733_v27 = vpop.eup %11732 }
 0xc08   : > { %11736 = vtanh.f32 %v3203_v60  ;;  %v3221_v41 = vadd.f32 1.0, %v11733_v27 }
 0xc09   : > { %11738 = vrcp.f32 %v3214_v31 }
 0xc0a   : > { %11740 = vrcp.f32 %v3221_v41  ;;  %v13595_v41 = vld [vmem:[%s16346_s29 + $0xe8] ss:$16 sps:$4 sm:$0xff]  }
 0xc14   : > { %v11735_v37 = vpop.eup %11734 }
 0xc15   : > { %v11737_v0 = vpop.eup %11736 }
 0xc16   : > { %v11739_v32 = vpop.eup %11738  ;;  %v3228_v17 = vmul.f32 %v11737_v0, %v11735_v37 }
 0xc17   : > { %v3227_v35 = vmul.f32 %v11739_v32, %v3225_v36  ;;  %v11741_v4 = vpop.eup %11740  ;;  %v13589_v32 = vld [vmem:[%s16346_s29 + $0xe0] ss:$16 sps:$4 sm:$0xff]  }
 0xc19   : > { %v13533_v63 = vadd.f32 %v3228_v17, %v3227_v35  ;;  %v13601_v17 = vld [vmem:[%s16346_s29 + $0xc4] ss:$16 sps:$4 sm:$0xff]   ;;  %v13607_v35 = vld [vmem:[%s16346_s29 + $0xcc] ss:$16 sps:$4 sm:$0xff]  }
 0xc1b   : > { %11742 = vtanh.f32 %v13533_v63 }
 0xc28   : > { %v11743_v12 = vpop.eup %11742 }
 0xc29   : > { %v13536_v22 = vmul.f32 %v11743_v12, %v11741_v4  ;;  %v13621_v4 = vld [vmem:[%s16346_s29 + $0xc8] ss:$16 sps:$4 sm:$0xff]   ;;  %v13627_v12 = vld [vmem:[%s16346_s29 + $0xa4] ss:$16 sps:$4 sm:$0xff]  }
 0xc2b   : > { %v3232_v60 = vpack.c.bf16 %v13536_v22, %v13536_v22 }
 0xc2d   : > { %v3234_v44 = vrot.slane %v3232_v60, 2  ;;  %v13633_v60 = vld [vmem:[%s16346_s29 + $0xac] ss:$16 sps:$4 sm:$0xff]  }
 0xc2f   : > { %3269 = vmatmul.mubr.bf16.vlgmr.msra.gmra.mxu1 %v3234_v44  ;;  %3310 = vmatmul.mubr.bf16.vlgmr.msra.gmra.mxu0 %v3234_v44  ;;  %v13639_v44 = vld [vmem:[%s16346_s29 + $0xa0] ss:$16 sps:$4 sm:$0xff]  }
 0xc30   : > { %3368 = vmatpush1.bf16.msra.mxu1 %v13144_v47  ;;  %3409 = vmatpush1.bf16.msra.mxu0 %v13149_v48 }
 0xc31   : > { %3369 = vmatprep.subr.bf16.mxu1 %v13156_v49  ;;  %3410 = vmatprep.subr.bf16.mxu0 %v13161_v50 }
 0xc32   : > { %3399 = vmatprep.mubr.bf16.mxu1 %v16348_v39  ;;  %3440 = vmatprep.mubr.bf16.mxu0 %v16348_v39 }
 0xc34   : > { %3370 = vmatpush1.bf16.msra.mxu1 %v13172_v51  ;;  %3411 = vmatpush1.bf16.msra.mxu0 %v13177_v52 }
 0xc35   : > { %3371 = vmatprep.subr.bf16.mxu1 %v13184_v29  ;;  %3412 = vmatprep.subr.bf16.mxu0 %v13189_v53 }
 0xc38   : > { %3372 = vmatpush1.bf16.msra.mxu1 %v13198_v54  ;;  %3413 = vmatpush1.bf16.msra.mxu0 %v13203_v55 }
 0xc39   : > { %3373 = vmatprep.subr.bf16.mxu1 %v13210_v56  ;;  %3414 = vmatprep.subr.bf16.mxu0 %v13215_v57 }
 0xc3c   : > { %3374 = vmatpush1.bf16.msra.mxu1 %v13222_v58  ;;  %3415 = vmatpush1.bf16.msra.mxu0 %v13227_v62 }
 0xc3d   : > { %3375 = vmatprep.subr.bf16.mxu1 %v13234_v25  ;;  %3416 = vmatprep.subr.bf16.mxu0 %v13239_v6 }
 0xc40   : > { %3376 = vmatpush1.bf16.msra.mxu1 %v13246_v59  ;;  %3417 = vmatpush1.bf16.msra.mxu0 %v13251_v16 }
 0xc41   : > { %3377 = vmatprep.subr.bf16.mxu1 %v13258_v18  ;;  %3418 = vmatprep.subr.bf16.mxu0 %v13263_v19 }
 0xc44   : > { %3378 = vmatpush1.bf16.msra.mxu1 %v13270_v9  ;;  %3419 = vmatpush1.bf16.msra.mxu0 %v13275_v8 }
 0xc45   : > { %3379 = vmatprep.subr.bf16.mxu1 %v13282_v14  ;;  %3420 = vmatprep.subr.bf16.mxu0 %v13287_v61 }
 0xc48   : > { %3380 = vmatpush1.bf16.msra.mxu1 %v13294_v11  ;;  %3421 = vmatpush1.bf16.msra.mxu0 %v13299_v2  ;;  %v3354_v11 = vrot.slane %v13533_v63, 1  ;;  %v13615_v63 = vld [vmem:[%s16346_s29 + $0xc0] ss:$16 sps:$4 sm:$0xff]  }
 0xc49   : > { %3381 = vmatprep.subr.bf16.mxu1 %v13306_v26  ;;  %3422 = vmatprep.subr.bf16.mxu0 %v13311_v24 }
 0xc4c   : > { %3382 = vmatpush1.bf16.msra.mxu1 %v13318_v1  ;;  %3423 = vmatpush1.bf16.msra.mxu0 %v13323_v20 }
 0xc4d   : > { %3496 = vmatprep.subr.bf16.mxu1 %v13134_v45  ;;  %3537 = vmatprep.subr.bf16.mxu0 %v13139_v46 }
 0xcef   : > { %v3270_v47 = vpop.f32.mrf.mxu1  ;;  %v3311_v48 = vpop.f32.mrf.mxu0 }
 0xcf0   : > { %v3322_v49 = vrot.slane %v3270_v47, 5  ;;  %v3324_v25 = vrot.slane %v3311_v48, 5  ;;  %v13645_v47 = vld [vmem:[%s16346_s29 + $0xa8] ss:$16 sps:$4 sm:$0xff]   ;;  %v13651_v48 = vld [vmem:[%s16346_s29 + $0x84] ss:$16 sps:$4 sm:$0xff]  }
 0xcf1   : > { %v3272_v50 = vpop.f32.mrf.mxu1  ;;  %v3313_v51 = vpop.f32.mrf.mxu0 }
 0xcf2   : > { %v3330_v52 = vadd.f32 %v3322_v49, %v13377_v33  ;;  %v3323_v29 = vrot.slane %v3272_v50, 5  ;;  %v3325_v45 = vrot.slane %v3313_v51, 5  ;;  %v3332_v16 = vadd.f32 %v3324_v25, %v13392_v23  ;;  %v13657_v49 = vld [vmem:[%s16346_s29 + $0x8c] ss:$16 sps:$4 sm:$0xff]   ;;  %v13663_v50 = vld [vmem:[%s16346_s29 + $0x80] ss:$16 sps:$4 sm:$0xff]  }
 0xcf3   : > { %v3274_v53 = vpop.f32.mrf.mxu1  ;;  %v3315_v54 = vpop.f32.mrf.mxu0  ;;  %v13669_v51 = vld [vmem:[%s16346_s29 + $0x88] ss:$16 sps:$4 sm:$0xff]  }
 0xcf4   : > { %v10318_v55 = vmul.f32 -1.442695, %v3330_v52  ;;  %v3331_v56 = vadd.f32 %v3323_v29, %v13379_v34  ;;  %v3333_v46 = vadd.f32 %v3325_v45, %v13388_v28  ;;  %v13675_v52 = vld [vmem:[%s16346_s29 + $0x64] ss:$16 sps:$4 sm:$0xff]   ;;  %v13681_v29 = vld [vmem:[%s16346_s29 + $0x6c] ss:$16 sps:$4 sm:$0xff]  }
 0xcf5   : > { %v3275_v57 = vpop.f32.mrf.mxu1  ;;  %v3316_v58 = vpop.f32.mrf.mxu0  ;;  %v13687_v53 = vld [vmem:[%s16346_s29 + $0x60] ss:$16 sps:$4 sm:$0xff]   ;;  %v13693_v54 = vld [vmem:[%s16346_s29 + $0x68] ss:$16 sps:$4 sm:$0xff]   ;;  %v13729_v45 = vld [vmem:[%s16346_s29 + $0x2c] ss:$16 sps:$4 sm:$0xff]  }
 0xcf6   : > { %11744 = vpow2.f32 %v10318_v55  ;;  %v10319_v62 = vmul.f32 -1.442695, %v3331_v56  ;;  %v10320_v6 = vmul.f32 -1.442695, %v3333_v46  ;;  %v13699_v55 = vld [vmem:[%s16346_s29 + $0x44] ss:$16 sps:$4 sm:$0xff]  }
 0xcf7   : > { %v13705_v56 = vld [vmem:[%s16346_s29 + $0x4c] ss:$16 sps:$4 sm:$0xff]   ;;  %v13711_v57 = vld [vmem:[%s16346_s29 + $0x40] ss:$16 sps:$4 sm:$0xff]   ;;  %v13717_v58 = vld [vmem:[%s16346_s29 + $0x48] ss:$16 sps:$4 sm:$0xff]  }
 0xcf8   : > { %11746 = vpow2.f32 %v10319_v62  ;;  %v13723_v62 = vld [vmem:[%s16346_s29 + $0x24] ss:$16 sps:$4 sm:$0xff]   ;;  %v13735_v46 = vld [vmem:[%s16346_s29 + $0x20] ss:$16 sps:$4 sm:$0xff]   ;;  %v13741_v25 = vld [vmem:[%s16346_s29 + $0x28] ss:$16 sps:$4 sm:$0xff]  }
 0xcf9   : > { %11748 = vpow2.f32 %v10320_v6  ;;  %v12156_v6 = vld [vmem:[%s16346_s29 + $0xe4] ss:$16 sps:$4 sm:$0xff]  }
 0xd03   : > { %v11745_v59 = vpop.eup %11744 }
 0xd04   : > { %v3337_v18 = vadd.f32 1.0, %v11745_v59  ;;  %v12157_v59 = vld [vmem:[%s16346_s29 + $0xec] ss:$16 sps:$4 sm:$0xff]  }
 0xd05   : > { %v11747_v19 = vpop.eup %11746 }
 0xd06   : > { %11750 = vrcp.f32 %v3337_v18  ;;  %v3343_v9 = vadd.f32 1.0, %v11747_v19  ;;  %v11749_v8 = vpop.eup %11748 }
 0xd07   : > { %11752 = vtanh.f32 %v3332_v16  ;;  %v3350_v38 = vadd.f32 1.0, %v11749_v8 }
 0xd08   : > { %11754 = vrcp.f32 %v3343_v9 }
 0xd09   : > { %11756 = vrcp.f32 %v3350_v38 }
 0xd13   : > { %v11751_v14 = vpop.eup %11750 }
 0xd14   : > { %v11753_v61 = vpop.eup %11752 }
 0xd15   : > { %v11755_v2 = vpop.eup %11754  ;;  %v3357_v13 = vmul.f32 %v11753_v61, %v11751_v14 }
 0xd16   : > { %v3356_v43 = vmul.f32 %v11755_v2, %v3354_v11  ;;  %v11757_v3 = vpop.eup %11756 }
 0xd18   : > { %v13579_v30 = vadd.f32 %v3357_v13, %v3356_v43 }
 0xd1a   : > { %11758 = vtanh.f32 %v13579_v30 }
 0xd27   : > { %v11759_v31 = vpop.eup %11758 }
 0xd28   : > { %v13582_v27 = vmul.f32 %v11759_v31, %v11757_v3 }
 0xd2a   : > { %v3361_v37 = vpack.c.bf16 %v13582_v27, %v13582_v27 }
 0xd2c   : > { %v3363_v0 = vshrl.u32 %v3361_v37, 16 }
 0xd2e   : > { %v3365_v36 = vrot.slane %v3363_v0, 1 }
 0xd30   : > { %3400 = vmatmul.mubr.bf16.vlgmr.msra.gmra.mxu1 %v3365_v36  ;;  %3441 = vmatmul.mubr.bf16.vlgmr.msra.gmra.mxu0 %v3365_v36 }
 0xd31   : > { %3497 = vmatpush1.bf16.msra.mxu1 %v13589_v32  ;;  %3538 = vmatpush1.bf16.msra.mxu0 %v13595_v41 }
 0xd32   : > { %3498 = vmatprep.subr.bf16.mxu1 %v13601_v17  ;;  %3539 = vmatprep.subr.bf16.mxu0 %v13607_v35 }
 0xd33   : > { %3528 = vmatprep.mubr.bf16.mxu1 %v16348_v39  ;;  %3569 = vmatprep.mubr.bf16.mxu0 %v16348_v39 }
 0xd35   : > { %3499 = vmatpush1.bf16.msra.mxu1 %v13615_v63  ;;  %3540 = vmatpush1.bf16.msra.mxu0 %v13621_v4 }
 0xd36   : > { %3500 = vmatprep.subr.bf16.mxu1 %v13627_v12  ;;  %3541 = vmatprep.subr.bf16.mxu0 %v13633_v60 }
 0xd39   : > { %3501 = vmatpush1.bf16.msra.mxu1 %v13639_v44  ;;  %3542 = vmatpush1.bf16.msra.mxu0 %v13645_v47 }
 0xd3a   : > { %3502 = vmatprep.subr.bf16.mxu1 %v13651_v48  ;;  %3543 = vmatprep.subr.bf16.mxu0 %v13657_v49 }
 0xd3d   : > { %3503 = vmatpush1.bf16.msra.mxu1 %v13663_v50  ;;  %3544 = vmatpush1.bf16.msra.mxu0 %v13669_v51 }
 0xd3e   : > { %3504 = vmatprep.subr.bf16.mxu1 %v13675_v52  ;;  %3545 = vmatprep.subr.bf16.mxu0 %v13681_v29 }
 0xd41   : > { %3505 = vmatpush1.bf16.msra.mxu1 %v13687_v53  ;;  %3546 = vmatpush1.bf16.msra.mxu0 %v13693_v54 }
 0xd42   : > { %3506 = vmatprep.subr.bf16.mxu1 %v13699_v55  ;;  %3547 = vmatprep.subr.bf16.mxu0 %v13705_v56 }
 0xd45   : > { %3507 = vmatpush1.bf16.msra.mxu1 %v13711_v57  ;;  %3548 = vmatpush1.bf16.msra.mxu0 %v13717_v58 }
 0xd46   : > { %3508 = vmatprep.subr.bf16.mxu1 %v13723_v62  ;;  %3549 = vmatprep.subr.bf16.mxu0 %v13729_v45 }
 0xd49   : > { %3509 = vmatpush1.bf16.msra.mxu1 %v13735_v46  ;;  %3550 = vmatpush1.bf16.msra.mxu0 %v13741_v25 }
 0xd4a   : > { %3510 = vmatprep.subr.bf16.mxu1 %v13306_v26  ;;  %3551 = vmatprep.subr.bf16.mxu0 %v13311_v24 }
 0xd4d   : > { %3511 = vmatpush1.bf16.msra.mxu1 %v13318_v1  ;;  %3552 = vmatpush1.bf16.msra.mxu0 %v13323_v20 }
 0xd4e   : > { %3626 = vmatprep.subr.bf16.mxu1 %v12156_v6  ;;  %3667 = vmatprep.subr.bf16.mxu0 %v12157_v59 }
 0xdf0   : > { %v3401_v16 = vpop.f32.mrf.mxu1  ;;  %v3442_v18 = vpop.f32.mrf.mxu0 }
 0xdf1   : > { %v3453_v19 = vrot.slane %v3401_v16, 6  ;;  %v3455_v3 = vrot.slane %v3442_v18, 6 }
 0xdf2   : > { %v3403_v26 = vpop.f32.mrf.mxu1  ;;  %v3444_v9 = vpop.f32.mrf.mxu0 }
 0xdf3   : > { %v3461_v24 = vadd.f32 %v3453_v19, %v13377_v33  ;;  %v3454_v1 = vrot.slane %v3403_v26, 6  ;;  %v3456_v13 = vrot.slane %v3444_v9, 6  ;;  %v3463_v0 = vadd.f32 %v3455_v3, %v13392_v23 }
 0xdf4   : > { %v3405_v8 = vpop.f32.mrf.mxu1  ;;  %v3446_v20 = vpop.f32.mrf.mxu0 }
 0xdf5   : > { %v10321_v14 = vmul.f32 -1.442695, %v3461_v24  ;;  %v3462_v61 = vadd.f32 %v3454_v1, %v13379_v34  ;;  %v3464_v43 = vadd.f32 %v3456_v13, %v13388_v28  ;;  %v3485_v24 = vrot.slane %v13579_v30, 1  ;;  %v12158_v30 = vld [vmem:[%s16346_s29 + $0x4] ss:$16 sps:$4 sm:$0xff]  }
 0xdf6   : > { %v3406_v11 = vpop.f32.mrf.mxu1  ;;  %v3447_v2 = vpop.f32.mrf.mxu0 }
 0xdf7   : > { %11760 = vpow2.f32 %v10321_v14  ;;  %v10322_v38 = vmul.f32 -1.442695, %v3462_v61  ;;  %v10323_v31 = vmul.f32 -1.442695, %v3464_v43 }
 0xdf9   : > { %11762 = vpow2.f32 %v10322_v38 }
 0xdfa   : > { %11764 = vpow2.f32 %v10323_v31 }
 0xe04   : > { %v11761_v37 = vpop.eup %11760 }
 0xe05   : > { %v3468_v36 = vadd.f32 1.0, %v11761_v37 }
 0xe06   : > { %v11763_v6 = vpop.eup %11762 }
 0xe07   : > { %11766 = vrcp.f32 %v3468_v36  ;;  %v3474_v59 = vadd.f32 1.0, %v11763_v6  ;;  %v11765_v16 = vpop.eup %11764 }
 0xe08   : > { %11768 = vtanh.f32 %v3463_v0  ;;  %v3481_v1 = vadd.f32 1.0, %v11765_v16 }
 0xe09   : > { %11770 = vrcp.f32 %v3474_v59 }
 0xe0a   : > { %11772 = vrcp.f32 %v3481_v1  ;;  %v11074_v1 = vld [vmem:[%s16349_s11 + $0xe4] ss:$16 sps:$4 sm:$0xff]  }
 0xe14   : > { %v11767_v19 = vpop.eup %11766 }
 0xe15   : > { %v11769_v26 = vpop.eup %11768 }
 0xe16   : > { %v11771_v9 = vpop.eup %11770  ;;  %v3488_v8 = vmul.f32 %v11769_v26, %v11767_v19 }
 0xe17   : > { %v3487_v18 = vmul.f32 %v11771_v9, %v3485_v24  ;;  %v11773_v14 = vpop.eup %11772 }
 0xe19   : > { %v13759_v20 = vadd.f32 %v3488_v8, %v3487_v18  ;;  %v11077_v8 = vld [vmem:[%s16349_s11 + $0xec] ss:$16 sps:$4 sm:$0xff]   ;;  %v11072_v18 = vld [vmem:[%s16349_s11 + $0xe0] ss:$16 sps:$4 sm:$0xff]  }
 0xe1b   : > { %11774 = vtanh.f32 %v13759_v20  ;;  %v3614_v31 = vrot.slane %v13759_v20, 1  ;;  %v11075_v20 = vld [vmem:[%s16349_s11 + $0xe8] ss:$16 sps:$4 sm:$0xff]  }
 0xe28   : > { %v11775_v61 = vpop.eup %11774 }
 0xe29   : > { %v13762_v11 = vmul.f32 %v11775_v61, %v11773_v14  ;;  %v11080_v14 = vld [vmem:[%s16349_s11 + $0xc4] ss:$16 sps:$4 sm:$0xff]   ;;  %v11083_v61 = vld [vmem:[%s16349_s11 + $0xcc] ss:$16 sps:$4 sm:$0xff]  }
 0xe2b   : > { %v3492_v2 = vpack.c.bf16 %v13762_v11, %v13762_v11 }
 0xe2d   : > { %v3494_v38 = vrot.slane %v3492_v2, 1  ;;  %v11078_v2 = vld [vmem:[%s16349_s11 + $0xc0] ss:$16 sps:$4 sm:$0xff]  }
 0xe2f   : > { %3529 = vmatmul.mubr.bf16.vlgmr.msra.gmra.mxu1 %v3494_v38  ;;  %3570 = vmatmul.mubr.bf16.vlgmr.msra.gmra.mxu0 %v3494_v38  ;;  %v11081_v38 = vld [vmem:[%s16349_s11 + $0xc8] ss:$16 sps:$4 sm:$0xff]  }
 0xe30   : > { %3627 = vmatpush1.bf16.msra.mxu1 %v13589_v32  ;;  %3668 = vmatpush1.bf16.msra.mxu0 %v13595_v41  ;;  %v12159_v32 = vld [vmem:[%s16346_s29 + $0xc] ss:$16 sps:$4 sm:$0xff]   ;;  %v12160_v41 = vld [vmem:[%s16346_s29] ss:$16 sps:$4 sm:$0xff]  }
 0xe31   : > { %3628 = vmatprep.subr.bf16.mxu1 %v13601_v17  ;;  %3669 = vmatprep.subr.bf16.mxu0 %v13607_v35  ;;  %v12161_v17 = vld [vmem:[%s16346_s29 + $0x8] ss:$16 sps:$4 sm:$0xff]  }
 0xe32   : > { %3658 = vmatprep.mubr.bf16.mxu1 %v16348_v39  ;;  %3699 = vmatprep.mubr.bf16.mxu0 %v16348_v39 }
 0xe34   : > { %3629 = vmatpush1.bf16.msra.mxu1 %v13615_v63  ;;  %3670 = vmatpush1.bf16.msra.mxu0 %v13621_v4 }
 0xe35   : > { %3630 = vmatprep.subr.bf16.mxu1 %v13627_v12  ;;  %3671 = vmatprep.subr.bf16.mxu0 %v13633_v60 }
 0xe38   : > { %3631 = vmatpush1.bf16.msra.mxu1 %v13639_v44  ;;  %3672 = vmatpush1.bf16.msra.mxu0 %v13645_v47 }
 0xe39   : > { %3632 = vmatprep.subr.bf16.mxu1 %v13651_v48  ;;  %3673 = vmatprep.subr.bf16.mxu0 %v13657_v49 }
 0xe3c   : > { %3633 = vmatpush1.bf16.msra.mxu1 %v13663_v50  ;;  %3674 = vmatpush1.bf16.msra.mxu0 %v13669_v51 }
 0xe3d   : > { %3634 = vmatprep.subr.bf16.mxu1 %v13675_v52  ;;  %3675 = vmatprep.subr.bf16.mxu0 %v13681_v29 }
 0xe40   : > { %3635 = vmatpush1.bf16.msra.mxu1 %v13687_v53  ;;  %3676 = vmatpush1.bf16.msra.mxu0 %v13693_v54 }
 0xe41   : > { %3636 = vmatprep.subr.bf16.mxu1 %v13699_v55  ;;  %3677 = vmatprep.subr.bf16.mxu0 %v13705_v56 }
 0xe44   : > { %3637 = vmatpush1.bf16.msra.mxu1 %v13711_v57  ;;  %3678 = vmatpush1.bf16.msra.mxu0 %v13717_v58 }
 0xe45   : > { %3638 = vmatprep.subr.bf16.mxu1 %v13723_v62  ;;  %3679 = vmatprep.subr.bf16.mxu0 %v13729_v45 }
 0xe48   : > { %3639 = vmatpush1.bf16.msra.mxu1 %v13735_v46  ;;  %3680 = vmatpush1.bf16.msra.mxu0 %v13741_v25 }
 0xe49   : > { %3640 = vmatprep.subr.bf16.mxu1 %v12158_v30  ;;  %3681 = vmatprep.subr.bf16.mxu0 %v12159_v32  ;;  %v11086_v30 = vld [vmem:[%s16349_s11 + $0xa4] ss:$16 sps:$4 sm:$0xff]   ;;  %v11089_v32 = vld [vmem:[%s16349_s11 + $0xac] ss:$16 sps:$4 sm:$0xff]  }
 0xe4c   : > { %3641 = vmatpush1.bf16.msra.mxu1 %v12160_v41  ;;  %3682 = vmatpush1.bf16.msra.mxu0 %v12161_v17  ;;  %v11084_v41 = vld [vmem:[%s16349_s11 + $0xa0] ss:$16 sps:$4 sm:$0xff]   ;;  %v11087_v17 = vld [vmem:[%s16349_s11 + $0xa8] ss:$16 sps:$4 sm:$0xff]  }
 0xe4d   : > { %4154 = vmatprep.subr.bf16.mxu1 %v11074_v1  ;;  %4195 = vmatprep.subr.bf16.mxu0 %v11077_v8  ;;  %v11141_v1 = vld [vmem:[%s16349_s11 + $0x188] ss:$16 sps:$4 sm:$0xff]   ;;  %v11146_v8 = vld [vmem:[%s16349_s11 + $0x164] ss:$16 sps:$4 sm:$0xff]  }
 0xeef   : > { %v3530_v35 = vpop.f32.mrf.mxu1  ;;  %v3571_v63 = vpop.f32.mrf.mxu0 }
 0xef0   : > { %v3582_v4 = vrot.slane %v3530_v35, 7  ;;  %v3584_v56 = vrot.slane %v3571_v63, 7  ;;  %v11092_v35 = vld [vmem:[%s16349_s11 + $0x84] ss:$16 sps:$4 sm:$0xff]   ;;  %v11095_v63 = vld [vmem:[%s16349_s11 + $0x8c] ss:$16 sps:$4 sm:$0xff]  }
 0xef1   : > { %v3532_v12 = vpop.f32.mrf.mxu1  ;;  %v3573_v60 = vpop.f32.mrf.mxu0 }
 0xef2   : > { %v3590_v44 = vadd.f32 %v3582_v4, %v13377_v33  ;;  %v3583_v47 = vrot.slane %v3532_v12, 7  ;;  %v3585_v54 = vrot.slane %v3573_v60, 7  ;;  %v3592_v62 = vadd.f32 %v3584_v56, %v13392_v23  ;;  %v11090_v4 = vld [vmem:[%s16349_s11 + $0x80] ss:$16 sps:$4 sm:$0xff]   ;;  %v11093_v12 = vld [vmem:[%s16349_s11 + $0x88] ss:$16 sps:$4 sm:$0xff]  }
 0xef3   : > { %v3534_v48 = vpop.f32.mrf.mxu1  ;;  %v3575_v49 = vpop.f32.mrf.mxu0  ;;  %v11098_v60 = vld [vmem:[%s16349_s11 + $0x64] ss:$16 sps:$4 sm:$0xff]  }
 0xef4   : > { %v10324_v50 = vmul.f32 -1.442695, %v3590_v44  ;;  %v3591_v51 = vadd.f32 %v3583_v47, %v13379_v34  ;;  %v3593_v55 = vadd.f32 %v3585_v54, %v13388_v28  ;;  %v11101_v44 = vld [vmem:[%s16349_s11 + $0x6c] ss:$16 sps:$4 sm:$0xff]   ;;  %v11096_v47 = vld [vmem:[%s16349_s11 + $0x60] ss:$16 sps:$4 sm:$0xff]  }
 0xef5   : > { %v3535_v52 = vpop.f32.mrf.mxu1  ;;  %v3576_v29 = vpop.f32.mrf.mxu0  ;;  %v11099_v48 = vld [vmem:[%s16349_s11 + $0x68] ss:$16 sps:$4 sm:$0xff]   ;;  %v11104_v49 = vld [vmem:[%s16349_s11 + $0x44] ss:$16 sps:$4 sm:$0xff]   ;;  %v11108_v54 = vld [vmem:[%s16349_s11 + $0x20] ss:$16 sps:$4 sm:$0xff]  }
 0xef6   : > { %11776 = vpow2.f32 %v10324_v50  ;;  %v10325_v53 = vmul.f32 -1.442695, %v3591_v51  ;;  %v10326_v57 = vmul.f32 -1.442695, %v3593_v55  ;;  %v11107_v50 = vld [vmem:[%s16349_s11 + $0x4c] ss:$16 sps:$4 sm:$0xff]  }
 0xef7   : > { %v11102_v51 = vld [vmem:[%s16349_s11 + $0x40] ss:$16 sps:$4 sm:$0xff]   ;;  %v11105_v52 = vld [vmem:[%s16349_s11 + $0x48] ss:$16 sps:$4 sm:$0xff]   ;;  %v11110_v29 = vld [vmem:[%s16349_s11 + $0x24] ss:$16 sps:$4 sm:$0xff]  }
 0xef8   : > { %11778 = vpow2.f32 %v10325_v53  ;;  %v11113_v53 = vld [vmem:[%s16349_s11 + $0x2c] ss:$16 sps:$4 sm:$0xff]   ;;  %v11111_v55 = vld [vmem:[%s16349_s11 + $0x28] ss:$16 sps:$4 sm:$0xff]   ;;  %v11116_v56 = vld [vmem:[%s16349_s11 + $0x4] ss:$16 sps:$4 sm:$0xff]  }
 0xef9   : > { %11780 = vpow2.f32 %v10326_v57  ;;  %v11119_v57 = vld [vmem:[%s16349_s11 + $0xc] ss:$16 sps:$4 sm:$0xff]  }
 0xf03   : > { %v11777_v58 = vpop.eup %11776 }
 0xf04   : > { %v3597_v45 = vadd.f32 1.0, %v11777_v58  ;;  %v11114_v58 = vld [vmem:[%s16349_s11] ss:$16 sps:$4 sm:$0xff]  }
 0xf05   : > { %v11779_v46 = vpop.eup %11778 }
 0xf06   : > { %11782 = vrcp.f32 %v3597_v45  ;;  %v3603_v25 = vadd.f32 1.0, %v11779_v46  ;;  %v11781_v13 = vpop.eup %11780  ;;  %v11122_v45 = vld [vmem:[%s16349_s11 + $0x1e4] ss:$16 sps:$4 sm:$0xff]   ;;  %v11125_v46 = vld [vmem:[%s16349_s11 + $0x1ec] ss:$16 sps:$4 sm:$0xff]  }
 0xf07   : > { %11784 = vtanh.f32 %v3592_v62  ;;  %v3610_v0 = vadd.f32 1.0, %v11781_v13  ;;  %v11117_v62 = vld [vmem:[%s16349_s11 + $0x8] ss:$16 sps:$4 sm:$0xff]  }
 0xf08   : > { %11786 = vrcp.f32 %v3603_v25  ;;  %v11120_v25 = vld [vmem:[%s16349_s11 + $0x1e0] ss:$16 sps:$4 sm:$0xff]   ;;  %v11123_v13 = vld [vmem:[%s16349_s11 + $0x1e8] ss:$16 sps:$4 sm:$0xff]  }
 0xf09   : > { %11788 = vrcp.f32 %v3610_v0  ;;  %v11134_v0 = vld [vmem:[%s16349_s11 + $0x1a4] ss:$16 sps:$4 sm:$0xff]  }
 0xf13   : > { %v11783_v43 = vpop.eup %11782 }
 0xf14   : > { %v11785_v3 = vpop.eup %11784 }
 0xf15   : > { %v11787_v37 = vpop.eup %11786  ;;  %v3617_v36 = vmul.f32 %v11785_v3, %v11783_v43  ;;  %v11128_v43 = vld [vmem:[%s16349_s11 + $0x1c4] ss:$16 sps:$4 sm:$0xff]   ;;  %v11131_v3 = vld [vmem:[%s16349_s11 + $0x1cc] ss:$16 sps:$4 sm:$0xff]  }
 0xf16   : > { %v3616_v6 = vmul.f32 %v11787_v37, %v3614_v31  ;;  %v11789_v16 = vpop.eup %11788  ;;  %v11126_v31 = vld [vmem:[%s16349_s11 + $0x1c0] ss:$16 sps:$4 sm:$0xff]   ;;  %v11129_v37 = vld [vmem:[%s16349_s11 + $0x1c8] ss:$16 sps:$4 sm:$0xff]  }
 0xf18   : > { %v13811_v59 = vadd.f32 %v3617_v36, %v3616_v6  ;;  %v11137_v36 = vld [vmem:[%s16349_s11 + $0x1ac] ss:$16 sps:$4 sm:$0xff]   ;;  %v11132_v6 = vld [vmem:[%s16349_s11 + $0x1a0] ss:$16 sps:$4 sm:$0xff]  }
 0xf1a   : > { %11790 = vtanh.f32 %v13811_v59 }
 0xf27   : > { %v11791_v19 = vpop.eup %11790 }
 0xf28   : > { %v13814_v26 = vmul.f32 %v11791_v19, %v11789_v16  ;;  %v11135_v16 = vld [vmem:[%s16349_s11 + $0x1a8] ss:$16 sps:$4 sm:$0xff]   ;;  %v11140_v19 = vld [vmem:[%s16349_s11 + $0x184] ss:$16 sps:$4 sm:$0xff]  }
 0xf2a   : > { %v3621_v24 = vpack.c.bf16 %v13814_v26, %v13814_v26 }
 0xf2c   : > { %v3623_v9 = vshrl.u32 %v3621_v24, 16  ;;  %v11143_v24 = vld [vmem:[%s16349_s11 + $0x18c] ss:$16 sps:$4 sm:$0xff]  }
 0xf2e   : > { %3659 = vmatmul.mubr.bf16.vlgmr.msra.gmra.mxu1 %v3623_v9  ;;  %3700 = vmatmul.mubr.bf16.vlgmr.msra.gmra.mxu0 %v3623_v9  ;;  %v11138_v9 = vld [vmem:[%s16349_s11 + $0x180] ss:$16 sps:$4 sm:$0xff]  }
 0xf2f   : > { %4155 = vmatpush1.bf16.msra.mxu1 %v11072_v18  ;;  %4196 = vmatpush1.bf16.msra.mxu0 %v11075_v20  ;;  %v11149_v18 = vld [vmem:[%s16349_s11 + $0x16c] ss:$16 sps:$4 sm:$0xff]   ;;  %v11144_v20 = vld [vmem:[%s16349_s11 + $0x160] ss:$16 sps:$4 sm:$0xff]  }
 0xf30   : > { %4156 = vmatprep.subr.bf16.mxu1 %v11080_v14  ;;  %4197 = vmatprep.subr.bf16.mxu0 %v11083_v61  ;;  %v11147_v14 = vld [vmem:[%s16349_s11 + $0x168] ss:$16 sps:$4 sm:$0xff]   ;;  %v11152_v61 = vld [vmem:[%s16349_s11 + $0x144] ss:$16 sps:$4 sm:$0xff]  }
 0xf33   : > { %4157 = vmatpush1.bf16.msra.mxu1 %v11078_v2  ;;  %4198 = vmatpush1.bf16.msra.mxu0 %v11081_v38  ;;  %v11155_v2 = vld [vmem:[%s16349_s11 + $0x14c] ss:$16 sps:$4 sm:$0xff]   ;;  %v11150_v38 = vld [vmem:[%s16349_s11 + $0x140] ss:$16 sps:$4 sm:$0xff]  }
 0xf34   : > { %4158 = vmatprep.subr.bf16.mxu1 %v11086_v30  ;;  %4199 = vmatprep.subr.bf16.mxu0 %v11089_v32  ;;  %v11153_v30 = vld [vmem:[%s16349_s11 + $0x148] ss:$16 sps:$4 sm:$0xff]   ;;  %v11158_v32 = vld [vmem:[%s16349_s11 + $0x124] ss:$16 sps:$4 sm:$0xff]  }
 0xf37   : > { %4159 = vmatpush1.bf16.msra.mxu1 %v11084_v41  ;;  %4200 = vmatpush1.bf16.msra.mxu0 %v11087_v17  ;;  %v11156_v41 = vld [vmem:[%s16349_s11 + $0x120] ss:$16 sps:$4 sm:$0xff]   ;;  %v11159_v17 = vld [vmem:[%s16349_s11 + $0x128] ss:$16 sps:$4 sm:$0xff]  }
 0xf38   : > { %4160 = vmatprep.subr.bf16.mxu1 %v11092_v35  ;;  %4201 = vmatprep.subr.bf16.mxu0 %v11095_v63  ;;  %v11161_v35 = vld [vmem:[%s16349_s11 + $0x12c] ss:$16 sps:$4 sm:$0xff]   ;;  %v11164_v63 = vld [vmem:[%s16349_s11 + $0x104] ss:$16 sps:$4 sm:$0xff]  }
 0xf3b   : > { %4161 = vmatpush1.bf16.msra.mxu1 %v11090_v4  ;;  %4202 = vmatpush1.bf16.msra.mxu0 %v11093_v12  ;;  %v11167_v4 = vld [vmem:[%s16349_s11 + $0x10c] ss:$16 sps:$4 sm:$0xff]   ;;  %v11162_v12 = vld [vmem:[%s16349_s11 + $0x100] ss:$16 sps:$4 sm:$0xff]  }
 0xf3c   : > { %4162 = vmatprep.subr.bf16.mxu1 %v11098_v60  ;;  %4203 = vmatprep.subr.bf16.mxu0 %v11101_v44  ;;  %v11165_v60 = vld [vmem:[%s16349_s11 + $0x108] ss:$16 sps:$4 sm:$0xff]   ;;  %v14013_v44 = vld [vmem:[%s16350_s0 + $0xe4] ss:$16 sps:$4 sm:$0xff]  }
 0xf3f   : > { %4163 = vmatpush1.bf16.msra.mxu1 %v11096_v47  ;;  %4204 = vmatpush1.bf16.msra.mxu0 %v11099_v48  ;;  %v14018_v47 = vld [vmem:[%s16350_s0 + $0xec] ss:$16 sps:$4 sm:$0xff]  }
 0xf40   : > { %4164 = vmatprep.subr.bf16.mxu1 %v11104_v49  ;;  %4205 = vmatprep.subr.bf16.mxu0 %v11107_v50 }
 0xf43   : > { %4165 = vmatpush1.bf16.msra.mxu1 %v11102_v51  ;;  %4206 = vmatpush1.bf16.msra.mxu0 %v11105_v52 }
 0xf44   : > { %4166 = vmatprep.subr.bf16.mxu1 %v11110_v29  ;;  %4207 = vmatprep.subr.bf16.mxu0 %v11113_v53 }
 0xf47   : > { %4167 = vmatpush1.bf16.msra.mxu1 %v11108_v54  ;;  %4208 = vmatpush1.bf16.msra.mxu0 %v11111_v55 }
 0xf48   : > { %4168 = vmatprep.subr.bf16.mxu1 %v11116_v56  ;;  %4209 = vmatprep.subr.bf16.mxu0 %v11119_v57 }
 0xf4b   : > { %4169 = vmatpush1.bf16.msra.mxu1 %v11114_v58  ;;  %4210 = vmatpush1.bf16.msra.mxu0 %v11117_v62 }
 0xf4c   : > { %4170 = vmatprep.subr.bf16.mxu1 %v11122_v45  ;;  %4211 = vmatprep.subr.bf16.mxu0 %v11125_v46 }
 0xf4f   : > { %4171 = vmatpush2.bf16.msra.mxu1 %v11120_v25  ;;  %4212 = vmatpush2.bf16.msra.mxu0 %v11123_v13 }
 0xf50   : > { %4172 = vmatprep.subr.bf16.mxu1 %v11128_v43  ;;  %4213 = vmatprep.subr.bf16.mxu0 %v11131_v3 }
 0xf53   : > { %4173 = vmatpush2.bf16.msra.mxu1 %v11126_v31  ;;  %4214 = vmatpush2.bf16.msra.mxu0 %v11129_v37  ;;  %v3732_v37 = vrot.slane %v13811_v59, 1 }
 0xf54   : > { %4174 = vmatprep.subr.bf16.mxu1 %v11134_v0  ;;  %4215 = vmatprep.subr.bf16.mxu0 %v11137_v36 }
 0xf57   : > { %4175 = vmatpush2.bf16.msra.mxu1 %v11132_v6  ;;  %4216 = vmatpush2.bf16.msra.mxu0 %v11135_v16 }
 0xf58   : > { %4176 = vmatprep.subr.bf16.mxu1 %v11140_v19  ;;  %4217 = vmatprep.subr.bf16.mxu0 %v11143_v24 }
 0xf5b   : > { %4177 = vmatpush2.bf16.msra.mxu1 %v11138_v9  ;;  %4218 = vmatpush2.bf16.msra.mxu0 %v11141_v1 }
 0xf5c   : > { %4178 = vmatprep.subr.bf16.mxu1 %v11146_v8  ;;  %4219 = vmatprep.subr.bf16.mxu0 %v11149_v18 }
 0xf5f   : > { %4179 = vmatpush2.bf16.msra.mxu1 %v11144_v20  ;;  %4220 = vmatpush2.bf16.msra.mxu0 %v11147_v14 }
 0xf60   : > { %4180 = vmatprep.subr.bf16.mxu1 %v11152_v61  ;;  %4221 = vmatprep.subr.bf16.mxu0 %v11155_v2  ;;  %v14093_v2 = vld [vmem:[%s16350_s0 + $0xac] ss:$16 sps:$4 sm:$0xff]  }
 0xf63   : > { %4181 = vmatpush2.bf16.msra.mxu1 %v11150_v38  ;;  %4222 = vmatpush2.bf16.msra.mxu0 %v11153_v30  ;;  %v14102_v38 = vld [vmem:[%s16350_s0 + $0xa0] ss:$16 sps:$4 sm:$0xff]   ;;  %v14107_v30 = vld [vmem:[%s16350_s0 + $0xa8] ss:$16 sps:$4 sm:$0xff]  }
 0xf64   : > { %4182 = vmatprep.subr.bf16.mxu1 %v11158_v32  ;;  %4223 = vmatprep.subr.bf16.mxu0 %v11161_v35  ;;  %v14114_v32 = vld [vmem:[%s16350_s0 + $0x84] ss:$16 sps:$4 sm:$0xff]   ;;  %v14131_v35 = vld [vmem:[%s16350_s0 + $0x88] ss:$16 sps:$4 sm:$0xff]  }
 0xf67   : > { %4183 = vmatpush2.bf16.msra.mxu1 %v11156_v41  ;;  %4224 = vmatpush2.bf16.msra.mxu0 %v11159_v17  ;;  %v14119_v41 = vld [vmem:[%s16350_s0 + $0x8c] ss:$16 sps:$4 sm:$0xff]   ;;  %v14126_v17 = vld [vmem:[%s16350_s0 + $0x80] ss:$16 sps:$4 sm:$0xff]  }
 0xf68   : > { %4184 = vmatprep.subr.bf16.mxu1 %v11164_v63  ;;  %4225 = vmatprep.subr.bf16.mxu0 %v11167_v4  ;;  %v14138_v63 = vld [vmem:[%s16350_s0 + $0x64] ss:$16 sps:$4 sm:$0xff]   ;;  %v14143_v4 = vld [vmem:[%s16350_s0 + $0x6c] ss:$16 sps:$4 sm:$0xff]  }
 0xf6b   : > { %4185 = vmatpush2.bf16.msra.mxu1 %v11162_v12  ;;  %4226 = vmatpush2.bf16.msra.mxu0 %v11165_v60  ;;  %v14150_v12 = vld [vmem:[%s16350_s0 + $0x60] ss:$16 sps:$4 sm:$0xff]   ;;  %v14155_v60 = vld [vmem:[%s16350_s0 + $0x68] ss:$16 sps:$4 sm:$0xff]  }
 0xf6c   : > { %4428 = vmatprep.subr.bf16.mxu1 %v14013_v44  ;;  %4469 = vmatprep.subr.bf16.mxu0 %v14018_v47 }
 0xfee   : > { %v3660_v48 = vpop.f32.mrf.mxu1  ;;  %v3701_v49 = vpop.f32.mrf.mxu0 }
 0xfef   : > { %v3708_v50 = vadd.f32 %v3660_v48, %v13377_v33  ;;  %v3710_v25 = vadd.f32 %v3701_v49, %v13392_v23  ;;  %v14162_v48 = vld [vmem:[%s16350_s0 + $0x44] ss:$16 sps:$4 sm:$0xff]   ;;  %v14167_v49 = vld [vmem:[%s16350_s0 + $0x4c] ss:$16 sps:$4 sm:$0xff]  }
 0xff0   : > { %v3662_v51 = vpop.f32.mrf.mxu1  ;;  %v3703_v52 = vpop.f32.mrf.mxu0 }
 0xff1   : > { %v10327_v29 = vmul.f32 -1.442695, %v3708_v50  ;;  %v3709_v53 = vadd.f32 %v3662_v51, %v13379_v34  ;;  %v3711_v62 = vadd.f32 %v3703_v52, %v13388_v28  ;;  %v14174_v50 = vld [vmem:[%s16350_s0 + $0x40] ss:$16 sps:$4 sm:$0xff]   ;;  %v14179_v51 = vld [vmem:[%s16350_s0 + $0x48] ss:$16 sps:$4 sm:$0xff]  }
 0xff2   : > { %v3664_v54 = vpop.f32.mrf.mxu1  ;;  %v3705_v55 = vpop.f32.mrf.mxu0  ;;  %v14186_v52 = vld [vmem:[%s16350_s0 + $0x24] ss:$16 sps:$4 sm:$0xff]  }
 0xff3   : > { %11792 = vpow2.f32 %v10327_v29  ;;  %v10328_v56 = vmul.f32 -1.442695, %v3709_v53  ;;  %v10329_v45 = vmul.f32 -1.442695, %v3711_v62  ;;  %v14191_v29 = vld [vmem:[%s16350_s0 + $0x2c] ss:$16 sps:$4 sm:$0xff]  }
 0xff4   : > { %v3665_v57 = vpop.f32.mrf.mxu1  ;;  %v3706_v58 = vpop.f32.mrf.mxu0  ;;  %v14198_v53 = vld [vmem:[%s16350_s0 + $0x20] ss:$16 sps:$4 sm:$0xff]   ;;  %v14203_v54 = vld [vmem:[%s16350_s0 + $0x28] ss:$16 sps:$4 sm:$0xff]   ;;  %v14210_v55 = vld [vmem:[%s16350_s0 + $0x4] ss:$16 sps:$4 sm:$0xff]  }
 0xff5   : > { %11794 = vpow2.f32 %v10328_v56  ;;  %v14215_v56 = vld [vmem:[%s16350_s0 + $0xc] ss:$16 sps:$4 sm:$0xff]   ;;  %v14222_v57 = vld [vmem:[%s16350_s0] ss:$16 sps:$4 sm:$0xff]   ;;  %v14227_v58 = vld [vmem:[%s16350_s0 + $0x8] ss:$16 sps:$4 sm:$0xff]  }
 0xff6   : > { %11796 = vpow2.f32 %v10329_v45 }
0x1000   : > { %v11793_v46 = vpop.eup %11792 }
0x1001   : > { %v3715_v13 = vadd.f32 1.0, %v11793_v46 }
0x1002   : > { %v11795_v33 = vpop.eup %11794 }
0x1003   : > { %11798 = vrcp.f32 %v3715_v13  ;;  %v3721_v43 = vadd.f32 1.0, %v11795_v33  ;;  %v11797_v34 = vpop.eup %11796 }
0x1004   : > { %11800 = vtanh.f32 %v3710_v25  ;;  %v3728_v36 = vadd.f32 1.0, %v11797_v34 }
0x1005   : > { %11802 = vrcp.f32 %v3721_v43 }
0x1006   : > { %11804 = vrcp.f32 %v3728_v36 }
0x1010   : > { %v11799_v3 = vpop.eup %11798 }
0x1011   : > { %v11801_v31 = vpop.eup %11800 }
0x1012   : > { %v11803_v0 = vpop.eup %11802  ;;  %v3735_v6 = vmul.f32 %v11801_v31, %v11799_v3  ;;  %v3812_v3 = vld [vmem:[%s16351_s2] sm:$0xf]  ;;  %s16322_s2 = smov 64  }
0x1013   : > { %v3734_v28 = vmul.f32 %v11803_v0, %v3732_v37  ;;  %v11805_v23 = vpop.eup %11804  ;;  %v3817_v31 = vrot.slane %v3812_v3, %v12698_v5  ;;  %v3821_v37 = vrot.slane %v3812_v3, %v12704_v7 }
0x1015   : > { %v3736_v16 = vadd.f32 %v3735_v6, %v3734_v28 }
0x1017   : > { %11806 = vtanh.f32 %v3736_v16 }
0x1024   : > { %v11807_v19 = vpop.eup %11806 }
0x1025   : > { %v3738_v24 = vmul.f32 %v11807_v19, %v11805_v23 }
0x1027   : > { %v3739_v9 = vsel %vm2314_vm4, %v3738_v24, %v13814_v26  ;;  %v14088_v26 = vld [vmem:[%s16350_s0 + $0xa4] ss:$16 sps:$4 sm:$0xff]  }
0x1028   : > { %v3740_v1 = vsel %vm828_vm0, %v3739_v9, %v13762_v11  ;;  %v14046_v11 = vld [vmem:[%s16350_s0 + $0xe0] ss:$16 sps:$4 sm:$0xff]  }
0x1029   : > { %v3741_v8 = vsel %vm2317_vm5, %v3740_v1, %v13582_v27  ;;  %v14081_v27 = vld [vmem:[%s16350_s0 + $0xc8] ss:$16 sps:$4 sm:$0xff]  }
0x102a   : > { %v3742_v59 = vsel %vm2319_vm6, %v3741_v8, %v13536_v22  ;;  %v14051_v22 = vld [vmem:[%s16350_s0 + $0xe8] ss:$16 sps:$4 sm:$0xff]  }
0x102b   : > { %v3743_v18 = vsel %vm2321_vm7, %v3742_v59, %v13490_v42  ;;  %v14055_v42 = vpack.c.bf16 %v13386_v10, %v13386_v10  ;;  %v14076_v10 = vld [vmem:[%s16350_s0 + $0xc0] ss:$16 sps:$4 sm:$0xff]  }
0x102c   : > { %v3744_v20 = vsel %vm2323_vm8, %v3743_v18, %v13444_v40  ;;  %v14065_v40 = vld [vmem:[%s16350_s0 + $0xcc] ss:$16 sps:$4 sm:$0xff]   ;;  %v3829_v18 = vrot.slane %v3812_v3, %v12714_v15 }
0x102d   : > { %v3745_v14 = vsel %vm2325_vm9, %v3744_v20, %v13398_v21  ;;  %v14060_v21 = vld [vmem:[%s16350_s0 + $0xc4] ss:$16 sps:$4 sm:$0xff]  }
0x102e   : > { %v14041_v61 = vpack.c.bf16 %v3745_v14, %v3745_v14 }
0x1030   : > { %4186 = vmatprep.mubr.bf16.mxu1 %v14041_v61  ;;  %4227 = vmatprep.mubr.bf16.mxu0 %v14041_v61 }
0x1031   : > { %4187 = vmatmul.mubr.bf16.vlgmr.msra.gmra.mxu1 %v14055_v42  ;;  %4228 = vmatmul.mubr.bf16.vlgmr.msra.gmra.mxu0 %v14055_v42 }
0x1032   : > { %4429 = vmatpush1.bf16.msra.mxu1 %v14046_v11  ;;  %4470 = vmatpush1.bf16.msra.mxu0 %v14051_v22 }
0x1033   : > { %4430 = vmatprep.subr.bf16.mxu1 %v14060_v21  ;;  %4471 = vmatprep.subr.bf16.mxu0 %v14065_v40 }
0x1034   : > { %4460 = vmatprep.mubr.bf16.mxu1 %v16348_v39  ;;  %4501 = vmatprep.mubr.bf16.mxu0 %v16348_v39 }
0x1036   : > { %4431 = vmatpush1.bf16.msra.mxu1 %v14076_v10  ;;  %4472 = vmatpush1.bf16.msra.mxu0 %v14081_v27 }
0x1037   : > { %4432 = vmatprep.subr.bf16.mxu1 %v14088_v26  ;;  %4473 = vmatprep.subr.bf16.mxu0 %v14093_v2 }
0x103a   : > { %4433 = vmatpush1.bf16.msra.mxu1 %v14102_v38  ;;  %4474 = vmatpush1.bf16.msra.mxu0 %v14107_v30 }
0x103b   : > { %4434 = vmatprep.subr.bf16.mxu1 %v14114_v32  ;;  %4475 = vmatprep.subr.bf16.mxu0 %v14119_v41 }
0x103e   : > { %4435 = vmatpush1.bf16.msra.mxu1 %v14126_v17  ;;  %4476 = vmatpush1.bf16.msra.mxu0 %v14131_v35 }
0x103f   : > { %4436 = vmatprep.subr.bf16.mxu1 %v14138_v63  ;;  %4477 = vmatprep.subr.bf16.mxu0 %v14143_v4 }
0x1042   : > { %4437 = vmatpush1.bf16.msra.mxu1 %v14150_v12  ;;  %4478 = vmatpush1.bf16.msra.mxu0 %v14155_v60 }
0x1043   : > { %4438 = vmatprep.subr.bf16.mxu1 %v14162_v48  ;;  %4479 = vmatprep.subr.bf16.mxu0 %v14167_v49 }
0x1046   : > { %4439 = vmatpush1.bf16.msra.mxu1 %v14174_v50  ;;  %4480 = vmatpush1.bf16.msra.mxu0 %v14179_v51 }
0x1047   : > { %4440 = vmatprep.subr.bf16.mxu1 %v14186_v52  ;;  %4481 = vmatprep.subr.bf16.mxu0 %v14191_v29 }
0x104a   : > { %4441 = vmatpush1.bf16.msra.mxu1 %v14198_v53  ;;  %4482 = vmatpush1.bf16.msra.mxu0 %v14203_v54 }
0x104b   : > { %4442 = vmatprep.subr.bf16.mxu1 %v14210_v55  ;;  %4483 = vmatprep.subr.bf16.mxu0 %v14215_v56 }
0x104e   : > { %4443 = vmatpush1.bf16.msra.mxu1 %v14222_v57  ;;  %4484 = vmatpush1.bf16.msra.mxu0 %v14227_v58 }
0x104f   : > { %4539 = vmatprep.subr.bf16.mxu1 %v14013_v44  ;;  %4580 = vmatprep.subr.bf16.mxu0 %v14018_v47 }
0x1051   : > { %4461 = vmatmul.mubr.bf16.vlgmr.msra.gmra.mxu1 %v16348_v39  ;;  %4502 = vmatmul.mubr.bf16.vlgmr.msra.gmra.mxu0 %v16348_v39 }
0x1052   : > { %4540 = vmatpush1.bf16.msra.mxu1 %v14046_v11  ;;  %4581 = vmatpush1.bf16.msra.mxu0 %v14051_v22 }
0x1053   : > { %4541 = vmatprep.subr.bf16.mxu1 %v14060_v21  ;;  %4582 = vmatprep.subr.bf16.mxu0 %v14065_v40 }
0x1054   : > { %4571 = vmatprep.mubr.bf16.mxu1 %v16348_v39  ;;  %4612 = vmatprep.mubr.bf16.mxu0 %v16348_v39 }
0x1056   : > { %4542 = vmatpush1.bf16.msra.mxu1 %v14076_v10  ;;  %4583 = vmatpush1.bf16.msra.mxu0 %v14081_v27 }
0x1057   : > { %4543 = vmatprep.subr.bf16.mxu1 %v14088_v26  ;;  %4584 = vmatprep.subr.bf16.mxu0 %v14093_v2 }
0x105a   : > { %4544 = vmatpush1.bf16.msra.mxu1 %v14102_v38  ;;  %4585 = vmatpush1.bf16.msra.mxu0 %v14107_v30 }
0x105b   : > { %4545 = vmatprep.subr.bf16.mxu1 %v14114_v32  ;;  %4586 = vmatprep.subr.bf16.mxu0 %v14119_v41 }
0x105e   : > { %4546 = vmatpush1.bf16.msra.mxu1 %v14126_v17  ;;  %4587 = vmatpush1.bf16.msra.mxu0 %v14131_v35 }
0x105f   : > { %4547 = vmatprep.subr.bf16.mxu1 %v14138_v63  ;;  %4588 = vmatprep.subr.bf16.mxu0 %v14143_v4 }
0x1062   : > { %4548 = vmatpush1.bf16.msra.mxu1 %v14150_v12  ;;  %4589 = vmatpush1.bf16.msra.mxu0 %v14155_v60 }
0x1063   : > { %4549 = vmatprep.subr.bf16.mxu1 %v14162_v48  ;;  %4590 = vmatprep.subr.bf16.mxu0 %v14167_v49 }
0x1066   : > { %4550 = vmatpush1.bf16.msra.mxu1 %v14174_v50  ;;  %4591 = vmatpush1.bf16.msra.mxu0 %v14179_v51 }
0x1067   : > { %4551 = vmatprep.subr.bf16.mxu1 %v14186_v52  ;;  %4592 = vmatprep.subr.bf16.mxu0 %v14191_v29 }
0x106a   : > { %4552 = vmatpush1.bf16.msra.mxu1 %v14198_v53  ;;  %4593 = vmatpush1.bf16.msra.mxu0 %v14203_v54 }
0x106b   : > { %4553 = vmatprep.subr.bf16.mxu1 %v14210_v55  ;;  %4594 = vmatprep.subr.bf16.mxu0 %v14215_v56 }
0x106e   : > { %4554 = vmatpush1.bf16.msra.mxu1 %v14222_v57  ;;  %4595 = vmatpush1.bf16.msra.mxu0 %v14227_v58 }
0x106f   : > { %4669 = vmatprep.subr.bf16.mxu1 %v14013_v44  ;;  %4710 = vmatprep.subr.bf16.mxu0 %v14018_v47 }
0x10f1   : > { %v4188_v62 = vpop.f32.mrf.mxu1  ;;  %v4229_v45 = vpop.f32.mrf.mxu0 }
0x10f2   : > { %v14276_v0 = vadd.f32 %v4188_v62, %v3817_v31 }
0x10f3   : > { %v4190_v46 = vpop.f32.mrf.mxu1  ;;  %v4231_v25 = vpop.f32.mrf.mxu0 }
0x10f4   : > { %v14278_v28 = vadd.f32 %v4190_v46, %v3821_v37  ;;  %v14283_v62 = vadd.f32 %v4231_v25, %v3829_v18  ;;  %v16352_v46 = vld [vmem:[#allocation5_spill] sm:$0xff] }
0x10f5   : > { %v4192_v13 = vpop.f32.mrf.mxu1  ;;  %v4233_v33 = vpop.f32.mrf.mxu0 }
0x10f6   : > { %v3825_v13 = vrot.slane %v3812_v3, %v16352_v46 }
0x10f7   : > { %v4193_v43 = vpop.f32.mrf.mxu1  ;;  %v4234_v34 = vpop.f32.mrf.mxu0 }
0x10f8   : > { %v14287_v43 = vadd.f32 %v4229_v45, %v3825_v13 }
0x1111   : > { %v4462_v36 = vpop.f32.mrf.mxu1  ;;  %v4503_v6 = vpop.f32.mrf.mxu0 }
0x1112   : > { %v4510_v16 = vadd.f32 %v4462_v36, %v14276_v0  ;;  %v4512_v37 = vadd.f32 %v4503_v6, %v14287_v43 }
0x1113   : > { %v4464_v23 = vpop.f32.mrf.mxu1  ;;  %v4505_v19 = vpop.f32.mrf.mxu0 }
0x1114   : > { %v10426_v24 = vmul.f32 -1.442695, %v4510_v16  ;;  %v4511_v9 = vadd.f32 %v4464_v23, %v14278_v28  ;;  %v4513_v33 = vadd.f32 %v4505_v19, %v14283_v62 }
0x1115   : > { %v4466_v1 = vpop.f32.mrf.mxu1  ;;  %v4507_v8 = vpop.f32.mrf.mxu0 }
0x1116   : > { %11808 = vpow2.f32 %v10426_v24  ;;  %v10427_v59 = vmul.f32 -1.442695, %v4511_v9  ;;  %v10428_v34 = vmul.f32 -1.442695, %v4513_v33 }
0x1117   : > { %v4467_v20 = vpop.f32.mrf.mxu1  ;;  %v4508_v14 = vpop.f32.mrf.mxu0 }
0x1118   : > { %11810 = vpow2.f32 %v10427_v59 }
0x1119   : > { %11812 = vpow2.f32 %v10428_v34 }
0x1123   : > { %v11809_v31 = vpop.eup %11808 }
0x1124   : > { %v4517_v36 = vadd.f32 1.0, %v11809_v31 }
0x1125   : > { %v11811_v16 = vpop.eup %11810 }
0x1126   : > { %11814 = vrcp.f32 %v4517_v36  ;;  %v4523_v23 = vadd.f32 1.0, %v11811_v16  ;;  %v11813_v24 = vpop.eup %11812 }
0x1127   : > { %11816 = vtanh.f32 %v4512_v37  ;;  %v4530_v3 = vadd.f32 1.0, %v11813_v24 }
0x1128   : > { %11818 = vrcp.f32 %v4523_v23 }
0x1129   : > { %11820 = vrcp.f32 %v4530_v3 }
0x1133   : > { %v11815_v25 = vpop.eup %11814 }
0x1134   : > { %v11817_v9 = vpop.eup %11816 }
0x1135   : > { %v11819_v1 = vpop.eup %11818  ;;  %v4534_v19 = vmul.f32 %v11817_v9, %v11815_v25 }
0x1136   : > { %v4533_v8 = vmul.f32 0.0, %v11819_v1  ;;  %v11821_v6 = vpop.eup %11820 }
0x1138   : > { %v14290_v45 = vadd.f32 %v4534_v19, %v4533_v8 }
0x113a   : > { %11822 = vtanh.f32 %v14290_v45 }
0x1147   : > { %v11823_v59 = vpop.eup %11822 }
0x1148   : > { %v14293_v18 = vmul.f32 %v11823_v59, %v11821_v6 }
0x114a   : > { %v4538_v20 = vpack.c.bf16 %v14293_v18, %v14293_v18 }
0x114c   : > { %4572 = vmatmul.mubr.bf16.vlgmr.msra.gmra.mxu1 %v4538_v20  ;;  %4613 = vmatmul.mubr.bf16.vlgmr.msra.gmra.mxu0 %v4538_v20 }
0x114d   : > { %4670 = vmatpush1.bf16.msra.mxu1 %v14046_v11  ;;  %4711 = vmatpush1.bf16.msra.mxu0 %v14051_v22 }
0x114e   : > { %4671 = vmatprep.subr.bf16.mxu1 %v14060_v21  ;;  %4712 = vmatprep.subr.bf16.mxu0 %v14065_v40 }
0x114f   : > { %4701 = vmatprep.mubr.bf16.mxu1 %v16348_v39  ;;  %4742 = vmatprep.mubr.bf16.mxu0 %v16348_v39 }
0x1151   : > { %4672 = vmatpush1.bf16.msra.mxu1 %v14076_v10  ;;  %4713 = vmatpush1.bf16.msra.mxu0 %v14081_v27 }
0x1152   : > { %4673 = vmatprep.subr.bf16.mxu1 %v14088_v26  ;;  %4714 = vmatprep.subr.bf16.mxu0 %v14093_v2 }
0x1155   : > { %4674 = vmatpush1.bf16.msra.mxu1 %v14102_v38  ;;  %4715 = vmatpush1.bf16.msra.mxu0 %v14107_v30 }
0x1156   : > { %4675 = vmatprep.subr.bf16.mxu1 %v14114_v32  ;;  %4716 = vmatprep.subr.bf16.mxu0 %v14119_v41 }
0x1159   : > { %4676 = vmatpush1.bf16.msra.mxu1 %v14126_v17  ;;  %4717 = vmatpush1.bf16.msra.mxu0 %v14131_v35 }
0x115a   : > { %4677 = vmatprep.subr.bf16.mxu1 %v14138_v63  ;;  %4718 = vmatprep.subr.bf16.mxu0 %v14143_v4 }
0x115d   : > { %4678 = vmatpush1.bf16.msra.mxu1 %v14150_v12  ;;  %4719 = vmatpush1.bf16.msra.mxu0 %v14155_v60 }
0x115e   : > { %4679 = vmatprep.subr.bf16.mxu1 %v14162_v48  ;;  %4720 = vmatprep.subr.bf16.mxu0 %v14167_v49 }
0x1161   : > { %4680 = vmatpush1.bf16.msra.mxu1 %v14174_v50  ;;  %4721 = vmatpush1.bf16.msra.mxu0 %v14179_v51 }
0x1162   : > { %4681 = vmatprep.subr.bf16.mxu1 %v14186_v52  ;;  %4722 = vmatprep.subr.bf16.mxu0 %v14191_v29 }
0x1165   : > { %4682 = vmatpush1.bf16.msra.mxu1 %v14198_v53  ;;  %4723 = vmatpush1.bf16.msra.mxu0 %v14203_v54 }
0x1166   : > { %4683 = vmatprep.subr.bf16.mxu1 %v14210_v55  ;;  %4724 = vmatprep.subr.bf16.mxu0 %v14215_v56 }
0x1169   : > { %4684 = vmatpush1.bf16.msra.mxu1 %v14222_v57  ;;  %4725 = vmatpush1.bf16.msra.mxu0 %v14227_v58 }
0x116a   : > { %4798 = vmatprep.subr.bf16.mxu1 %v14013_v44  ;;  %4839 = vmatprep.subr.bf16.mxu0 %v14018_v47 }
0x120c   : > { %v4573_v14 = vpop.f32.mrf.mxu1  ;;  %v4614_v13 = vpop.f32.mrf.mxu0 }
0x120d   : > { %v4625_v33 = vrot.slane %v4573_v14, 7  ;;  %v4627_v6 = vrot.slane %v4614_v13, 7 }
0x120e   : > { %v4575_v34 = vpop.f32.mrf.mxu1  ;;  %v4616_v31 = vpop.f32.mrf.mxu0 }
0x120f   : > { %v4633_v37 = vadd.f32 %v4625_v33, %v14276_v0  ;;  %v4626_v36 = vrot.slane %v4575_v34, 7  ;;  %v4628_v8 = vrot.slane %v4616_v31, 7  ;;  %v4635_v14 = vadd.f32 %v4627_v6, %v14287_v43 }
0x1210   : > { %v4577_v16 = vpop.f32.mrf.mxu1  ;;  %v4618_v23 = vpop.f32.mrf.mxu0 }
0x1211   : > { %v10429_v24 = vmul.f32 -1.442695, %v4633_v37  ;;  %v4634_v25 = vadd.f32 %v4626_v36, %v14278_v28  ;;  %v4636_v19 = vadd.f32 %v4628_v8, %v14283_v62 }
0x1212   : > { %v4578_v9 = vpop.f32.mrf.mxu1  ;;  %v4619_v1 = vpop.f32.mrf.mxu0 }
0x1213   : > { %11824 = vpow2.f32 %v10429_v24  ;;  %v10430_v3 = vmul.f32 -1.442695, %v4634_v25  ;;  %v10431_v59 = vmul.f32 -1.442695, %v4636_v19  ;;  %v4657_v24 = vrot.slane %v14290_v45, 7 }
0x1215   : > { %11826 = vpow2.f32 %v10430_v3 }
0x1216   : > { %11828 = vpow2.f32 %v10431_v59 }
0x1220   : > { %v11825_v20 = vpop.eup %11824 }
0x1221   : > { %v4640_v33 = vadd.f32 1.0, %v11825_v20 }
0x1222   : > { %v11827_v34 = vpop.eup %11826 }
0x1223   : > { %11830 = vrcp.f32 %v4640_v33  ;;  %v4646_v37 = vadd.f32 1.0, %v11827_v34  ;;  %v11829_v36 = vpop.eup %11828 }
0x1224   : > { %11832 = vtanh.f32 %v4635_v14  ;;  %v4653_v25 = vadd.f32 1.0, %v11829_v36 }
0x1225   : > { %11834 = vrcp.f32 %v4646_v37 }
0x1226   : > { %11836 = vrcp.f32 %v4653_v25 }
0x1230   : > { %v11831_v16 = vpop.eup %11830 }
0x1231   : > { %v11833_v23 = vpop.eup %11832 }
0x1232   : > { %v11835_v31 = vpop.eup %11834  ;;  %v4660_v9 = vmul.f32 %v11833_v23, %v11831_v16 }
0x1233   : > { %v4659_v13 = vmul.f32 %v11835_v31, %v4657_v24  ;;  %v11837_v3 = vpop.eup %11836 }
0x1235   : > { %v14336_v1 = vadd.f32 %v4660_v9, %v4659_v13 }
0x1237   : > { %11838 = vtanh.f32 %v14336_v1 }
0x1244   : > { %v11839_v8 = vpop.eup %11838 }
0x1245   : > { %v14339_v19 = vmul.f32 %v11839_v8, %v11837_v3 }
0x1247   : > { %v4664_v6 = vpack.c.bf16 %v14339_v19, %v14339_v19 }
0x1249   : > { %v4666_v59 = vshrl.u32 %v4664_v6, 16 }
0x124b   : > { %4702 = vmatmul.mubr.bf16.vlgmr.msra.gmra.mxu1 %v4666_v59  ;;  %4743 = vmatmul.mubr.bf16.vlgmr.msra.gmra.mxu0 %v4666_v59 }
0x124c   : > { %4799 = vmatpush1.bf16.msra.mxu1 %v14046_v11  ;;  %4840 = vmatpush1.bf16.msra.mxu0 %v14051_v22 }
0x124d   : > { %4800 = vmatprep.subr.bf16.mxu1 %v14060_v21  ;;  %4841 = vmatprep.subr.bf16.mxu0 %v14065_v40 }
0x124e   : > { %4830 = vmatprep.mubr.bf16.mxu1 %v16348_v39  ;;  %4871 = vmatprep.mubr.bf16.mxu0 %v16348_v39 }
0x1250   : > { %4801 = vmatpush1.bf16.msra.mxu1 %v14076_v10  ;;  %4842 = vmatpush1.bf16.msra.mxu0 %v14081_v27 }
0x1251   : > { %4802 = vmatprep.subr.bf16.mxu1 %v14088_v26  ;;  %4843 = vmatprep.subr.bf16.mxu0 %v14093_v2 }
0x1254   : > { %4803 = vmatpush1.bf16.msra.mxu1 %v14102_v38  ;;  %4844 = vmatpush1.bf16.msra.mxu0 %v14107_v30 }
0x1255   : > { %4804 = vmatprep.subr.bf16.mxu1 %v14114_v32  ;;  %4845 = vmatprep.subr.bf16.mxu0 %v14119_v41 }
0x1258   : > { %4805 = vmatpush1.bf16.msra.mxu1 %v14126_v17  ;;  %4846 = vmatpush1.bf16.msra.mxu0 %v14131_v35 }
0x1259   : > { %4806 = vmatprep.subr.bf16.mxu1 %v14138_v63  ;;  %4847 = vmatprep.subr.bf16.mxu0 %v14143_v4 }
0x125c   : > { %4807 = vmatpush1.bf16.msra.mxu1 %v14150_v12  ;;  %4848 = vmatpush1.bf16.msra.mxu0 %v14155_v60 }
0x125d   : > { %4808 = vmatprep.subr.bf16.mxu1 %v14162_v48  ;;  %4849 = vmatprep.subr.bf16.mxu0 %v14167_v49 }
0x1260   : > { %4809 = vmatpush1.bf16.msra.mxu1 %v14174_v50  ;;  %4850 = vmatpush1.bf16.msra.mxu0 %v14179_v51 }
0x1261   : > { %4810 = vmatprep.subr.bf16.mxu1 %v14186_v52  ;;  %4851 = vmatprep.subr.bf16.mxu0 %v14191_v29 }
0x1264   : > { %4811 = vmatpush1.bf16.msra.mxu1 %v14198_v53  ;;  %4852 = vmatpush1.bf16.msra.mxu0 %v14203_v54 }
0x1265   : > { %4812 = vmatprep.subr.bf16.mxu1 %v14210_v55  ;;  %4853 = vmatprep.subr.bf16.mxu0 %v14215_v56 }
0x1268   : > { %4813 = vmatpush1.bf16.msra.mxu1 %v14222_v57  ;;  %4854 = vmatpush1.bf16.msra.mxu0 %v14227_v58 }
0x1269   : > { %4929 = vmatprep.subr.bf16.mxu1 %v14013_v44  ;;  %4970 = vmatprep.subr.bf16.mxu0 %v14018_v47 }
0x130b   : > { %v4703_v45 = vpop.f32.mrf.mxu1  ;;  %v4744_v20 = vpop.f32.mrf.mxu0 }
0x130c   : > { %v4755_v14 = vrot.slane %v4703_v45, 6  ;;  %v4757_v6 = vrot.slane %v4744_v20, 6 }
0x130d   : > { %v4705_v33 = vpop.f32.mrf.mxu1  ;;  %v4746_v34 = vpop.f32.mrf.mxu0 }
0x130e   : > { %v4763_v37 = vadd.f32 %v4755_v14, %v14276_v0  ;;  %v4756_v36 = vrot.slane %v4705_v33, 6  ;;  %v4758_v3 = vrot.slane %v4746_v34, 6  ;;  %v4765_v46 = vadd.f32 %v4757_v6, %v14287_v43 }
0x130f   : > { %v4707_v16 = vpop.f32.mrf.mxu1  ;;  %v4748_v23 = vpop.f32.mrf.mxu0 }
0x1310   : > { %v10432_v24 = vmul.f32 -1.442695, %v4763_v37  ;;  %v4764_v31 = vadd.f32 %v4756_v36, %v14278_v28  ;;  %v4766_v8 = vadd.f32 %v4758_v3, %v14283_v62 }
0x1311   : > { %v4708_v25 = vpop.f32.mrf.mxu1  ;;  %v4749_v9 = vpop.f32.mrf.mxu0 }
0x1312   : > { %11840 = vpow2.f32 %v10432_v24  ;;  %v10433_v13 = vmul.f32 -1.442695, %v4764_v31  ;;  %v10434_v59 = vmul.f32 -1.442695, %v4766_v8  ;;  %v4787_v24 = vrot.slane %v14336_v1, 7 }
0x1314   : > { %11842 = vpow2.f32 %v10433_v13 }
0x1315   : > { %11844 = vpow2.f32 %v10434_v59 }
0x131f   : > { %v11841_v45 = vpop.eup %11840 }
0x1320   : > { %v4770_v14 = vadd.f32 1.0, %v11841_v45 }
0x1321   : > { %v11843_v33 = vpop.eup %11842 }
0x1322   : > { %11846 = vrcp.f32 %v4770_v14  ;;  %v4776_v37 = vadd.f32 1.0, %v11843_v33  ;;  %v11845_v36 = vpop.eup %11844 }
0x1323   : > { %11848 = vtanh.f32 %v4765_v46  ;;  %v4783_v31 = vadd.f32 1.0, %v11845_v36  ;;  %v5443_v46 = vsel %vm2314_vm4, %v14293_v18, %v14339_v19 }
0x1324   : > { %11850 = vrcp.f32 %v4776_v37 }
0x1325   : > { %11852 = vrcp.f32 %v4783_v31 }
0x132f   : > { %v11847_v16 = vpop.eup %11846 }
0x1330   : > { %v11849_v23 = vpop.eup %11848 }
0x1331   : > { %v11851_v34 = vpop.eup %11850  ;;  %v4790_v25 = vmul.f32 %v11849_v23, %v11847_v16 }
0x1332   : > { %v4789_v20 = vmul.f32 %v11851_v34, %v4787_v24  ;;  %v11853_v13 = vpop.eup %11852 }
0x1334   : > { %v14382_v9 = vadd.f32 %v4790_v25, %v4789_v20 }
0x1336   : > { %11854 = vtanh.f32 %v14382_v9 }
0x1343   : > { %v11855_v3 = vpop.eup %11854 }
0x1344   : > { %v4793_v8 = vmul.f32 %v11855_v3, %v11853_v13 }
0x1346   : > { %v4794_v6 = vpack.c.bf16 %v4793_v8, %v4793_v8  ;;  %v14389_v59 = vsel %vm828_vm0, %v5443_v46, %v4793_v8 }
0x1348   : > { %v4796_v1 = vrot.slane %v4794_v6, 1 }
0x134a   : > { %4831 = vmatmul.mubr.bf16.vlgmr.msra.gmra.mxu1 %v4796_v1  ;;  %4872 = vmatmul.mubr.bf16.vlgmr.msra.gmra.mxu0 %v4796_v1 }
0x134b   : > { %4930 = vmatpush1.bf16.msra.mxu1 %v14046_v11  ;;  %4971 = vmatpush1.bf16.msra.mxu0 %v14051_v22 }
0x134c   : > { %4931 = vmatprep.subr.bf16.mxu1 %v14060_v21  ;;  %4972 = vmatprep.subr.bf16.mxu0 %v14065_v40 }
0x134d   : > { %4961 = vmatprep.mubr.bf16.mxu1 %v16348_v39  ;;  %5002 = vmatprep.mubr.bf16.mxu0 %v16348_v39 }
0x134f   : > { %4932 = vmatpush1.bf16.msra.mxu1 %v14076_v10  ;;  %4973 = vmatpush1.bf16.msra.mxu0 %v14081_v27 }
0x1350   : > { %4933 = vmatprep.subr.bf16.mxu1 %v14088_v26  ;;  %4974 = vmatprep.subr.bf16.mxu0 %v14093_v2 }
0x1353   : > { %4934 = vmatpush1.bf16.msra.mxu1 %v14102_v38  ;;  %4975 = vmatpush1.bf16.msra.mxu0 %v14107_v30 }
0x1354   : > { %4935 = vmatprep.subr.bf16.mxu1 %v14114_v32  ;;  %4976 = vmatprep.subr.bf16.mxu0 %v14119_v41 }
0x1357   : > { %4936 = vmatpush1.bf16.msra.mxu1 %v14126_v17  ;;  %4977 = vmatpush1.bf16.msra.mxu0 %v14131_v35 }
0x1358   : > { %4937 = vmatprep.subr.bf16.mxu1 %v14138_v63  ;;  %4978 = vmatprep.subr.bf16.mxu0 %v14143_v4 }
0x135b   : > { %4938 = vmatpush1.bf16.msra.mxu1 %v14150_v12  ;;  %4979 = vmatpush1.bf16.msra.mxu0 %v14155_v60 }
0x135c   : > { %4939 = vmatprep.subr.bf16.mxu1 %v14162_v48  ;;  %4980 = vmatprep.subr.bf16.mxu0 %v14167_v49 }
0x135f   : > { %4940 = vmatpush1.bf16.msra.mxu1 %v14174_v50  ;;  %4981 = vmatpush1.bf16.msra.mxu0 %v14179_v51 }
0x1360   : > { %4941 = vmatprep.subr.bf16.mxu1 %v14186_v52  ;;  %4982 = vmatprep.subr.bf16.mxu0 %v14191_v29 }
0x1363   : > { %4942 = vmatpush1.bf16.msra.mxu1 %v14198_v53  ;;  %4983 = vmatpush1.bf16.msra.mxu0 %v14203_v54 }
0x1364   : > { %4943 = vmatprep.subr.bf16.mxu1 %v14210_v55  ;;  %4984 = vmatprep.subr.bf16.mxu0 %v14215_v56 }
0x1367   : > { %4944 = vmatpush1.bf16.msra.mxu1 %v14222_v57  ;;  %4985 = vmatpush1.bf16.msra.mxu0 %v14227_v58 }
0x1368   : > { %5058 = vmatprep.subr.bf16.mxu1 %v14013_v44  ;;  %5099 = vmatprep.subr.bf16.mxu0 %v14018_v47 }
0x140a   : > { %v4832_v18 = vpop.f32.mrf.mxu1  ;;  %v4873_v19 = vpop.f32.mrf.mxu0 }
0x140b   : > { %v4884_v45 = vrot.slane %v4832_v18, 5  ;;  %v4886_v8 = vrot.slane %v4873_v19, 5 }
0x140c   : > { %v4834_v14 = vpop.f32.mrf.mxu1  ;;  %v4875_v33 = vpop.f32.mrf.mxu0 }
0x140d   : > { %v4892_v37 = vadd.f32 %v4884_v45, %v14276_v0  ;;  %v4885_v36 = vrot.slane %v4834_v14, 5  ;;  %v4887_v13 = vrot.slane %v4875_v33, 5  ;;  %v4894_v1 = vadd.f32 %v4886_v8, %v14287_v43 }
0x140e   : > { %v4836_v16 = vpop.f32.mrf.mxu1  ;;  %v4877_v23 = vpop.f32.mrf.mxu0 }
0x140f   : > { %v10435_v24 = vmul.f32 -1.442695, %v4892_v37  ;;  %v4893_v34 = vadd.f32 %v4885_v36, %v14278_v28  ;;  %v4895_v3 = vadd.f32 %v4887_v13, %v14283_v62  ;;  %v4916_v23 = vrot.slane %v14382_v9, 7 }
0x1410   : > { %v4837_v31 = vpop.f32.mrf.mxu1  ;;  %v4878_v25 = vpop.f32.mrf.mxu0 }
0x1411   : > { %11856 = vpow2.f32 %v10435_v24  ;;  %v10436_v20 = vmul.f32 -1.442695, %v4893_v34  ;;  %v10437_v46 = vmul.f32 -1.442695, %v4895_v3 }
0x1413   : > { %11858 = vpow2.f32 %v10436_v20 }
0x1414   : > { %11860 = vpow2.f32 %v10437_v46 }
0x141e   : > { %v11857_v6 = vpop.eup %11856 }
0x141f   : > { %v4899_v18 = vadd.f32 1.0, %v11857_v6 }
0x1420   : > { %v11859_v45 = vpop.eup %11858 }
0x1421   : > { %11862 = vrcp.f32 %v4899_v18  ;;  %v4905_v14 = vadd.f32 1.0, %v11859_v45  ;;  %v11861_v37 = vpop.eup %11860 }
0x1422   : > { %11864 = vtanh.f32 %v4894_v1  ;;  %v4912_v24 = vadd.f32 1.0, %v11861_v37 }
0x1423   : > { %11866 = vrcp.f32 %v4905_v14 }
0x1424   : > { %11868 = vrcp.f32 %v4912_v24 }
0x142e   : > { %v11863_v36 = vpop.eup %11862 }
0x142f   : > { %v11865_v16 = vpop.eup %11864 }
0x1430   : > { %v11867_v33 = vpop.eup %11866  ;;  %v4919_v34 = vmul.f32 %v11865_v16, %v11863_v36 }
0x1431   : > { %v4918_v19 = vmul.f32 %v11867_v33, %v4916_v23  ;;  %v11869_v25 = vpop.eup %11868 }
0x1433   : > { %v14430_v31 = vadd.f32 %v4919_v34, %v4918_v19 }
0x1435   : > { %11870 = vtanh.f32 %v14430_v31 }
0x1442   : > { %v11871_v20 = vpop.eup %11870 }
0x1443   : > { %v4922_v13 = vmul.f32 %v11871_v20, %v11869_v25 }
0x1445   : > { %v4923_v3 = vpack.c.bf16 %v4922_v13, %v4922_v13  ;;  %v14435_v8 = vsel %vm2317_vm5, %v14389_v59, %v4922_v13 }
0x1447   : > { %v4925_v46 = vshrl.u32 %v4923_v3, 16 }
0x1449   : > { %v4927_v6 = vrot.slane %v4925_v46, 1 }
0x144b   : > { %4962 = vmatmul.mubr.bf16.vlgmr.msra.gmra.mxu1 %v4927_v6  ;;  %5003 = vmatmul.mubr.bf16.vlgmr.msra.gmra.mxu0 %v4927_v6 }
0x144c   : > { %5059 = vmatpush1.bf16.msra.mxu1 %v14046_v11  ;;  %5100 = vmatpush1.bf16.msra.mxu0 %v14051_v22 }
0x144d   : > { %5060 = vmatprep.subr.bf16.mxu1 %v14060_v21  ;;  %5101 = vmatprep.subr.bf16.mxu0 %v14065_v40 }
0x144e   : > { %5090 = vmatprep.mubr.bf16.mxu1 %v16348_v39  ;;  %5131 = vmatprep.mubr.bf16.mxu0 %v16348_v39 }
0x1450   : > { %5061 = vmatpush1.bf16.msra.mxu1 %v14076_v10  ;;  %5102 = vmatpush1.bf16.msra.mxu0 %v14081_v27 }
0x1451   : > { %5062 = vmatprep.subr.bf16.mxu1 %v14088_v26  ;;  %5103 = vmatprep.subr.bf16.mxu0 %v14093_v2 }
0x1454   : > { %5063 = vmatpush1.bf16.msra.mxu1 %v14102_v38  ;;  %5104 = vmatpush1.bf16.msra.mxu0 %v14107_v30 }
0x1455   : > { %5064 = vmatprep.subr.bf16.mxu1 %v14114_v32  ;;  %5105 = vmatprep.subr.bf16.mxu0 %v14119_v41 }
0x1458   : > { %5065 = vmatpush1.bf16.msra.mxu1 %v14126_v17  ;;  %5106 = vmatpush1.bf16.msra.mxu0 %v14131_v35 }
0x1459   : > { %5066 = vmatprep.subr.bf16.mxu1 %v14138_v63  ;;  %5107 = vmatprep.subr.bf16.mxu0 %v14143_v4 }
0x145c   : > { %5067 = vmatpush1.bf16.msra.mxu1 %v14150_v12  ;;  %5108 = vmatpush1.bf16.msra.mxu0 %v14155_v60 }
0x145d   : > { %5068 = vmatprep.subr.bf16.mxu1 %v14162_v48  ;;  %5109 = vmatprep.subr.bf16.mxu0 %v14167_v49 }
0x1460   : > { %5069 = vmatpush1.bf16.msra.mxu1 %v14174_v50  ;;  %5110 = vmatpush1.bf16.msra.mxu0 %v14179_v51 }
0x1461   : > { %5070 = vmatprep.subr.bf16.mxu1 %v14186_v52  ;;  %5111 = vmatprep.subr.bf16.mxu0 %v14191_v29 }
0x1464   : > { %5071 = vmatpush1.bf16.msra.mxu1 %v14198_v53  ;;  %5112 = vmatpush1.bf16.msra.mxu0 %v14203_v54 }
0x1465   : > { %5072 = vmatprep.subr.bf16.mxu1 %v14210_v55  ;;  %5113 = vmatprep.subr.bf16.mxu0 %v14215_v56 }
0x1468   : > { %5073 = vmatpush1.bf16.msra.mxu1 %v14222_v57  ;;  %5114 = vmatpush1.bf16.msra.mxu0 %v14227_v58 }
0x1469   : > { %5189 = vmatprep.subr.bf16.mxu1 %v14013_v44  ;;  %5230 = vmatprep.subr.bf16.mxu0 %v14018_v47 }
0x150b   : > { %v4963_v9 = vpop.f32.mrf.mxu1  ;;  %v5004_v59 = vpop.f32.mrf.mxu0 }
0x150c   : > { %v5015_v1 = vrot.slane %v4963_v9, 4  ;;  %v5017_v25 = vrot.slane %v5004_v59, 4 }
0x150d   : > { %v4965_v18 = vpop.f32.mrf.mxu1  ;;  %v5006_v45 = vpop.f32.mrf.mxu0 }
0x150e   : > { %v5023_v14 = vadd.f32 %v5015_v1, %v14276_v0  ;;  %v5016_v37 = vrot.slane %v4965_v18, 4  ;;  %v5018_v44 = vrot.slane %v5006_v45, 4  ;;  %v5025_v3 = vadd.f32 %v5017_v25, %v14287_v43 }
0x150f   : > { %v4967_v36 = vpop.f32.mrf.mxu1  ;;  %v5008_v16 = vpop.f32.mrf.mxu0 }
0x1510   : > { %v10438_v23 = vmul.f32 -1.442695, %v5023_v14  ;;  %v5024_v33 = vadd.f32 %v5016_v37, %v14278_v28  ;;  %v5026_v47 = vadd.f32 %v5018_v44, %v14283_v62  ;;  %v5047_v37 = vrot.slane %v14430_v31, 7 }
0x1511   : > { %v4968_v24 = vpop.f32.mrf.mxu1  ;;  %v5009_v34 = vpop.f32.mrf.mxu0 }
0x1512   : > { %11872 = vpow2.f32 %v10438_v23  ;;  %v10439_v19 = vmul.f32 -1.442695, %v5024_v33  ;;  %v10440_v20 = vmul.f32 -1.442695, %v5026_v47 }
0x1514   : > { %11874 = vpow2.f32 %v10439_v19 }
0x1515   : > { %11876 = vpow2.f32 %v10440_v20 }
0x151f   : > { %v11873_v13 = vpop.eup %11872 }
0x1520   : > { %v5030_v46 = vadd.f32 1.0, %v11873_v13 }
0x1521   : > { %v11875_v6 = vpop.eup %11874 }
0x1522   : > { %11878 = vrcp.f32 %v5030_v46  ;;  %v5036_v9 = vadd.f32 1.0, %v11875_v6  ;;  %v11877_v1 = vpop.eup %11876 }
0x1523   : > { %11880 = vtanh.f32 %v5025_v3  ;;  %v5043_v36 = vadd.f32 1.0, %v11877_v1 }
0x1524   : > { %11882 = vrcp.f32 %v5036_v9 }
0x1525   : > { %11884 = vrcp.f32 %v5043_v36  ;;  %v12167_v36 = vld [vmem:[%s16350_s0 + $0xcc] ss:$16 sps:$4 sm:$0xff]  }
0x152f   : > { %v11879_v18 = vpop.eup %11878 }
0x1530   : > { %v11881_v14 = vpop.eup %11880 }
0x1531   : > { %v11883_v45 = vpop.eup %11882  ;;  %v5050_v16 = vmul.f32 %v11881_v14, %v11879_v18  ;;  %v12164_v14 = vld [vmem:[%s16350_s0 + $0xe0] ss:$16 sps:$4 sm:$0xff]  }
0x1532   : > { %v5049_v59 = vmul.f32 %v11883_v45, %v5047_v37  ;;  %v11885_v33 = vpop.eup %11884  ;;  %v12165_v37 = vld [vmem:[%s16350_s0 + $0xe8] ss:$16 sps:$4 sm:$0xff]   ;;  %v12166_v45 = vld [vmem:[%s16350_s0 + $0xc4] ss:$16 sps:$4 sm:$0xff]  }
0x1534   : > { %v14476_v23 = vadd.f32 %v5050_v16, %v5049_v59  ;;  %v12168_v16 = vld [vmem:[%s16350_s0 + $0xc0] ss:$16 sps:$4 sm:$0xff]   ;;  %v12169_v59 = vld [vmem:[%s16350_s0 + $0xc8] ss:$16 sps:$4 sm:$0xff]  }
0x1536   : > { %11886 = vtanh.f32 %v14476_v23 }
0x1543   : > { %v11887_v24 = vpop.eup %11886 }
0x1544   : > { %v5053_v34 = vmul.f32 %v11887_v24, %v11885_v33  ;;  %v12171_v33 = vld [vmem:[%s16350_s0 + $0xac] ss:$16 sps:$4 sm:$0xff]   ;;  %v12172_v24 = vld [vmem:[%s16350_s0 + $0xa0] ss:$16 sps:$4 sm:$0xff]  }
0x1546   : > { %v5054_v19 = vpack.c.bf16 %v5053_v34, %v5053_v34  ;;  %v14481_v44 = vsel %vm2319_vm6, %v14435_v8, %v5053_v34  ;;  %v12173_v34 = vld [vmem:[%s16350_s0 + $0xa8] ss:$16 sps:$4 sm:$0xff]  }
0x1548   : > { %v5056_v47 = vrot.slane %v5054_v19, 2  ;;  %v12174_v19 = vld [vmem:[%s16350_s0 + $0x84] ss:$16 sps:$4 sm:$0xff]  }
0x154a   : > { %5091 = vmatmul.mubr.bf16.vlgmr.msra.gmra.mxu1 %v5056_v47  ;;  %5132 = vmatmul.mubr.bf16.vlgmr.msra.gmra.mxu0 %v5056_v47  ;;  %v12176_v47 = vld [vmem:[%s16350_s0 + $0x80] ss:$16 sps:$4 sm:$0xff]  }
0x154b   : > { %5190 = vmatpush1.bf16.msra.mxu1 %v14046_v11  ;;  %5231 = vmatpush1.bf16.msra.mxu0 %v14051_v22  ;;  %v12162_v11 = vld [vmem:[%s16350_s0 + $0xe4] ss:$16 sps:$4 sm:$0xff]   ;;  %v12163_v22 = vld [vmem:[%s16350_s0 + $0xec] ss:$16 sps:$4 sm:$0xff]  }
0x154c   : > { %5191 = vmatprep.subr.bf16.mxu1 %v14060_v21  ;;  %5232 = vmatprep.subr.bf16.mxu0 %v14065_v40 }
0x154d   : > { %5221 = vmatprep.mubr.bf16.mxu1 %v16348_v39  ;;  %5262 = vmatprep.mubr.bf16.mxu0 %v16348_v39 }
0x154f   : > { %5192 = vmatpush1.bf16.msra.mxu1 %v14076_v10  ;;  %5233 = vmatpush1.bf16.msra.mxu0 %v14081_v27 }
0x1550   : > { %5193 = vmatprep.subr.bf16.mxu1 %v14088_v26  ;;  %5234 = vmatprep.subr.bf16.mxu0 %v14093_v2 }
0x1553   : > { %5194 = vmatpush1.bf16.msra.mxu1 %v14102_v38  ;;  %5235 = vmatpush1.bf16.msra.mxu0 %v14107_v30 }
0x1554   : > { %5195 = vmatprep.subr.bf16.mxu1 %v14114_v32  ;;  %5236 = vmatprep.subr.bf16.mxu0 %v14119_v41 }
0x1557   : > { %5196 = vmatpush1.bf16.msra.mxu1 %v14126_v17  ;;  %5237 = vmatpush1.bf16.msra.mxu0 %v14131_v35 }
0x1558   : > { %5197 = vmatprep.subr.bf16.mxu1 %v14138_v63  ;;  %5238 = vmatprep.subr.bf16.mxu0 %v14143_v4 }
0x155b   : > { %5198 = vmatpush1.bf16.msra.mxu1 %v14150_v12  ;;  %5239 = vmatpush1.bf16.msra.mxu0 %v14155_v60 }
0x155c   : > { %5199 = vmatprep.subr.bf16.mxu1 %v14162_v48  ;;  %5240 = vmatprep.subr.bf16.mxu0 %v14167_v49 }
0x155f   : > { %5200 = vmatpush1.bf16.msra.mxu1 %v14174_v50  ;;  %5241 = vmatpush1.bf16.msra.mxu0 %v14179_v51 }
0x1560   : > { %5201 = vmatprep.subr.bf16.mxu1 %v14186_v52  ;;  %5242 = vmatprep.subr.bf16.mxu0 %v14191_v29 }
0x1563   : > { %5202 = vmatpush1.bf16.msra.mxu1 %v14198_v53  ;;  %5243 = vmatpush1.bf16.msra.mxu0 %v14203_v54 }
0x1564   : > { %5203 = vmatprep.subr.bf16.mxu1 %v14210_v55  ;;  %5244 = vmatprep.subr.bf16.mxu0 %v14215_v56 }
0x1567   : > { %5204 = vmatpush1.bf16.msra.mxu1 %v14222_v57  ;;  %5245 = vmatpush1.bf16.msra.mxu0 %v14227_v58  ;;  %v5176_v57 = vrot.slane %v14476_v23, 7  ;;  %v12170_v23 = vld [vmem:[%s16350_s0 + $0xa4] ss:$16 sps:$4 sm:$0xff]  }
0x1568   : > { %5318 = vmatprep.subr.bf16.mxu1 %v12162_v11  ;;  %5359 = vmatprep.subr.bf16.mxu0 %v12163_v22  ;;  %v12177_v11 = vld [vmem:[%s16350_s0 + $0x88] ss:$16 sps:$4 sm:$0xff]   ;;  %v12178_v22 = vld [vmem:[%s16350_s0 + $0x64] ss:$16 sps:$4 sm:$0xff]  }
0x160a   : > { %v5092_v21 = vpop.f32.mrf.mxu1  ;;  %v5133_v40 = vpop.f32.mrf.mxu0 }
0x160b   : > { %v5144_v10 = vrot.slane %v5092_v21, 3  ;;  %v5146_v48 = vrot.slane %v5133_v40, 3  ;;  %v12179_v21 = vld [vmem:[%s16350_s0 + $0x6c] ss:$16 sps:$4 sm:$0xff]   ;;  %v12180_v40 = vld [vmem:[%s16350_s0 + $0x60] ss:$16 sps:$4 sm:$0xff]  }
0x160c   : > { %v5094_v27 = vpop.f32.mrf.mxu1  ;;  %v5135_v26 = vpop.f32.mrf.mxu0 }
0x160d   : > { %v5152_v2 = vadd.f32 %v5144_v10, %v14276_v0  ;;  %v5145_v38 = vrot.slane %v5094_v27, 3  ;;  %v5147_v12 = vrot.slane %v5135_v26, 3  ;;  %v5154_v51 = vadd.f32 %v5146_v48, %v14287_v43  ;;  %v12181_v10 = vld [vmem:[%s16350_s0 + $0x68] ss:$16 sps:$4 sm:$0xff]   ;;  %v12182_v27 = vld [vmem:[%s16350_s0 + $0x44] ss:$16 sps:$4 sm:$0xff]  }
0x160e   : > { %v5096_v30 = vpop.f32.mrf.mxu1  ;;  %v5137_v32 = vpop.f32.mrf.mxu0  ;;  %v12183_v26 = vld [vmem:[%s16350_s0 + $0x4c] ss:$16 sps:$4 sm:$0xff]  }
0x160f   : > { %v10441_v41 = vmul.f32 -1.442695, %v5152_v2  ;;  %v5153_v17 = vadd.f32 %v5145_v38, %v14278_v28  ;;  %v5155_v60 = vadd.f32 %v5147_v12, %v14283_v62  ;;  %v12184_v2 = vld [vmem:[%s16350_s0 + $0x40] ss:$16 sps:$4 sm:$0xff]   ;;  %v12185_v38 = vld [vmem:[%s16350_s0 + $0x48] ss:$16 sps:$4 sm:$0xff]  }
0x1610   : > { %v5097_v35 = vpop.f32.mrf.mxu1  ;;  %v5138_v63 = vpop.f32.mrf.mxu0  ;;  %v12186_v30 = vld [vmem:[%s16350_s0 + $0x24] ss:$16 sps:$4 sm:$0xff]   ;;  %v12187_v32 = vld [vmem:[%s16350_s0 + $0x2c] ss:$16 sps:$4 sm:$0xff]   ;;  %v12193_v12 = vld [vmem:[%s16350_s0 + $0x8] ss:$16 sps:$4 sm:$0xff]  }
0x1611   : > { %11888 = vpow2.f32 %v10441_v41  ;;  %v10442_v4 = vmul.f32 -1.442695, %v5153_v17  ;;  %v10443_v49 = vmul.f32 -1.442695, %v5155_v60  ;;  %v12188_v41 = vld [vmem:[%s16350_s0 + $0x20] ss:$16 sps:$4 sm:$0xff]  }
0x1612   : > { %v12189_v17 = vld [vmem:[%s16350_s0 + $0x28] ss:$16 sps:$4 sm:$0xff]   ;;  %v12190_v35 = vld [vmem:[%s16350_s0 + $0x4] ss:$16 sps:$4 sm:$0xff]   ;;  %v12191_v63 = vld [vmem:[%s16350_s0 + $0xc] ss:$16 sps:$4 sm:$0xff]  }
0x1613   : > { %11890 = vpow2.f32 %v10442_v4  ;;  %v12192_v4 = vld [vmem:[%s16350_s0] ss:$16 sps:$4 sm:$0xff]   ;;  %v11218_v60 = vld [vmem:[%s16288_s12 + $0xe4] ss:$16 sps:$4 sm:$0xff]   ;;  %v11221_v48 = vld [vmem:[%s16288_s12 + $0xec] ss:$16 sps:$4 sm:$0xff]  }
0x1614   : > { %11892 = vpow2.f32 %v10443_v49 }
0x161e   : > { %v11889_v50 = vpop.eup %11888 }
0x161f   : > { %v5159_v52 = vadd.f32 1.0, %v11889_v50 }
0x1620   : > { %v11891_v29 = vpop.eup %11890 }
0x1621   : > { %11894 = vrcp.f32 %v5159_v52  ;;  %v5165_v53 = vadd.f32 1.0, %v11891_v29  ;;  %v11893_v54 = vpop.eup %11892 }
0x1622   : > { %11896 = vtanh.f32 %v5154_v51  ;;  %v5172_v31 = vadd.f32 1.0, %v11893_v54 }
0x1623   : > { %11898 = vrcp.f32 %v5165_v53 }
0x1624   : > { %11900 = vrcp.f32 %v5172_v31 }
0x162e   : > { %v11895_v55 = vpop.eup %11894 }
0x162f   : > { %v11897_v56 = vpop.eup %11896 }
0x1630   : > { %v11899_v58 = vpop.eup %11898  ;;  %v5179_v8 = vmul.f32 %v11897_v56, %v11895_v55 }
0x1631   : > { %v5178_v25 = vmul.f32 %v11899_v58, %v5176_v57  ;;  %v11901_v13 = vpop.eup %11900 }
0x1633   : > { %v14526_v20 = vadd.f32 %v5179_v8, %v5178_v25 }
0x1635   : > { %11902 = vtanh.f32 %v14526_v20 }
0x1642   : > { %v11903_v3 = vpop.eup %11902 }
0x1643   : > { %v5182_v46 = vmul.f32 %v11903_v3, %v11901_v13 }
0x1645   : > { %v5183_v6 = vpack.c.bf16 %v5182_v46, %v5182_v46  ;;  %v14531_v9 = vsel %vm2321_vm7, %v14481_v44, %v5182_v46  ;;  %v12175_v44 = vld [vmem:[%s16350_s0 + $0x8c] ss:$16 sps:$4 sm:$0xff]  }
0x1647   : > { %v5185_v1 = vshrl.u32 %v5183_v6, 16 }
0x1649   : > { %v5187_v18 = vrot.slane %v5185_v1, 2 }
0x164b   : > { %5222 = vmatmul.mubr.bf16.vlgmr.msra.gmra.mxu1 %v5187_v18  ;;  %5263 = vmatmul.mubr.bf16.vlgmr.msra.gmra.mxu0 %v5187_v18 }
0x164c   : > { %5319 = vmatpush1.bf16.msra.mxu1 %v12164_v14  ;;  %5360 = vmatpush1.bf16.msra.mxu0 %v12165_v37 }
0x164d   : > { %5320 = vmatprep.subr.bf16.mxu1 %v12166_v45  ;;  %5361 = vmatprep.subr.bf16.mxu0 %v12167_v36 }
0x164e   : > { %5350 = vmatprep.mubr.bf16.mxu1 %v16348_v39  ;;  %5391 = vmatprep.mubr.bf16.mxu0 %v16348_v39 }
0x1650   : > { %5321 = vmatpush1.bf16.msra.mxu1 %v12168_v16  ;;  %5362 = vmatpush1.bf16.msra.mxu0 %v12169_v59 }
0x1651   : > { %5322 = vmatprep.subr.bf16.mxu1 %v12170_v23  ;;  %5363 = vmatprep.subr.bf16.mxu0 %v12171_v33  ;;  %v5307_v23 = vrot.slane %v14526_v20, 7  ;;  %v11216_v20 = vld [vmem:[%s16288_s12 + $0xe0] ss:$16 sps:$4 sm:$0xff]  }
0x1654   : > { %5323 = vmatpush1.bf16.msra.mxu1 %v12172_v24  ;;  %5364 = vmatpush1.bf16.msra.mxu0 %v12173_v34 }
0x1655   : > { %5324 = vmatprep.subr.bf16.mxu1 %v12174_v19  ;;  %5365 = vmatprep.subr.bf16.mxu0 %v12175_v44 }
0x1658   : > { %5325 = vmatpush1.bf16.msra.mxu1 %v12176_v47  ;;  %5366 = vmatpush1.bf16.msra.mxu0 %v12177_v11 }
0x1659   : > { %5326 = vmatprep.subr.bf16.mxu1 %v12178_v22  ;;  %5367 = vmatprep.subr.bf16.mxu0 %v12179_v21 }
0x165c   : > { %5327 = vmatpush1.bf16.msra.mxu1 %v12180_v40  ;;  %5368 = vmatpush1.bf16.msra.mxu0 %v12181_v10  ;;  %v11219_v10 = vld [vmem:[%s16288_s12 + $0xe8] ss:$16 sps:$4 sm:$0xff]  }
0x165d   : > { %5328 = vmatprep.subr.bf16.mxu1 %v12182_v27  ;;  %5369 = vmatprep.subr.bf16.mxu0 %v12183_v26  ;;  %v11224_v26 = vld [vmem:[%s16288_s12 + $0xc4] ss:$16 sps:$4 sm:$0xff]  }
0x1660   : > { %5329 = vmatpush1.bf16.msra.mxu1 %v12184_v2  ;;  %5370 = vmatpush1.bf16.msra.mxu0 %v12185_v38  ;;  %v11227_v2 = vld [vmem:[%s16288_s12 + $0xcc] ss:$16 sps:$4 sm:$0xff]   ;;  %v11225_v38 = vld [vmem:[%s16288_s12 + $0xc8] ss:$16 sps:$4 sm:$0xff]  }
0x1661   : > { %5330 = vmatprep.subr.bf16.mxu1 %v12186_v30  ;;  %5371 = vmatprep.subr.bf16.mxu0 %v12187_v32  ;;  %v11230_v30 = vld [vmem:[%s16288_s12 + $0xa4] ss:$16 sps:$4 sm:$0xff]   ;;  %v11233_v32 = vld [vmem:[%s16288_s12 + $0xac] ss:$16 sps:$4 sm:$0xff]  }
0x1664   : > { %5331 = vmatpush1.bf16.msra.mxu1 %v12188_v41  ;;  %5372 = vmatpush1.bf16.msra.mxu0 %v12189_v17  ;;  %v11228_v41 = vld [vmem:[%s16288_s12 + $0xa0] ss:$16 sps:$4 sm:$0xff]   ;;  %v11236_v17 = vld [vmem:[%s16288_s12 + $0x84] ss:$16 sps:$4 sm:$0xff]  }
0x1665   : > { %5332 = vmatprep.subr.bf16.mxu1 %v12190_v35  ;;  %5373 = vmatprep.subr.bf16.mxu0 %v12191_v63  ;;  %v11239_v35 = vld [vmem:[%s16288_s12 + $0x8c] ss:$16 sps:$4 sm:$0xff]   ;;  %v11234_v63 = vld [vmem:[%s16288_s12 + $0x80] ss:$16 sps:$4 sm:$0xff]  }
0x1668   : > { %5333 = vmatpush1.bf16.msra.mxu1 %v12192_v4  ;;  %5374 = vmatpush1.bf16.msra.mxu0 %v12193_v12  ;;  %v11237_v4 = vld [vmem:[%s16288_s12 + $0x88] ss:$16 sps:$4 sm:$0xff]   ;;  %v11242_v12 = vld [vmem:[%s16288_s12 + $0x64] ss:$16 sps:$4 sm:$0xff]  }
0x1669   : > { %5856 = vmatprep.subr.bf16.mxu1 %v11218_v60  ;;  %5897 = vmatprep.subr.bf16.mxu0 %v11221_v48  ;;  %v11245_v60 = vld [vmem:[%s16288_s12 + $0x6c] ss:$16 sps:$4 sm:$0xff]   ;;  %v11240_v48 = vld [vmem:[%s16288_s12 + $0x60] ss:$16 sps:$4 sm:$0xff]  }
0x170b   : > { %v5223_v49 = vpop.f32.mrf.mxu1  ;;  %v5264_v50 = vpop.f32.mrf.mxu0 }
0x170c   : > { %v5275_v51 = vrot.slane %v5223_v49, 2  ;;  %v5277_v46 = vrot.slane %v5264_v50, 2  ;;  %v11243_v49 = vld [vmem:[%s16288_s12 + $0x68] ss:$16 sps:$4 sm:$0xff]   ;;  %v11248_v50 = vld [vmem:[%s16288_s12 + $0x44] ss:$16 sps:$4 sm:$0xff]  }
0x170d   : > { %v5225_v52 = vpop.f32.mrf.mxu1  ;;  %v5266_v29 = vpop.f32.mrf.mxu0 }
0x170e   : > { %v5283_v53 = vadd.f32 %v5275_v51, %v14276_v0  ;;  %v5276_v54 = vrot.slane %v5225_v52, 2  ;;  %v5278_v13 = vrot.slane %v5266_v29, 2  ;;  %v5285_v18 = vadd.f32 %v5277_v46, %v14287_v43  ;;  %v11251_v51 = vld [vmem:[%s16288_s12 + $0x4c] ss:$16 sps:$4 sm:$0xff]   ;;  %v11246_v52 = vld [vmem:[%s16288_s12 + $0x40] ss:$16 sps:$4 sm:$0xff]  }
0x170f   : > { %v5227_v55 = vpop.f32.mrf.mxu1  ;;  %v5268_v56 = vpop.f32.mrf.mxu0  ;;  %v11249_v29 = vld [vmem:[%s16288_s12 + $0x48] ss:$16 sps:$4 sm:$0xff]  }
0x1710   : > { %v10444_v57 = vmul.f32 -1.442695, %v5283_v53  ;;  %v5284_v58 = vadd.f32 %v5276_v54, %v14278_v28  ;;  %v5286_v3 = vadd.f32 %v5278_v13, %v14283_v62  ;;  %v11254_v53 = vld [vmem:[%s16288_s12 + $0x24] ss:$16 sps:$4 sm:$0xff]   ;;  %v11257_v54 = vld [vmem:[%s16288_s12 + $0x2c] ss:$16 sps:$4 sm:$0xff]  }
0x1711   : > { %v5228_v31 = vpop.f32.mrf.mxu1  ;;  %v5269_v8 = vpop.f32.mrf.mxu0  ;;  %v11252_v55 = vld [vmem:[%s16288_s12 + $0x20] ss:$16 sps:$4 sm:$0xff]   ;;  %v11255_v56 = vld [vmem:[%s16288_s12 + $0x28] ss:$16 sps:$4 sm:$0xff]   ;;  %v11269_v13 = vld [vmem:[%s16288_s12 + $0x1ec] ss:$16 sps:$4 sm:$0xff]  }
0x1712   : > { %11904 = vpow2.f32 %v10444_v57  ;;  %v10445_v25 = vmul.f32 -1.442695, %v5284_v58  ;;  %v10446_v6 = vmul.f32 -1.442695, %v5286_v3  ;;  %v11260_v57 = vld [vmem:[%s16288_s12 + $0x4] ss:$16 sps:$4 sm:$0xff]  }
0x1713   : > { %v11263_v58 = vld [vmem:[%s16288_s12 + $0xc] ss:$16 sps:$4 sm:$0xff]   ;;  %v11258_v31 = vld [vmem:[%s16288_s12] ss:$16 sps:$4 sm:$0xff]   ;;  %v11261_v8 = vld [vmem:[%s16288_s12 + $0x8] ss:$16 sps:$4 sm:$0xff]  }
0x1714   : > { %11906 = vpow2.f32 %v10445_v25  ;;  %v11266_v25 = vld [vmem:[%s16288_s12 + $0x1e4] ss:$16 sps:$4 sm:$0xff]   ;;  %v11264_v3 = vld [vmem:[%s16288_s12 + $0x1e0] ss:$16 sps:$4 sm:$0xff]   ;;  %v11267_v46 = vld [vmem:[%s16288_s12 + $0x1e8] ss:$16 sps:$4 sm:$0xff]  }
0x1715   : > { %11908 = vpow2.f32 %v10446_v6  ;;  %v11272_v6 = vld [vmem:[%s16288_s12 + $0x1c4] ss:$16 sps:$4 sm:$0xff]  }
0x171f   : > { %v11905_v1 = vpop.eup %11904 }
0x1720   : > { %v5290_v14 = vadd.f32 1.0, %v11905_v1  ;;  %v11275_v1 = vld [vmem:[%s16288_s12 + $0x1cc] ss:$16 sps:$4 sm:$0xff]  }
0x1721   : > { %v11907_v37 = vpop.eup %11906 }
0x1722   : > { %11910 = vrcp.f32 %v5290_v14  ;;  %v5296_v45 = vadd.f32 1.0, %v11907_v37  ;;  %v11909_v36 = vpop.eup %11908  ;;  %v11273_v14 = vld [vmem:[%s16288_s12 + $0x1c8] ss:$16 sps:$4 sm:$0xff]   ;;  %v11278_v37 = vld [vmem:[%s16288_s12 + $0x1a4] ss:$16 sps:$4 sm:$0xff]  }
0x1723   : > { %11912 = vtanh.f32 %v5285_v18  ;;  %v5303_v24 = vadd.f32 1.0, %v11909_v36  ;;  %v11270_v18 = vld [vmem:[%s16288_s12 + $0x1c0] ss:$16 sps:$4 sm:$0xff]  }
0x1724   : > { %11914 = vrcp.f32 %v5296_v45  ;;  %v11281_v45 = vld [vmem:[%s16288_s12 + $0x1ac] ss:$16 sps:$4 sm:$0xff]   ;;  %v11276_v36 = vld [vmem:[%s16288_s12 + $0x1a0] ss:$16 sps:$4 sm:$0xff]  }
0x1725   : > { %11916 = vrcp.f32 %v5303_v24  ;;  %v11285_v24 = vld [vmem:[%s16288_s12 + $0x188] ss:$16 sps:$4 sm:$0xff]  }
0x172f   : > { %v11911_v16 = vpop.eup %11910 }
0x1730   : > { %v11913_v59 = vpop.eup %11912 }
0x1731   : > { %v11915_v33 = vpop.eup %11914  ;;  %v5310_v34 = vmul.f32 %v11913_v59, %v11911_v16  ;;  %v11279_v16 = vld [vmem:[%s16288_s12 + $0x1a8] ss:$16 sps:$4 sm:$0xff]   ;;  %v11284_v59 = vld [vmem:[%s16288_s12 + $0x184] ss:$16 sps:$4 sm:$0xff]  }
0x1732   : > { %v5309_v19 = vmul.f32 %v11915_v33, %v5307_v23  ;;  %v11917_v47 = vpop.eup %11916  ;;  %v11287_v23 = vld [vmem:[%s16288_s12 + $0x18c] ss:$16 sps:$4 sm:$0xff]   ;;  %v11282_v33 = vld [vmem:[%s16288_s12 + $0x180] ss:$16 sps:$4 sm:$0xff]  }
0x1734   : > { %v14636_v44 = vadd.f32 %v5310_v34, %v5309_v19  ;;  %v11290_v34 = vld [vmem:[%s16288_s12 + $0x164] ss:$16 sps:$4 sm:$0xff]   ;;  %v11293_v19 = vld [vmem:[%s16288_s12 + $0x16c] ss:$16 sps:$4 sm:$0xff]  }
0x1736   : > { %11918 = vtanh.f32 %v14636_v44 }
0x1743   : > { %v11919_v11 = vpop.eup %11918 }
0x1744   : > { %v5313_v22 = vmul.f32 %v11919_v11, %v11917_v47  ;;  %v11288_v47 = vld [vmem:[%s16288_s12 + $0x160] ss:$16 sps:$4 sm:$0xff]   ;;  %v11291_v11 = vld [vmem:[%s16288_s12 + $0x168] ss:$16 sps:$4 sm:$0xff]  }
0x1746   : > { %v5314_v21 = vpack.c.bf16 %v5313_v22, %v5313_v22  ;;  %v14641_v40 = vsel %vm2323_vm8, %v14531_v9, %v5313_v22  ;;  %v11222_v9 = vld [vmem:[%s16288_s12 + $0xc0] ss:$16 sps:$4 sm:$0xff]   ;;  %v11296_v22 = vld [vmem:[%s16288_s12 + $0x144] ss:$16 sps:$4 sm:$0xff]  }
0x1748   : > { %v5316_v27 = vrot.slane %v5314_v21, 3  ;;  %v11299_v21 = vld [vmem:[%s16288_s12 + $0x14c] ss:$16 sps:$4 sm:$0xff]  }
0x174a   : > { %5351 = vmatmul.mubr.bf16.vlgmr.msra.gmra.mxu1 %v5316_v27  ;;  %5392 = vmatmul.mubr.bf16.vlgmr.msra.gmra.mxu0 %v5316_v27  ;;  %v11302_v27 = vld [vmem:[%s16288_s12 + $0x124] ss:$16 sps:$4 sm:$0xff]  }
0x174b   : > { %5857 = vmatpush1.bf16.msra.mxu1 %v11216_v20  ;;  %5898 = vmatpush1.bf16.msra.mxu0 %v11219_v10  ;;  %v11294_v20 = vld [vmem:[%s16288_s12 + $0x140] ss:$16 sps:$4 sm:$0xff]   ;;  %v11297_v10 = vld [vmem:[%s16288_s12 + $0x148] ss:$16 sps:$4 sm:$0xff]  }
0x174c   : > { %5888 = vmatprep.mubr.bf16.mxu1 %v14041_v61  ;;  %5929 = vmatprep.mubr.bf16.mxu0 %v14041_v61  ;;  %v11231_v61 = vld [vmem:[%s16288_s12 + $0xa8] ss:$16 sps:$4 sm:$0xff]  }
0x174d   : > { %5858 = vmatprep.subr.bf16.mxu1 %v11224_v26  ;;  %5899 = vmatprep.subr.bf16.mxu0 %v11227_v2  ;;  %v11305_v26 = vld [vmem:[%s16288_s12 + $0x12c] ss:$16 sps:$4 sm:$0xff]   ;;  %v11300_v2 = vld [vmem:[%s16288_s12 + $0x120] ss:$16 sps:$4 sm:$0xff]  }
0x174f   : > { %5859 = vmatpush1.bf16.msra.mxu1 %v11222_v9  ;;  %5900 = vmatpush1.bf16.msra.mxu0 %v11225_v38  ;;  %v11303_v9 = vld [vmem:[%s16288_s12 + $0x128] ss:$16 sps:$4 sm:$0xff]   ;;  %v11308_v38 = vld [vmem:[%s16288_s12 + $0x104] ss:$16 sps:$4 sm:$0xff]  }
0x1750   : > { %5860 = vmatprep.subr.bf16.mxu1 %v11230_v30  ;;  %5901 = vmatprep.subr.bf16.mxu0 %v11233_v32  ;;  %v11311_v30 = vld [vmem:[%s16288_s12 + $0x10c] ss:$16 sps:$4 sm:$0xff]   ;;  %v11306_v32 = vld [vmem:[%s16288_s12 + $0x100] ss:$16 sps:$4 sm:$0xff]  }
0x1753   : > { %5861 = vmatpush1.bf16.msra.mxu1 %v11228_v41  ;;  %5902 = vmatpush1.bf16.msra.mxu0 %v11231_v61  ;;  %v11309_v41 = vld [vmem:[%s16288_s12 + $0x108] ss:$16 sps:$4 sm:$0xff]   ;;  %v14834_v61 = vld [vmem:[%s16289_s13 + $0xe4] ss:$16 sps:$4 sm:$0xff]  }
0x1754   : > { %5862 = vmatprep.subr.bf16.mxu1 %v11236_v17  ;;  %5903 = vmatprep.subr.bf16.mxu0 %v11239_v35  ;;  %v14839_v17 = vld [vmem:[%s16289_s13 + $0xec] ss:$16 sps:$4 sm:$0xff]   ;;  %v14844_v35 = vld [vmem:[%s16289_s13 + $0xe0] ss:$16 sps:$4 sm:$0xff]  }
0x1757   : > { %5863 = vmatpush1.bf16.msra.mxu1 %v11234_v63  ;;  %5904 = vmatpush1.bf16.msra.mxu0 %v11237_v4  ;;  %v14849_v63 = vld [vmem:[%s16289_s13 + $0xe8] ss:$16 sps:$4 sm:$0xff]   ;;  %v14856_v4 = vld [vmem:[%s16289_s13 + $0xc4] ss:$16 sps:$4 sm:$0xff]  }
0x1758   : > { %5864 = vmatprep.subr.bf16.mxu1 %v11242_v12  ;;  %5905 = vmatprep.subr.bf16.mxu0 %v11245_v60  ;;  %v14861_v12 = vld [vmem:[%s16289_s13 + $0xcc] ss:$16 sps:$4 sm:$0xff]   ;;  %v14870_v60 = vld [vmem:[%s16289_s13 + $0xc0] ss:$16 sps:$4 sm:$0xff]  }
0x175b   : > { %5865 = vmatpush1.bf16.msra.mxu1 %v11240_v48  ;;  %5906 = vmatpush1.bf16.msra.mxu0 %v11243_v49  ;;  %v14875_v48 = vld [vmem:[%s16289_s13 + $0xc8] ss:$16 sps:$4 sm:$0xff]   ;;  %v14887_v49 = vld [vmem:[%s16289_s13 + $0xac] ss:$16 sps:$4 sm:$0xff]  }
0x175c   : > { %5866 = vmatprep.subr.bf16.mxu1 %v11248_v50  ;;  %5907 = vmatprep.subr.bf16.mxu0 %v11251_v51  ;;  %v14896_v50 = vld [vmem:[%s16289_s13 + $0xa0] ss:$16 sps:$4 sm:$0xff]   ;;  %v14901_v51 = vld [vmem:[%s16289_s13 + $0xa8] ss:$16 sps:$4 sm:$0xff]  }
0x175f   : > { %5867 = vmatpush1.bf16.msra.mxu1 %v11246_v52  ;;  %5908 = vmatpush1.bf16.msra.mxu0 %v11249_v29  ;;  %v14908_v52 = vld [vmem:[%s16289_s13 + $0x84] ss:$16 sps:$4 sm:$0xff]   ;;  %v14913_v29 = vld [vmem:[%s16289_s13 + $0x8c] ss:$16 sps:$4 sm:$0xff]  }
0x1760   : > { %5868 = vmatprep.subr.bf16.mxu1 %v11254_v53  ;;  %5909 = vmatprep.subr.bf16.mxu0 %v11257_v54  ;;  %v14920_v53 = vld [vmem:[%s16289_s13 + $0x80] ss:$16 sps:$4 sm:$0xff]   ;;  %v14925_v54 = vld [vmem:[%s16289_s13 + $0x88] ss:$16 sps:$4 sm:$0xff]  }
0x1763   : > { %5869 = vmatpush1.bf16.msra.mxu1 %v11252_v55  ;;  %5910 = vmatpush1.bf16.msra.mxu0 %v11255_v56  ;;  %v14932_v55 = vld [vmem:[%s16289_s13 + $0x64] ss:$16 sps:$4 sm:$0xff]   ;;  %v14937_v56 = vld [vmem:[%s16289_s13 + $0x6c] ss:$16 sps:$4 sm:$0xff]  }
0x1764   : > { %5870 = vmatprep.subr.bf16.mxu1 %v11260_v57  ;;  %5911 = vmatprep.subr.bf16.mxu0 %v11263_v58  ;;  %v14944_v57 = vld [vmem:[%s16289_s13 + $0x60] ss:$16 sps:$4 sm:$0xff]   ;;  %v14949_v58 = vld [vmem:[%s16289_s13 + $0x68] ss:$16 sps:$4 sm:$0xff]  }
0x1767   : > { %5871 = vmatpush1.bf16.msra.mxu1 %v11258_v31  ;;  %5912 = vmatpush1.bf16.msra.mxu0 %v11261_v8  ;;  %v14956_v31 = vld [vmem:[%s16289_s13 + $0x44] ss:$16 sps:$4 sm:$0xff]   ;;  %v14961_v8 = vld [vmem:[%s16289_s13 + $0x4c] ss:$16 sps:$4 sm:$0xff]  }
0x1768   : > { %5872 = vmatprep.subr.bf16.mxu1 %v11266_v25  ;;  %5913 = vmatprep.subr.bf16.mxu0 %v11269_v13  ;;  %v14968_v25 = vld [vmem:[%s16289_s13 + $0x40] ss:$16 sps:$4 sm:$0xff]   ;;  %v14973_v13 = vld [vmem:[%s16289_s13 + $0x48] ss:$16 sps:$4 sm:$0xff]  }
0x176b   : > { %5873 = vmatpush2.bf16.msra.mxu1 %v11264_v3  ;;  %5914 = vmatpush2.bf16.msra.mxu0 %v11267_v46  ;;  %v14980_v3 = vld [vmem:[%s16289_s13 + $0x24] ss:$16 sps:$4 sm:$0xff]   ;;  %v14985_v46 = vld [vmem:[%s16289_s13 + $0x2c] ss:$16 sps:$4 sm:$0xff]  }
0x176c   : > { %5874 = vmatprep.subr.bf16.mxu1 %v11272_v6  ;;  %5915 = vmatprep.subr.bf16.mxu0 %v11275_v1  ;;  %v14992_v6 = vld [vmem:[%s16289_s13 + $0x20] ss:$16 sps:$4 sm:$0xff]   ;;  %v14997_v1 = vld [vmem:[%s16289_s13 + $0x28] ss:$16 sps:$4 sm:$0xff]  }
0x176f   : > { %5875 = vmatpush2.bf16.msra.mxu1 %v11270_v18  ;;  %5916 = vmatpush2.bf16.msra.mxu0 %v11273_v14  ;;  %v15004_v18 = vld [vmem:[%s16289_s13 + $0x4] ss:$16 sps:$4 sm:$0xff]   ;;  %v15009_v14 = vld [vmem:[%s16289_s13 + $0xc] ss:$16 sps:$4 sm:$0xff]  }
0x1770   : > { %5876 = vmatprep.subr.bf16.mxu1 %v11278_v37  ;;  %5917 = vmatprep.subr.bf16.mxu0 %v11281_v45  ;;  %v15016_v37 = vld [vmem:[%s16289_s13] ss:$16 sps:$4 sm:$0xff]   ;;  %v15021_v45 = vld [vmem:[%s16289_s13 + $0x8] ss:$16 sps:$4 sm:$0xff]  }
0x1773   : > { %5877 = vmatpush2.bf16.msra.mxu1 %v11276_v36  ;;  %5918 = vmatpush2.bf16.msra.mxu0 %v11279_v16 }
0x1774   : > { %5878 = vmatprep.subr.bf16.mxu1 %v11284_v59  ;;  %5919 = vmatprep.subr.bf16.mxu0 %v11287_v23 }
0x1777   : > { %5879 = vmatpush2.bf16.msra.mxu1 %v11282_v33  ;;  %5920 = vmatpush2.bf16.msra.mxu0 %v11285_v24 }
0x1778   : > { %5880 = vmatprep.subr.bf16.mxu1 %v11290_v34  ;;  %5921 = vmatprep.subr.bf16.mxu0 %v11293_v19 }
0x177b   : > { %5881 = vmatpush2.bf16.msra.mxu1 %v11288_v47  ;;  %5922 = vmatpush2.bf16.msra.mxu0 %v11291_v11 }
0x177c   : > { %5882 = vmatprep.subr.bf16.mxu1 %v11296_v22  ;;  %5923 = vmatprep.subr.bf16.mxu0 %v11299_v21 }
0x177f   : > { %5883 = vmatpush2.bf16.msra.mxu1 %v11294_v20  ;;  %5924 = vmatpush2.bf16.msra.mxu0 %v11297_v10 }
0x1780   : > { %5884 = vmatprep.subr.bf16.mxu1 %v11302_v27  ;;  %5925 = vmatprep.subr.bf16.mxu0 %v11305_v26 }
0x1783   : > { %5885 = vmatpush2.bf16.msra.mxu1 %v11300_v2  ;;  %5926 = vmatpush2.bf16.msra.mxu0 %v11303_v9 }
0x1784   : > { %5886 = vmatprep.subr.bf16.mxu1 %v11308_v38  ;;  %5927 = vmatprep.subr.bf16.mxu0 %v11311_v30 }
0x1787   : > { %5887 = vmatpush2.bf16.msra.mxu1 %v11306_v32  ;;  %5928 = vmatpush2.bf16.msra.mxu0 %v11309_v41 }
0x1788   : > { %6130 = vmatprep.subr.bf16.mxu1 %v14834_v61  ;;  %6171 = vmatprep.subr.bf16.mxu0 %v14839_v17 }
0x178a   : > { %5889 = vmatmul.mubr.bf16.vlgmr.msra.gmra.mxu1 %v14055_v42  ;;  %5930 = vmatmul.mubr.bf16.vlgmr.msra.gmra.mxu0 %v14055_v42  ;;  %v14882_v42 = vld [vmem:[%s16289_s13 + $0xa4] ss:$16 sps:$4 sm:$0xff]  }
0x178b   : > { %6131 = vmatpush1.bf16.msra.mxu1 %v14844_v35  ;;  %6172 = vmatpush1.bf16.msra.mxu0 %v14849_v63 }
0x178c   : > { %6132 = vmatprep.subr.bf16.mxu1 %v14856_v4  ;;  %6173 = vmatprep.subr.bf16.mxu0 %v14861_v12 }
0x178d   : > { %6162 = vmatprep.mubr.bf16.mxu1 %v16348_v39  ;;  %6203 = vmatprep.mubr.bf16.mxu0 %v16348_v39 }
0x178f   : > { %6133 = vmatpush1.bf16.msra.mxu1 %v14870_v60  ;;  %6174 = vmatpush1.bf16.msra.mxu0 %v14875_v48 }
0x1790   : > { %6134 = vmatprep.subr.bf16.mxu1 %v14882_v42  ;;  %6175 = vmatprep.subr.bf16.mxu0 %v14887_v49 }
0x1793   : > { %6135 = vmatpush1.bf16.msra.mxu1 %v14896_v50  ;;  %6176 = vmatpush1.bf16.msra.mxu0 %v14901_v51 }
0x1794   : > { %6136 = vmatprep.subr.bf16.mxu1 %v14908_v52  ;;  %6177 = vmatprep.subr.bf16.mxu0 %v14913_v29 }
0x1797   : > { %6137 = vmatpush1.bf16.msra.mxu1 %v14920_v53  ;;  %6178 = vmatpush1.bf16.msra.mxu0 %v14925_v54 }
0x1798   : > { %6138 = vmatprep.subr.bf16.mxu1 %v14932_v55  ;;  %6179 = vmatprep.subr.bf16.mxu0 %v14937_v56 }
0x179b   : > { %6139 = vmatpush1.bf16.msra.mxu1 %v14944_v57  ;;  %6180 = vmatpush1.bf16.msra.mxu0 %v14949_v58 }
0x179c   : > { %6140 = vmatprep.subr.bf16.mxu1 %v14956_v31  ;;  %6181 = vmatprep.subr.bf16.mxu0 %v14961_v8 }
0x179f   : > { %6141 = vmatpush1.bf16.msra.mxu1 %v14968_v25  ;;  %6182 = vmatpush1.bf16.msra.mxu0 %v14973_v13 }
0x17a0   : > { %6142 = vmatprep.subr.bf16.mxu1 %v14980_v3  ;;  %6183 = vmatprep.subr.bf16.mxu0 %v14985_v46 }
0x17a3   : > { %6143 = vmatpush1.bf16.msra.mxu1 %v14992_v6  ;;  %6184 = vmatpush1.bf16.msra.mxu0 %v14997_v1 }
0x17a4   : > { %6144 = vmatprep.subr.bf16.mxu1 %v15004_v18  ;;  %6185 = vmatprep.subr.bf16.mxu0 %v15009_v14 }
0x17a7   : > { %6145 = vmatpush1.bf16.msra.mxu1 %v15016_v37  ;;  %6186 = vmatpush1.bf16.msra.mxu0 %v15021_v45 }
0x17a8   : > { %6258 = vmatprep.subr.bf16.mxu1 %v14834_v61  ;;  %6299 = vmatprep.subr.bf16.mxu0 %v14839_v17 }
0x17aa   : > { %6163 = vmatmul.mubr.bf16.vlgmr.msra.gmra.mxu1 %v16348_v39  ;;  %6204 = vmatmul.mubr.bf16.vlgmr.msra.gmra.mxu0 %v16348_v39 }
0x17ab   : > { %6259 = vmatpush1.bf16.msra.mxu1 %v14844_v35  ;;  %6300 = vmatpush1.bf16.msra.mxu0 %v14849_v63 }
0x17ac   : > { %6260 = vmatprep.subr.bf16.mxu1 %v14856_v4  ;;  %6301 = vmatprep.subr.bf16.mxu0 %v14861_v12 }
0x17ad   : > { %6290 = vmatprep.mubr.bf16.mxu1 %v16348_v39  ;;  %6331 = vmatprep.mubr.bf16.mxu0 %v16348_v39 }
0x17af   : > { %6261 = vmatpush1.bf16.msra.mxu1 %v14870_v60  ;;  %6302 = vmatpush1.bf16.msra.mxu0 %v14875_v48 }
0x17b0   : > { %6262 = vmatprep.subr.bf16.mxu1 %v14882_v42  ;;  %6303 = vmatprep.subr.bf16.mxu0 %v14887_v49 }
0x17b3   : > { %6263 = vmatpush1.bf16.msra.mxu1 %v14896_v50  ;;  %6304 = vmatpush1.bf16.msra.mxu0 %v14901_v51 }
0x17b4   : > { %6264 = vmatprep.subr.bf16.mxu1 %v14908_v52  ;;  %6305 = vmatprep.subr.bf16.mxu0 %v14913_v29 }
0x17b7   : > { %6265 = vmatpush1.bf16.msra.mxu1 %v14920_v53  ;;  %6306 = vmatpush1.bf16.msra.mxu0 %v14925_v54 }
0x17b8   : > { %6266 = vmatprep.subr.bf16.mxu1 %v14932_v55  ;;  %6307 = vmatprep.subr.bf16.mxu0 %v14937_v56 }
0x17bb   : > { %6267 = vmatpush1.bf16.msra.mxu1 %v14944_v57  ;;  %6308 = vmatpush1.bf16.msra.mxu0 %v14949_v58 }
0x17bc   : > { %6268 = vmatprep.subr.bf16.mxu1 %v14956_v31  ;;  %6309 = vmatprep.subr.bf16.mxu0 %v14961_v8 }
0x17bf   : > { %6269 = vmatpush1.bf16.msra.mxu1 %v14968_v25  ;;  %6310 = vmatpush1.bf16.msra.mxu0 %v14973_v13 }
0x17c0   : > { %6270 = vmatprep.subr.bf16.mxu1 %v14980_v3  ;;  %6311 = vmatprep.subr.bf16.mxu0 %v14985_v46 }
0x17c3   : > { %6271 = vmatpush1.bf16.msra.mxu1 %v14992_v6  ;;  %6312 = vmatpush1.bf16.msra.mxu0 %v14997_v1 }
0x17c4   : > { %6272 = vmatprep.subr.bf16.mxu1 %v15004_v18  ;;  %6313 = vmatprep.subr.bf16.mxu0 %v15009_v14 }
0x17c7   : > { %6273 = vmatpush1.bf16.msra.mxu1 %v15016_v37  ;;  %6314 = vmatpush1.bf16.msra.mxu0 %v15021_v45 }
0x17c8   : > { %6387 = vmatprep.subr.bf16.mxu1 %v14834_v61  ;;  %6428 = vmatprep.subr.bf16.mxu0 %v14839_v17 }
0x180a   : > { %v5352_v36 = vpop.f32.mrf.mxu1  ;;  %v5393_v16 = vpop.f32.mrf.mxu0 }
0x180b   : > { %v5404_v59 = vrot.slane %v5352_v36, 1  ;;  %v5406_v26 = vrot.slane %v5393_v16, 1 }
0x180c   : > { %v5354_v23 = vpop.f32.mrf.mxu1  ;;  %v5395_v33 = vpop.f32.mrf.mxu0 }
0x180d   : > { %v5412_v24 = vadd.f32 %v5404_v59, %v14276_v0  ;;  %v5405_v34 = vrot.slane %v5354_v23, 1  ;;  %v5407_v27 = vrot.slane %v5395_v33, 1  ;;  %v5414_v9 = vadd.f32 %v5406_v26, %v14287_v43 }
0x180e   : > { %v5356_v19 = vpop.f32.mrf.mxu1  ;;  %v5397_v47 = vpop.f32.mrf.mxu0  ;;  %v5436_v33 = vrot.slane %v14636_v44, 7 }
0x180f   : > { %v10447_v11 = vmul.f32 -1.442695, %v5412_v24  ;;  %v5413_v22 = vadd.f32 %v5405_v34, %v14278_v28  ;;  %v5415_v2 = vadd.f32 %v5407_v27, %v14283_v62 }
0x1810   : > { %v5357_v21 = vpop.f32.mrf.mxu1  ;;  %v5398_v20 = vpop.f32.mrf.mxu0 }
0x1811   : > { %11920 = vpow2.f32 %v10447_v11  ;;  %v10448_v10 = vmul.f32 -1.442695, %v5413_v22  ;;  %v10449_v38 = vmul.f32 -1.442695, %v5415_v2 }
0x1813   : > { %11922 = vpow2.f32 %v10448_v10 }
0x1814   : > { %11924 = vtanh.f32 %v5414_v9  ;;  %v5514_v9 = vld [vmem:[%s16290_s14] sm:$0xf] }
0x1815   : > { %11926 = vpow2.f32 %v10449_v38  ;;  %v5519_v38 = vrot.slane %v5514_v9, %v12698_v5 }
0x181e   : > { %v11921_v30 = vpop.eup %11920 }
0x181f   : > { %v5419_v0 = vadd.f32 1.0, %v11921_v30  ;;  %v5523_v30 = vrot.slane %v5514_v9, %v12704_v7 }
0x1820   : > { %v11923_v32 = vpop.eup %11922 }
0x1821   : > { %11928 = vrcp.f32 %v5419_v0  ;;  %v5425_v41 = vadd.f32 1.0, %v11923_v32  ;;  %v11925_v28 = vpop.eup %11924 }
0x1822   : > { %v11927_v36 = vpop.eup %11926 }
0x1823   : > { %11930 = vrcp.f32 %v5425_v41  ;;  %v5432_v24 = vadd.f32 1.0, %v11927_v36 }
0x1825   : > { %11932 = vrcp.f32 %v5432_v24 }
0x182e   : > { %v11929_v59 = vpop.eup %11928 }
0x182f   : > { %v5439_v23 = vmul.f32 %v11929_v59, %v11925_v28 }
0x1830   : > { %v11931_v16 = vpop.eup %11930 }
0x1831   : > { %v5438_v62 = vmul.f32 %v11931_v16, %v5436_v33 }
0x1832   : > { %v11933_v43 = vpop.eup %11932 }
0x1833   : > { %v5440_v34 = vadd.f32 %v5439_v23, %v5438_v62 }
0x1835   : > { %11934 = vtanh.f32 %v5440_v34 }
0x1842   : > { %v11935_v19 = vpop.eup %11934 }
0x1843   : > { %v5442_v47 = vmul.f32 %v11935_v19, %v11933_v43 }
0x1845   : > { %v15072_v11 = vsel %vm2325_vm9, %v14641_v40, %v5442_v47 }
0x184a   : > { %v5890_v22 = vpop.f32.mrf.mxu1  ;;  %v5931_v21 = vpop.f32.mrf.mxu0 }
0x184b   : > { %v15079_v40 = vadd.f32 %v5890_v22, %v5519_v38  ;;  %v5531_v22 = vrot.slane %v5514_v9, %v12714_v15 }
0x184c   : > { %v5892_v20 = vpop.f32.mrf.mxu1  ;;  %v5933_v10 = vpop.f32.mrf.mxu0 }
0x184d   : > { %v15081_v59 = vadd.f32 %v5892_v20, %v5523_v30  ;;  %v16353_v20 = vld [vmem:[#allocation5_spill] sm:$0xff] }
0x184e   : > { %v5894_v27 = vpop.f32.mrf.mxu1  ;;  %v5935_v26 = vpop.f32.mrf.mxu0 }
0x184f   : > { %v15086_v26 = vadd.f32 %v5933_v10, %v5531_v22 }
0x1850   : > { %v5895_v44 = vpop.f32.mrf.mxu1  ;;  %v5936_v2 = vpop.f32.mrf.mxu0 }
0x1851   : > { %v5527_v44 = vrot.slane %v5514_v9, %v16353_v20 }
0x1853   : > { %v15090_v30 = vadd.f32 %v5931_v21, %v5527_v44 }
0x186a   : > { %v6164_v0 = vpop.f32.mrf.mxu1  ;;  %v6205_v32 = vpop.f32.mrf.mxu0 }
0x186b   : > { %v6216_v41 = vrot.slane %v6164_v0, 1  ;;  %v6218_v38 = vrot.slane %v6205_v32, 1 }
0x186c   : > { %v6166_v28 = vpop.f32.mrf.mxu1  ;;  %v6207_v36 = vpop.f32.mrf.mxu0 }
0x186d   : > { %v6224_v23 = vadd.f32 %v6216_v41, %v15079_v40  ;;  %v6217_v33 = vrot.slane %v6166_v28, 1  ;;  %v6219_v27 = vrot.slane %v6207_v36, 1  ;;  %v6226_v28 = vadd.f32 %v6218_v38, %v15090_v30 }
0x186e   : > { %v6168_v16 = vpop.f32.mrf.mxu1  ;;  %v6209_v24 = vpop.f32.mrf.mxu0 }
0x186f   : > { %v10546_v62 = vmul.f32 -1.442695, %v6224_v23  ;;  %v6225_v34 = vadd.f32 %v6217_v33, %v15081_v59  ;;  %v6227_v2 = vadd.f32 %v6219_v27, %v15086_v26 }
0x1870   : > { %v6169_v43 = vpop.f32.mrf.mxu1  ;;  %v6210_v19 = vpop.f32.mrf.mxu0 }
0x1871   : > { %11936 = vpow2.f32 %v10546_v62  ;;  %v10547_v47 = vmul.f32 -1.442695, %v6225_v34  ;;  %v10548_v0 = vmul.f32 -1.442695, %v6227_v2 }
0x1873   : > { %11938 = vpow2.f32 %v10547_v47 }
0x1874   : > { %11940 = vpow2.f32 %v10548_v0 }
0x187e   : > { %v11937_v41 = vpop.eup %11936 }
0x187f   : > { %v6231_v23 = vadd.f32 1.0, %v11937_v41 }
0x1880   : > { %v11939_v33 = vpop.eup %11938 }
0x1881   : > { %11942 = vrcp.f32 %v6231_v23  ;;  %v6237_v16 = vadd.f32 1.0, %v11939_v33  ;;  %v11941_v10 = vpop.eup %11940 }
0x1882   : > { %11944 = vtanh.f32 %v6226_v28  ;;  %v6244_v62 = vadd.f32 1.0, %v11941_v10 }
0x1883   : > { %11946 = vrcp.f32 %v6237_v16 }
0x1884   : > { %11948 = vrcp.f32 %v6244_v62 }
0x188e   : > { %v11943_v36 = vpop.eup %11942 }
0x188f   : > { %v11945_v24 = vpop.eup %11944 }
0x1890   : > { %v11947_v9 = vpop.eup %11946  ;;  %v6248_v32 = vmul.f32 %v11945_v24, %v11943_v36 }
0x1891   : > { %v6247_v34 = vmul.f32 0.0, %v11947_v9  ;;  %v11949_v43 = vpop.eup %11948 }
0x1893   : > { %v15093_v21 = vadd.f32 %v6248_v32, %v6247_v34 }
0x1895   : > { %11950 = vtanh.f32 %v15093_v21 }
0x18a2   : > { %v11951_v19 = vpop.eup %11950 }
0x18a3   : > { %v15096_v47 = vmul.f32 %v11951_v19, %v11949_v43 }
0x18a5   : > { %v6252_v22 = vpack.c.bf16 %v15096_v47, %v15096_v47 }
0x18a7   : > { %v6254_v27 = vshrl.u32 %v6252_v22, 16 }
0x18a9   : > { %v6256_v44 = vrot.slane %v6254_v27, 3 }
0x18ab   : > { %6291 = vmatmul.mubr.bf16.vlgmr.msra.gmra.mxu1 %v6256_v44  ;;  %6332 = vmatmul.mubr.bf16.vlgmr.msra.gmra.mxu0 %v6256_v44 }
0x18ac   : > { %6388 = vmatpush1.bf16.msra.mxu1 %v14844_v35  ;;  %6429 = vmatpush1.bf16.msra.mxu0 %v14849_v63 }
0x18ad   : > { %6389 = vmatprep.subr.bf16.mxu1 %v14856_v4  ;;  %6430 = vmatprep.subr.bf16.mxu0 %v14861_v12 }
0x18ae   : > { %6419 = vmatprep.mubr.bf16.mxu1 %v16348_v39  ;;  %6460 = vmatprep.mubr.bf16.mxu0 %v16348_v39 }
0x18b0   : > { %6390 = vmatpush1.bf16.msra.mxu1 %v14870_v60  ;;  %6431 = vmatpush1.bf16.msra.mxu0 %v14875_v48 }
0x18b1   : > { %6391 = vmatprep.subr.bf16.mxu1 %v14882_v42  ;;  %6432 = vmatprep.subr.bf16.mxu0 %v14887_v49 }
0x18b4   : > { %6392 = vmatpush1.bf16.msra.mxu1 %v14896_v50  ;;  %6433 = vmatpush1.bf16.msra.mxu0 %v14901_v51 }
0x18b5   : > { %6393 = vmatprep.subr.bf16.mxu1 %v14908_v52  ;;  %6434 = vmatprep.subr.bf16.mxu0 %v14913_v29 }
0x18b8   : > { %6394 = vmatpush1.bf16.msra.mxu1 %v14920_v53  ;;  %6435 = vmatpush1.bf16.msra.mxu0 %v14925_v54 }
0x18b9   : > { %6395 = vmatprep.subr.bf16.mxu1 %v14932_v55  ;;  %6436 = vmatprep.subr.bf16.mxu0 %v14937_v56 }
0x18bc   : > { %6396 = vmatpush1.bf16.msra.mxu1 %v14944_v57  ;;  %6437 = vmatpush1.bf16.msra.mxu0 %v14949_v58 }
0x18bd   : > { %6397 = vmatprep.subr.bf16.mxu1 %v14956_v31  ;;  %6438 = vmatprep.subr.bf16.mxu0 %v14961_v8 }
0x18c0   : > { %6398 = vmatpush1.bf16.msra.mxu1 %v14968_v25  ;;  %6439 = vmatpush1.bf16.msra.mxu0 %v14973_v13 }
0x18c1   : > { %6399 = vmatprep.subr.bf16.mxu1 %v14980_v3  ;;  %6440 = vmatprep.subr.bf16.mxu0 %v14985_v46 }
0x18c4   : > { %6400 = vmatpush1.bf16.msra.mxu1 %v14992_v6  ;;  %6441 = vmatpush1.bf16.msra.mxu0 %v14997_v1 }
0x18c5   : > { %6401 = vmatprep.subr.bf16.mxu1 %v15004_v18  ;;  %6442 = vmatprep.subr.bf16.mxu0 %v15009_v14 }
0x18c8   : > { %6402 = vmatpush1.bf16.msra.mxu1 %v15016_v37  ;;  %6443 = vmatpush1.bf16.msra.mxu0 %v15021_v45 }
0x18c9   : > { %6518 = vmatprep.subr.bf16.mxu1 %v14834_v61  ;;  %6559 = vmatprep.subr.bf16.mxu0 %v14839_v17 }
0x196b   : > { %v6292_v2 = vpop.f32.mrf.mxu1  ;;  %v6333_v38 = vpop.f32.mrf.mxu0 }
0x196c   : > { %v6344_v0 = vrot.slane %v6292_v2, 2  ;;  %v6346_v19 = vrot.slane %v6333_v38, 2 }
0x196d   : > { %v6294_v41 = vpop.f32.mrf.mxu1  ;;  %v6335_v28 = vpop.f32.mrf.mxu0 }
0x196e   : > { %v6352_v23 = vadd.f32 %v6344_v0, %v15079_v40  ;;  %v6345_v33 = vrot.slane %v6294_v41, 2  ;;  %v6347_v32 = vrot.slane %v6335_v28, 2  ;;  %v6354_v44 = vadd.f32 %v6346_v19, %v15090_v30 }
0x196f   : > { %v6296_v16 = vpop.f32.mrf.mxu1  ;;  %v6337_v10 = vpop.f32.mrf.mxu0 }
0x1970   : > { %v10549_v36 = vmul.f32 -1.442695, %v6352_v23  ;;  %v6353_v24 = vadd.f32 %v6345_v33, %v15081_v59  ;;  %v6355_v43 = vadd.f32 %v6347_v32, %v15086_v26  ;;  %v6376_v10 = vrot.slane %v15093_v21, 1 }
0x1971   : > { %v6297_v9 = vpop.f32.mrf.mxu1  ;;  %v6338_v62 = vpop.f32.mrf.mxu0 }
0x1972   : > { %11952 = vpow2.f32 %v10549_v36  ;;  %v10550_v34 = vmul.f32 -1.442695, %v6353_v24  ;;  %v10551_v22 = vmul.f32 -1.442695, %v6355_v43 }
0x1974   : > { %11954 = vpow2.f32 %v10550_v34 }
0x1975   : > { %11956 = vpow2.f32 %v10551_v22 }
0x197f   : > { %v11953_v27 = vpop.eup %11952 }
0x1980   : > { %v6359_v2 = vadd.f32 1.0, %v11953_v27 }
0x1981   : > { %v11955_v0 = vpop.eup %11954 }
0x1982   : > { %11958 = vrcp.f32 %v6359_v2  ;;  %v6365_v41 = vadd.f32 1.0, %v11955_v0  ;;  %v11957_v23 = vpop.eup %11956 }
0x1983   : > { %11960 = vtanh.f32 %v6354_v44  ;;  %v6372_v36 = vadd.f32 1.0, %v11957_v23 }
0x1984   : > { %11962 = vrcp.f32 %v6365_v41 }
0x1985   : > { %11964 = vrcp.f32 %v6372_v36 }
0x198f   : > { %v11959_v33 = vpop.eup %11958 }
0x1990   : > { %v11961_v16 = vpop.eup %11960 }
0x1991   : > { %v11963_v28 = vpop.eup %11962  ;;  %v6379_v24 = vmul.f32 %v11961_v16, %v11959_v33 }
0x1992   : > { %v6378_v38 = vmul.f32 %v11963_v28, %v6376_v10  ;;  %v11965_v62 = vpop.eup %11964 }
0x1994   : > { %v15139_v9 = vadd.f32 %v6379_v24, %v6378_v38 }
0x1996   : > { %11966 = vtanh.f32 %v15139_v9 }
0x19a3   : > { %v11967_v34 = vpop.eup %11966 }
0x19a4   : > { %v15142_v32 = vmul.f32 %v11967_v34, %v11965_v62 }
0x19a6   : > { %v6383_v43 = vpack.c.bf16 %v15142_v32, %v15142_v32 }
0x19a8   : > { %v6385_v19 = vrot.slane %v6383_v43, 3 }
0x19aa   : > { %6420 = vmatmul.mubr.bf16.vlgmr.msra.gmra.mxu1 %v6385_v19  ;;  %6461 = vmatmul.mubr.bf16.vlgmr.msra.gmra.mxu0 %v6385_v19 }
0x19ab   : > { %6519 = vmatpush1.bf16.msra.mxu1 %v14844_v35  ;;  %6560 = vmatpush1.bf16.msra.mxu0 %v14849_v63 }
0x19ac   : > { %6520 = vmatprep.subr.bf16.mxu1 %v14856_v4  ;;  %6561 = vmatprep.subr.bf16.mxu0 %v14861_v12 }
0x19ad   : > { %6550 = vmatprep.mubr.bf16.mxu1 %v16348_v39  ;;  %6591 = vmatprep.mubr.bf16.mxu0 %v16348_v39 }
0x19af   : > { %6521 = vmatpush1.bf16.msra.mxu1 %v14870_v60  ;;  %6562 = vmatpush1.bf16.msra.mxu0 %v14875_v48 }
0x19b0   : > { %6522 = vmatprep.subr.bf16.mxu1 %v14882_v42  ;;  %6563 = vmatprep.subr.bf16.mxu0 %v14887_v49 }
0x19b3   : > { %6523 = vmatpush1.bf16.msra.mxu1 %v14896_v50  ;;  %6564 = vmatpush1.bf16.msra.mxu0 %v14901_v51 }
0x19b4   : > { %6524 = vmatprep.subr.bf16.mxu1 %v14908_v52  ;;  %6565 = vmatprep.subr.bf16.mxu0 %v14913_v29 }
0x19b7   : > { %6525 = vmatpush1.bf16.msra.mxu1 %v14920_v53  ;;  %6566 = vmatpush1.bf16.msra.mxu0 %v14925_v54 }
0x19b8   : > { %6526 = vmatprep.subr.bf16.mxu1 %v14932_v55  ;;  %6567 = vmatprep.subr.bf16.mxu0 %v14937_v56 }
0x19bb   : > { %6527 = vmatpush1.bf16.msra.mxu1 %v14944_v57  ;;  %6568 = vmatpush1.bf16.msra.mxu0 %v14949_v58 }
0x19bc   : > { %6528 = vmatprep.subr.bf16.mxu1 %v14956_v31  ;;  %6569 = vmatprep.subr.bf16.mxu0 %v14961_v8 }
0x19bf   : > { %6529 = vmatpush1.bf16.msra.mxu1 %v14968_v25  ;;  %6570 = vmatpush1.bf16.msra.mxu0 %v14973_v13 }
0x19c0   : > { %6530 = vmatprep.subr.bf16.mxu1 %v14980_v3  ;;  %6571 = vmatprep.subr.bf16.mxu0 %v14985_v46 }
0x19c3   : > { %6531 = vmatpush1.bf16.msra.mxu1 %v14992_v6  ;;  %6572 = vmatpush1.bf16.msra.mxu0 %v14997_v1 }
0x19c4   : > { %6532 = vmatprep.subr.bf16.mxu1 %v15004_v18  ;;  %6573 = vmatprep.subr.bf16.mxu0 %v15009_v14 }
0x19c7   : > { %6533 = vmatpush1.bf16.msra.mxu1 %v15016_v37  ;;  %6574 = vmatpush1.bf16.msra.mxu0 %v15021_v45 }
0x19c8   : > { %6647 = vmatprep.subr.bf16.mxu1 %v14834_v61  ;;  %6688 = vmatprep.subr.bf16.mxu0 %v14839_v17 }
0x1a6a   : > { %v6421_v21 = vpop.f32.mrf.mxu1  ;;  %v6462_v22 = vpop.f32.mrf.mxu0 }
0x1a6b   : > { %v6473_v27 = vrot.slane %v6421_v21, 3  ;;  %v6475_v34 = vrot.slane %v6462_v22, 3 }
0x1a6c   : > { %v6423_v44 = vpop.f32.mrf.mxu1  ;;  %v6464_v2 = vpop.f32.mrf.mxu0 }
0x1a6d   : > { %v6481_v0 = vadd.f32 %v6473_v27, %v15079_v40  ;;  %v6474_v41 = vrot.slane %v6423_v44, 3  ;;  %v6476_v38 = vrot.slane %v6464_v2, 3  ;;  %v6483_v21 = vadd.f32 %v6475_v34, %v15090_v30 }
0x1a6e   : > { %v6425_v23 = vpop.f32.mrf.mxu1  ;;  %v6466_v33 = vpop.f32.mrf.mxu0 }
0x1a6f   : > { %v10552_v16 = vmul.f32 -1.442695, %v6481_v0  ;;  %v6482_v10 = vadd.f32 %v6474_v41, %v15081_v59  ;;  %v6484_v62 = vadd.f32 %v6476_v38, %v15086_v26 }
0x1a70   : > { %v6426_v28 = vpop.f32.mrf.mxu1  ;;  %v6467_v36 = vpop.f32.mrf.mxu0 }
0x1a71   : > { %11968 = vpow2.f32 %v10552_v16  ;;  %v10553_v24 = vmul.f32 -1.442695, %v6482_v10  ;;  %v10554_v43 = vmul.f32 -1.442695, %v6484_v62  ;;  %v6505_v16 = vrot.slane %v15139_v9, 1 }
0x1a73   : > { %11970 = vpow2.f32 %v10553_v24 }
0x1a74   : > { %11972 = vpow2.f32 %v10554_v43 }
0x1a7e   : > { %v11969_v19 = vpop.eup %11968 }
0x1a7f   : > { %v6488_v27 = vadd.f32 1.0, %v11969_v19 }
0x1a80   : > { %v11971_v44 = vpop.eup %11970 }
0x1a81   : > { %11974 = vrcp.f32 %v6488_v27  ;;  %v6494_v0 = vadd.f32 1.0, %v11971_v44  ;;  %v11973_v41 = vpop.eup %11972 }
0x1a82   : > { %11976 = vtanh.f32 %v6483_v21  ;;  %v6501_v10 = vadd.f32 1.0, %v11973_v41 }
0x1a83   : > { %11978 = vrcp.f32 %v6494_v0 }
0x1a84   : > { %11980 = vrcp.f32 %v6501_v10 }
0x1a8e   : > { %v11975_v23 = vpop.eup %11974 }
0x1a8f   : > { %v11977_v33 = vpop.eup %11976 }
0x1a90   : > { %v11979_v2 = vpop.eup %11978  ;;  %v6508_v28 = vmul.f32 %v11977_v33, %v11975_v23 }
0x1a91   : > { %v6507_v22 = vmul.f32 %v11979_v2, %v6505_v16  ;;  %v11981_v24 = vpop.eup %11980 }
0x1a93   : > { %v15185_v36 = vadd.f32 %v6508_v28, %v6507_v22 }
0x1a95   : > { %11982 = vtanh.f32 %v15185_v36 }
0x1aa2   : > { %v11983_v38 = vpop.eup %11982 }
0x1aa3   : > { %v15188_v62 = vmul.f32 %v11983_v38, %v11981_v24 }
0x1aa5   : > { %v6512_v34 = vpack.c.bf16 %v15188_v62, %v15188_v62 }
0x1aa7   : > { %v6514_v43 = vshrl.u32 %v6512_v34, 16 }
0x1aa9   : > { %v6516_v19 = vrot.slane %v6514_v43, 2 }
0x1aab   : > { %6551 = vmatmul.mubr.bf16.vlgmr.msra.gmra.mxu1 %v6516_v19  ;;  %6592 = vmatmul.mubr.bf16.vlgmr.msra.gmra.mxu0 %v6516_v19 }
0x1aac   : > { %6648 = vmatpush1.bf16.msra.mxu1 %v14844_v35  ;;  %6689 = vmatpush1.bf16.msra.mxu0 %v14849_v63 }
0x1aad   : > { %6649 = vmatprep.subr.bf16.mxu1 %v14856_v4  ;;  %6690 = vmatprep.subr.bf16.mxu0 %v14861_v12 }
0x1aae   : > { %6679 = vmatprep.mubr.bf16.mxu1 %v16348_v39  ;;  %6720 = vmatprep.mubr.bf16.mxu0 %v16348_v39 }
0x1ab0   : > { %6650 = vmatpush1.bf16.msra.mxu1 %v14870_v60  ;;  %6691 = vmatpush1.bf16.msra.mxu0 %v14875_v48 }
0x1ab1   : > { %6651 = vmatprep.subr.bf16.mxu1 %v14882_v42  ;;  %6692 = vmatprep.subr.bf16.mxu0 %v14887_v49 }
0x1ab4   : > { %6652 = vmatpush1.bf16.msra.mxu1 %v14896_v50  ;;  %6693 = vmatpush1.bf16.msra.mxu0 %v14901_v51 }
0x1ab5   : > { %6653 = vmatprep.subr.bf16.mxu1 %v14908_v52  ;;  %6694 = vmatprep.subr.bf16.mxu0 %v14913_v29 }
0x1ab8   : > { %6654 = vmatpush1.bf16.msra.mxu1 %v14920_v53  ;;  %6695 = vmatpush1.bf16.msra.mxu0 %v14925_v54 }
0x1ab9   : > { %6655 = vmatprep.subr.bf16.mxu1 %v14932_v55  ;;  %6696 = vmatprep.subr.bf16.mxu0 %v14937_v56 }
0x1abc   : > { %6656 = vmatpush1.bf16.msra.mxu1 %v14944_v57  ;;  %6697 = vmatpush1.bf16.msra.mxu0 %v14949_v58 }
0x1abd   : > { %6657 = vmatprep.subr.bf16.mxu1 %v14956_v31  ;;  %6698 = vmatprep.subr.bf16.mxu0 %v14961_v8 }
0x1ac0   : > { %6658 = vmatpush1.bf16.msra.mxu1 %v14968_v25  ;;  %6699 = vmatpush1.bf16.msra.mxu0 %v14973_v13 }
0x1ac1   : > { %6659 = vmatprep.subr.bf16.mxu1 %v14980_v3  ;;  %6700 = vmatprep.subr.bf16.mxu0 %v14985_v46 }
0x1ac4   : > { %6660 = vmatpush1.bf16.msra.mxu1 %v14992_v6  ;;  %6701 = vmatpush1.bf16.msra.mxu0 %v14997_v1 }
0x1ac5   : > { %6661 = vmatprep.subr.bf16.mxu1 %v15004_v18  ;;  %6702 = vmatprep.subr.bf16.mxu0 %v15009_v14 }
0x1ac8   : > { %6662 = vmatpush1.bf16.msra.mxu1 %v15016_v37  ;;  %6703 = vmatpush1.bf16.msra.mxu0 %v15021_v45 }
0x1ac9   : > { %6778 = vmatprep.subr.bf16.mxu1 %v14834_v61  ;;  %6819 = vmatprep.subr.bf16.mxu0 %v14839_v17 }
0x1b6b   : > { %v6552_v9 = vpop.f32.mrf.mxu1  ;;  %v6593_v21 = vpop.f32.mrf.mxu0 }
0x1b6c   : > { %v6604_v27 = vrot.slane %v6552_v9, 4  ;;  %v6606_v43 = vrot.slane %v6593_v21, 4 }
0x1b6d   : > { %v6554_v44 = vpop.f32.mrf.mxu1  ;;  %v6595_v0 = vpop.f32.mrf.mxu0 }
0x1b6e   : > { %v6612_v41 = vadd.f32 %v6604_v27, %v15079_v40  ;;  %v6605_v23 = vrot.slane %v6554_v44, 4  ;;  %v6607_v38 = vrot.slane %v6595_v0, 4  ;;  %v6614_v7 = vadd.f32 %v6606_v43, %v15090_v30 }
0x1b6f   : > { %v6556_v33 = vpop.f32.mrf.mxu1  ;;  %v6597_v16 = vpop.f32.mrf.mxu0 }
0x1b70   : > { %v10555_v2 = vmul.f32 -1.442695, %v6612_v41  ;;  %v6613_v10 = vadd.f32 %v6605_v23, %v15081_v59  ;;  %v6615_v34 = vadd.f32 %v6607_v38, %v15086_v26 }
0x1b71   : > { %v6557_v28 = vpop.f32.mrf.mxu1  ;;  %v6598_v22 = vpop.f32.mrf.mxu0 }
0x1b72   : > { %11984 = vpow2.f32 %v10555_v2  ;;  %v10556_v24 = vmul.f32 -1.442695, %v6613_v10  ;;  %v10557_v19 = vmul.f32 -1.442695, %v6615_v34  ;;  %v6636_v2 = vrot.slane %v15185_v36, 1 }
0x1b74   : > { %11986 = vpow2.f32 %v10556_v24 }
0x1b75   : > { %11988 = vpow2.f32 %v10557_v19 }
0x1b7f   : > { %v11985_v9 = vpop.eup %11984 }
0x1b80   : > { %v6619_v27 = vadd.f32 1.0, %v11985_v9 }
0x1b81   : > { %v11987_v44 = vpop.eup %11986 }
0x1b82   : > { %11990 = vrcp.f32 %v6619_v27  ;;  %v6625_v41 = vadd.f32 1.0, %v11987_v44  ;;  %v11989_v23 = vpop.eup %11988 }
0x1b83   : > { %11992 = vtanh.f32 %v6614_v7  ;;  %v6632_v10 = vadd.f32 1.0, %v11989_v23 }
0x1b84   : > { %11994 = vrcp.f32 %v6625_v41 }
0x1b85   : > { %11996 = vrcp.f32 %v6632_v10  ;;  %v15293_v10 = vld [vmem:[%s16289_s13 + $0xe8] ss:$16 sps:$4 sm:$0xff]  }
0x1b8f   : > { %v11991_v33 = vpop.eup %11990 }
0x1b90   : > { %v11993_v16 = vpop.eup %11992 }
0x1b91   : > { %v11995_v0 = vpop.eup %11994  ;;  %v6639_v28 = vmul.f32 %v11993_v16, %v11991_v33 }
0x1b92   : > { %v6638_v21 = vmul.f32 %v11995_v0, %v6636_v2  ;;  %v11997_v24 = vpop.eup %11996  ;;  %v15287_v0 = vld [vmem:[%s16289_s13 + $0xe0] ss:$16 sps:$4 sm:$0xff]  }
0x1b94   : > { %v15231_v22 = vadd.f32 %v6639_v28, %v6638_v21  ;;  %v15299_v28 = vld [vmem:[%s16289_s13 + $0xc4] ss:$16 sps:$4 sm:$0xff]   ;;  %v15305_v21 = vld [vmem:[%s16289_s13 + $0xcc] ss:$16 sps:$4 sm:$0xff]  }
0x1b96   : > { %11998 = vtanh.f32 %v15231_v22 }
0x1ba3   : > { %v11999_v38 = vpop.eup %11998 }
0x1ba4   : > { %v15234_v34 = vmul.f32 %v11999_v38, %v11997_v24  ;;  %v15319_v24 = vld [vmem:[%s16289_s13 + $0xc8] ss:$16 sps:$4 sm:$0xff]   ;;  %v15325_v38 = vld [vmem:[%s16289_s13 + $0xa4] ss:$16 sps:$4 sm:$0xff]  }
0x1ba6   : > { %v6643_v7 = vpack.c.bf16 %v15234_v34, %v15234_v34 }
0x1ba8   : > { %v6645_v43 = vrot.slane %v6643_v7, 2  ;;  %v15331_v7 = vld [vmem:[%s16289_s13 + $0xac] ss:$16 sps:$4 sm:$0xff]  }
0x1baa   : > { %6680 = vmatmul.mubr.bf16.vlgmr.msra.gmra.mxu1 %v6645_v43  ;;  %6721 = vmatmul.mubr.bf16.vlgmr.msra.gmra.mxu0 %v6645_v43  ;;  %v15337_v43 = vld [vmem:[%s16289_s13 + $0xa0] ss:$16 sps:$4 sm:$0xff]  }
0x1bab   : > { %6779 = vmatpush1.bf16.msra.mxu1 %v14844_v35  ;;  %6820 = vmatpush1.bf16.msra.mxu0 %v14849_v63 }
0x1bac   : > { %6780 = vmatprep.subr.bf16.mxu1 %v14856_v4  ;;  %6821 = vmatprep.subr.bf16.mxu0 %v14861_v12 }
0x1bad   : > { %6810 = vmatprep.mubr.bf16.mxu1 %v16348_v39  ;;  %6851 = vmatprep.mubr.bf16.mxu0 %v16348_v39 }
0x1baf   : > { %6781 = vmatpush1.bf16.msra.mxu1 %v14870_v60  ;;  %6822 = vmatpush1.bf16.msra.mxu0 %v14875_v48 }
0x1bb0   : > { %6782 = vmatprep.subr.bf16.mxu1 %v14882_v42  ;;  %6823 = vmatprep.subr.bf16.mxu0 %v14887_v49 }
0x1bb3   : > { %6783 = vmatpush1.bf16.msra.mxu1 %v14896_v50  ;;  %6824 = vmatpush1.bf16.msra.mxu0 %v14901_v51 }
0x1bb4   : > { %6784 = vmatprep.subr.bf16.mxu1 %v14908_v52  ;;  %6825 = vmatprep.subr.bf16.mxu0 %v14913_v29 }
0x1bb7   : > { %6785 = vmatpush1.bf16.msra.mxu1 %v14920_v53  ;;  %6826 = vmatpush1.bf16.msra.mxu0 %v14925_v54 }
0x1bb8   : > { %6786 = vmatprep.subr.bf16.mxu1 %v14932_v55  ;;  %6827 = vmatprep.subr.bf16.mxu0 %v14937_v56 }
0x1bbb   : > { %6787 = vmatpush1.bf16.msra.mxu1 %v14944_v57  ;;  %6828 = vmatpush1.bf16.msra.mxu0 %v14949_v58 }
0x1bbc   : > { %6788 = vmatprep.subr.bf16.mxu1 %v14956_v31  ;;  %6829 = vmatprep.subr.bf16.mxu0 %v14961_v8 }
0x1bbf   : > { %6789 = vmatpush1.bf16.msra.mxu1 %v14968_v25  ;;  %6830 = vmatpush1.bf16.msra.mxu0 %v14973_v13 }
0x1bc0   : > { %6790 = vmatprep.subr.bf16.mxu1 %v14980_v3  ;;  %6831 = vmatprep.subr.bf16.mxu0 %v14985_v46 }
0x1bc3   : > { %6791 = vmatpush1.bf16.msra.mxu1 %v14992_v6  ;;  %6832 = vmatpush1.bf16.msra.mxu0 %v14997_v1  ;;  %v6765_v6 = vrot.slane %v15231_v22, 1  ;;  %v15313_v22 = vld [vmem:[%s16289_s13 + $0xc0] ss:$16 sps:$4 sm:$0xff]  }
0x1bc4   : > { %6792 = vmatprep.subr.bf16.mxu1 %v15004_v18  ;;  %6833 = vmatprep.subr.bf16.mxu0 %v15009_v14 }
0x1bc7   : > { %6793 = vmatpush1.bf16.msra.mxu1 %v15016_v37  ;;  %6834 = vmatpush1.bf16.msra.mxu0 %v15021_v45 }
0x1bc8   : > { %6907 = vmatprep.subr.bf16.mxu1 %v14834_v61  ;;  %6948 = vmatprep.subr.bf16.mxu0 %v14839_v17 }
0x1c6a   : > { %v6681_v35 = vpop.f32.mrf.mxu1  ;;  %v6722_v63 = vpop.f32.mrf.mxu0 }
0x1c6b   : > { %v6733_v4 = vrot.slane %v6681_v35, 5  ;;  %v6735_v55 = vrot.slane %v6722_v63, 5  ;;  %v15343_v35 = vld [vmem:[%s16289_s13 + $0xa8] ss:$16 sps:$4 sm:$0xff]   ;;  %v15349_v63 = vld [vmem:[%s16289_s13 + $0x84] ss:$16 sps:$4 sm:$0xff]  }
0x1c6c   : > { %v6683_v12 = vpop.f32.mrf.mxu1  ;;  %v6724_v60 = vpop.f32.mrf.mxu0 }
0x1c6d   : > { %v6741_v48 = vadd.f32 %v6733_v4, %v15079_v40  ;;  %v6734_v42 = vrot.slane %v6683_v12, 5  ;;  %v6736_v61 = vrot.slane %v6724_v60, 5  ;;  %v6743_v58 = vadd.f32 %v6735_v55, %v15090_v30  ;;  %v15355_v4 = vld [vmem:[%s16289_s13 + $0x8c] ss:$16 sps:$4 sm:$0xff]   ;;  %v15361_v12 = vld [vmem:[%s16289_s13 + $0x80] ss:$16 sps:$4 sm:$0xff]  }
0x1c6e   : > { %v6685_v49 = vpop.f32.mrf.mxu1  ;;  %v6726_v50 = vpop.f32.mrf.mxu0  ;;  %v15367_v60 = vld [vmem:[%s16289_s13 + $0x88] ss:$16 sps:$4 sm:$0xff]  }
0x1c6f   : > { %v10558_v51 = vmul.f32 -1.442695, %v6741_v48  ;;  %v6742_v52 = vadd.f32 %v6734_v42, %v15081_v59  ;;  %v6744_v17 = vadd.f32 %v6736_v61, %v15086_v26  ;;  %v15373_v48 = vld [vmem:[%s16289_s13 + $0x64] ss:$16 sps:$4 sm:$0xff]   ;;  %v15379_v42 = vld [vmem:[%s16289_s13 + $0x6c] ss:$16 sps:$4 sm:$0xff]  }
0x1c70   : > { %v6686_v29 = vpop.f32.mrf.mxu1  ;;  %v6727_v53 = vpop.f32.mrf.mxu0  ;;  %v15385_v49 = vld [vmem:[%s16289_s13 + $0x60] ss:$16 sps:$4 sm:$0xff]   ;;  %v15391_v50 = vld [vmem:[%s16289_s13 + $0x68] ss:$16 sps:$4 sm:$0xff]   ;;  %v15427_v61 = vld [vmem:[%s16289_s13 + $0x2c] ss:$16 sps:$4 sm:$0xff]  }
0x1c71   : > { %12000 = vpow2.f32 %v10558_v51  ;;  %v10559_v54 = vmul.f32 -1.442695, %v6742_v52  ;;  %v10560_v56 = vmul.f32 -1.442695, %v6744_v17  ;;  %v15397_v51 = vld [vmem:[%s16289_s13 + $0x44] ss:$16 sps:$4 sm:$0xff]  }
0x1c72   : > { %v15403_v52 = vld [vmem:[%s16289_s13 + $0x4c] ss:$16 sps:$4 sm:$0xff]   ;;  %v15409_v29 = vld [vmem:[%s16289_s13 + $0x40] ss:$16 sps:$4 sm:$0xff]   ;;  %v15415_v53 = vld [vmem:[%s16289_s13 + $0x48] ss:$16 sps:$4 sm:$0xff]  }
0x1c73   : > { %12002 = vpow2.f32 %v10559_v54  ;;  %v15421_v54 = vld [vmem:[%s16289_s13 + $0x24] ss:$16 sps:$4 sm:$0xff]   ;;  %v15433_v17 = vld [vmem:[%s16289_s13 + $0x20] ss:$16 sps:$4 sm:$0xff]   ;;  %v15439_v55 = vld [vmem:[%s16289_s13 + $0x28] ss:$16 sps:$4 sm:$0xff]  }
0x1c74   : > { %12004 = vpow2.f32 %v10560_v56  ;;  %v12220_v56 = vld [vmem:[%s16289_s13 + $0xe4] ss:$16 sps:$4 sm:$0xff]  }
0x1c7e   : > { %v12001_v57 = vpop.eup %12000 }
0x1c7f   : > { %v6748_v31 = vadd.f32 1.0, %v12001_v57  ;;  %v12221_v57 = vld [vmem:[%s16289_s13 + $0xec] ss:$16 sps:$4 sm:$0xff]  }
0x1c80   : > { %v12003_v8 = vpop.eup %12002 }
0x1c81   : > { %12006 = vrcp.f32 %v6748_v31  ;;  %v6754_v25 = vadd.f32 1.0, %v12003_v8  ;;  %v12005_v13 = vpop.eup %12004 }
0x1c82   : > { %12008 = vtanh.f32 %v6743_v58  ;;  %v6761_v36 = vadd.f32 1.0, %v12005_v13 }
0x1c83   : > { %12010 = vrcp.f32 %v6754_v25 }
0x1c84   : > { %12012 = vrcp.f32 %v6761_v36 }
0x1c8e   : > { %v12007_v3 = vpop.eup %12006 }
0x1c8f   : > { %v12009_v46 = vpop.eup %12008 }
0x1c90   : > { %v12011_v1 = vpop.eup %12010  ;;  %v6768_v19 = vmul.f32 %v12009_v46, %v12007_v3 }
0x1c91   : > { %v6767_v9 = vmul.f32 %v12011_v1, %v6765_v6  ;;  %v12013_v44 = vpop.eup %12012 }
0x1c93   : > { %v15277_v27 = vadd.f32 %v6768_v19, %v6767_v9 }
0x1c95   : > { %12014 = vtanh.f32 %v15277_v27 }
0x1ca2   : > { %v12015_v41 = vpop.eup %12014 }
0x1ca3   : > { %v15280_v23 = vmul.f32 %v12015_v41, %v12013_v44 }
0x1ca5   : > { %v6772_v33 = vpack.c.bf16 %v15280_v23, %v15280_v23 }
0x1ca7   : > { %v6774_v16 = vshrl.u32 %v6772_v33, 16 }
0x1ca9   : > { %v6776_v2 = vrot.slane %v6774_v16, 1 }
0x1cab   : > { %6811 = vmatmul.mubr.bf16.vlgmr.msra.gmra.mxu1 %v6776_v2  ;;  %6852 = vmatmul.mubr.bf16.vlgmr.msra.gmra.mxu0 %v6776_v2 }
0x1cac   : > { %6908 = vmatpush1.bf16.msra.mxu1 %v15287_v0  ;;  %6949 = vmatpush1.bf16.msra.mxu0 %v15293_v10 }
0x1cad   : > { %6909 = vmatprep.subr.bf16.mxu1 %v15299_v28  ;;  %6950 = vmatprep.subr.bf16.mxu0 %v15305_v21 }
0x1cae   : > { %6939 = vmatprep.mubr.bf16.mxu1 %v16348_v39  ;;  %6980 = vmatprep.mubr.bf16.mxu0 %v16348_v39 }
0x1cb0   : > { %6910 = vmatpush1.bf16.msra.mxu1 %v15313_v22  ;;  %6951 = vmatpush1.bf16.msra.mxu0 %v15319_v24 }
0x1cb1   : > { %6911 = vmatprep.subr.bf16.mxu1 %v15325_v38  ;;  %6952 = vmatprep.subr.bf16.mxu0 %v15331_v7 }
0x1cb4   : > { %6912 = vmatpush1.bf16.msra.mxu1 %v15337_v43  ;;  %6953 = vmatpush1.bf16.msra.mxu0 %v15343_v35 }
0x1cb5   : > { %6913 = vmatprep.subr.bf16.mxu1 %v15349_v63  ;;  %6954 = vmatprep.subr.bf16.mxu0 %v15355_v4 }
0x1cb8   : > { %6914 = vmatpush1.bf16.msra.mxu1 %v15361_v12  ;;  %6955 = vmatpush1.bf16.msra.mxu0 %v15367_v60 }
0x1cb9   : > { %6915 = vmatprep.subr.bf16.mxu1 %v15373_v48  ;;  %6956 = vmatprep.subr.bf16.mxu0 %v15379_v42 }
0x1cbc   : > { %6916 = vmatpush1.bf16.msra.mxu1 %v15385_v49  ;;  %6957 = vmatpush1.bf16.msra.mxu0 %v15391_v50 }
0x1cbd   : > { %6917 = vmatprep.subr.bf16.mxu1 %v15397_v51  ;;  %6958 = vmatprep.subr.bf16.mxu0 %v15403_v52 }
0x1cc0   : > { %6918 = vmatpush1.bf16.msra.mxu1 %v15409_v29  ;;  %6959 = vmatpush1.bf16.msra.mxu0 %v15415_v53 }
0x1cc1   : > { %6919 = vmatprep.subr.bf16.mxu1 %v15421_v54  ;;  %6960 = vmatprep.subr.bf16.mxu0 %v15427_v61 }
0x1cc4   : > { %6920 = vmatpush1.bf16.msra.mxu1 %v15433_v17  ;;  %6961 = vmatpush1.bf16.msra.mxu0 %v15439_v55 }
0x1cc5   : > { %6921 = vmatprep.subr.bf16.mxu1 %v15004_v18  ;;  %6962 = vmatprep.subr.bf16.mxu0 %v15009_v14 }
0x1cc8   : > { %6922 = vmatpush1.bf16.msra.mxu1 %v15016_v37  ;;  %6963 = vmatpush1.bf16.msra.mxu0 %v15021_v45 }
0x1cc9   : > { %7037 = vmatprep.subr.bf16.mxu1 %v12220_v56  ;;  %7078 = vmatprep.subr.bf16.mxu0 %v12221_v57 }
0x1d6b   : > { %v6812_v58 = vpop.f32.mrf.mxu1  ;;  %v6853_v31 = vpop.f32.mrf.mxu0 }
0x1d6c   : > { %v6864_v8 = vrot.slane %v6812_v58, 6  ;;  %v6866_v44 = vrot.slane %v6853_v31, 6 }
0x1d6d   : > { %v6814_v18 = vpop.f32.mrf.mxu1  ;;  %v6855_v25 = vpop.f32.mrf.mxu0 }
0x1d6e   : > { %v6872_v14 = vadd.f32 %v6864_v8, %v15079_v40  ;;  %v6865_v37 = vrot.slane %v6814_v18, 6  ;;  %v6867_v19 = vrot.slane %v6855_v25, 6  ;;  %v6874_v16 = vadd.f32 %v6866_v44, %v15090_v30 }
0x1d6f   : > { %v6816_v13 = vpop.f32.mrf.mxu1  ;;  %v6857_v45 = vpop.f32.mrf.mxu0 }
0x1d70   : > { %v10561_v3 = vmul.f32 -1.442695, %v6872_v14  ;;  %v6873_v46 = vadd.f32 %v6865_v37, %v15081_v59  ;;  %v6875_v9 = vadd.f32 %v6867_v19, %v15086_v26  ;;  %v6896_v14 = vrot.slane %v15277_v27, 1  ;;  %v12222_v27 = vld [vmem:[%s16289_s13 + $0x4] ss:$16 sps:$4 sm:$0xff]  }
0x1d71   : > { %v6817_v6 = vpop.f32.mrf.mxu1  ;;  %v6858_v1 = vpop.f32.mrf.mxu0 }
0x1d72   : > { %12016 = vpow2.f32 %v10561_v3  ;;  %v10562_v36 = vmul.f32 -1.442695, %v6873_v46  ;;  %v10563_v41 = vmul.f32 -1.442695, %v6875_v9 }
0x1d74   : > { %12018 = vpow2.f32 %v10562_v36 }
0x1d75   : > { %12020 = vpow2.f32 %v10563_v41 }
0x1d7f   : > { %v12017_v33 = vpop.eup %12016 }
0x1d80   : > { %v6879_v2 = vadd.f32 1.0, %v12017_v33 }
0x1d81   : > { %v12019_v56 = vpop.eup %12018 }
0x1d82   : > { %12022 = vrcp.f32 %v6879_v2  ;;  %v6885_v57 = vadd.f32 1.0, %v12019_v56  ;;  %v12021_v58 = vpop.eup %12020 }
0x1d83   : > { %12024 = vtanh.f32 %v6874_v16  ;;  %v6892_v37 = vadd.f32 1.0, %v12021_v58 }
0x1d84   : > { %12026 = vrcp.f32 %v6885_v57 }
0x1d85   : > { %12028 = vrcp.f32 %v6892_v37  ;;  %v11362_v37 = vld [vmem:[%s16291_s15 + $0x154] ss:$24 sps:$4 sm:$0xff]  }
0x1d8f   : > { %v12023_v8 = vpop.eup %12022 }
0x1d90   : > { %v12025_v18 = vpop.eup %12024 }
0x1d91   : > { %v12027_v25 = vpop.eup %12026  ;;  %v6899_v13 = vmul.f32 %v12025_v18, %v12023_v8 }
0x1d92   : > { %v6898_v31 = vmul.f32 %v12027_v25, %v6896_v14  ;;  %v12029_v3 = vpop.eup %12028 }
0x1d94   : > { %v15457_v45 = vadd.f32 %v6899_v13, %v6898_v31  ;;  %v11360_v13 = vld [vmem:[%s16291_s15 + $0x150] ss:$24 sps:$4 sm:$0xff]   ;;  %v11365_v31 = vld [vmem:[%s16291_s15 + $0x15c] ss:$24 sps:$4 sm:$0xff]  }
0x1d96   : > { %12030 = vtanh.f32 %v15457_v45  ;;  %v7025_v41 = vrot.slane %v15457_v45, 1  ;;  %v11363_v45 = vld [vmem:[%s16291_s15 + $0x158] ss:$24 sps:$4 sm:$0xff]  }
0x1da3   : > { %v12031_v46 = vpop.eup %12030 }
0x1da4   : > { %v15460_v6 = vmul.f32 %v12031_v46, %v12029_v3  ;;  %v11368_v3 = vld [vmem:[%s16291_s15 + $0x124] ss:$24 sps:$4 sm:$0xff]   ;;  %v11366_v46 = vld [vmem:[%s16291_s15 + $0x120] ss:$24 sps:$4 sm:$0xff]  }
0x1da6   : > { %v6903_v1 = vpack.c.bf16 %v15460_v6, %v15460_v6 }
0x1da8   : > { %v6905_v36 = vrot.slane %v6903_v1, 1  ;;  %v11371_v1 = vld [vmem:[%s16291_s15 + $0x12c] ss:$24 sps:$4 sm:$0xff]  }
0x1daa   : > { %6940 = vmatmul.mubr.bf16.vlgmr.msra.gmra.mxu1 %v6905_v36  ;;  %6981 = vmatmul.mubr.bf16.vlgmr.msra.gmra.mxu0 %v6905_v36  ;;  %v11369_v36 = vld [vmem:[%s16291_s15 + $0x128] ss:$24 sps:$4 sm:$0xff]  }
0x1dab   : > { %7038 = vmatpush1.bf16.msra.mxu1 %v15287_v0  ;;  %7079 = vmatpush1.bf16.msra.mxu0 %v15293_v10  ;;  %v12223_v0 = vld [vmem:[%s16289_s13 + $0xc] ss:$16 sps:$4 sm:$0xff]   ;;  %v12224_v10 = vld [vmem:[%s16289_s13] ss:$16 sps:$4 sm:$0xff]  }
0x1dac   : > { %7039 = vmatprep.subr.bf16.mxu1 %v15299_v28  ;;  %7080 = vmatprep.subr.bf16.mxu0 %v15305_v21  ;;  %v12225_v28 = vld [vmem:[%s16289_s13 + $0x8] ss:$16 sps:$4 sm:$0xff]  }
0x1dad   : > { %7069 = vmatprep.mubr.bf16.mxu1 %v16348_v39  ;;  %7110 = vmatprep.mubr.bf16.mxu0 %v16348_v39 }
0x1daf   : > { %7040 = vmatpush1.bf16.msra.mxu1 %v15313_v22  ;;  %7081 = vmatpush1.bf16.msra.mxu0 %v15319_v24 }
0x1db0   : > { %7041 = vmatprep.subr.bf16.mxu1 %v15325_v38  ;;  %7082 = vmatprep.subr.bf16.mxu0 %v15331_v7 }
0x1db3   : > { %7042 = vmatpush1.bf16.msra.mxu1 %v15337_v43  ;;  %7083 = vmatpush1.bf16.msra.mxu0 %v15343_v35 }
0x1db4   : > { %7043 = vmatprep.subr.bf16.mxu1 %v15349_v63  ;;  %7084 = vmatprep.subr.bf16.mxu0 %v15355_v4 }
0x1db7   : > { %7044 = vmatpush1.bf16.msra.mxu1 %v15361_v12  ;;  %7085 = vmatpush1.bf16.msra.mxu0 %v15367_v60 }
0x1db8   : > { %7045 = vmatprep.subr.bf16.mxu1 %v15373_v48  ;;  %7086 = vmatprep.subr.bf16.mxu0 %v15379_v42 }
0x1dbb   : > { %7046 = vmatpush1.bf16.msra.mxu1 %v15385_v49  ;;  %7087 = vmatpush1.bf16.msra.mxu0 %v15391_v50 }
0x1dbc   : > { %7047 = vmatprep.subr.bf16.mxu1 %v15397_v51  ;;  %7088 = vmatprep.subr.bf16.mxu0 %v15403_v52 }
0x1dbf   : > { %7048 = vmatpush1.bf16.msra.mxu1 %v15409_v29  ;;  %7089 = vmatpush1.bf16.msra.mxu0 %v15415_v53 }
0x1dc0   : > { %7049 = vmatprep.subr.bf16.mxu1 %v15421_v54  ;;  %7090 = vmatprep.subr.bf16.mxu0 %v15427_v61 }
0x1dc3   : > { %7050 = vmatpush1.bf16.msra.mxu1 %v15433_v17  ;;  %7091 = vmatpush1.bf16.msra.mxu0 %v15439_v55 }
0x1dc4   : > { %7051 = vmatprep.subr.bf16.mxu1 %v12222_v27  ;;  %7092 = vmatprep.subr.bf16.mxu0 %v12223_v0  ;;  %v11374_v27 = vld [vmem:[%s16291_s15 + $0xf4] ss:$24 sps:$4 sm:$0xff]   ;;  %v11372_v0 = vld [vmem:[%s16291_s15 + $0xf0] ss:$24 sps:$4 sm:$0xff]  }
0x1dc7   : > { %7052 = vmatpush1.bf16.msra.mxu1 %v12224_v10  ;;  %7093 = vmatpush1.bf16.msra.mxu0 %v12225_v28  ;;  %v11377_v10 = vld [vmem:[%s16291_s15 + $0xfc] ss:$24 sps:$4 sm:$0xff]   ;;  %v11375_v28 = vld [vmem:[%s16291_s15 + $0xf8] ss:$24 sps:$4 sm:$0xff]  }
0x1dc8   : > { %7767 = vmatprep.subr.bf16.mxu1 %v11362_v37  ;;  %7808 = vmatprep.subr.bf16.mxu0 %v11365_v31  ;;  %v11429_v37 = vld [vmem:[%s16291_s15 + $0x248] ss:$24 sps:$4 sm:$0xff]  }
0x1dc9   : > { %v11432_v31 = vld [vmem:[%s16291_s15 + $0x210] ss:$24 sps:$4 sm:$0xff]  }
0x1e6a   : > { %v6941_v21 = vpop.f32.mrf.mxu1  ;;  %v6982_v22 = vpop.f32.mrf.mxu0 }
0x1e6b   : > { %v6993_v24 = vrot.slane %v6941_v21, 7  ;;  %v6995_v52 = vrot.slane %v6982_v22, 7  ;;  %v11380_v21 = vld [vmem:[%s16291_s15 + $0xc4] ss:$24 sps:$4 sm:$0xff]   ;;  %v11378_v22 = vld [vmem:[%s16291_s15 + $0xc0] ss:$24 sps:$4 sm:$0xff]  }
0x1e6c   : > { %v6943_v38 = vpop.f32.mrf.mxu1  ;;  %v6984_v7 = vpop.f32.mrf.mxu0 }
0x1e6d   : > { %v7001_v43 = vadd.f32 %v6993_v24, %v15079_v40  ;;  %v6994_v35 = vrot.slane %v6943_v38, 7  ;;  %v6996_v50 = vrot.slane %v6984_v7, 7  ;;  %v7003_v54 = vadd.f32 %v6995_v52, %v15090_v30  ;;  %v11383_v24 = vld [vmem:[%s16291_s15 + $0xcc] ss:$24 sps:$4 sm:$0xff]   ;;  %v11381_v38 = vld [vmem:[%s16291_s15 + $0xc8] ss:$24 sps:$4 sm:$0xff]  }
0x1e6e   : > { %v6945_v63 = vpop.f32.mrf.mxu1  ;;  %v6986_v4 = vpop.f32.mrf.mxu0  ;;  %v11386_v7 = vld [vmem:[%s16291_s15 + $0x94] ss:$24 sps:$4 sm:$0xff]   ;;  %v11404_v52 = vld [vmem:[%s16291_s15 + $0x4] ss:$24 sps:$4 sm:$0xff]  }
0x1e6f   : > { %v10564_v12 = vmul.f32 -1.442695, %v7001_v43  ;;  %v7002_v60 = vadd.f32 %v6994_v35, %v15081_v59  ;;  %v7004_v51 = vadd.f32 %v6996_v50, %v15086_v26  ;;  %v11384_v43 = vld [vmem:[%s16291_s15 + $0x90] ss:$24 sps:$4 sm:$0xff]   ;;  %v11389_v35 = vld [vmem:[%s16291_s15 + $0x9c] ss:$24 sps:$4 sm:$0xff]  }
0x1e70   : > { %v6946_v48 = vpop.f32.mrf.mxu1  ;;  %v6987_v42 = vpop.f32.mrf.mxu0  ;;  %v11387_v63 = vld [vmem:[%s16291_s15 + $0x98] ss:$24 sps:$4 sm:$0xff]   ;;  %v11392_v4 = vld [vmem:[%s16291_s15 + $0x64] ss:$24 sps:$4 sm:$0xff]  }
0x1e71   : > { %12032 = vpow2.f32 %v10564_v12  ;;  %v10565_v49 = vmul.f32 -1.442695, %v7002_v60  ;;  %v10566_v29 = vmul.f32 -1.442695, %v7004_v51  ;;  %v11390_v12 = vld [vmem:[%s16291_s15 + $0x60] ss:$24 sps:$4 sm:$0xff]  }
0x1e72   : > { %v11395_v60 = vld [vmem:[%s16291_s15 + $0x6c] ss:$24 sps:$4 sm:$0xff]   ;;  %v11393_v48 = vld [vmem:[%s16291_s15 + $0x68] ss:$24 sps:$4 sm:$0xff]   ;;  %v11401_v50 = vld [vmem:[%s16291_s15 + $0x3c] ss:$24 sps:$4 sm:$0xff]  }
0x1e73   : > { %12034 = vpow2.f32 %v10565_v49  ;;  %v11398_v42 = vld [vmem:[%s16291_s15 + $0x34] ss:$24 sps:$4 sm:$0xff]   ;;  %v11396_v49 = vld [vmem:[%s16291_s15 + $0x30] ss:$24 sps:$4 sm:$0xff]  }
0x1e74   : > { %12036 = vpow2.f32 %v10566_v29  ;;  %v11399_v51 = vld [vmem:[%s16291_s15 + $0x38] ss:$24 sps:$4 sm:$0xff]  }
0x1e75   : > { %v11402_v29 = vld [vmem:[%s16291_s15] ss:$24 sps:$4 sm:$0xff]  }
0x1e7e   : > { %v12033_v53 = vpop.eup %12032 }
0x1e7f   : > { %v7008_v61 = vadd.f32 1.0, %v12033_v53  ;;  %v11407_v53 = vld [vmem:[%s16291_s15 + $0xc] ss:$24 sps:$4 sm:$0xff]  }
0x1e80   : > { %v12035_v17 = vpop.eup %12034 }
0x1e81   : > { %12038 = vrcp.f32 %v7008_v61  ;;  %v7014_v55 = vadd.f32 1.0, %v12035_v17  ;;  %v12037_v19 = vpop.eup %12036  ;;  %v11410_v61 = vld [vmem:[%s16291_s15 + $0x2d4] ss:$24 sps:$4 sm:$0xff]   ;;  %v11408_v17 = vld [vmem:[%s16291_s15 + $0x2d0] ss:$24 sps:$4 sm:$0xff]  }
0x1e82   : > { %12040 = vtanh.f32 %v7003_v54  ;;  %v7021_v16 = vadd.f32 1.0, %v12037_v19  ;;  %v11405_v54 = vld [vmem:[%s16291_s15 + $0x8] ss:$24 sps:$4 sm:$0xff]   ;;  %v11411_v19 = vld [vmem:[%s16291_s15 + $0x2d8] ss:$24 sps:$4 sm:$0xff]  }
0x1e83   : > { %12042 = vrcp.f32 %v7014_v55  ;;  %v11413_v55 = vld [vmem:[%s16291_s15 + $0x2dc] ss:$24 sps:$4 sm:$0xff]  }
0x1e84   : > { %12044 = vrcp.f32 %v7021_v16  ;;  %v11422_v16 = vld [vmem:[%s16291_s15 + $0x274] ss:$24 sps:$4 sm:$0xff]  }
0x1e8e   : > { %v12039_v9 = vpop.eup %12038 }
0x1e8f   : > { %v12041_v44 = vpop.eup %12040 }
0x1e90   : > { %v12043_v33 = vpop.eup %12042  ;;  %v7028_v2 = vmul.f32 %v12041_v44, %v12039_v9  ;;  %v11416_v9 = vld [vmem:[%s16291_s15 + $0x2a4] ss:$24 sps:$4 sm:$0xff]   ;;  %v11414_v44 = vld [vmem:[%s16291_s15 + $0x2a0] ss:$24 sps:$4 sm:$0xff]  }
0x1e91   : > { %v7027_v56 = vmul.f32 %v12043_v33, %v7025_v41  ;;  %v12045_v58 = vpop.eup %12044  ;;  %v11419_v41 = vld [vmem:[%s16291_s15 + $0x2ac] ss:$24 sps:$4 sm:$0xff]   ;;  %v11417_v33 = vld [vmem:[%s16291_s15 + $0x2a8] ss:$24 sps:$4 sm:$0xff]  }
0x1e93   : > { %v15509_v57 = vadd.f32 %v7028_v2, %v7027_v56  ;;  %v11420_v2 = vld [vmem:[%s16291_s15 + $0x270] ss:$24 sps:$4 sm:$0xff]   ;;  %v11425_v56 = vld [vmem:[%s16291_s15 + $0x27c] ss:$24 sps:$4 sm:$0xff]  }
0x1e95   : > { %12046 = vtanh.f32 %v15509_v57 }
0x1ea2   : > { %v12047_v8 = vpop.eup %12046 }
0x1ea3   : > { %v15512_v18 = vmul.f32 %v12047_v8, %v12045_v58  ;;  %v11423_v58 = vld [vmem:[%s16291_s15 + $0x278] ss:$24 sps:$4 sm:$0xff]   ;;  %v11428_v8 = vld [vmem:[%s16291_s15 + $0x244] ss:$24 sps:$4 sm:$0xff]  }
0x1ea5   : > { %v7032_v14 = vpack.c.bf16 %v15512_v18, %v15512_v18 }
0x1ea7   : > { %v7034_v25 = vshrl.u32 %v7032_v14, 16  ;;  %v11426_v14 = vld [vmem:[%s16291_s15 + $0x240] ss:$24 sps:$4 sm:$0xff]  }
0x1ea9   : > { %7070 = vmatmul.mubr.bf16.vlgmr.msra.gmra.mxu1 %v7034_v25  ;;  %7111 = vmatmul.mubr.bf16.vlgmr.msra.gmra.mxu0 %v7034_v25  ;;  %v11431_v25 = vld [vmem:[%s16291_s15 + $0x24c] ss:$24 sps:$4 sm:$0xff]  }
0x1eaa   : > { %7768 = vmatpush1.bf16.msra.mxu1 %v11360_v13  ;;  %7809 = vmatpush1.bf16.msra.mxu0 %v11363_v45  ;;  %v11434_v13 = vld [vmem:[%s16291_s15 + $0x214] ss:$24 sps:$4 sm:$0xff]  }
0x1eab   : > { %7769 = vmatprep.subr.bf16.mxu1 %v11368_v3  ;;  %7810 = vmatprep.subr.bf16.mxu0 %v11371_v1  ;;  %v11437_v45 = vld [vmem:[%s16291_s15 + $0x21c] ss:$24 sps:$4 sm:$0xff]   ;;  %v11435_v3 = vld [vmem:[%s16291_s15 + $0x218] ss:$24 sps:$4 sm:$0xff]  }
0x1eac   : > { %v11438_v1 = vld [vmem:[%s16291_s15 + $0x1e0] ss:$24 sps:$4 sm:$0xff]  }
0x1eae   : > { %7770 = vmatpush1.bf16.msra.mxu1 %v11366_v46  ;;  %7811 = vmatpush1.bf16.msra.mxu0 %v11369_v36  ;;  %v11440_v46 = vld [vmem:[%s16291_s15 + $0x1e4] ss:$24 sps:$4 sm:$0xff]  }
0x1eaf   : > { %7771 = vmatprep.subr.bf16.mxu1 %v11374_v27  ;;  %7812 = vmatprep.subr.bf16.mxu0 %v11377_v10  ;;  %v11443_v36 = vld [vmem:[%s16291_s15 + $0x1ec] ss:$24 sps:$4 sm:$0xff]   ;;  %v11441_v27 = vld [vmem:[%s16291_s15 + $0x1e8] ss:$24 sps:$4 sm:$0xff]  }
0x1eb0   : > { %v11444_v10 = vld [vmem:[%s16291_s15 + $0x1b0] ss:$24 sps:$4 sm:$0xff]  }
0x1eb2   : > { %7772 = vmatpush1.bf16.msra.mxu1 %v11372_v0  ;;  %7813 = vmatpush1.bf16.msra.mxu0 %v11375_v28  ;;  %v11446_v0 = vld [vmem:[%s16291_s15 + $0x1b4] ss:$24 sps:$4 sm:$0xff]  }
0x1eb3   : > { %7773 = vmatprep.subr.bf16.mxu1 %v11380_v21  ;;  %7814 = vmatprep.subr.bf16.mxu0 %v11383_v24  ;;  %v11449_v28 = vld [vmem:[%s16291_s15 + $0x1bc] ss:$24 sps:$4 sm:$0xff]   ;;  %v11447_v21 = vld [vmem:[%s16291_s15 + $0x1b8] ss:$24 sps:$4 sm:$0xff]   ;;  %v11455_v24 = vld [vmem:[%s16291_s15 + $0x18c] ss:$24 sps:$4 sm:$0xff]  }
0x1eb6   : > { %7774 = vmatpush1.bf16.msra.mxu1 %v11378_v22  ;;  %7815 = vmatpush1.bf16.msra.mxu0 %v11381_v38  ;;  %v11452_v22 = vld [vmem:[%s16291_s15 + $0x184] ss:$24 sps:$4 sm:$0xff]   ;;  %v11450_v38 = vld [vmem:[%s16291_s15 + $0x180] ss:$24 sps:$4 sm:$0xff]  }
0x1eb7   : > { %7775 = vmatprep.subr.bf16.mxu1 %v11386_v7  ;;  %7816 = vmatprep.subr.bf16.mxu0 %v11389_v35  ;;  %v11453_v7 = vld [vmem:[%s16291_s15 + $0x188] ss:$24 sps:$4 sm:$0xff]   ;;  %v16354_v35 = vmov 0.0  }
0x1eba   : > { %7776 = vmatpush1.bf16.msra.mxu1 %v11384_v43  ;;  %7817 = vmatpush1.bf16.msra.mxu0 %v11387_v63  ;;  %v11458_v43 = vld [vmem:[%s16291_s15 + $0x164] ss:$24 sps:$4 sm:$0xff]  }
0x1ebb   : > { %7777 = vmatprep.subr.bf16.mxu1 %v11392_v4  ;;  %7818 = vmatprep.subr.bf16.mxu0 %v11395_v60 }
0x1ebe   : > { %7778 = vmatpush1.bf16.msra.mxu1 %v11390_v12  ;;  %7819 = vmatpush1.bf16.msra.mxu0 %v11393_v48 }
0x1ebf   : > { %7779 = vmatprep.subr.bf16.mxu1 %v11398_v42  ;;  %7820 = vmatprep.subr.bf16.mxu0 %v11401_v50 }
0x1ec2   : > { %7780 = vmatpush1.bf16.msra.mxu1 %v11396_v49  ;;  %7821 = vmatpush1.bf16.msra.mxu0 %v11399_v51 }
0x1ec3   : > { %7781 = vmatprep.subr.bf16.mxu1 %v11404_v52  ;;  %7822 = vmatprep.subr.bf16.mxu0 %v11407_v53 }
0x1ec6   : > { %7782 = vmatpush1.bf16.msra.mxu1 %v11402_v29  ;;  %7823 = vmatpush1.bf16.msra.mxu0 %v11405_v54 }
0x1ec7   : > { %7783 = vmatprep.subr.bf16.mxu1 %v11410_v61  ;;  %7824 = vmatprep.subr.bf16.mxu0 %v11413_v55 }
0x1eca   : > { %7784 = vmatpush2.bf16.msra.mxu1 %v11408_v17  ;;  %7825 = vmatpush2.bf16.msra.mxu0 %v11411_v19 }
0x1ecb   : > { %7785 = vmatprep.subr.bf16.mxu1 %v11416_v9  ;;  %7826 = vmatprep.subr.bf16.mxu0 %v11419_v41 }
0x1ece   : > { %7786 = vmatpush2.bf16.msra.mxu1 %v11414_v44  ;;  %7827 = vmatpush2.bf16.msra.mxu0 %v11417_v33  ;;  %v7143_v33 = vrot.slane %v15509_v57, 1 }
0x1ecf   : > { %7787 = vmatprep.subr.bf16.mxu1 %v11422_v16  ;;  %7828 = vmatprep.subr.bf16.mxu0 %v11425_v56 }
0x1ed2   : > { %7788 = vmatpush2.bf16.msra.mxu1 %v11420_v2  ;;  %7829 = vmatpush2.bf16.msra.mxu0 %v11423_v58 }
0x1ed3   : > { %7789 = vmatprep.subr.bf16.mxu1 %v11428_v8  ;;  %7830 = vmatprep.subr.bf16.mxu0 %v11431_v25 }
0x1ed6   : > { %7790 = vmatpush2.bf16.msra.mxu1 %v11426_v14  ;;  %7831 = vmatpush2.bf16.msra.mxu0 %v11429_v37 }
0x1ed7   : > { %7791 = vmatprep.subr.bf16.mxu1 %v11434_v13  ;;  %7832 = vmatprep.subr.bf16.mxu0 %v11437_v45 }
0x1eda   : > { %7792 = vmatpush2.bf16.msra.mxu1 %v11432_v31  ;;  %7833 = vmatpush2.bf16.msra.mxu0 %v11435_v3 }
0x1edb   : > { %7793 = vmatprep.subr.bf16.mxu1 %v11440_v46  ;;  %7834 = vmatprep.subr.bf16.mxu0 %v11443_v36  ;;  %v11468_v36 = vld [vmem:[%s16291_s15 + $0xa0] ss:$24 sps:$4 sm:$0xff]  }
0x1ede   : > { %7794 = vmatpush2.bf16.msra.mxu1 %v11438_v1  ;;  %7835 = vmatpush2.bf16.msra.mxu0 %v11441_v27  ;;  %v11470_v1 = vld [vmem:[%s16291_s15 + $0xa4] ss:$24 sps:$4 sm:$0xff]   ;;  %v11473_v27 = vld [vmem:[%s16291_s15 + $0x74] ss:$24 sps:$4 sm:$0xff]  }
0x1edf   : > { %7795 = vmatprep.subr.bf16.mxu1 %v11446_v0  ;;  %7836 = vmatprep.subr.bf16.mxu0 %v11449_v28  ;;  %v11471_v0 = vld [vmem:[%s16291_s15 + $0x70] ss:$24 sps:$4 sm:$0xff]   ;;  %v11474_v28 = vld [vmem:[%s16291_s15 + $0x40] ss:$24 sps:$4 sm:$0xff]  }
0x1ee2   : > { %7796 = vmatpush2.bf16.msra.mxu1 %v11444_v10  ;;  %7837 = vmatpush2.bf16.msra.mxu0 %v11447_v21  ;;  %v11476_v10 = vld [vmem:[%s16291_s15 + $0x44] ss:$24 sps:$4 sm:$0xff]   ;;  %v11479_v21 = vld [vmem:[%s16291_s15 + $0x14] ss:$24 sps:$4 sm:$0xff]  }
0x1ee3   : > { %7797 = vmatprep.subr.bf16.mxu1 %v11452_v22  ;;  %7838 = vmatprep.subr.bf16.mxu0 %v11455_v24  ;;  %v11477_v22 = vld [vmem:[%s16291_s15 + $0x10] ss:$24 sps:$4 sm:$0xff]   ;;  %v11482_v24 = vld [vmem:[%s16291_s15 + $0x2e4] ss:$24 sps:$4 sm:$0xff]  }
0x1ee6   : > { %7798 = vmatpush2.bf16.msra.mxu1 %v11450_v38  ;;  %7839 = vmatpush2.bf16.msra.mxu0 %v11453_v7  ;;  %v11480_v38 = vld [vmem:[%s16291_s15 + $0x2e0] ss:$24 sps:$4 sm:$0xff]   ;;  %v11485_v7 = vld [vmem:[%s16291_s15 + $0x2b4] ss:$24 sps:$4 sm:$0xff]  }
0x1ee7   : > { %10816 = vmatprep.subr.mxu0 %v16354_v35  ;;  %7849 = vmatprep.subr.bf16.mxu1 %v11458_v43  ;;  %v11483_v43 = vld [vmem:[%s16291_s15 + $0x2b0] ss:$24 sps:$4 sm:$0xff]  }
0x1f69   : > { %v7071_v63 = vpop.f32.mrf.mxu1  ;;  %v7112_v4 = vpop.f32.mrf.mxu0 }
0x1f6a   : > { %v7119_v12 = vadd.f32 %v7071_v63, %v15079_v40  ;;  %v7121_v55 = vadd.f32 %v7112_v4, %v15090_v30  ;;  %v11488_v63 = vld [vmem:[%s16291_s15 + $0x284] ss:$24 sps:$4 sm:$0xff]   ;;  %v11486_v4 = vld [vmem:[%s16291_s15 + $0x280] ss:$24 sps:$4 sm:$0xff]  }
0x1f6b   : > { %v7073_v60 = vpop.f32.mrf.mxu1  ;;  %v7114_v48 = vpop.f32.mrf.mxu0 }
0x1f6c   : > { %v10567_v42 = vmul.f32 -1.442695, %v7119_v12  ;;  %v7120_v49 = vadd.f32 %v7073_v60, %v15081_v59  ;;  %v7122_v54 = vadd.f32 %v7114_v48, %v15086_v26  ;;  %v11491_v12 = vld [vmem:[%s16291_s15 + $0x254] ss:$24 sps:$4 sm:$0xff]   ;;  %v11489_v60 = vld [vmem:[%s16291_s15 + $0x250] ss:$24 sps:$4 sm:$0xff]  }
0x1f6d   : > { %v7075_v50 = vpop.f32.mrf.mxu1  ;;  %v7116_v51 = vpop.f32.mrf.mxu0  ;;  %v11494_v48 = vld [vmem:[%s16291_s15 + $0x224] ss:$24 sps:$4 sm:$0xff]  }
0x1f6e   : > { %12048 = vpow2.f32 %v10567_v42  ;;  %v10568_v52 = vmul.f32 -1.442695, %v7120_v49  ;;  %v10569_v61 = vmul.f32 -1.442695, %v7122_v54  ;;  %v11492_v42 = vld [vmem:[%s16291_s15 + $0x220] ss:$24 sps:$4 sm:$0xff]  }
0x1f6f   : > { %v7076_v29 = vpop.f32.mrf.mxu1  ;;  %v7117_v53 = vpop.f32.mrf.mxu0  ;;  %v11497_v49 = vld [vmem:[%s16291_s15 + $0x1f4] ss:$24 sps:$4 sm:$0xff]   ;;  %v11495_v50 = vld [vmem:[%s16291_s15 + $0x1f0] ss:$24 sps:$4 sm:$0xff]   ;;  %v11500_v51 = vld [vmem:[%s16291_s15 + $0x1c4] ss:$24 sps:$4 sm:$0xff]  }
0x1f70   : > { %12050 = vpow2.f32 %v10568_v52  ;;  %v11498_v52 = vld [vmem:[%s16291_s15 + $0x1c0] ss:$24 sps:$4 sm:$0xff]   ;;  %v11503_v29 = vld [vmem:[%s16291_s15 + $0x194] ss:$24 sps:$4 sm:$0xff]   ;;  %v11501_v53 = vld [vmem:[%s16291_s15 + $0x190] ss:$24 sps:$4 sm:$0xff]  }
0x1f71   : > { %12052 = vpow2.f32 %v10569_v61  ;;  %v15837_v54 = vld [vmem:[%s16292_s16] sm:$0x3f] }
0x1f72   : > { %v7268_v61 = vrot.slane %v15837_v54, %v16353_v20 }
0x1f7b   : > { %v12049_v17 = vpop.eup %12048 }
0x1f7c   : > { %v7126_v19 = vadd.f32 1.0, %v12049_v17  ;;  %v7260_v17 = vrot.slane %v15837_v54, %v12698_v5 }
0x1f7d   : > { %v12051_v40 = vpop.eup %12050 }
0x1f7e   : > { %12054 = vrcp.f32 %v7126_v19  ;;  %v7132_v9 = vadd.f32 1.0, %v12051_v40  ;;  %v12053_v59 = vpop.eup %12052 }
0x1f7f   : > { %12056 = vtanh.f32 %v7121_v55  ;;  %v7139_v2 = vadd.f32 1.0, %v12053_v59 }
0x1f80   : > { %12058 = vrcp.f32 %v7132_v9 }
0x1f81   : > { %12060 = vrcp.f32 %v7139_v2  ;;  %v16355_v2 = vld [vmem:[#allocation3_spill] sm:$0xff] }
0x1f8b   : > { %v12055_v44 = vpop.eup %12054 }
0x1f8c   : > { %v12057_v41 = vpop.eup %12056 }
0x1f8d   : > { %v12059_v16 = vpop.eup %12058  ;;  %v7146_v56 = vmul.f32 %v12057_v41, %v12055_v44 }
0x1f8e   : > { %v7145_v26 = vmul.f32 %v12059_v16, %v7143_v33  ;;  %v12061_v30 = vpop.eup %12060 }
0x1f90   : > { %v7147_v58 = vadd.f32 %v7146_v56, %v7145_v26  ;;  %v7275_v56 = vsub.s32 4, %v16355_v2 }
0x1f92   : > { %12062 = vtanh.f32 %v7147_v58  ;;  %v7276_v26 = vrot.slane %v15837_v54, %v7275_v56 }
0x1f9f   : > { %v12063_v8 = vpop.eup %12062 }
0x1fa0   : > { %v7149_v14 = vmul.f32 %v12063_v8, %v12061_v30 }
0x1fa2   : > { %v7150_v25 = vsel %vm2314_vm4, %v7149_v14, %v15512_v18  ;;  %v11465_v18 = vld [vmem:[%s16291_s15 + $0xd0] ss:$24 sps:$4 sm:$0xff]  }
0x1fa3   : > { %v7151_v37 = vsel %vm828_vm0, %v7150_v25, %v15460_v6  ;;  %v11456_v6 = vld [vmem:[%s16291_s15 + $0x160] ss:$24 sps:$4 sm:$0xff]  }
0x1fa4   : > { %v7152_v13 = vsel %vm2317_vm5, %v7151_v37, %v15280_v23  ;;  %v15736_v23 = vpack.c.bf16 %v15072_v11, %v15072_v11  ;;  %v11464_v11 = vld [vmem:[%s16291_s15 + $0x104] ss:$24 sps:$4 sm:$0xff]  }
0x1fa5   : > { %v7153_v57 = vsel %vm2319_vm6, %v7152_v13, %v15234_v34  ;;  %v11461_v34 = vld [vmem:[%s16291_s15 + $0x134] ss:$24 sps:$4 sm:$0xff]  }
0x1fa6   : > { %v7154_v31 = vsel %vm2321_vm7, %v7153_v57, %v15188_v62  ;;  %v11467_v62 = vld [vmem:[%s16291_s15 + $0xd4] ss:$24 sps:$4 sm:$0xff]  }
0x1fa7   : > { %v7155_v45 = vsel %vm2323_vm8, %v7154_v31, %v15142_v32  ;;  %v11462_v32 = vld [vmem:[%s16291_s15 + $0x100] ss:$24 sps:$4 sm:$0xff]  }
0x1fa8   : > { %v7156_v3 = vsel %vm2325_vm9, %v7155_v45, %v15096_v47  ;;  %v11459_v47 = vld [vmem:[%s16291_s15 + $0x130] ss:$24 sps:$4 sm:$0xff]  }
0x1fa9   : > { %v7158_v46 = vpack.c.bf16 %v7156_v3, %v7156_v3 }
0x1fab   : > { %7799 = vmatprep.mubr.bf16.mxu1 %v7158_v46  ;;  %7840 = vmatprep.mubr.bf16.mxu0 %v7158_v46 }
0x1fac   : > { %7800 = vmatmul.mubr.bf16.vlgmr.msra.gmra.mxu1 %v15736_v23  ;;  %7841 = vmatmul.mubr.bf16.vlgmr.msra.gmra.mxu0 %v15736_v23 }
0x1fad   : > { %7850 = vmatpush1.bf16.msra.mxu1 %v11456_v6  ;;  %7881 = vmatprep.mubr.bf16.mxu1 %v7158_v46 }
0x1fae   : > { %7851 = vmatprep.subr.bf16.mxu1 %v11461_v34  ;;  %10818 = vmatprep.mubr.msk.f32.mxu0 %vm12235_vm1, %v16354_v35 }
0x1fb1   : > { %7852 = vmatpush1.bf16.msra.mxu1 %v11459_v47 }
0x1fb2   : > { %7853 = vmatprep.subr.bf16.mxu1 %v11464_v11 }
0x1fb5   : > { %7854 = vmatpush1.bf16.msra.mxu1 %v11462_v32 }
0x1fb6   : > { %7855 = vmatprep.subr.bf16.mxu1 %v11467_v62 }
0x1fb9   : > { %7856 = vmatpush1.bf16.msra.mxu1 %v11465_v18 }
0x1fba   : > { %7857 = vmatprep.subr.bf16.mxu1 %v11470_v1 }
0x1fbd   : > { %7858 = vmatpush1.bf16.msra.mxu1 %v11468_v36 }
0x1fbe   : > { %7859 = vmatprep.subr.bf16.mxu1 %v11473_v27 }
0x1fc1   : > { %7860 = vmatpush1.bf16.msra.mxu1 %v11471_v0 }
0x1fc2   : > { %7861 = vmatprep.subr.bf16.mxu1 %v11476_v10 }
0x1fc5   : > { %7862 = vmatpush1.bf16.msra.mxu1 %v11474_v28 }
0x1fc6   : > { %7863 = vmatprep.subr.bf16.mxu1 %v11479_v21 }
0x1fc9   : > { %7864 = vmatpush1.bf16.msra.mxu1 %v11477_v22 }
0x1fca   : > { %7865 = vmatprep.subr.bf16.mxu1 %v11482_v24 }
0x1fcd   : > { %7866 = vmatpush2.bf16.msra.mxu1 %v11480_v38 }
0x1fce   : > { %7867 = vmatprep.subr.bf16.mxu1 %v11485_v7 }
0x1fd1   : > { %7868 = vmatpush2.bf16.msra.mxu1 %v11483_v43  ;;  %v11506_v43 = vld [vmem:[%s16293_s17 + $0x34] ss:$8 sps:$4 sm:$0xff]  }
0x1fd2   : > { %7869 = vmatprep.subr.bf16.mxu1 %v11488_v63 }
0x1fd5   : > { %7870 = vmatpush2.bf16.msra.mxu1 %v11486_v4 }
0x1fd6   : > { %7871 = vmatprep.subr.bf16.mxu1 %v11491_v12  ;;  %v11504_v12 = vld [vmem:[%s16293_s17 + $0x30] ss:$8 sps:$4 sm:$0xff]  }
0x1fd9   : > { %7872 = vmatpush2.bf16.msra.mxu1 %v11489_v60 }
0x1fda   : > { %7873 = vmatprep.subr.bf16.mxu1 %v11494_v48  ;;  %v11509_v48 = vld [vmem:[%s16293_s17 + $0x24] ss:$8 sps:$4 sm:$0xff]  }
0x1fdd   : > { %7874 = vmatpush2.bf16.msra.mxu1 %v11492_v42  ;;  %v11507_v42 = vld [vmem:[%s16293_s17 + $0x20] ss:$8 sps:$4 sm:$0xff]  }
0x1fde   : > { %7875 = vmatprep.subr.bf16.mxu1 %v11497_v49  ;;  %v11512_v49 = vld [vmem:[%s16293_s17 + $0x14] ss:$8 sps:$4 sm:$0xff]  }
0x1fe1   : > { %7876 = vmatpush2.bf16.msra.mxu1 %v11495_v50 }
0x1fe2   : > { %7877 = vmatprep.subr.bf16.mxu1 %v11500_v51  ;;  %v11510_v51 = vld [vmem:[%s16293_s17 + $0x10] ss:$8 sps:$4 sm:$0xff]  }
0x1fe5   : > { %7878 = vmatpush2.bf16.msra.mxu1 %v11498_v52 }
0x1fe6   : > { %7879 = vmatprep.subr.bf16.mxu1 %v11503_v29  ;;  %v11515_v29 = vld [vmem:[%s16293_s17 + $0x4] ss:$8 sps:$4 sm:$0xff]  }
0x1fe9   : > { %7880 = vmatpush2.bf16.msra.mxu1 %v11501_v53 }
0x1fec   : > { %7882 = vmatmul.mubr.bf16.vlgmr.msra.gmra.mxu1 %v15736_v23 }
0x1fed   : > { %8584 = vmatprep.mubr.bf16.mxu1 %v16348_v39 }
0x206c   : > { %v7801_v55 = vpop.f32.mrf.mxu1  ;;  %v7842_v19 = vpop.f32.mrf.mxu0 }
0x206d   : > { %v15843_v40 = vadd.f32 %v7842_v19, %v7268_v61  ;;  %v15853_v20 = vadd.f32 %v7801_v55, %v7260_v17  ;;  %v11513_v61 = vld [vmem:[%s16293_s17] ss:$8 sps:$4 sm:$0xff]  }
0x206e   : > { %v15845_v9 = vpop.f32.mrf.mxu1  ;;  %v15847_v59 = vpop.f32.mrf.mxu0 }
0x206f   : > { %8060 = vrot.lane.b32.xlu1 %v15843_v40, %s12237_s6  ;;  %10817 = vmatpush3.xpose.msk.msra.mxu0 %vm7890_vm10, %v15843_v40 }
0x2070   : > { %v7805_v44 = vpop.f32.mrf.mxu1  ;;  %v7846_v41 = vpop.f32.mrf.mxu0  ;;  %10821 = vmatprep.subr.mxu0 %v16354_v35 }
0x2072   : > { %v7806_v33 = vpop.f32.mrf.mxu1  ;;  %v7847_v16 = vpop.f32.mrf.mxu0  ;;  %10819 = vmatmul.mubr.msk.f32.vlgmr.msra.gmra.mxu0 %vm7890_vm10, %v15853_v20 }
0x2073   : > { %8058 = vrot.lane.b32.xlu1 %v15853_v20, %s12237_s6  ;;  %10823 = vmatprep.mubr.msk.f32.mxu0 %vm12235_vm1, %v16354_v35 }
0x20ac   : > { %v7883_v58 = vpop.f32.mrf.mxu1 }
0x20ad   : > { %v15864_v30 = vadd.f32 %v7883_v58, %v7276_v26 }
0x20ae   : > { %v15866_v8 = vpop.f32.mrf.mxu1 }
0x20af   : > { %10822 = vmatpush3.msra.mxu0 %v15864_v30 }
0x20b0   : > { %v7887_v14 = vpop.f32.mrf.mxu1  ;;  %10826 = vmatprep.subr.mxu0 %v16354_v35 }
0x20b2   : > { %v7888_v25 = vpop.f32.mrf.mxu1 }
0x20e1   : > { %v8061_v11 = vpop.permute.xlu1 %8060 }
0x20e5   : > { %v8059_v62 = vpop.permute.xlu1 %8058 }
0x2132   : > { %v7963_v37 = vpop.f32.mrf.mxu0 }
0x2133   : > { %v7967_v13 = vmul.f32 0.17677669, %v7963_v37 }
0x2134   : > { %v10820_v57 = vpop.f32.mrf.mxu0 }
0x2135   : > { %v7969_v31 = vsel %vm7968_vm11, %v7967_v13, -inf }
0x2136   : > { %7970 = vmax.xlane.f32.xlu0 %v7969_v31 }
0x21bf   : > { %v7971_v45 = vpop.xlane.xlu0 %7970 }
0x21c0   : > { %v7972_v3 = vsub.f32 %v7967_v13, %v7971_v45 }
0x21c2   : > { %v7973_v46 = vmul.f32 1.442695, %v7972_v3 }
0x21c4   : > { %12064 = vpow2.f32 %v7973_v46 }
0x21d1   : > { %v12065_v6 = vpop.eup %12064 }
0x21d2   : > { %v7975_v23 = vsel %vm7968_vm11, %v12065_v6, 0.0 }
0x21d3   : > { %7976 = vadd.xlane.f32.xlu0 %v7975_v23 }
0x225c   : > { %v7977_v34 = vpop.xlane.xlu0 %7976 }
0x225d   : > { %12066 = vrcp.f32 %v7977_v34 }
0x226a   : > { %v12067_v47 = vpop.eup %12066 }
0x226b   : > { %v7979_v32 = vmul.f32 %v12067_v47, %v12065_v6  ;;  %v11516_v47 = vld [vmem:[%s16293_s17 + $0x50] ss:$8 sps:$4 sm:$0xff]  }
0x226d   : > { %10824 = vmatmul.mubr.msk.f32.vlgmr.msra.gmra.mxu0 %vm7968_vm11, %v7979_v32  ;;  %v11521_v32 = vld [vmem:[%s16293_s17 + $0x44] ss:$8 sps:$4 sm:$0xff]  }
0x226e   : > { %10827 = vmatpush3.xpose.msk.msra.mxu0 %vm7890_vm10, %v8061_v11  ;;  %10828 = vmatprep.mubr.msk.f32.mxu0 %vm12235_vm1, %v16354_v35  ;;  %v11518_v11 = vld [vmem:[%s16293_s17 + $0x54] ss:$8 sps:$4 sm:$0xff]  }
0x226f   : > { %10831 = vmatprep.subr.mxu0 %v16354_v35  ;;  %8564 = vmatprep.subr.bf16.mxu1 %v11518_v11  ;;  %v11531_v11 = vld [vmem:[%s16293_s17 + $0x80] ss:$8 sps:$4 sm:$0xff]  }
0x2270   : > { %8565 = vmatpush1.bf16.msra.mxu1 %v11516_v47 }
0x2271   : > { %10829 = vmatmul.mubr.msk.f32.vlgmr.msra.gmra.mxu0 %vm7890_vm10, %v8059_v62  ;;  %v11519_v62 = vld [vmem:[%s16293_s17 + $0x40] ss:$8 sps:$4 sm:$0xff]   ;;  %8566 = vmatprep.subr.bf16.mxu1 %v11521_v32 }
0x2272   : > { %10833 = vmatprep.mubr.msk.f32.mxu0 %vm12235_vm1, %v16354_v35 }
0x2274   : > { %8567 = vmatpush1.bf16.msra.mxu1 %v11519_v62 }
0x232d   : > { %v8049_v18 = vpop.f32.mrf.mxu0 }
0x232e   : > { %v8053_v17 = vpack.c.bf16 %v8049_v18, %v8049_v18 }
0x232f   : > { %v10825_v1 = vpop.f32.mrf.mxu0 }
0x2331   : > { %v8132_v36 = vpop.f32.mrf.mxu0 }
0x2332   : > { %v8136_v27 = vmul.f32 0.17677669, %v8132_v36 }
0x2333   : > { %v10830_v0 = vpop.f32.mrf.mxu0 }
0x2334   : > { %v8137_v10 = vsel %vm7968_vm11, %v8136_v27, -inf }
0x2335   : > { %8138 = vmax.xlane.f32.xlu0 %v8137_v10 }
0x234b   : > { %8149 = vrot.lane.b32.xlu0 %v15864_v30, %s12237_s6 }
0x234f   : > { %8360 = vrot.lane.b32.xlu0 %v15843_v40, %s16322_s2 }
0x2353   : > { %8358 = vrot.lane.b32.xlu0 %v15853_v20, %s16322_s2 }
0x23be   : > { %v8139_v28 = vpop.xlane.xlu0 %8138 }
0x23bf   : > { %v8140_v21 = vsub.f32 %v8136_v27, %v8139_v28 }
0x23c1   : > { %v8141_v22 = vmul.f32 1.442695, %v8140_v21 }
0x23c2   : > { %v8150_v24 = vpop.permute.xlu0 %8149 }
0x23c3   : > { %12068 = vpow2.f32 %v8141_v22  ;;  %10832 = vmatpush3.msra.mxu0 %v8150_v24 }
0x23c4   : > { %8265 = vmatprep.subr.bf16.mxu0 %v11506_v43 }
0x23c6   : > { %v8361_v55 = vpop.permute.xlu0 %8360 }
0x23ca   : > { %v8359_v19 = vpop.permute.xlu0 %8358 }
0x23d0   : > { %v12069_v38 = vpop.eup %12068 }
0x23d1   : > { %v8143_v7 = vsel %vm7968_vm11, %v12069_v38, 0.0 }
0x23d2   : > { %8144 = vadd.xlane.f32.xlu1 %v8143_v7 }
0x23e3   : > { %8448 = vrot.lane.b32.xlu1 %v15864_v30, %s16322_s2 }
0x23e7   : > { %8597 = vrot.lane.b32.xlu1 %v15843_v40, %s12239_s3 }
0x245b   : > { %v8145_v63 = vpop.xlane.xlu1 %8144 }
0x245c   : > { %12070 = vrcp.f32 %v8145_v63 }
0x245f   : > { %v8449_v40 = vpop.permute.xlu1 %8448 }
0x2469   : > { %v12071_v4 = vpop.eup %12070 }
0x246a   : > { %v8147_v60 = vmul.f32 %v12071_v4, %v12069_v38 }
0x246c   : > { %10834 = vmatmul.mubr.msk.f32.vlgmr.msra.gmra.mxu0 %vm7968_vm11, %v8147_v60 }
0x246d   : > { %8266 = vmatpush1.bf16.msra.mxu0 %v11504_v12  ;;  %8285 = vmatprep.mubr.bf16.mxu0 %v16348_v39 }
0x246e   : > { %8267 = vmatprep.subr.bf16.mxu0 %v11509_v48 }
0x2471   : > { %8268 = vmatpush1.bf16.msra.mxu0 %v11507_v42 }
0x2472   : > { %8329 = vmatprep.subr.bf16.mxu0 %v11512_v49  ;;  %v11522_v49 = vld [vmem:[%s16293_s17 + $0x70] ss:$8 sps:$4 sm:$0xff]  }
0x252c   : > { %v8221_v50 = vpop.f32.mrf.mxu0 }
0x252d   : > { %v8225_v52 = vpack.c.bf16 %v8221_v50, %v8221_v50 }
0x252e   : > { %v10835_v53 = vpop.f32.mrf.mxu0 }
0x252f   : > { %10676 = vmatmul.mubr.msk.bf16.vlgmr.msra.gmra.mxu0 %vm7890_vm10, %v8225_v52  ;;  %v11525_v53 = vld [vmem:[%s16293_s17 + $0x60] ss:$8 sps:$4 sm:$0xff]  }
0x2530   : > { %8330 = vmatpush1.bf16.msra.mxu0 %v11510_v51  ;;  %8349 = vmatprep.mubr.bf16.mxu0 %v16348_v39  ;;  %v11527_v51 = vld [vmem:[%s16293_s17 + $0x64] ss:$8 sps:$4 sm:$0xff]  }
0x2531   : > { %8331 = vmatprep.subr.bf16.mxu0 %v11515_v29 }
0x2534   : > { %8332 = vmatpush1.bf16.msra.mxu0 %v11513_v61 }
0x2535   : > { %10836 = vmatprep.subr.mxu0 %v16354_v35 }
0x2537   : > { %10681 = vmatmul.mubr.msk.bf16.vlgmr.msra.gmra.mxu0 %vm7890_vm10, %v8053_v17 }
0x2538   : > { %10837 = vmatpush3.xpose.msk.msra.mxu0 %vm7890_vm10, %v8361_v55  ;;  %10838 = vmatprep.mubr.msk.f32.mxu0 %vm12235_vm1, %v16354_v35  ;;  %v7272_v55 = vrot.slane %v15837_v54, %v12714_v15 }
0x2539   : > { %10841 = vmatprep.subr.mxu0 %v16354_v35 }
0x253f   : > { %10839 = vmatmul.mubr.msk.f32.vlgmr.msra.gmra.mxu0 %vm7890_vm10, %v8359_v19  ;;  %v7279_v19 = vsub.s32 5, %v16355_v2 }
0x2540   : > { %10842 = vmatpush3.msra.mxu0 %v8449_v40  ;;  %10843 = vmatprep.mubr.msk.f32.mxu0 %vm12235_vm1, %v16354_v35 }
0x2541   : > { %10846 = vmatprep.subr.mxu0 %v16354_v35 }
0x25ef   : > { %v8287_v44 = vpop.f32.mrf.mxu0 }
0x25f1   : > { %v8289_v41 = vpop.f32.mrf.mxu0 }
0x25f3   : > { %v8291_v33 = vpop.f32.mrf.mxu0 }
0x25f5   : > { %v8292_v16 = vpop.f32.mrf.mxu0 }
0x25f6   : > { %v15982_v16 = vadd.f32 %v15847_v59, %v7272_v55 }
0x25f7   : > { %v8351_v56 = vpop.f32.mrf.mxu0 }
0x25f8   : > { %v8352_v26 = vadd.f32 %v8351_v56, %v8287_v44  ;;  %v16356_v44 = vld [vmem:[#allocation4_spill] sm:$0xff]  ;;  %v7280_v56 = vrot.slane %v15837_v54, %v7279_v19 }
0x25f9   : > { %v8353_v58 = vpop.f32.mrf.mxu0 }
0x25fa   : > { %v15930_v14 = vadd.f32 %v8353_v58, %v8289_v41  ;;  %v7264_v41 = vrot.slane %v15837_v54, %v16356_v44  ;;  %v15995_v2 = vadd.f32 %v15866_v8, %v7280_v56 }
0x25fb   : > { %v8355_v25 = vpop.f32.mrf.mxu0 }
0x25fc   : > { %v15991_v15 = vadd.f32 %v15845_v9, %v7264_v41 }
0x25fd   : > { %v8356_v37 = vpop.f32.mrf.mxu0 }
0x25ff   : > { %v8432_v13 = vpop.f32.mrf.mxu0 }
0x2600   : > { %v8436_v57 = vmul.f32 0.17677669, %v8432_v13 }
0x2601   : > { %v10840_v31 = vpop.f32.mrf.mxu0 }
0x2602   : > { %v8437_v45 = vsel %vm7968_vm11, %v8436_v57, -inf }
0x2603   : > { %8438 = vmax.xlane.f32.xlu0 %v8437_v45 }
0x268c   : > { %v8439_v3 = vpop.xlane.xlu0 %8438 }
0x268d   : > { %v8440_v46 = vsub.f32 %v8436_v57, %v8439_v3  ;;  %v11528_v3 = vld [vmem:[%s16293_s17 + $0x90] ss:$8 sps:$4 sm:$0xff]  }
0x268f   : > { %v8441_v6 = vmul.f32 1.442695, %v8440_v46  ;;  %v11530_v46 = vld [vmem:[%s16293_s17 + $0x94] ss:$8 sps:$4 sm:$0xff]  }
0x2691   : > { %12072 = vpow2.f32 %v8441_v6 }
0x269e   : > { %v12073_v23 = vpop.eup %12072 }
0x269f   : > { %v8443_v34 = vsel %vm7968_vm11, %v12073_v23, 0.0 }
0x26a0   : > { %8444 = vadd.xlane.f32.xlu1 %v8443_v34 }
0x26b1   : > { %8595 = vrot.lane.b32.xlu1 %v15853_v20, %s12239_s3  ;;  %v8598_v20 = vpop.permute.xlu1 %8597 }
0x2729   : > { %v8445_v18 = vpop.xlane.xlu1 %8444 }
0x272a   : > { %12074 = vrcp.f32 %v8445_v18 }
0x272d   : > { %v8596_v27 = vpop.permute.xlu1 %8595 }
0x2737   : > { %v12075_v1 = vpop.eup %12074 }
0x2738   : > { %v8447_v36 = vmul.f32 %v12075_v1, %v12073_v23  ;;  %v11533_v23 = vld [vmem:[%s16293_s17 + $0x84] ss:$8 sps:$4 sm:$0xff]  }
0x273a   : > { %10844 = vmatmul.mubr.msk.f32.vlgmr.msra.gmra.mxu0 %vm7968_vm11, %v8447_v36 }
0x273b   : > { %10847 = vmatpush3.xpose.msk.msra.mxu0 %vm7890_vm10, %v8598_v20  ;;  %10848 = vmatprep.mubr.msk.f32.mxu0 %vm12235_vm1, %v16354_v35 }
0x273c   : > { %10851 = vmatprep.subr.mxu0 %v16354_v35 }
0x273e   : > { %10849 = vmatmul.mubr.msk.f32.vlgmr.msra.gmra.mxu0 %vm7890_vm10, %v8596_v27 }
0x273f   : > { %10853 = vmatprep.mubr.msk.f32.mxu0 %vm12235_vm1, %v16354_v35 }
0x27fa   : > { %v8520_v0 = vpop.f32.mrf.mxu0 }
0x27fb   : > { %v8524_v10 = vpack.c.bf16 %v8520_v0, %v8520_v0 }
0x27fc   : > { %v10845_v28 = vpop.f32.mrf.mxu0 }
0x27fd   : > { %10689 = vmatmul.mubr.msk.bf16.vlgmr.msra.gmra.mxu1 %vm7890_vm10, %v8524_v10 }
0x27fe   : > { %v8669_v21 = vpop.f32.mrf.mxu0  ;;  %8821 = vmatprep.mubr.bf16.mxu1 %v16348_v39 }
0x27ff   : > { %v8673_v22 = vmul.f32 0.17677669, %v8669_v21 }
0x2800   : > { %v10850_v24 = vpop.f32.mrf.mxu0 }
0x2801   : > { %v8674_v38 = vsel %vm7968_vm11, %v8673_v22, -inf }
0x2802   : > { %8675 = vmax.xlane.f32.xlu0 %v8674_v38 }
0x2818   : > { %8685 = vrot.lane.b32.xlu0 %v15864_v30, %s12239_s3  ;;  %v11524_v30 = vld [vmem:[%s16293_s17 + $0x74] ss:$8 sps:$4 sm:$0xff]  }
0x2819   : > { %8801 = vmatprep.subr.bf16.mxu1 %v11524_v30 }
0x281a   : > { %8802 = vmatpush1.bf16.msra.mxu1 %v11522_v49  ;;  %v11536_v49 = vld [vmem:[%s16293_s17 + $0xb4] ss:$8 sps:$4 sm:$0xff]  }
0x281b   : > { %8803 = vmatprep.subr.bf16.mxu1 %v11527_v51 }
0x281e   : > { %8804 = vmatpush1.bf16.msra.mxu1 %v11525_v53 }
0x281f   : > { %9033 = vmatprep.subr.bf16.mxu1 %v11530_v46  ;;  %v11545_v46 = vld [vmem:[%s16293_s17 + $0xc4] ss:$8 sps:$4 sm:$0xff]  }
0x288b   : > { %v8676_v7 = vpop.xlane.xlu0 %8675 }
0x288c   : > { %v8677_v43 = vsub.f32 %v8673_v22, %v8676_v7 }
0x288e   : > { %v8678_v63 = vmul.f32 1.442695, %v8677_v43 }
0x288f   : > { %v8686_v4 = vpop.permute.xlu0 %8685 }
0x2890   : > { %12076 = vpow2.f32 %v8678_v63  ;;  %10852 = vmatpush3.msra.mxu0 %v8686_v4 }
0x2891   : > { %10856 = vmatprep.subr.mxu0 %v16354_v35 }
0x289d   : > { %v12077_v12 = vpop.eup %12076 }
0x289e   : > { %v8680_v60 = vsel %vm7968_vm11, %v12077_v12, 0.0 }
0x289f   : > { %8681 = vadd.xlane.f32.xlu1 %v8680_v60 }
0x28bd   : > { %v8586_v48 = vpop.f32.mrf.mxu1 }
0x28be   : > { %v8593_v42 = vadd.f32 %v8586_v48, %v8352_v26 }
0x28bf   : > { %v8588_v50 = vpop.f32.mrf.mxu1 }
0x28c0   : > { %v8594_v52 = vadd.f32 %v8588_v50, %v15930_v14  ;;  %v11539_v50 = vld [vmem:[%s16293_s17 + $0xa4] ss:$8 sps:$4 sm:$0xff]  }
0x28c1   : > { %v8590_v29 = vpop.f32.mrf.mxu1 }
0x28c2   : > { %v11537_v29 = vld [vmem:[%s16293_s17 + $0xa0] ss:$8 sps:$4 sm:$0xff]  }
0x28c3   : > { %v8591_v61 = vpop.f32.mrf.mxu1 }
0x2928   : > { %v8682_v17 = vpop.xlane.xlu1 %8681 }
0x2929   : > { %12078 = vrcp.f32 %v8682_v17 }
0x2936   : > { %v12079_v40 = vpop.eup %12078 }
0x2937   : > { %v8684_v33 = vmul.f32 %v12079_v40, %v12077_v12 }
0x2939   : > { %10854 = vmatmul.mubr.msk.f32.vlgmr.msra.gmra.mxu0 %vm7968_vm11, %v8684_v33 }
0x293a   : > { %10857 = vmatpush3.xpose.msk.msra.mxu0 %vm7890_vm10, %v15982_v16  ;;  %10858 = vmatprep.mubr.msk.f32.mxu0 %vm12235_vm1, %v16354_v35 }
0x293b   : > { %10861 = vmatprep.subr.mxu0 %v16354_v35 }
0x293d   : > { %10859 = vmatmul.mubr.msk.f32.vlgmr.msra.gmra.mxu0 %vm7890_vm10, %v15991_v15 }
0x293e   : > { %10862 = vmatpush3.msra.mxu0 %v15995_v2  ;;  %10863 = vmatprep.mubr.msk.f32.mxu0 %vm12235_vm1, %v16354_v35 }
0x293f   : > { %10866 = vmatprep.subr.mxu0 %v16354_v35 }
0x29f9   : > { %v8757_v54 = vpop.f32.mrf.mxu0 }
0x29fa   : > { %v8761_v59 = vpack.c.bf16 %v8757_v54, %v8757_v54 }
0x29fb   : > { %v10855_v26 = vpop.f32.mrf.mxu0 }
0x29fc   : > { %10697 = vmatmul.mubr.msk.bf16.vlgmr.msra.gmra.mxu1 %vm7890_vm10, %v8761_v59 }
0x29fd   : > { %v8904_v9 = vpop.f32.mrf.mxu0  ;;  %9053 = vmatprep.mubr.bf16.mxu1 %v16348_v39  ;;  %9034 = vmatpush1.bf16.msra.mxu1 %v11528_v3 }
0x29fe   : > { %v8908_v8 = vmul.f32 0.17677669, %v8904_v9  ;;  %9035 = vmatprep.subr.bf16.mxu1 %v11533_v23 }
0x29ff   : > { %v10860_v58 = vpop.f32.mrf.mxu0 }
0x2a00   : > { %v8909_v14 = vsel %vm7968_vm11, %v8908_v8, -inf }
0x2a01   : > { %8910 = vmax.xlane.f32.xlu0 %v8909_v14  ;;  %9036 = vmatpush1.bf16.msra.mxu1 %v11531_v11 }
0x2a02   : > { %9271 = vmatprep.subr.bf16.mxu1 %v11536_v49 }
0x2a17   : > { %9064 = vrot.lane.b32.xlu0 %v15991_v15, %s12237_s6 }
0x2a8a   : > { %v8911_v25 = vpop.xlane.xlu0 %8910 }
0x2a8b   : > { %v8912_v37 = vsub.f32 %v8908_v8, %v8911_v25 }
0x2a8d   : > { %v8913_v13 = vmul.f32 1.442695, %v8912_v37 }
0x2a8e   : > { %v9065_v27 = vpop.permute.xlu0 %9064 }
0x2a8f   : > { %12080 = vpow2.f32 %v8913_v13 }
0x2a9c   : > { %v12081_v57 = vpop.eup %12080 }
0x2a9d   : > { %v8915_v31 = vsel %vm7968_vm11, %v12081_v57, 0.0 }
0x2a9e   : > { %8916 = vadd.xlane.f32.xlu1 %v8915_v31 }
0x2aaf   : > { %9066 = vrot.lane.b32.xlu1 %v15982_v16, %s12237_s6 }
0x2abc   : > { %v8823_v45 = vpop.f32.mrf.mxu1 }
0x2abd   : > { %v8830_v6 = vadd.f32 %v8823_v45, %v8593_v42  ;;  %v11534_v42 = vld [vmem:[%s16293_s17 + $0xb0] ss:$8 sps:$4 sm:$0xff]   ;;  %v11542_v45 = vld [vmem:[%s16293_s17 + $0xd4] ss:$8 sps:$4 sm:$0xff]  }
0x2abe   : > { %v8825_v34 = vpop.f32.mrf.mxu1 }
0x2abf   : > { %v8831_v47 = vadd.f32 %v8825_v34, %v8594_v52 }
0x2ac0   : > { %v8827_v32 = vpop.f32.mrf.mxu1 }
0x2ac2   : > { %v8828_v62 = vpop.f32.mrf.mxu1 }
0x2b27   : > { %v8917_v20 = vpop.xlane.xlu1 %8916 }
0x2b28   : > { %12082 = vrcp.f32 %v8917_v20 }
0x2b2b   : > { %v9067_v36 = vpop.permute.xlu1 %9066 }
0x2b35   : > { %v12083_v18 = vpop.eup %12082 }
0x2b36   : > { %v8919_v1 = vmul.f32 %v12083_v18, %v12081_v57 }
0x2b38   : > { %10864 = vmatmul.mubr.msk.f32.vlgmr.msra.gmra.mxu0 %vm7968_vm11, %v8919_v1 }
0x2b39   : > { %10867 = vmatpush3.xpose.msk.msra.mxu0 %vm7890_vm10, %v9067_v36  ;;  %10868 = vmatprep.mubr.msk.f32.mxu0 %vm12235_vm1, %v16354_v35 }
0x2b3a   : > { %10871 = vmatprep.subr.mxu0 %v16354_v35 }
0x2b3c   : > { %10869 = vmatmul.mubr.msk.f32.vlgmr.msra.gmra.mxu0 %vm7890_vm10, %v9065_v27 }
0x2b3d   : > { %10873 = vmatprep.mubr.msk.f32.mxu0 %vm12235_vm1, %v16354_v35 }
0x2bf8   : > { %v8989_v0 = vpop.f32.mrf.mxu0 }
0x2bf9   : > { %v8993_v10 = vpack.c.bf16 %v8989_v0, %v8989_v0 }
0x2bfa   : > { %v10865_v28 = vpop.f32.mrf.mxu0 }
0x2bfb   : > { %10705 = vmatmul.mubr.msk.bf16.vlgmr.msra.gmra.mxu1 %vm7890_vm10, %v8993_v10 }
0x2bfc   : > { %v9138_v21 = vpop.f32.mrf.mxu0  ;;  %9291 = vmatprep.mubr.bf16.mxu1 %v16348_v39  ;;  %9272 = vmatpush1.bf16.msra.mxu1 %v11534_v42 }
0x2bfd   : > { %v9142_v22 = vmul.f32 0.17677669, %v9138_v21  ;;  %9273 = vmatprep.subr.bf16.mxu1 %v11539_v50 }
0x2bfe   : > { %v10870_v24 = vpop.f32.mrf.mxu0 }
0x2bff   : > { %v9143_v38 = vsel %vm7968_vm11, %v9142_v22, -inf }
0x2c00   : > { %9144 = vmax.xlane.f32.xlu1 %v9143_v38  ;;  %9274 = vmatpush1.bf16.msra.mxu1 %v11537_v29 }
0x2c01   : > { %9508 = vmatprep.subr.bf16.mxu1 %v11542_v45 }
0x2c11   : > { %9155 = vrot.lane.b32.xlu1 %v15995_v2, %s12237_s6 }
0x2c15   : > { %9302 = vrot.lane.b32.xlu1 %v15991_v15, %s16357_s4 }
0x2c89   : > { %v9145_v7 = vpop.xlane.xlu1 %9144 }
0x2c8a   : > { %v9146_v43 = vsub.f32 %v9142_v22, %v9145_v7 }
0x2c8c   : > { %v9147_v63 = vmul.f32 1.442695, %v9146_v43 }
0x2c8d   : > { %v9156_v4 = vpop.permute.xlu1 %9155 }
0x2c8e   : > { %12084 = vpow2.f32 %v9147_v63  ;;  %10872 = vmatpush3.msra.mxu0 %v9156_v4  ;;  %v11548_v4 = vld [vmem:[%s16293_s17 + $0xf4] ss:$8 sps:$4 sm:$0xff]  }
0x2c8f   : > { %10876 = vmatprep.subr.mxu0 %v16354_v35 }
0x2c91   : > { %v9303_v41 = vpop.permute.xlu1 %9302 }
0x2c9b   : > { %v12085_v12 = vpop.eup %12084 }
0x2c9c   : > { %v9149_v60 = vsel %vm7968_vm11, %v12085_v12, 0.0 }
0x2c9d   : > { %9150 = vadd.xlane.f32.xlu0 %v9149_v60 }
0x2cb3   : > { %9304 = vrot.lane.b32.xlu0 %v15982_v16, %s16357_s4 }
0x2cbb   : > { %v9055_v48 = vpop.f32.mrf.mxu1 }
0x2cbc   : > { %v9062_v30 = vadd.f32 %v9055_v48, %v8830_v6 }
0x2cbd   : > { %v9057_v51 = vpop.f32.mrf.mxu1 }
0x2cbe   : > { %v9063_v52 = vadd.f32 %v9057_v51, %v8831_v47 }
0x2cbf   : > { %v9059_v53 = vpop.f32.mrf.mxu1 }
0x2cc1   : > { %v9060_v61 = vpop.f32.mrf.mxu1 }
0x2d26   : > { %v9151_v17 = vpop.xlane.xlu0 %9150 }
0x2d27   : > { %12086 = vrcp.f32 %v9151_v17 }
0x2d2a   : > { %v9305_v40 = vpop.permute.xlu0 %9304 }
0x2d34   : > { %v12087_v55 = vpop.eup %12086 }
0x2d35   : > { %v9153_v19 = vmul.f32 %v12087_v55, %v12085_v12  ;;  %v11549_v12 = vld [vmem:[%s16293_s17 + $0xe0] ss:$8 sps:$4 sm:$0xff]  }
0x2d36   : > { %v9776_v55 = vld [vmem:[%s16294_s18] sm:$0x3] }
0x2d37   : > { %10874 = vmatmul.mubr.msk.f32.vlgmr.msra.gmra.mxu0 %vm7968_vm11, %v9153_v19  ;;  %v9781_v19 = vrot.slane %v9776_v55, %v12698_v5 }
0x2d38   : > { %10877 = vmatpush3.xpose.msk.msra.mxu0 %vm7890_vm10, %v9305_v40  ;;  %10878 = vmatprep.mubr.msk.f32.mxu0 %vm12235_vm1, %v16354_v35 }
0x2d39   : > { %10881 = vmatprep.subr.mxu0 %v16354_v35 }
0x2d3b   : > { %10879 = vmatmul.mubr.msk.f32.vlgmr.msra.gmra.mxu0 %vm7890_vm10, %v9303_v41 }
0x2d3c   : > { %10883 = vmatprep.mubr.msk.f32.mxu0 %vm12235_vm1, %v16354_v35 }
0x2df7   : > { %v9227_v33 = vpop.f32.mrf.mxu0 }
0x2df8   : > { %v9231_v56 = vpack.c.bf16 %v9227_v33, %v9227_v33  ;;  %v9785_v33 = vrot.slane %v9776_v55, %v16356_v44  ;;  %v9887_v55 = vld [vmem:[%s16297_s21 + $0xb8] sm:$0xff] }
0x2df9   : > { %v10875_v54 = vpop.f32.mrf.mxu0 }
0x2dfa   : > { %10713 = vmatmul.mubr.msk.bf16.vlgmr.msra.gmra.mxu1 %vm7890_vm10, %v9231_v56 }
0x2dfb   : > { %v9376_v59 = vpop.f32.mrf.mxu0  ;;  %9528 = vmatprep.mubr.bf16.mxu1 %v16348_v39 }
0x2dfc   : > { %v9380_v26 = vmul.f32 0.17677669, %v9376_v59 }
0x2dfd   : > { %v10880_v9 = vpop.f32.mrf.mxu0 }
0x2dfe   : > { %v9381_v8 = vsel %vm7968_vm11, %v9380_v26, -inf }
0x2dff   : > { %9382 = vmax.xlane.f32.xlu1 %v9381_v8 }
0x2e10   : > { %9392 = vrot.lane.b32.xlu1 %v15995_v2, %s16357_s4 }
0x2e14   : > { %9539 = vrot.lane.b32.xlu1 %v15991_v15, %s12239_s3  ;;  %v11540_v15 = vld [vmem:[%s16293_s17 + $0xd0] ss:$8 sps:$4 sm:$0xff]  }
0x2e15   : > { %9509 = vmatpush1.bf16.msra.mxu1 %v11540_v15 }
0x2e16   : > { %9510 = vmatprep.subr.bf16.mxu1 %v11545_v46 }
0x2e88   : > { %v9383_v58 = vpop.xlane.xlu1 %9382 }
0x2e89   : > { %v9384_v14 = vsub.f32 %v9380_v26, %v9383_v58 }
0x2e8b   : > { %v9385_v25 = vmul.f32 1.442695, %v9384_v14 }
0x2e8c   : > { %v9393_v37 = vpop.permute.xlu1 %9392 }
0x2e8d   : > { %12088 = vpow2.f32 %v9385_v25  ;;  %10882 = vmatpush3.msra.mxu0 %v9393_v37 }
0x2e8e   : > { %10886 = vmatprep.subr.mxu0 %v16354_v35 }
0x2e90   : > { %v9540_v18 = vpop.permute.xlu1 %9539 }
0x2e9a   : > { %v12089_v13 = vpop.eup %12088 }
0x2e9b   : > { %v9387_v57 = vsel %vm7968_vm11, %v12089_v13, 0.0 }
0x2e9c   : > { %9388 = vadd.xlane.f32.xlu0 %v9387_v57 }
0x2eb2   : > { %9541 = vrot.lane.b32.xlu0 %v15982_v16, %s12239_s3  ;;  %v11543_v16 = vld [vmem:[%s16293_s17 + $0xc0] ss:$8 sps:$4 sm:$0xff]  }
0x2eb3   : > { %9511 = vmatpush1.bf16.msra.mxu1 %v11543_v16 }
0x2eb4   : > { %9745 = vmatprep.subr.bf16.mxu1 %v11548_v4 }
0x2eba   : > { %v9293_v31 = vpop.f32.mrf.mxu1 }
0x2ebb   : > { %v9300_v3 = vadd.f32 %v9293_v31, %v9062_v30 }
0x2ebc   : > { %v9295_v6 = vpop.f32.mrf.mxu1 }
0x2ebd   : > { %v9301_v23 = vadd.f32 %v9295_v6, %v9063_v52 }
0x2ebe   : > { %v9297_v34 = vpop.f32.mrf.mxu1 }
0x2ec0   : > { %v9298_v47 = vpop.f32.mrf.mxu1 }
0x2f25   : > { %v9389_v11 = vpop.xlane.xlu0 %9388 }
0x2f26   : > { %12090 = vrcp.f32 %v9389_v11 }
0x2f29   : > { %v9542_v20 = vpop.permute.xlu0 %9541 }
0x2f33   : > { %v12091_v32 = vpop.eup %12090 }
0x2f34   : > { %v9391_v62 = vmul.f32 %v12091_v32, %v12089_v13 }
0x2f36   : > { %10884 = vmatmul.mubr.msk.f32.vlgmr.msra.gmra.mxu0 %vm7968_vm11, %v9391_v62 }
0x2f37   : > { %10887 = vmatpush3.xpose.msk.msra.mxu0 %vm7890_vm10, %v9542_v20  ;;  %10888 = vmatprep.mubr.msk.f32.mxu0 %vm12235_vm1, %v16354_v35 }
0x2f38   : > { %10891 = vmatprep.subr.mxu0 %v16354_v35 }
0x2f3a   : > { %10889 = vmatmul.mubr.msk.f32.vlgmr.msra.gmra.mxu0 %vm7890_vm10, %v9540_v18 }
0x2f3b   : > { %10893 = vmatprep.mubr.msk.f32.mxu0 %vm12235_vm1, %v16354_v35 }
0x2ff6   : > { %v9464_v1 = vpop.f32.mrf.mxu0 }
0x2ff7   : > { %v9468_v36 = vpack.c.bf16 %v9464_v1, %v9464_v1 }
0x2ff8   : > { %v10885_v27 = vpop.f32.mrf.mxu0 }
0x2ff9   : > { %10721 = vmatmul.mubr.msk.bf16.vlgmr.msra.gmra.mxu1 %vm7890_vm10, %v9468_v36 }
0x2ffa   : > { %v9613_v0 = vpop.f32.mrf.mxu0  ;;  %9765 = vmatprep.mubr.bf16.mxu1 %v16348_v39  ;;  %v11546_v39 = vld [vmem:[%s16293_s17 + $0xf0] ss:$8 sps:$4 sm:$0xff]  }
0x2ffb   : > { %v9617_v10 = vmul.f32 0.17677669, %v9613_v0  ;;  %9746 = vmatpush1.bf16.msra.mxu1 %v11546_v39 }
0x2ffc   : > { %v10890_v28 = vpop.f32.mrf.mxu0 }
0x2ffd   : > { %v9618_v21 = vsel %vm7968_vm11, %v9617_v10, -inf }
0x2ffe   : > { %9619 = vmax.xlane.f32.xlu1 %v9618_v21  ;;  %v9895_v21 = vld [vmem:[%s16297_s21 + $0xf8] sm:$0xff] }
0x300f   : > { %9629 = vrot.lane.b32.xlu1 %v15995_v2, %s12239_s3  ;;  %v11551_v2 = vld [vmem:[%s16293_s17 + $0xe4] ss:$8 sps:$4 sm:$0xff]  }
0x3010   : > { %9747 = vmatprep.subr.bf16.mxu1 %v11551_v2 }
0x3011   : > { %9748 = vmatpush1.bf16.msra.mxu1 %v11549_v12 }
0x3012   : > { %10896 = vmatprep.subr.mxu1 %v16354_v35 }
0x3087   : > { %v9620_v22 = vpop.xlane.xlu1 %9619 }
0x3088   : > { %v9621_v24 = vsub.f32 %v9617_v10, %v9620_v22  ;;  %v9879_v22 = vld [vmem:[%s16297_s21 + $0x78] sm:$0xff] }
0x308a   : > { %v9622_v38 = vmul.f32 1.442695, %v9621_v24  ;;  %v9894_v24 = vld [vmem:[%s16297_s21 + $0xf0] sm:$0xff] }
0x308b   : > { %v9630_v7 = vpop.permute.xlu1 %9629 }
0x308c   : > { %12092 = vpow2.f32 %v9622_v38  ;;  %10892 = vmatpush3.msra.mxu0 %v9630_v7  ;;  %v9878_v38 = vld [vmem:[%s16297_s21 + $0x70] sm:$0xff]  ;;  %v9893_v7 = vld [vmem:[%s16297_s21 + $0xe8] sm:$0xff] }
0x308d   : > { %10768 = vmatprep.subr.mxu0 %v9895_v21 }
0x3099   : > { %v12093_v43 = vpop.eup %12092 }
0x309a   : > { %v9624_v63 = vsel %vm7968_vm11, %v12093_v43, 0.0 }
0x309b   : > { %9625 = vadd.xlane.f32.xlu0 %v9624_v63  ;;  %v9892_v63 = vld [vmem:[%s16297_s21 + $0xe0] sm:$0xff] }
0x30b9   : > { %v9530_v60 = vpop.f32.mrf.mxu1 }
0x30ba   : > { %v9537_v48 = vadd.f32 %v9530_v60, %v9300_v3 }
0x30bb   : > { %v9532_v42 = vpop.f32.mrf.mxu1 }
0x30bc   : > { %v9538_v49 = vadd.f32 %v9532_v42, %v9301_v23 }
0x30bd   : > { %v9534_v30 = vpop.f32.mrf.mxu1 }
0x30be   : > { %v9891_v30 = vld [vmem:[%s16297_s21 + $0xd8] sm:$0xff] }
0x30bf   : > { %v9535_v50 = vpop.f32.mrf.mxu1 }
0x30c0   : > { %v9875_v50 = vld [vmem:[%s16297_s21 + $0x58] sm:$0xff] }
0x3124   : > { %v9626_v51 = vpop.xlane.xlu0 %9625 }
0x3125   : > { %12094 = vrcp.f32 %v9626_v51  ;;  %v9890_v51 = vld [vmem:[%s16297_s21 + $0xd0] sm:$0xff] }
0x3132   : > { %v12095_v52 = vpop.eup %12094 }
0x3133   : > { %v9628_v29 = vmul.f32 %v12095_v52, %v12093_v43  ;;  %v9877_v43 = vld [vmem:[%s16297_s21 + $0x68] sm:$0xff]  ;;  %v9874_v52 = vld [vmem:[%s16297_s21 + $0x50] sm:$0xff] }
0x3135   : > { %10894 = vmatmul.mubr.msk.f32.vlgmr.msra.gmra.mxu0 %vm7968_vm11, %v9628_v29  ;;  %v9889_v29 = vld [vmem:[%s16297_s21 + $0xc8] sm:$0xff] }
0x3136   : > { %10769 = vmatpush3.msra.mxu0 %v9879_v22 }
0x3137   : > { %10770 = vmatprep.subr.mxu0 %v9894_v24  ;;  %v10048_v24 = vld [vmem:[%s16301_s25 + $0x8] sm:$0xff] }
0x3138   : > { %10771 = vmatpush3.msra.mxu0 %v9878_v38  ;;  %v10047_v38 = vld [vmem:[%s16301_s25] sm:$0xff] }
0x3139   : > { %10772 = vmatprep.subr.mxu0 %v9893_v7  ;;  %v9972_v7 = vld [vmem:[%s16300_s24] sm:$0x1] }
0x313a   : > { %10773 = vmatpush3.msra.mxu0 %v9877_v43 }
0x313b   : > { %10774 = vmatprep.subr.mxu0 %v9892_v63 }
0x31f5   : > { %v9701_v53 = vpop.f32.mrf.mxu0 }
0x31f6   : > { %v9705_v61 = vpack.c.bf16 %v9701_v53, %v9701_v53  ;;  %v9873_v53 = vld [vmem:[%s16297_s21 + $0x48] sm:$0xff] }
0x31f7   : > { %v10895_v17 = vpop.f32.mrf.mxu0 }
0x31f8   : > { %10729 = vmatmul.mubr.msk.bf16.vlgmr.msra.gmra.mxu1 %vm7890_vm10, %v9705_v61  ;;  %v9888_v61 = vld [vmem:[%s16297_s21 + $0xc0] sm:$0xff] }
0x31f9   : > { %10904 = vmatprep.mubr.msk.f32.mxu1 %vm12235_vm1, %v16354_v35  ;;  %v9872_v17 = vld [vmem:[%s16297_s21 + $0x40] sm:$0xff] }
0x32b8   : > { %v9767_v40 = vpop.f32.mrf.mxu1 }
0x32b9   : > { %v9774_v41 = vadd.f32 %v9767_v40, %v9537_v48  ;;  %v9886_v40 = vld [vmem:[%s16297_s21 + $0xb0] sm:$0xff] }
0x32ba   : > { %v9769_v56 = vpop.f32.mrf.mxu1 }
0x32bb   : > { %v9788_v54 = vadd.f32 %v9781_v19, %v9774_v41  ;;  %v9775_v59 = vadd.f32 %v9769_v56, %v9538_v49  ;;  %v9876_v49 = vld [vmem:[%s16297_s21 + $0x60] sm:$0xff]  ;;  %v9871_v19 = vld [vmem:[%s16297_s21 + $0x38] sm:$0xff]  ;;  %v9870_v41 = vld [vmem:[%s16297_s21 + $0x30] sm:$0xff] }
0x32bc   : > { %v9771_v26 = vpop.f32.mrf.mxu1  ;;  %10775 = vmatpush3.msra.mxu0 %v9876_v49  ;;  %v9869_v56 = vld [vmem:[%s16297_s21 + $0x28] sm:$0xff] }
0x32bd   : > { %v9790_v9 = vrot.slane %v9788_v54, 4  ;;  %v9789_v8 = vadd.f32 %v9785_v33, %v9775_v59  ;;  %10776 = vmatprep.subr.mxu0 %v9891_v30  ;;  %v9885_v33 = vld [vmem:[%s16297_s21 + $0xa8] sm:$0xff]  ;;  %v9868_v59 = vld [vmem:[%s16297_s21 + $0x20] sm:$0xff]  ;;  %v9883_v26 = vld [vmem:[%s16297_s21 + $0x98] sm:$0xff] }
0x32be   : > { %v9772_v58 = vpop.f32.mrf.mxu1  ;;  %10777 = vmatpush3.msra.mxu0 %v9875_v50 }
0x32bf   : > { %v9791_v14 = vmax.f32 %v9788_v54, %v9790_v9  ;;  %v9803_v25 = vadd.f32 %v9790_v9, %v9788_v54  ;;  %v9796_v37 = vrot.slane %v9789_v8, 4  ;;  %10778 = vmatprep.subr.mxu0 %v9890_v51  ;;  %v9884_v54 = vld [vmem:[%s16297_s21 + $0xa0] sm:$0xff]  ;;  %v9867_v9 = vld [vmem:[%s16297_s21 + $0x18] sm:$0xff]  ;;  %v9866_v58 = vld [vmem:[%s16297_s21 + $0x10] sm:$0xff] }
0x32c0   : > { %10779 = vmatpush3.msra.mxu0 %v9874_v52 }
0x32c1   : > { %v9792_v13 = vrot.slane %v9791_v14, 2  ;;  %v9804_v57 = vrot.slane %v9803_v25, 2  ;;  %v9797_v31 = vmax.f32 %v9789_v8, %v9796_v37  ;;  %v9809_v15 = vadd.f32 %v9796_v37, %v9789_v8  ;;  %10780 = vmatprep.subr.mxu0 %v9889_v29  ;;  %v9882_v8 = vld [vmem:[%s16297_s21 + $0x90] sm:$0xff]  ;;  %v9880_v37 = vld [vmem:[%s16297_s21 + $0x80] sm:$0xff] }
0x32c2   : > { %10781 = vmatpush3.msra.mxu0 %v9873_v53 }
0x32c3   : > { %v9798_v45 = vrot.slane %v9797_v31, 2  ;;  %v9810_v3 = vrot.slane %v9809_v15, 2  ;;  %v9793_v46 = vmax.f32 %v9791_v14, %v9792_v13  ;;  %v9805_v6 = vadd.f32 %v9804_v57, %v9803_v25  ;;  %10782 = vmatprep.subr.mxu0 %v9888_v61  ;;  %v9881_v14 = vld [vmem:[%s16297_s21 + $0x88] sm:$0xff]  ;;  %v9864_v13 = vld [vmem:[%s16297_s21] sm:$0xff] }
0x32c4   : > { %10783 = vmatpush3.msra.mxu0 %v9872_v17  ;;  %v9865_v25 = vld [vmem:[%s16297_s21 + $0x8] sm:$0xff] }
0x32c5   : > { %v9799_v23 = vmax.f32 %v9797_v31, %v9798_v45  ;;  %v9806_v16 = vrot.slane %v9805_v6, 1  ;;  %v9811_v34 = vadd.f32 %v9810_v3, %v9809_v15  ;;  %v9794_v47 = vrot.slane %v9793_v46, 1  ;;  %10784 = vmatprep.subr.mxu0 %v9887_v55  ;;  %v9836_v45 = vld [vmem:[%s16295_s19] sm:$0x3] }
0x32c6   : > { %10785 = vmatpush3.msra.mxu0 %v9871_v19  ;;  %v9850_v3 = vld [vmem:[%s16296_s20] sm:$0x3] }
0x32c7   : > { %v9800_v11 = vrot.slane %v9799_v23, 1  ;;  %v9807_v32 = vadd.f32 %v9806_v16, %v9805_v6  ;;  %v9812_v62 = vrot.slane %v9811_v34, 1  ;;  %v9795_v1 = vmax.f32 %v9793_v46, %v9794_v47  ;;  %10786 = vmatprep.subr.mxu0 %v9886_v40 }
0x32c8   : > { %10787 = vmatpush3.msra.mxu0 %v9870_v41  ;;  %v9841_v46 = vrot.slane %v9836_v45, %v12698_v5  ;;  %v9845_v6 = vrot.slane %v9836_v45, %v16356_v44  ;;  %v9855_v47 = vrot.slane %v9850_v3, %v12698_v5  ;;  %v9969_v5 = vld [vmem:[%s16299_s23 + $0x8] sm:$0xff] }
0x32c9   : > { %v9813_v20 = vadd.f32 %v9812_v62, %v9811_v34  ;;  %v9815_v18 = vmul.f32 0.125, %v9807_v32  ;;  %v9801_v36 = vmax.f32 %v9799_v23, %v9800_v11  ;;  %10788 = vmatprep.subr.mxu0 %v9885_v33  ;;  %v9859_v11 = vrot.slane %v9850_v3, %v16356_v44  ;;  %v9968_v44 = vld [vmem:[%s16299_s23] sm:$0xff] }
0x32ca   : > { %10789 = vmatpush3.msra.mxu0 %v9869_v56 }
0x32cb   : > { %v9816_v27 = vmul.f32 0.125, %v9813_v20  ;;  %v9817_v0 = vadd.f32 %v9815_v18, %v9795_v1  ;;  %10790 = vmatprep.subr.mxu0 %v9884_v54  ;;  %v9971_v1 = vld [vmem:[%s16299_s23 + $0x18] sm:$0xff] }
0x32cc   : > { %10791 = vmatpush3.msra.mxu0 %v9868_v59  ;;  %10897 = vmatpush3.msra.mxu1 %v9971_v1 }
0x32cd   : > { %v9818_v10 = vadd.f32 %v9816_v27, %v9801_v36  ;;  %10792 = vmatprep.subr.mxu0 %v9883_v26  ;;  %10898 = vmatprep.subr.mxu1 %v16354_v35  ;;  %v9970_v36 = vld [vmem:[%s16299_s23 + $0x10] sm:$0xff] }
0x32ce   : > { %10793 = vmatpush3.msra.mxu0 %v9867_v9  ;;  %10899 = vmatpush3.msra.mxu1 %v9970_v36 }
0x32cf   : > { %v9819_v28 = vadd.f32 %v9818_v10, %v9817_v0  ;;  %10794 = vmatprep.subr.mxu0 %v9882_v8  ;;  %10900 = vmatprep.subr.mxu1 %v16354_v35 }
0x32d0   : > { %10795 = vmatpush3.msra.mxu0 %v9866_v58  ;;  %10901 = vmatpush3.msra.mxu1 %v9969_v5 }
0x32d1   : > { %9820 = vadd.xlane.f32.xlu0 %v9819_v28  ;;  %10796 = vmatprep.subr.mxu0 %v9881_v14 }
0x32d2   : > { %10797 = vmatpush3.msra.mxu0 %v9865_v25  ;;  %10902 = vmatprep.subr.mxu1 %v16354_v35 }
0x32d3   : > { %10798 = vmatprep.subr.mxu0 %v9880_v37  ;;  %10903 = vmatpush3.msra.mxu1 %v9968_v44 }
0x32d4   : > { %10799 = vmatpush3.msra.mxu0 %v9864_v13  ;;  %10907 = vmatprep.subr.mxu1 %v16354_v35 }
0x335a   : > { %v9821_v39 = vpop.xlane.xlu0 %9820 }
0x335b   : > { %v9823_v4 = vmul.f32 0.00390625, %v9821_v39 }
0x335d   : > { %v16142_v2 = vsub.f32 %v9817_v0, %v9823_v4  ;;  %v16144_v12 = vsub.f32 %v9818_v10, %v9823_v4  ;;  %v9896_v0 = vld [vmem:[%s16298_s22] sm:$0x1] }
0x335f   : > { %v9826_v60 = vmul.f32 %v16142_v2, %v16142_v2  ;;  %v9827_v48 = vmul.f32 %v16144_v12, %v16144_v12 }
0x3361   : > { %v9828_v42 = vadd.f32 %v9827_v48, %v9826_v60 }
0x3363   : > { %9829 = vadd.xlane.f32.xlu0 %v9828_v42 }
0x33ec   : > { %v9830_v57 = vpop.xlane.xlu0 %9829 }
0x33ed   : > { %v9831_v31 = vmul.f32 0.00390625, %v9830_v57 }
0x33ef   : > { %v9832_v15 = vadd.f32 1e-05, %v9831_v31 }
0x33f1   : > { %12096 = vrsqrt.f32 %v9832_v15 }
0x33fe   : > { %v12097_v23 = vpop.eup %12096 }
0x33ff   : > { %v9834_v16 = vmul.f32 %v12097_v23, %v16142_v2  ;;  %v9835_v34 = vmul.f32 %v12097_v23, %v16144_v12  ;;  %v10049_v2 = vld [vmem:[#allocation2] sm:$0x1] }
0x3401   : > { %v9848_v32 = vmul.f32 %v9841_v46, %v9834_v16  ;;  %v9849_v62 = vmul.f32 %v9845_v6, %v9835_v34 }
0x3403   : > { %v9862_v20 = vadd.f32 %v9855_v47, %v9848_v32  ;;  %v9863_v18 = vadd.f32 %v9859_v11, %v9849_v62 }
0x3405   : > { %9961 = vmatprep.mubr.f32.mxu0 %v9863_v18 }
0x3406   : > { %9962 = vmatmul.mubr.f32.vlgmr.msra.gmra.mxu0 %v9862_v20 }
0x34c6   : > { %v10800_v27 = vpop.f32.mrf.mxu0 }
0x34c8   : > { %v10801_v10 = vpop.f32.mrf.mxu0 }
0x34c9   : > { %v10802_v28 = vadd.f32 %v10801_v10, %v10800_v27 }
0x34cb   : > { %v9964_v21 = vadd.f32 %v10802_v28, %v9896_v0 }
0x34cd   : > { %v9967_v22 = vmax.f32 %v9964_v21, 0.0 }
0x34cf   : > { %10905 = vmatmul.mubr.msk.f32.vlgmr.msra.gmra.mxu1 %vm7890_vm10, %v9967_v22 }
0x34d0   : > { %10911 = vmatprep.mubr.msk.f32.mxu1 %vm12235_vm1, %v16354_v35  ;;  %10908 = vmatpush3.msra.mxu1 %v10048_v24 }
0x34d1   : > { %10909 = vmatprep.subr.mxu1 %v16354_v35 }
0x34d2   : > { %10910 = vmatpush3.msra.mxu1 %v10047_v38 }
0x358f   : > { %v10042_v43 = vpop.f32.mrf.mxu1 }
0x3590   : > { %v10043_v63 = vadd.f32 %v10042_v43, %v9972_v7 }
0x3591   : > { %v10906_v39 = vpop.f32.mrf.mxu1 }
0x3592   : > { %v10046_v4 = vmax.f32 %v10043_v63, 0.0 }
0x3594   : > { %10912 = vmatmul.mubr.msk.f32.vlgmr.msra.gmra.mxu1 %vm10050_vm12, %v10046_v4 }
0x3654   : > { %v10120_v12 = vpop.f32.mrf.mxu1 }
0x3655   : > { %v10121_v60 = vadd.f32 %v10120_v12, %v10049_v2 }
0x3656   : > { %v10913_v35 = vpop.f32.mrf.mxu1 }
0x3657   : > { %10125 = vst.msk [vmem:[%s813_s9] sm:$0x1] %vm10124_vm13, %v10121_v60 }
0x3658 PF: > { %s39_s8 = sadd.s32 1, %s12232_s8  }
0x3659   : > { %p36_p4 = scmp.ge.s32.totalorder %s39_s8, 4  }
0x365b   :  { %38 = sbr.rel (!%p36_p4) target bundleno = 13 (0xd), region = 158 }

</bundles_post_ra>
